<compile_context>
chip_gen: v5e
topology: v5e:2x2
jax: 0.10.0
libtpu: 0.0.40
codegen_flags: <defaults>
</compile_context>

<pallas_src>
import jax
import jax.numpy as jnp
from jax.experimental import pallas as pl
from jax.experimental.pallas import tpu as pltpu


# ----------------------------------------------------------------------------------------
# Fused kernel: layer-0 input projection + 2-layer LSTM recurrence (time loop unrolled
# inside the kernel, state carried in VMEM across time chunks) + concat + Linear + Tanh.
# ----------------------------------------------------------------------------------------
def _fused_lstm2_ff_kernel(x_ref, wih0_ref, b0_ref, whh0_ref, wih1_ref, whh1_ref,
                           b1_ref, ffw_ref, ffb_ref, out_ref,
                           g0_sc, h0_sc, c0_sc, h1_sc, c1_sc):
    chunk = pl.program_id(1)
    n_rows = x_ref.shape[1]          # Tc * bb rows in (t, b) order
    bb, H = h0_sc.shape
    Tc = n_rows // bb

    # Reset the carried (h, c) state at the first time chunk of every batch block.
    @pl.when(chunk == 0)
    def _():
        h0_sc[...] = jnp.zeros_like(h0_sc)
        c0_sc[...] = jnp.zeros_like(c0_sc)
        h1_sc[...] = jnp.zeros_like(h1_sc)
        c1_sc[...] = jnp.zeros_like(c1_sc)

    def dot32(a, w_ref):
        # Cast the activation to the (possibly bf16) weight dtype; accumulate in f32.
        return jnp.dot(a.astype(w_ref.dtype), w_ref[...],
                       preferred_element_type=jnp.float32)

    # Hoisted layer-0 input projection for the whole chunk: one (Tc*bb, Din) @ (Din, 4H)
    # MXU matmul instead of Tc tiny (bb, Din) matmuls; result parked in VMEM scratch so the
    # unrolled recurrence only keeps (bb, *) values live in vregs.
    g0_sc[...] = dot32(x_ref[0], wih0_ref) + b0_ref[...]

    def cell(gates, c_prev):
        # Gate blocks were permuted at init to [i, f, o, g]: one sigmoid over the
        # contiguous (bb, 3H) slab + one tanh covers all gate activations.
        sig = jax.nn.sigmoid(gates[:, :3 * H])
        i_g = sig[:, 0 * H:1 * H]
        f_g = sig[:, 1 * H:2 * H]
        o_g = sig[:, 2 * H:3 * H]
        g_g = jnp.tanh(gates[:, 3 * H:])
        c_new = f_g * c_prev + i_g * g_g
        h_new = o_g * jnp.tanh(c_new)
        return h_new, c_new

    h0 = h0_sc[...]
    c0 = c0_sc[...]
    h1 = h1_sc[...]
    c1 = c1_sc[...]
    # Hoist the layer-1 bias broadcast out of the time loop (JAX does not CSE broadcasts).
    b1 = jnp.broadcast_to(b1_ref[...], (bb, b1_ref.shape[1]))

    # Fully-unrolled time loop (Tc is static): recurrence state stays in vregs, the only
    # per-step memory traffic is VMEM, and layer-0/layer-1 work can pipeline across steps.
    for t in range(Tc):
        g0_t = g0_sc[t * bb:(t + 1) * bb, :]
        h0, c0 = cell(g0_t + dot32(h0, whh0_ref), c0)
        # Layer 1 as two dots -- no per-step concatenate of [h0, h1].
        h1, c1 = cell(dot32(h0, wih1_ref) + dot32(h1, whh1_ref) + b1, c1)

    # Carry the state to the next time chunk.
    h0_sc[...] = h0
    c0_sc[...] = c0
    h1_sc[...] = h1
    c1_sc[...] = c1

    # Epilogue on the last chunk: concat finals [h0, c0, h1, c1] -> Linear -> Tanh,
    # single lane-dense HBM store.
    @pl.when(chunk == pl.num_programs(1) - 1)
    def _():
        emb = jnp.concatenate([h0, c0, h1, c1], axis=1)          # (bb, 4H)
        z = dot32(emb, ffw_ref) + ffb_ref[...]
        out_ref[...] = jnp.tanh(z).astype(out_ref.dtype)


def fused_ques_embedding(ques, wih0_t, b0_row, whh0_t, wih1_t, whh1_t, b1_row,
                         ffw_t, ffb_row, *, batch_block=None, time_chunk=None,
                         out_dtype=jnp.float32):
    """ques: (B, T, Din) batch-first. Returns (B, Fout)."""
    B, T, Din = ques.shape
    four_h = whh0_t.shape[1]
    H = four_h // 4
    Fout = ffw_t.shape[1]

    # Batch block: full batch by default; split into two 8-aligned blocks when B >= 16 so
    # the "parallel" axis has >= 2 blocks (v7x megacore sharding).
    if batch_block is None:
        bb = B // 2 if (B >= 16 and B % 16 == 0) else B
    else:
        bb = batch_block
    assert B % bb == 0, "batch size must be divisible by the batch block"
    assert bb == B or bb % 8 == 0, "batch block must be a multiple of 8 (sublane tile)"
    nb = B // bb

    # Time chunk: largest divisor of T (<= 16) whose (tc*bb) row count is sublane-aligned;
    # fall back to tc = T (block then equals the full dim). Chunk axis carries the state.
    if time_chunk is None:
        tc = T
        for cand in range(min(T, 16), 0, -1):
            if T % cand == 0 and (cand * bb) % 8 == 0:
                tc = cand
                break
    else:
        tc = time_chunk
    assert T % tc == 0, "sequence length must be divisible by the time chunk"
    nchunks = T // tc

    # Wrapper-side layout plumbing (not compute): group the batch into nb blocks and order
    # rows as (t, b) so each (block, chunk) is one contiguous lane-dense (tc*bb, Din) slab,
    # avoiding any in-kernel reshape/relayout.
    x_blk = (ques.astype(jnp.float32)
             .reshape(nb, bb, T, Din)
             .transpose(0, 2, 1, 3)
             .reshape(nb, T * bb, Din))

    return pl.pallas_call(
        _fused_lstm2_ff_kernel,
        out_shape=jax.ShapeDtypeStruct((B, Fout), out_dtype),
        grid_spec=pltpu.PrefetchScalarGridSpec(
            num_scalar_prefetch=0,
            grid=(nb, nchunks),
            in_specs=[
                pl.BlockSpec((1, tc * bb, Din), lambda b, c: (b, c, 0)),   # x chunk
                pl.BlockSpec((Din, four_h), lambda b, c: (0, 0)),          # W_ih0^T
                pl.BlockSpec((1, four_h), lambda b, c: (0, 0)),            # b_ih0 + b_hh0
                pl.BlockSpec((H, four_h), lambda b, c: (0, 0)),            # W_hh0^T
                pl.BlockSpec((H, four_h), lambda b, c: (0, 0)),            # W_ih1^T
                pl.BlockSpec((H, four_h), lambda b, c: (0, 0)),            # W_hh1^T
                pl.BlockSpec((1, four_h), lambda b, c: (0, 0)),            # b_ih1 + b_hh1
                pl.BlockSpec((four_h, Fout), lambda b, c: (0, 0)),         # FF W^T
                pl.BlockSpec((1, Fout), lambda b, c: (0, 0)),              # FF bias
            ],
            out_specs=pl.BlockSpec((bb, Fout), lambda b, c: (b, 0)),
            scratch_shapes=[
                pltpu.VMEM((tc * bb, four_h), jnp.float32),   # per-chunk layer-0 gates
                pltpu.VMEM((bb, H), jnp.float32),             # h0 carry
                pltpu.VMEM((bb, H), jnp.float32),             # c0 carry
                pltpu.VMEM((bb, H), jnp.float32),             # h1 carry
                pltpu.VMEM((bb, H), jnp.float32),             # c1 carry
            ]),
        compiler_params=pltpu.CompilerParams(
            # Batch blocks are independent (megacore on v7x); time chunks carry the
            # recurrence and must stay serial/innermost.
            dimension_semantics=("parallel", "arbitrary")),
    )(x_blk, wih0_t, b0_row, whh0_t, wih1_t, whh1_t, b1_row, ffw_t, ffb_row)


def _permute_gate_blocks(w):
    """Reorder PyTorch LSTM gate blocks [i, f, g, o] -> [i, f, o, g] along axis 0."""
    H = w.shape[0] // 4
    return jnp.concatenate([w[:2 * H], w[3 * H:], w[2 * H:3 * H]], axis=0)


# ------------------------------------ QuesEmbedding ------------------------------------
class QuesEmbeddingPallas:
    def __init__(self, input_size=64, hidden_size=128, output_size=256, num_layers=2,
                 key=None, param_dtype=jnp.bfloat16):
        # TODO(synk): only the default num_layers=2 unidirectional branch of the PyTorch
        #             module is implemented (the num_layers==1 bidirectional path is not).
        assert num_layers == 2, "fused kernel mirrors the default num_layers=2 branch"
        self.input_size = input_size
        self.hidden_size = hidden_size
        self.output_size = output_size
        self.num_layers = num_layers

        key = jax.random.PRNGKey(0) if key is None else key
        H = hidden_size
        scale = 1.0 / jnp.sqrt(jnp.float32(H))

        # Original-layout parameters (kept f32 for the pure-JAX reference).
        self.layers = []
        for l in range(num_layers):
            din = input_size if l == 0 else hidden_size
            key, k1, k2, k3, k4 = jax.random.split(key, 5)
            w_ih = jax.random.uniform(k1, (4 * H, din), jnp.float32, -scale, scale)
            w_hh = jax.random.uniform(k2, (4 * H, H), jnp.float32, -scale, scale)
            b_ih = jax.random.uniform(k3, (4 * H,), jnp.float32, -scale, scale)
            b_hh = jax.random.uniform(k4, (4 * H,), jnp.float32, -scale, scale)
            self.layers.append((w_ih, w_hh, b_ih, b_hh))

        fin = 2 * num_layers * hidden_size
        key, k5, k6 = jax.random.split(key, 3)
        fscale = 1.0 / jnp.sqrt(jnp.float32(fin))
        self.ff_w = jax.random.uniform(k5, (output_size, fin), jnp.float32, -fscale, fscale)
        self.ff_b = jax.random.uniform(k6, (output_size,), jnp.float32, -fscale, fscale)

        # Kernel-layout parameters, prepped ONCE: gate blocks permuted [i,f,g,o]->[i,f,o,g],
        # pre-transposed, biases pre-summed.  Weight matrices stored in param_dtype (bf16
        # default for MXU throughput); bias rows stay f32 (added into f32 accumulators).
        (w_ih0, w_hh0, b_ih0, b_hh0) = self.layers[0]
        (w_ih1, w_hh1, b_ih1, b_hh1) = self.layers[1]
        self.wih0_t = _permute_gate_blocks(w_ih0).T.astype(param_dtype)       # (Din, 4H)
        self.whh0_t = _permute_gate_blocks(w_hh0).T.astype(param_dtype)       # (H, 4H)
        self.b0_row = _permute_gate_blocks(b_ih0 + b_hh0).reshape(1, 4 * H)   # (1, 4H) f32
        self.wih1_t = _permute_gate_blocks(w_ih1).T.astype(param_dtype)       # (H, 4H)
        self.whh1_t = _permute_gate_blocks(w_hh1).T.astype(param_dtype)       # (H, 4H)
        self.b1_row = _permute_gate_blocks(b_ih1 + b_hh1).reshape(1, 4 * H)   # (1, 4H) f32
        self.ffw_t = self.ff_w.T.astype(param_dtype)                          # (4H, Fout)
        self.ffb_row = self.ff_b.reshape(1, output_size)                      # (1, Fout) f32

    def __call__(self, ques, *, batch_block=None, time_chunk=None):
        # ques: (B, T, input_size) -- batch_first=True, like the PyTorch module.
        return fused_ques_embedding(
            ques, self.wih0_t, self.b0_row, self.whh0_t, self.wih1_t, self.whh1_t,
            self.b1_row, self.ffw_t, self.ffb_row,
            batch_block=batch_block, time_chunk=time_chunk)                   # (B, Fout)


# --------------------------------- pure-JAX reference ---------------------------------
def _reference(model, ques):
    x = jnp.transpose(ques, (1, 0, 2)).astype(jnp.float32)   # (T, B, Din)
    H = model.hidden_size
    finals = []
    for (w_ih, w_hh, b_ih, b_hh) in model.layers:
        B = x.shape[1]
        h = jnp.zeros((B, H), jnp.float32)
        c = jnp.zeros((B, H), jnp.float32)

        def step(carry, x_t):
            h, c = carry
            gates = x_t @ w_ih.T + h @ w_hh.T + b_ih + b_hh
            i = jax.nn.sigmoid(gates[:, 0 * H:1 * H])
            f = jax.nn.sigmoid(gates[:, 1 * H:2 * H])
            g = jnp.tanh(gates[:, 2 * H:3 * H])
            o = jax.nn.sigmoid(gates[:, 3 * H:4 * H])
            c = f * c + i * g
            h = o * jnp.tanh(c)
            return (h, c), h

        (h, c), ys = jax.lax.scan(step, (h, c), x)
        finals.append(jnp.concatenate([h, c], axis=1))
        x = ys
    emb = jnp.concatenate(finals, axis=1)
    return jnp.tanh(emb @ model.ff_w.T + model.ff_b)


if __name__ == "__main__":
    # Small synthetic config (lane/sublane friendly: B=8, H=128, feature dims x128).
    B, T = 8, 8
    input_size, hidden_size, output_size, num_layers = 64, 128, 256, 2

    key = jax.random.PRNGKey(0)
    k_x, k_p = jax.random.split(key)
    ques = jax.random.normal(k_x, (B, T, input_size), dtype=jnp.float32)

    # f32 weights: tight check against the pure-JAX LSTM reference.
    model_f32 = QuesEmbeddingPallas(input_size=input_size, hidden_size=hidden_size,
                                    output_size=output_size, num_layers=num_layers,
                                    key=k_p, param_dtype=jnp.float32)
    out = jax.block_until_ready(model_f32(ques))
    assert out.shape == (B, output_size), out.shape
    ref = jax.block_until_ready(_reference(model_f32, ques))
    err_f32 = float(jnp.max(jnp.abs(out - ref)))
    assert jnp.allclose(out, ref, atol=1e-4, rtol=1e-4), err_f32

    # bf16 weight storage (production path, MXU-native on v5e/v6e/v7x): loose sanity check
    # against the same f32 reference (error accumulates over the recurrence).
    model_bf16 = QuesEmbeddingPallas(input_size=input_size, hidden_size=hidden_size,
                                     output_size=output_size, num_layers=num_layers,
                                     key=k_p, param_dtype=jnp.bfloat16)
    out_bf16 = jax.block_until_ready(model_bf16(ques))
    assert out_bf16.shape == (B, output_size), out_bf16.shape
    err_bf16 = float(jnp.max(jnp.abs(out_bf16 - ref)))
    assert err_bf16 < 0.15, err_bf16

    print("KERNEL_OK")
</pallas_src>

<mosaic_0001>
module attributes {stable_mosaic.version = 11 : i64} {
  func.func @_fused_lstm2_ff_kernel(%arg0: i32, %arg1: i32, %arg2: memref<1x64x64xf32, #tpu.memory_space<vmem>>, %arg3: memref<64x512xf32, #tpu.memory_space<vmem>>, %arg4: memref<1x512xf32, #tpu.memory_space<vmem>>, %arg5: memref<128x512xf32, #tpu.memory_space<vmem>>, %arg6: memref<128x512xf32, #tpu.memory_space<vmem>>, %arg7: memref<128x512xf32, #tpu.memory_space<vmem>>, %arg8: memref<1x512xf32, #tpu.memory_space<vmem>>, %arg9: memref<512x256xf32, #tpu.memory_space<vmem>>, %arg10: memref<1x256xf32, #tpu.memory_space<vmem>>, %arg11: memref<8x256xf32, #tpu.memory_space<vmem>>, %arg12: memref<64x512xf32, #tpu.memory_space<vmem>>, %arg13: memref<8x128xf32, #tpu.memory_space<vmem>>, %arg14: memref<8x128xf32, #tpu.memory_space<vmem>>, %arg15: memref<8x128xf32, #tpu.memory_space<vmem>>, %arg16: memref<8x128xf32, #tpu.memory_space<vmem>>) attributes {dimension_semantics = [#tpu.dimension_semantics<parallel>, #tpu.dimension_semantics<arbitrary>], iteration_bounds = array<i64: 1, 1>, scalar_prefetch = 0 : i64, scratch_operands = 5 : i64, tpu.core_type = #tpu.core_type<tc>, window_params = [{transform_indices = @transform_0, window_bounds = array<i64: 1, 64, 64>}, {pipeline_mode = #tpu.pipeline_mode<synchronous>, transform_indices = @transform_1, window_bounds = array<i64: 64, 512>}, {pipeline_mode = #tpu.pipeline_mode<synchronous>, transform_indices = @transform_2, window_bounds = array<i64: 1, 512>}, {pipeline_mode = #tpu.pipeline_mode<synchronous>, transform_indices = @transform_3, window_bounds = array<i64: 128, 512>}, {pipeline_mode = #tpu.pipeline_mode<synchronous>, transform_indices = @transform_4, window_bounds = array<i64: 128, 512>}, {pipeline_mode = #tpu.pipeline_mode<synchronous>, transform_indices = @transform_5, window_bounds = array<i64: 128, 512>}, {pipeline_mode = #tpu.pipeline_mode<synchronous>, transform_indices = @transform_6, window_bounds = array<i64: 1, 512>}, {pipeline_mode = #tpu.pipeline_mode<synchronous>, transform_indices = @transform_7, window_bounds = array<i64: 512, 256>}, {pipeline_mode = #tpu.pipeline_mode<synchronous>, transform_indices = @transform_8, window_bounds = array<i64: 1, 256>}, {transform_indices = @transform_9, window_bounds = array<i64: 8, 256>}]} {
    %c0_i32 = arith.constant 0 : i32
    %0 = arith.cmpi eq, %arg1, %c0_i32 : i32
    %1 = arith.extui %0 : i1 to i32
    %c0_i32_0 = arith.constant 0 : i32
    %2 = arith.cmpi ne, %1, %c0_i32_0 : i32
    scf.if %2 {
      %cst_126 = arith.constant 0.000000e+00 : f32
      %361 = vector.broadcast %cst_126 : f32 to vector<8x128xf32>
      %c0_127 = arith.constant 0 : index
      %c0_128 = arith.constant 0 : index
      %362 = vector.load %arg13[%c0_127, %c0_128] : memref<8x128xf32, #tpu.memory_space<vmem>>, vector<8x128xf32>
      tpu.vector_store %arg13[%c0_127, %c0_128], %361 {strides = array<i32>} : memref<8x128xf32, #tpu.memory_space<vmem>>, vector<8x128xf32>,
      %cst_129 = arith.constant 0.000000e+00 : f32
      %363 = vector.broadcast %cst_129 : f32 to vector<8x128xf32>
      %c0_130 = arith.constant 0 : index
      %c0_131 = arith.constant 0 : index
      %364 = vector.load %arg14[%c0_130, %c0_131] : memref<8x128xf32, #tpu.memory_space<vmem>>, vector<8x128xf32>
      tpu.vector_store %arg14[%c0_130, %c0_131], %363 {strides = array<i32>} : memref<8x128xf32, #tpu.memory_space<vmem>>, vector<8x128xf32>,
      %cst_132 = arith.constant 0.000000e+00 : f32
      %365 = vector.broadcast %cst_132 : f32 to vector<8x128xf32>
      %c0_133 = arith.constant 0 : index
      %c0_134 = arith.constant 0 : index
      %366 = vector.load %arg15[%c0_133, %c0_134] : memref<8x128xf32, #tpu.memory_space<vmem>>, vector<8x128xf32>
      tpu.vector_store %arg15[%c0_133, %c0_134], %365 {strides = array<i32>} : memref<8x128xf32, #tpu.memory_space<vmem>>, vector<8x128xf32>,
      %cst_135 = arith.constant 0.000000e+00 : f32
      %367 = vector.broadcast %cst_135 : f32 to vector<8x128xf32>
      %c0_136 = arith.constant 0 : index
      %c0_137 = arith.constant 0 : index
      %368 = vector.load %arg16[%c0_136, %c0_137] : memref<8x128xf32, #tpu.memory_space<vmem>>, vector<8x128xf32>
      tpu.vector_store %arg16[%c0_136, %c0_137], %367 {strides = array<i32>} : memref<8x128xf32, #tpu.memory_space<vmem>>, vector<8x128xf32>,
    } else {
    }
    %c0 = arith.constant 0 : index
    %c0_1 = arith.constant 0 : index
    %c0_2 = arith.constant 0 : index
    %3 = vector.load %arg2[%c0, %c0_1, %c0_2] : memref<1x64x64xf32, #tpu.memory_space<vmem>>, vector<1x64x64xf32>
    %4 = vector.shape_cast %3 : vector<1x64x64xf32> to vector<64x64xf32>
    %c0_3 = arith.constant 0 : index
    %c0_4 = arith.constant 0 : index
    %5 = vector.load %arg3[%c0_3, %c0_4] : memref<64x512xf32, #tpu.memory_space<vmem>>, vector<64x512xf32>
    %cst = arith.constant dense<0.000000e+00> : vector<64x512xf32>
    %6 = tpu.matmul %4, %5, %cst {dimension_numbers = #tpu.dot_dimension_numbers<[1], [0], [0], [1], [0, 0, 1, 1], [], []>} : vector<64x64xf32>, vector<64x512xf32>, vector<64x512xf32> -> vector<64x512xf32>
    %c0_5 = arith.constant 0 : index
    %c0_6 = arith.constant 0 : index
    %7 = vector.load %arg4[%c0_5, %c0_6] : memref<1x512xf32, #tpu.memory_space<vmem>>, vector<1x512xf32>
    %8 = vector.broadcast %7 : vector<1x512xf32> to vector<64x512xf32>
    %9 = arith.addf %6, %8 : vector<64x512xf32>
    %c0_7 = arith.constant 0 : index
    %c0_8 = arith.constant 0 : index
    %10 = vector.load %arg12[%c0_7, %c0_8] : memref<64x512xf32, #tpu.memory_space<vmem>>, vector<64x512xf32>
    tpu.vector_store %arg12[%c0_7, %c0_8], %9 {strides = array<i32>} : memref<64x512xf32, #tpu.memory_space<vmem>>, vector<64x512xf32>,
    %c0_9 = arith.constant 0 : index
    %c0_10 = arith.constant 0 : index
    %11 = vector.load %arg13[%c0_9, %c0_10] : memref<8x128xf32, #tpu.memory_space<vmem>>, vector<8x128xf32>
    %c0_11 = arith.constant 0 : index
    %c0_12 = arith.constant 0 : index
    %12 = vector.load %arg14[%c0_11, %c0_12] : memref<8x128xf32, #tpu.memory_space<vmem>>, vector<8x128xf32>
    %c0_13 = arith.constant 0 : index
    %c0_14 = arith.constant 0 : index
    %13 = vector.load %arg15[%c0_13, %c0_14] : memref<8x128xf32, #tpu.memory_space<vmem>>, vector<8x128xf32>
    %c0_15 = arith.constant 0 : index
    %c0_16 = arith.constant 0 : index
    %14 = vector.load %arg16[%c0_15, %c0_16] : memref<8x128xf32, #tpu.memory_space<vmem>>, vector<8x128xf32>
    %c0_17 = arith.constant 0 : index
    %c0_18 = arith.constant 0 : index
    %15 = vector.load %arg8[%c0_17, %c0_18] : memref<1x512xf32, #tpu.memory_space<vmem>>, vector<1x512xf32>
    %16 = vector.shape_cast %15 : vector<1x512xf32> to vector<1x512xf32>
    %17 = vector.broadcast %16 : vector<1x512xf32> to vector<8x512xf32>
    %c0_19 = arith.constant 0 : index
    %c0_20 = arith.constant 0 : index
    %18 = vector.load %arg12[%c0_19, %c0_20] : memref<64x512xf32, #tpu.memory_space<vmem>>, vector<8x512xf32>
    %c0_21 = arith.constant 0 : index
    %c0_22 = arith.constant 0 : index
    %19 = vector.load %arg5[%c0_21, %c0_22] : memref<128x512xf32, #tpu.memory_space<vmem>>, vector<128x512xf32>
    %cst_23 = arith.constant dense<0.000000e+00> : vector<8x512xf32>
    %20 = tpu.matmul %11, %19, %cst_23 {dimension_numbers = #tpu.dot_dimension_numbers<[1], [0], [0], [1], [0, 0, 1, 1], [], []>} : vector<8x128xf32>, vector<128x512xf32>, vector<8x512xf32> -> vector<8x512xf32>
    %21 = arith.addf %18, %20 : vector<8x512xf32>
    %22 = vector.extract_strided_slice %21 {offsets = [0, 0], sizes = [8, 384], strides = [1, 1]} : vector<8x512xf32> to vector<8x384xf32>
    %23 = arith.negf %22 : vector<8x384xf32>
    %24 = math.exp %23 : vector<8x384xf32>
    %cst_24 = arith.constant 1.000000e+00 : f32
    %25 = vector.broadcast %cst_24 : f32 to vector<8x384xf32>
    %26 = arith.addf %25, %24 : vector<8x384xf32>
    %27 = arith.divf %25, %26 : vector<8x384xf32>
    %28 = vector.extract_strided_slice %27 {offsets = [0, 0], sizes = [8, 128], strides = [1, 1]} : vector<8x384xf32> to vector<8x128xf32>
    %29 = vector.extract_strided_slice %27 {offsets = [0, 128], sizes = [8, 128], strides = [1, 1]} : vector<8x384xf32> to vector<8x128xf32>
    %30 = vector.extract_strided_slice %27 {offsets = [0, 256], sizes = [8, 128], strides = [1, 1]} : vector<8x384xf32> to vector<8x128xf32>
    %31 = vector.extract_strided_slice %21 {offsets = [0, 384], sizes = [8, 128], strides = [1, 1]} : vector<8x512xf32> to vector<8x128xf32>
    %32 = math.tanh %31 : vector<8x128xf32>
    %33 = arith.mulf %29, %12 : vector<8x128xf32>
    %34 = arith.mulf %28, %32 : vector<8x128xf32>
    %35 = arith.addf %33, %34 : vector<8x128xf32>
    %36 = math.tanh %35 : vector<8x128xf32>
    %37 = arith.mulf %30, %36 : vector<8x128xf32>
    %c0_25 = arith.constant 0 : index
    %c0_26 = arith.constant 0 : index
    %38 = vector.load %arg6[%c0_25, %c0_26] : memref<128x512xf32, #tpu.memory_space<vmem>>, vector<128x512xf32>
    %cst_27 = arith.constant dense<0.000000e+00> : vector<8x512xf32>
    %39 = tpu.matmul %37, %38, %cst_27 {dimension_numbers = #tpu.dot_dimension_numbers<[1], [0], [0], [1], [0, 0, 1, 1], [], []>} : vector<8x128xf32>, vector<128x512xf32>, vector<8x512xf32> -> vector<8x512xf32>
    %c0_28 = arith.constant 0 : index
    %c0_29 = arith.constant 0 : index
    %40 = vector.load %arg7[%c0_28, %c0_29] : memref<128x512xf32, #tpu.memory_space<vmem>>, vector<128x512xf32>
    %cst_30 = arith.constant dense<0.000000e+00> : vector<8x512xf32>
    %41 = tpu.matmul %13, %40, %cst_30 {dimension_numbers = #tpu.dot_dimension_numbers<[1], [0], [0], [1], [0, 0, 1, 1], [], []>} : vector<8x128xf32>, vector<128x512xf32>, vector<8x512xf32> -> vector<8x512xf32>
    %42 = arith.addf %39, %41 : vector<8x512xf32>
    %43 = arith.addf %42, %17 : vector<8x512xf32>
    %44 = vector.extract_strided_slice %43 {offsets = [0, 0], sizes = [8, 384], strides = [1, 1]} : vector<8x512xf32> to vector<8x384xf32>
    %45 = arith.negf %44 : vector<8x384xf32>
    %46 = math.exp %45 : vector<8x384xf32>
    %cst_31 = arith.constant 1.000000e+00 : f32
    %47 = vector.broadcast %cst_31 : f32 to vector<8x384xf32>
    %48 = arith.addf %47, %46 : vector<8x384xf32>
    %49 = arith.divf %47, %48 : vector<8x384xf32>
    %50 = vector.extract_strided_slice %49 {offsets = [0, 0], sizes = [8, 128], strides = [1, 1]} : vector<8x384xf32> to vector<8x128xf32>
    %51 = vector.extract_strided_slice %49 {offsets = [0, 128], sizes = [8, 128], strides = [1, 1]} : vector<8x384xf32> to vector<8x128xf32>
    %52 = vector.extract_strided_slice %49 {offsets = [0, 256], sizes = [8, 128], strides = [1, 1]} : vector<8x384xf32> to vector<8x128xf32>
    %53 = vector.extract_strided_slice %43 {offsets = [0, 384], sizes = [8, 128], strides = [1, 1]} : vector<8x512xf32> to vector<8x128xf32>
    %54 = math.tanh %53 : vector<8x128xf32>
    %55 = arith.mulf %51, %14 : vector<8x128xf32>
    %56 = arith.mulf %50, %54 : vector<8x128xf32>
    %57 = arith.addf %55, %56 : vector<8x128xf32>
    %58 = math.tanh %57 : vector<8x128xf32>
    %59 = arith.mulf %52, %58 : vector<8x128xf32>
    %c8 = arith.constant 8 : index
    %c0_32 = arith.constant 0 : index
    %60 = vector.load %arg12[%c8, %c0_32] : memref<64x512xf32, #tpu.memory_space<vmem>>, vector<8x512xf32>
    %c0_33 = arith.constant 0 : index
    %c0_34 = arith.constant 0 : index
    %61 = vector.load %arg5[%c0_33, %c0_34] : memref<128x512xf32, #tpu.memory_space<vmem>>, vector<128x512xf32>
    %cst_35 = arith.constant dense<0.000000e+00> : vector<8x512xf32>
    %62 = tpu.matmul %37, %61, %cst_35 {dimension_numbers = #tpu.dot_dimension_numbers<[1], [0], [0], [1], [0, 0, 1, 1], [], []>} : vector<8x128xf32>, vector<128x512xf32>, vector<8x512xf32> -> vector<8x512xf32>
    %63 = arith.addf %60, %62 : vector<8x512xf32>
    %64 = vector.extract_strided_slice %63 {offsets = [0, 0], sizes = [8, 384], strides = [1, 1]} : vector<8x512xf32> to vector<8x384xf32>
    %65 = arith.negf %64 : vector<8x384xf32>
    %66 = math.exp %65 : vector<8x384xf32>
    %cst_36 = arith.constant 1.000000e+00 : f32
    %67 = vector.broadcast %cst_36 : f32 to vector<8x384xf32>
    %68 = arith.addf %67, %66 : vector<8x384xf32>
    %69 = arith.divf %67, %68 : vector<8x384xf32>
    %70 = vector.extract_strided_slice %69 {offsets = [0, 0], sizes = [8, 128], strides = [1, 1]} : vector<8x384xf32> to vector<8x128xf32>
    %71 = vector.extract_strided_slice %69 {offsets = [0, 128], sizes = [8, 128], strides = [1, 1]} : vector<8x384xf32> to vector<8x128xf32>
    %72 = vector.extract_strided_slice %69 {offsets = [0, 256], sizes = [8, 128], strides = [1, 1]} : vector<8x384xf32> to vector<8x128xf32>
    %73 = vector.extract_strided_slice %63 {offsets = [0, 384], sizes = [8, 128], strides = [1, 1]} : vector<8x512xf32> to vector<8x128xf32>
    %74 = math.tanh %73 : vector<8x128xf32>
    %75 = arith.mulf %71, %35 : vector<8x128xf32>
    %76 = arith.mulf %70, %74 : vector<8x128xf32>
    %77 = arith.addf %75, %76 : vector<8x128xf32>
    %78 = math.tanh %77 : vector<8x128xf32>
    %79 = arith.mulf %72, %78 : vector<8x128xf32>
    %c0_37 = arith.constant 0 : index
    %c0_38 = arith.constant 0 : index
    %80 = vector.load %arg6[%c0_37, %c0_38] : memref<128x512xf32, #tpu.memory_space<vmem>>, vector<128x512xf32>
    %cst_39 = arith.constant dense<0.000000e+00> : vector<8x512xf32>
    %81 = tpu.matmul %79, %80, %cst_39 {dimension_numbers = #tpu.dot_dimension_numbers<[1], [0], [0], [1], [0, 0, 1, 1], [], []>} : vector<8x128xf32>, vector<128x512xf32>, vector<8x512xf32> -> vector<8x512xf32>
    %c0_40 = arith.constant 0 : index
    %c0_41 = arith.constant 0 : index
    %82 = vector.load %arg7[%c0_40, %c0_41] : memref<128x512xf32, #tpu.memory_space<vmem>>, vector<128x512xf32>
    %cst_42 = arith.constant dense<0.000000e+00> : vector<8x512xf32>
    %83 = tpu.matmul %59, %82, %cst_42 {dimension_numbers = #tpu.dot_dimension_numbers<[1], [0], [0], [1], [0, 0, 1, 1], [], []>} : vector<8x128xf32>, vector<128x512xf32>, vector<8x512xf32> -> vector<8x512xf32>
    %84 = arith.addf %81, %83 : vector<8x512xf32>
    %85 = arith.addf %84, %17 : vector<8x512xf32>
    %86 = vector.extract_strided_slice %85 {offsets = [0, 0], sizes = [8, 384], strides = [1, 1]} : vector<8x512xf32> to vector<8x384xf32>
    %87 = arith.negf %86 : vector<8x384xf32>
    %88 = math.exp %87 : vector<8x384xf32>
    %cst_43 = arith.constant 1.000000e+00 : f32
    %89 = vector.broadcast %cst_43 : f32 to vector<8x384xf32>
    %90 = arith.addf %89, %88 : vector<8x384xf32>
    %91 = arith.divf %89, %90 : vector<8x384xf32>
    %92 = vector.extract_strided_slice %91 {offsets = [0, 0], sizes = [8, 128], strides = [1, 1]} : vector<8x384xf32> to vector<8x128xf32>
    %93 = vector.extract_strided_slice %91 {offsets = [0, 128], sizes = [8, 128], strides = [1, 1]} : vector<8x384xf32> to vector<8x128xf32>
    %94 = vector.extract_strided_slice %91 {offsets = [0, 256], sizes = [8, 128], strides = [1, 1]} : vector<8x384xf32> to vector<8x128xf32>
    %95 = vector.extract_strided_slice %85 {offsets = [0, 384], sizes = [8, 128], strides = [1, 1]} : vector<8x512xf32> to vector<8x128xf32>
    %96 = math.tanh %95 : vector<8x128xf32>
    %97 = arith.mulf %93, %57 : vector<8x128xf32>
    %98 = arith.mulf %92, %96 : vector<8x128xf32>
    %99 = arith.addf %97, %98 : vector<8x128xf32>
    %100 = math.tanh %99 : vector<8x128xf32>
    %101 = arith.mulf %94, %100 : vector<8x128xf32>
    %c16 = arith.constant 16 : index
    %c0_44 = arith.constant 0 : index
    %102 = vector.load %arg12[%c16, %c0_44] : memref<64x512xf32, #tpu.memory_space<vmem>>, vector<8x512xf32>
    %c0_45 = arith.constant 0 : index
    %c0_46 = arith.constant 0 : index
    %103 = vector.load %arg5[%c0_45, %c0_46] : memref<128x512xf32, #tpu.memory_space<vmem>>, vector<128x512xf32>
    %cst_47 = arith.constant dense<0.000000e+00> : vector<8x512xf32>
    %104 = tpu.matmul %79, %103, %cst_47 {dimension_numbers = #tpu.dot_dimension_numbers<[1], [0], [0], [1], [0, 0, 1, 1], [], []>} : vector<8x128xf32>, vector<128x512xf32>, vector<8x512xf32> -> vector<8x512xf32>
    %105 = arith.addf %102, %104 : vector<8x512xf32>
    %106 = vector.extract_strided_slice %105 {offsets = [0, 0], sizes = [8, 384], strides = [1, 1]} : vector<8x512xf32> to vector<8x384xf32>
    %107 = arith.negf %106 : vector<8x384xf32>
    %108 = math.exp %107 : vector<8x384xf32>
    %cst_48 = arith.constant 1.000000e+00 : f32
    %109 = vector.broadcast %cst_48 : f32 to vector<8x384xf32>
    %110 = arith.addf %109, %108 : vector<8x384xf32>
    %111 = arith.divf %109, %110 : vector<8x384xf32>
    %112 = vector.extract_strided_slice %111 {offsets = [0, 0], sizes = [8, 128], strides = [1, 1]} : vector<8x384xf32> to vector<8x128xf32>
    %113 = vector.extract_strided_slice %111 {offsets = [0, 128], sizes = [8, 128], strides = [1, 1]} : vector<8x384xf32> to vector<8x128xf32>
    %114 = vector.extract_strided_slice %111 {offsets = [0, 256], sizes = [8, 128], strides = [1, 1]} : vector<8x384xf32> to vector<8x128xf32>
    %115 = vector.extract_strided_slice %105 {offsets = [0, 384], sizes = [8, 128], strides = [1, 1]} : vector<8x512xf32> to vector<8x128xf32>
    %116 = math.tanh %115 : vector<8x128xf32>
    %117 = arith.mulf %113, %77 : vector<8x128xf32>
    %118 = arith.mulf %112, %116 : vector<8x128xf32>
    %119 = arith.addf %117, %118 : vector<8x128xf32>
    %120 = math.tanh %119 : vector<8x128xf32>
    %121 = arith.mulf %114, %120 : vector<8x128xf32>
    %c0_49 = arith.constant 0 : index
    %c0_50 = arith.constant 0 : index
    %122 = vector.load %arg6[%c0_49, %c0_50] : memref<128x512xf32, #tpu.memory_space<vmem>>, vector<128x512xf32>
    %cst_51 = arith.constant dense<0.000000e+00> : vector<8x512xf32>
    %123 = tpu.matmul %121, %122, %cst_51 {dimension_numbers = #tpu.dot_dimension_numbers<[1], [0], [0], [1], [0, 0, 1, 1], [], []>} : vector<8x128xf32>, vector<128x512xf32>, vector<8x512xf32> -> vector<8x512xf32>
    %c0_52 = arith.constant 0 : index
    %c0_53 = arith.constant 0 : index
    %124 = vector.load %arg7[%c0_52, %c0_53] : memref<128x512xf32, #tpu.memory_space<vmem>>, vector<128x512xf32>
    %cst_54 = arith.constant dense<0.000000e+00> : vector<8x512xf32>
    %125 = tpu.matmul %101, %124, %cst_54 {dimension_numbers = #tpu.dot_dimension_numbers<[1], [0], [0], [1], [0, 0, 1, 1], [], []>} : vector<8x128xf32>, vector<128x512xf32>, vector<8x512xf32> -> vector<8x512xf32>
    %126 = arith.addf %123, %125 : vector<8x512xf32>
    %127 = arith.addf %126, %17 : vector<8x512xf32>
    %128 = vector.extract_strided_slice %127 {offsets = [0, 0], sizes = [8, 384], strides = [1, 1]} : vector<8x512xf32> to vector<8x384xf32>
    %129 = arith.negf %128 : vector<8x384xf32>
    %130 = math.exp %129 : vector<8x384xf32>
    %cst_55 = arith.constant 1.000000e+00 : f32
    %131 = vector.broadcast %cst_55 : f32 to vector<8x384xf32>
    %132 = arith.addf %131, %130 : vector<8x384xf32>
    %133 = arith.divf %131, %132 : vector<8x384xf32>
    %134 = vector.extract_strided_slice %133 {offsets = [0, 0], sizes = [8, 128], strides = [1, 1]} : vector<8x384xf32> to vector<8x128xf32>
    %135 = vector.extract_strided_slice %133 {offsets = [0, 128], sizes = [8, 128], strides = [1, 1]} : vector<8x384xf32> to vector<8x128xf32>
    %136 = vector.extract_strided_slice %133 {offsets = [0, 256], sizes = [8, 128], strides = [1, 1]} : vector<8x384xf32> to vector<8x128xf32>
    %137 = vector.extract_strided_slice %127 {offsets = [0, 384], sizes = [8, 128], strides = [1, 1]} : vector<8x512xf32> to vector<8x128xf32>
    %138 = math.tanh %137 : vector<8x128xf32>
    %139 = arith.mulf %135, %99 : vector<8x128xf32>
    %140 = arith.mulf %134, %138 : vector<8x128xf32>
    %141 = arith.addf %139, %140 : vector<8x128xf32>
    %142 = math.tanh %141 : vector<8x128xf32>
    %143 = arith.mulf %136, %142 : vector<8x128xf32>
    %c24 = arith.constant 24 : index
    %c0_56 = arith.constant 0 : index
    %144 = vector.load %arg12[%c24, %c0_56] : memref<64x512xf32, #tpu.memory_space<vmem>>, vector<8x512xf32>
    %c0_57 = arith.constant 0 : index
    %c0_58 = arith.constant 0 : index
    %145 = vector.load %arg5[%c0_57, %c0_58] : memref<128x512xf32, #tpu.memory_space<vmem>>, vector<128x512xf32>
    %cst_59 = arith.constant dense<0.000000e+00> : vector<8x512xf32>
    %146 = tpu.matmul %121, %145, %cst_59 {dimension_numbers = #tpu.dot_dimension_numbers<[1], [0], [0], [1], [0, 0, 1, 1], [], []>} : vector<8x128xf32>, vector<128x512xf32>, vector<8x512xf32> -> vector<8x512xf32>
    %147 = arith.addf %144, %146 : vector<8x512xf32>
    %148 = vector.extract_strided_slice %147 {offsets = [0, 0], sizes = [8, 384], strides = [1, 1]} : vector<8x512xf32> to vector<8x384xf32>
    %149 = arith.negf %148 : vector<8x384xf32>
    %150 = math.exp %149 : vector<8x384xf32>
    %cst_60 = arith.constant 1.000000e+00 : f32
    %151 = vector.broadcast %cst_60 : f32 to vector<8x384xf32>
    %152 = arith.addf %151, %150 : vector<8x384xf32>
    %153 = arith.divf %151, %152 : vector<8x384xf32>
    %154 = vector.extract_strided_slice %153 {offsets = [0, 0], sizes = [8, 128], strides = [1, 1]} : vector<8x384xf32> to vector<8x128xf32>
    %155 = vector.extract_strided_slice %153 {offsets = [0, 128], sizes = [8, 128], strides = [1, 1]} : vector<8x384xf32> to vector<8x128xf32>
    %156 = vector.extract_strided_slice %153 {offsets = [0, 256], sizes = [8, 128], strides = [1, 1]} : vector<8x384xf32> to vector<8x128xf32>
    %157 = vector.extract_strided_slice %147 {offsets = [0, 384], sizes = [8, 128], strides = [1, 1]} : vector<8x512xf32> to vector<8x128xf32>
    %158 = math.tanh %157 : vector<8x128xf32>
    %159 = arith.mulf %155, %119 : vector<8x128xf32>
    %160 = arith.mulf %154, %158 : vector<8x128xf32>
    %161 = arith.addf %159, %160 : vector<8x128xf32>
    %162 = math.tanh %161 : vector<8x128xf32>
    %163 = arith.mulf %156, %162 : vector<8x128xf32>
    %c0_61 = arith.constant 0 : index
    %c0_62 = arith.constant 0 : index
    %164 = vector.load %arg6[%c0_61, %c0_62] : memref<128x512xf32, #tpu.memory_space<vmem>>, vector<128x512xf32>
    %cst_63 = arith.constant dense<0.000000e+00> : vector<8x512xf32>
    %165 = tpu.matmul %163, %164, %cst_63 {dimension_numbers = #tpu.dot_dimension_numbers<[1], [0], [0], [1], [0, 0, 1, 1], [], []>} : vector<8x128xf32>, vector<128x512xf32>, vector<8x512xf32> -> vector<8x512xf32>
    %c0_64 = arith.constant 0 : index
    %c0_65 = arith.constant 0 : index
    %166 = vector.load %arg7[%c0_64, %c0_65] : memref<128x512xf32, #tpu.memory_space<vmem>>, vector<128x512xf32>
    %cst_66 = arith.constant dense<0.000000e+00> : vector<8x512xf32>
    %167 = tpu.matmul %143, %166, %cst_66 {dimension_numbers = #tpu.dot_dimension_numbers<[1], [0], [0], [1], [0, 0, 1, 1], [], []>} : vector<8x128xf32>, vector<128x512xf32>, vector<8x512xf32> -> vector<8x512xf32>
    %168 = arith.addf %165, %167 : vector<8x512xf32>
    %169 = arith.addf %168, %17 : vector<8x512xf32>
    %170 = vector.extract_strided_slice %169 {offsets = [0, 0], sizes = [8, 384], strides = [1, 1]} : vector<8x512xf32> to vector<8x384xf32>
    %171 = arith.negf %170 : vector<8x384xf32>
    %172 = math.exp %171 : vector<8x384xf32>
    %cst_67 = arith.constant 1.000000e+00 : f32
    %173 = vector.broadcast %cst_67 : f32 to vector<8x384xf32>
    %174 = arith.addf %173, %172 : vector<8x384xf32>
    %175 = arith.divf %173, %174 : vector<8x384xf32>
    %176 = vector.extract_strided_slice %175 {offsets = [0, 0], sizes = [8, 128], strides = [1, 1]} : vector<8x384xf32> to vector<8x128xf32>
    %177 = vector.extract_strided_slice %175 {offsets = [0, 128], sizes = [8, 128], strides = [1, 1]} : vector<8x384xf32> to vector<8x128xf32>
    %178 = vector.extract_strided_slice %175 {offsets = [0, 256], sizes = [8, 128], strides = [1, 1]} : vector<8x384xf32> to vector<8x128xf32>
    %179 = vector.extract_strided_slice %169 {offsets = [0, 384], sizes = [8, 128], strides = [1, 1]} : vector<8x512xf32> to vector<8x128xf32>
    %180 = math.tanh %179 : vector<8x128xf32>
    %181 = arith.mulf %177, %141 : vector<8x128xf32>
    %182 = arith.mulf %176, %180 : vector<8x128xf32>
    %183 = arith.addf %181, %182 : vector<8x128xf32>
    %184 = math.tanh %183 : vector<8x128xf32>
    %185 = arith.mulf %178, %184 : vector<8x128xf32>
    %c32 = arith.constant 32 : index
    %c0_68 = arith.constant 0 : index
    %186 = vector.load %arg12[%c32, %c0_68] : memref<64x512xf32, #tpu.memory_space<vmem>>, vector<8x512xf32>
    %c0_69 = arith.constant 0 : index
    %c0_70 = arith.constant 0 : index
    %187 = vector.load %arg5[%c0_69, %c0_70] : memref<128x512xf32, #tpu.memory_space<vmem>>, vector<128x512xf32>
    %cst_71 = arith.constant dense<0.000000e+00> : vector<8x512xf32>
    %188 = tpu.matmul %163, %187, %cst_71 {dimension_numbers = #tpu.dot_dimension_numbers<[1], [0], [0], [1], [0, 0, 1, 1], [], []>} : vector<8x128xf32>, vector<128x512xf32>, vector<8x512xf32> -> vector<8x512xf32>
    %189 = arith.addf %186, %188 : vector<8x512xf32>
    %190 = vector.extract_strided_slice %189 {offsets = [0, 0], sizes = [8, 384], strides = [1, 1]} : vector<8x512xf32> to vector<8x384xf32>
    %191 = arith.negf %190 : vector<8x384xf32>
    %192 = math.exp %191 : vector<8x384xf32>
    %cst_72 = arith.constant 1.000000e+00 : f32
    %193 = vector.broadcast %cst_72 : f32 to vector<8x384xf32>
    %194 = arith.addf %193, %192 : vector<8x384xf32>
    %195 = arith.divf %193, %194 : vector<8x384xf32>
    %196 = vector.extract_strided_slice %195 {offsets = [0, 0], sizes = [8, 128], strides = [1, 1]} : vector<8x384xf32> to vector<8x128xf32>
    %197 = vector.extract_strided_slice %195 {offsets = [0, 128], sizes = [8, 128], strides = [1, 1]} : vector<8x384xf32> to vector<8x128xf32>
    %198 = vector.extract_strided_slice %195 {offsets = [0, 256], sizes = [8, 128], strides = [1, 1]} : vector<8x384xf32> to vector<8x128xf32>
    %199 = vector.extract_strided_slice %189 {offsets = [0, 384], sizes = [8, 128], strides = [1, 1]} : vector<8x512xf32> to vector<8x128xf32>
    %200 = math.tanh %199 : vector<8x128xf32>
    %201 = arith.mulf %197, %161 : vector<8x128xf32>
    %202 = arith.mulf %196, %200 : vector<8x128xf32>
    %203 = arith.addf %201, %202 : vector<8x128xf32>
    %204 = math.tanh %203 : vector<8x128xf32>
    %205 = arith.mulf %198, %204 : vector<8x128xf32>
    %c0_73 = arith.constant 0 : index
    %c0_74 = arith.constant 0 : index
    %206 = vector.load %arg6[%c0_73, %c0_74] : memref<128x512xf32, #tpu.memory_space<vmem>>, vector<128x512xf32>
    %cst_75 = arith.constant dense<0.000000e+00> : vector<8x512xf32>
    %207 = tpu.matmul %205, %206, %cst_75 {dimension_numbers = #tpu.dot_dimension_numbers<[1], [0], [0], [1], [0, 0, 1, 1], [], []>} : vector<8x128xf32>, vector<128x512xf32>, vector<8x512xf32> -> vector<8x512xf32>
    %c0_76 = arith.constant 0 : index
    %c0_77 = arith.constant 0 : index
    %208 = vector.load %arg7[%c0_76, %c0_77] : memref<128x512xf32, #tpu.memory_space<vmem>>, vector<128x512xf32>
    %cst_78 = arith.constant dense<0.000000e+00> : vector<8x512xf32>
    %209 = tpu.matmul %185, %208, %cst_78 {dimension_numbers = #tpu.dot_dimension_numbers<[1], [0], [0], [1], [0, 0, 1, 1], [], []>} : vector<8x128xf32>, vector<128x512xf32>, vector<8x512xf32> -> vector<8x512xf32>
    %210 = arith.addf %207, %209 : vector<8x512xf32>
    %211 = arith.addf %210, %17 : vector<8x512xf32>
    %212 = vector.extract_strided_slice %211 {offsets = [0, 0], sizes = [8, 384], strides = [1, 1]} : vector<8x512xf32> to vector<8x384xf32>
    %213 = arith.negf %212 : vector<8x384xf32>
    %214 = math.exp %213 : vector<8x384xf32>
    %cst_79 = arith.constant 1.000000e+00 : f32
    %215 = vector.broadcast %cst_79 : f32 to vector<8x384xf32>
    %216 = arith.addf %215, %214 : vector<8x384xf32>
    %217 = arith.divf %215, %216 : vector<8x384xf32>
    %218 = vector.extract_strided_slice %217 {offsets = [0, 0], sizes = [8, 128], strides = [1, 1]} : vector<8x384xf32> to vector<8x128xf32>
    %219 = vector.extract_strided_slice %217 {offsets = [0, 128], sizes = [8, 128], strides = [1, 1]} : vector<8x384xf32> to vector<8x128xf32>
    %220 = vector.extract_strided_slice %217 {offsets = [0, 256], sizes = [8, 128], strides = [1, 1]} : vector<8x384xf32> to vector<8x128xf32>
    %221 = vector.extract_strided_slice %211 {offsets = [0, 384], sizes = [8, 128], strides = [1, 1]} : vector<8x512xf32> to vector<8x128xf32>
    %222 = math.tanh %221 : vector<8x128xf32>
    %223 = arith.mulf %219, %183 : vector<8x128xf32>
    %224 = arith.mulf %218, %222 : vector<8x128xf32>
    %225 = arith.addf %223, %224 : vector<8x128xf32>
    %226 = math.tanh %225 : vector<8x128xf32>
    %227 = arith.mulf %220, %226 : vector<8x128xf32>
    %c40 = arith.constant 40 : index
    %c0_80 = arith.constant 0 : index
    %228 = vector.load %arg12[%c40, %c0_80] : memref<64x512xf32, #tpu.memory_space<vmem>>, vector<8x512xf32>
    %c0_81 = arith.constant 0 : index
    %c0_82 = arith.constant 0 : index
    %229 = vector.load %arg5[%c0_81, %c0_82] : memref<128x512xf32, #tpu.memory_space<vmem>>, vector<128x512xf32>
    %cst_83 = arith.constant dense<0.000000e+00> : vector<8x512xf32>
    %230 = tpu.matmul %205, %229, %cst_83 {dimension_numbers = #tpu.dot_dimension_numbers<[1], [0], [0], [1], [0, 0, 1, 1], [], []>} : vector<8x128xf32>, vector<128x512xf32>, vector<8x512xf32> -> vector<8x512xf32>
    %231 = arith.addf %228, %230 : vector<8x512xf32>
    %232 = vector.extract_strided_slice %231 {offsets = [0, 0], sizes = [8, 384], strides = [1, 1]} : vector<8x512xf32> to vector<8x384xf32>
    %233 = arith.negf %232 : vector<8x384xf32>
    %234 = math.exp %233 : vector<8x384xf32>
    %cst_84 = arith.constant 1.000000e+00 : f32
    %235 = vector.broadcast %cst_84 : f32 to vector<8x384xf32>
    %236 = arith.addf %235, %234 : vector<8x384xf32>
    %237 = arith.divf %235, %236 : vector<8x384xf32>
    %238 = vector.extract_strided_slice %237 {offsets = [0, 0], sizes = [8, 128], strides = [1, 1]} : vector<8x384xf32> to vector<8x128xf32>
    %239 = vector.extract_strided_slice %237 {offsets = [0, 128], sizes = [8, 128], strides = [1, 1]} : vector<8x384xf32> to vector<8x128xf32>
    %240 = vector.extract_strided_slice %237 {offsets = [0, 256], sizes = [8, 128], strides = [1, 1]} : vector<8x384xf32> to vector<8x128xf32>
    %241 = vector.extract_strided_slice %231 {offsets = [0, 384], sizes = [8, 128], strides = [1, 1]} : vector<8x512xf32> to vector<8x128xf32>
    %242 = math.tanh %241 : vector<8x128xf32>
    %243 = arith.mulf %239, %203 : vector<8x128xf32>
    %244 = arith.mulf %238, %242 : vector<8x128xf32>
    %245 = arith.addf %243, %244 : vector<8x128xf32>
    %246 = math.tanh %245 : vector<8x128xf32>
    %247 = arith.mulf %240, %246 : vector<8x128xf32>
    %c0_85 = arith.constant 0 : index
    %c0_86 = arith.constant 0 : index
    %248 = vector.load %arg6[%c0_85, %c0_86] : memref<128x512xf32, #tpu.memory_space<vmem>>, vector<128x512xf32>
    %cst_87 = arith.constant dense<0.000000e+00> : vector<8x512xf32>
    %249 = tpu.matmul %247, %248, %cst_87 {dimension_numbers = #tpu.dot_dimension_numbers<[1], [0], [0], [1], [0, 0, 1, 1], [], []>} : vector<8x128xf32>, vector<128x512xf32>, vector<8x512xf32> -> vector<8x512xf32>
    %c0_88 = arith.constant 0 : index
    %c0_89 = arith.constant 0 : index
    %250 = vector.load %arg7[%c0_88, %c0_89] : memref<128x512xf32, #tpu.memory_space<vmem>>, vector<128x512xf32>
    %cst_90 = arith.constant dense<0.000000e+00> : vector<8x512xf32>
    %251 = tpu.matmul %227, %250, %cst_90 {dimension_numbers = #tpu.dot_dimension_numbers<[1], [0], [0], [1], [0, 0, 1, 1], [], []>} : vector<8x128xf32>, vector<128x512xf32>, vector<8x512xf32> -> vector<8x512xf32>
    %252 = arith.addf %249, %251 : vector<8x512xf32>
    %253 = arith.addf %252, %17 : vector<8x512xf32>
    %254 = vector.extract_strided_slice %253 {offsets = [0, 0], sizes = [8, 384], strides = [1, 1]} : vector<8x512xf32> to vector<8x384xf32>
    %255 = arith.negf %254 : vector<8x384xf32>
    %256 = math.exp %255 : vector<8x384xf32>
    %cst_91 = arith.constant 1.000000e+00 : f32
    %257 = vector.broadcast %cst_91 : f32 to vector<8x384xf32>
    %258 = arith.addf %257, %256 : vector<8x384xf32>
    %259 = arith.divf %257, %258 : vector<8x384xf32>
    %260 = vector.extract_strided_slice %259 {offsets = [0, 0], sizes = [8, 128], strides = [1, 1]} : vector<8x384xf32> to vector<8x128xf32>
    %261 = vector.extract_strided_slice %259 {offsets = [0, 128], sizes = [8, 128], strides = [1, 1]} : vector<8x384xf32> to vector<8x128xf32>
    %262 = vector.extract_strided_slice %259 {offsets = [0, 256], sizes = [8, 128], strides = [1, 1]} : vector<8x384xf32> to vector<8x128xf32>
    %263 = vector.extract_strided_slice %253 {offsets = [0, 384], sizes = [8, 128], strides = [1, 1]} : vector<8x512xf32> to vector<8x128xf32>
    %264 = math.tanh %263 : vector<8x128xf32>
    %265 = arith.mulf %261, %225 : vector<8x128xf32>
    %266 = arith.mulf %260, %264 : vector<8x128xf32>
    %267 = arith.addf %265, %266 : vector<8x128xf32>
    %268 = math.tanh %267 : vector<8x128xf32>
    %269 = arith.mulf %262, %268 : vector<8x128xf32>
    %c48 = arith.constant 48 : index
    %c0_92 = arith.constant 0 : index
    %270 = vector.load %arg12[%c48, %c0_92] : memref<64x512xf32, #tpu.memory_space<vmem>>, vector<8x512xf32>
    %c0_93 = arith.constant 0 : index
    %c0_94 = arith.constant 0 : index
    %271 = vector.load %arg5[%c0_93, %c0_94] : memref<128x512xf32, #tpu.memory_space<vmem>>, vector<128x512xf32>
    %cst_95 = arith.constant dense<0.000000e+00> : vector<8x512xf32>
    %272 = tpu.matmul %247, %271, %cst_95 {dimension_numbers = #tpu.dot_dimension_numbers<[1], [0], [0], [1], [0, 0, 1, 1], [], []>} : vector<8x128xf32>, vector<128x512xf32>, vector<8x512xf32> -> vector<8x512xf32>
    %273 = arith.addf %270, %272 : vector<8x512xf32>
    %274 = vector.extract_strided_slice %273 {offsets = [0, 0], sizes = [8, 384], strides = [1, 1]} : vector<8x512xf32> to vector<8x384xf32>
    %275 = arith.negf %274 : vector<8x384xf32>
    %276 = math.exp %275 : vector<8x384xf32>
    %cst_96 = arith.constant 1.000000e+00 : f32
    %277 = vector.broadcast %cst_96 : f32 to vector<8x384xf32>
    %278 = arith.addf %277, %276 : vector<8x384xf32>
    %279 = arith.divf %277, %278 : vector<8x384xf32>
    %280 = vector.extract_strided_slice %279 {offsets = [0, 0], sizes = [8, 128], strides = [1, 1]} : vector<8x384xf32> to vector<8x128xf32>
    %281 = vector.extract_strided_slice %279 {offsets = [0, 128], sizes = [8, 128], strides = [1, 1]} : vector<8x384xf32> to vector<8x128xf32>
    %282 = vector.extract_strided_slice %279 {offsets = [0, 256], sizes = [8, 128], strides = [1, 1]} : vector<8x384xf32> to vector<8x128xf32>
    %283 = vector.extract_strided_slice %273 {offsets = [0, 384], sizes = [8, 128], strides = [1, 1]} : vector<8x512xf32> to vector<8x128xf32>
    %284 = math.tanh %283 : vector<8x128xf32>
    %285 = arith.mulf %281, %245 : vector<8x128xf32>
    %286 = arith.mulf %280, %284 : vector<8x128xf32>
    %287 = arith.addf %285, %286 : vector<8x128xf32>
    %288 = math.tanh %287 : vector<8x128xf32>
    %289 = arith.mulf %282, %288 : vector<8x128xf32>
    %c0_97 = arith.constant 0 : index
    %c0_98 = arith.constant 0 : index
    %290 = vector.load %arg6[%c0_97, %c0_98] : memref<128x512xf32, #tpu.memory_space<vmem>>, vector<128x512xf32>
    %cst_99 = arith.constant dense<0.000000e+00> : vector<8x512xf32>
    %291 = tpu.matmul %289, %290, %cst_99 {dimension_numbers = #tpu.dot_dimension_numbers<[1], [0], [0], [1], [0, 0, 1, 1], [], []>} : vector<8x128xf32>, vector<128x512xf32>, vector<8x512xf32> -> vector<8x512xf32>
    %c0_100 = arith.constant 0 : index
    %c0_101 = arith.constant 0 : index
    %292 = vector.load %arg7[%c0_100, %c0_101] : memref<128x512xf32, #tpu.memory_space<vmem>>, vector<128x512xf32>
    %cst_102 = arith.constant dense<0.000000e+00> : vector<8x512xf32>
    %293 = tpu.matmul %269, %292, %cst_102 {dimension_numbers = #tpu.dot_dimension_numbers<[1], [0], [0], [1], [0, 0, 1, 1], [], []>} : vector<8x128xf32>, vector<128x512xf32>, vector<8x512xf32> -> vector<8x512xf32>
    %294 = arith.addf %291, %293 : vector<8x512xf32>
    %295 = arith.addf %294, %17 : vector<8x512xf32>
    %296 = vector.extract_strided_slice %295 {offsets = [0, 0], sizes = [8, 384], strides = [1, 1]} : vector<8x512xf32> to vector<8x384xf32>
    %297 = arith.negf %296 : vector<8x384xf32>
    %298 = math.exp %297 : vector<8x384xf32>
    %cst_103 = arith.constant 1.000000e+00 : f32
    %299 = vector.broadcast %cst_103 : f32 to vector<8x384xf32>
    %300 = arith.addf %299, %298 : vector<8x384xf32>
    %301 = arith.divf %299, %300 : vector<8x384xf32>
    %302 = vector.extract_strided_slice %301 {offsets = [0, 0], sizes = [8, 128], strides = [1, 1]} : vector<8x384xf32> to vector<8x128xf32>
    %303 = vector.extract_strided_slice %301 {offsets = [0, 128], sizes = [8, 128], strides = [1, 1]} : vector<8x384xf32> to vector<8x128xf32>
    %304 = vector.extract_strided_slice %301 {offsets = [0, 256], sizes = [8, 128], strides = [1, 1]} : vector<8x384xf32> to vector<8x128xf32>
    %305 = vector.extract_strided_slice %295 {offsets = [0, 384], sizes = [8, 128], strides = [1, 1]} : vector<8x512xf32> to vector<8x128xf32>
    %306 = math.tanh %305 : vector<8x128xf32>
    %307 = arith.mulf %303, %267 : vector<8x128xf32>
    %308 = arith.mulf %302, %306 : vector<8x128xf32>
    %309 = arith.addf %307, %308 : vector<8x128xf32>
    %310 = math.tanh %309 : vector<8x128xf32>
    %311 = arith.mulf %304, %310 : vector<8x128xf32>
    %c56 = arith.constant 56 : index
    %c0_104 = arith.constant 0 : index
    %312 = vector.load %arg12[%c56, %c0_104] : memref<64x512xf32, #tpu.memory_space<vmem>>, vector<8x512xf32>
    %c0_105 = arith.constant 0 : index
    %c0_106 = arith.constant 0 : index
    %313 = vector.load %arg5[%c0_105, %c0_106] : memref<128x512xf32, #tpu.memory_space<vmem>>, vector<128x512xf32>
    %cst_107 = arith.constant dense<0.000000e+00> : vector<8x512xf32>
    %314 = tpu.matmul %289, %313, %cst_107 {dimension_numbers = #tpu.dot_dimension_numbers<[1], [0], [0], [1], [0, 0, 1, 1], [], []>} : vector<8x128xf32>, vector<128x512xf32>, vector<8x512xf32> -> vector<8x512xf32>
    %315 = arith.addf %312, %314 : vector<8x512xf32>
    %316 = vector.extract_strided_slice %315 {offsets = [0, 0], sizes = [8, 384], strides = [1, 1]} : vector<8x512xf32> to vector<8x384xf32>
    %317 = arith.negf %316 : vector<8x384xf32>
    %318 = math.exp %317 : vector<8x384xf32>
    %cst_108 = arith.constant 1.000000e+00 : f32
    %319 = vector.broadcast %cst_108 : f32 to vector<8x384xf32>
    %320 = arith.addf %319, %318 : vector<8x384xf32>
    %321 = arith.divf %319, %320 : vector<8x384xf32>
    %322 = vector.extract_strided_slice %321 {offsets = [0, 0], sizes = [8, 128], strides = [1, 1]} : vector<8x384xf32> to vector<8x128xf32>
    %323 = vector.extract_strided_slice %321 {offsets = [0, 128], sizes = [8, 128], strides = [1, 1]} : vector<8x384xf32> to vector<8x128xf32>
    %324 = vector.extract_strided_slice %321 {offsets = [0, 256], sizes = [8, 128], strides = [1, 1]} : vector<8x384xf32> to vector<8x128xf32>
    %325 = vector.extract_strided_slice %315 {offsets = [0, 384], sizes = [8, 128], strides = [1, 1]} : vector<8x512xf32> to vector<8x128xf32>
    %326 = math.tanh %325 : vector<8x128xf32>
    %327 = arith.mulf %323, %287 : vector<8x128xf32>
    %328 = arith.mulf %322, %326 : vector<8x128xf32>
    %329 = arith.addf %327, %328 : vector<8x128xf32>
    %330 = math.tanh %329 : vector<8x128xf32>
    %331 = arith.mulf %324, %330 : vector<8x128xf32>
    %c0_109 = arith.constant 0 : index
    %c0_110 = arith.constant 0 : index
    %332 = vector.load %arg6[%c0_109, %c0_110] : memref<128x512xf32, #tpu.memory_space<vmem>>, vector<128x512xf32>
    %cst_111 = arith.constant dense<0.000000e+00> : vector<8x512xf32>
    %333 = tpu.matmul %331, %332, %cst_111 {dimension_numbers = #tpu.dot_dimension_numbers<[1], [0], [0], [1], [0, 0, 1, 1], [], []>} : vector<8x128xf32>, vector<128x512xf32>, vector<8x512xf32> -> vector<8x512xf32>
    %c0_112 = arith.constant 0 : index
    %c0_113 = arith.constant 0 : index
    %334 = vector.load %arg7[%c0_112, %c0_113] : memref<128x512xf32, #tpu.memory_space<vmem>>, vector<128x512xf32>
    %cst_114 = arith.constant dense<0.000000e+00> : vector<8x512xf32>
    %335 = tpu.matmul %311, %334, %cst_114 {dimension_numbers = #tpu.dot_dimension_numbers<[1], [0], [0], [1], [0, 0, 1, 1], [], []>} : vector<8x128xf32>, vector<128x512xf32>, vector<8x512xf32> -> vector<8x512xf32>
    %336 = arith.addf %333, %335 : vector<8x512xf32>
    %337 = arith.addf %336, %17 : vector<8x512xf32>
    %338 = vector.extract_strided_slice %337 {offsets = [0, 0], sizes = [8, 384], strides = [1, 1]} : vector<8x512xf32> to vector<8x384xf32>
    %339 = arith.negf %338 : vector<8x384xf32>
    %340 = math.exp %339 : vector<8x384xf32>
    %cst_115 = arith.constant 1.000000e+00 : f32
    %341 = vector.broadcast %cst_115 : f32 to vector<8x384xf32>
    %342 = arith.addf %341, %340 : vector<8x384xf32>
    %343 = arith.divf %341, %342 : vector<8x384xf32>
    %344 = vector.extract_strided_slice %343 {offsets = [0, 0], sizes = [8, 128], strides = [1, 1]} : vector<8x384xf32> to vector<8x128xf32>
    %345 = vector.extract_strided_slice %343 {offsets = [0, 128], sizes = [8, 128], strides = [1, 1]} : vector<8x384xf32> to vector<8x128xf32>
    %346 = vector.extract_strided_slice %343 {offsets = [0, 256], sizes = [8, 128], strides = [1, 1]} : vector<8x384xf32> to vector<8x128xf32>
    %347 = vector.extract_strided_slice %337 {offsets = [0, 384], sizes = [8, 128], strides = [1, 1]} : vector<8x512xf32> to vector<8x128xf32>
    %348 = math.tanh %347 : vector<8x128xf32>
    %349 = arith.mulf %345, %309 : vector<8x128xf32>
    %350 = arith.mulf %344, %348 : vector<8x128xf32>
    %351 = arith.addf %349, %350 : vector<8x128xf32>
    %352 = math.tanh %351 : vector<8x128xf32>
    %353 = arith.mulf %346, %352 : vector<8x128xf32>
    %c0_116 = arith.constant 0 : index
    %c0_117 = arith.constant 0 : index
    %354 = vector.load %arg13[%c0_116, %c0_117] : memref<8x128xf32, #tpu.memory_space<vmem>>, vector<8x128xf32>
    tpu.vector_store %arg13[%c0_116, %c0_117], %331 {strides = array<i32>} : memref<8x128xf32, #tpu.memory_space<vmem>>, vector<8x128xf32>,
    %c0_118 = arith.constant 0 : index
    %c0_119 = arith.constant 0 : index
    %355 = vector.load %arg14[%c0_118, %c0_119] : memref<8x128xf32, #tpu.memory_space<vmem>>, vector<8x128xf32>
    tpu.vector_store %arg14[%c0_118, %c0_119], %329 {strides = array<i32>} : memref<8x128xf32, #tpu.memory_space<vmem>>, vector<8x128xf32>,
    %c0_120 = arith.constant 0 : index
    %c0_121 = arith.constant 0 : index
    %356 = vector.load %arg15[%c0_120, %c0_121] : memref<8x128xf32, #tpu.memory_space<vmem>>, vector<8x128xf32>
    tpu.vector_store %arg15[%c0_120, %c0_121], %353 {strides = array<i32>} : memref<8x128xf32, #tpu.memory_space<vmem>>, vector<8x128xf32>,
    %c0_122 = arith.constant 0 : index
    %c0_123 = arith.constant 0 : index
    %357 = vector.load %arg16[%c0_122, %c0_123] : memref<8x128xf32, #tpu.memory_space<vmem>>, vector<8x128xf32>
    tpu.vector_store %arg16[%c0_122, %c0_123], %351 {strides = array<i32>} : memref<8x128xf32, #tpu.memory_space<vmem>>, vector<8x128xf32>,
    %c0_i32_124 = arith.constant 0 : i32
    %358 = arith.cmpi eq, %arg1, %c0_i32_124 : i32
    %359 = arith.extui %358 : i1 to i32
    %c0_i32_125 = arith.constant 0 : i32
    %360 = arith.cmpi ne, %359, %c0_i32_125 : i32
    scf.if %360 {
      %361 = tpu.concatenate %331, %329, %353, %351 in 1 : vector<8x128xf32>, vector<8x128xf32>, vector<8x128xf32>, vector<8x128xf32> -> vector<8x512xf32>
      %c0_126 = arith.constant 0 : index
      %c0_127 = arith.constant 0 : index
      %362 = vector.load %arg9[%c0_126, %c0_127] : memref<512x256xf32, #tpu.memory_space<vmem>>, vector<512x256xf32>
      %cst_128 = arith.constant dense<0.000000e+00> : vector<8x256xf32>
      %363 = tpu.matmul %361, %362, %cst_128 {dimension_numbers = #tpu.dot_dimension_numbers<[1], [0], [0], [1], [0, 0, 1, 1], [], []>} : vector<8x512xf32>, vector<512x256xf32>, vector<8x256xf32> -> vector<8x256xf32>
      %c0_129 = arith.constant 0 : index
      %c0_130 = arith.constant 0 : index
      %364 = vector.load %arg10[%c0_129, %c0_130] : memref<1x256xf32, #tpu.memory_space<vmem>>, vector<1x256xf32>
      %365 = vector.broadcast %364 : vector<1x256xf32> to vector<8x256xf32>
      %366 = arith.addf %363, %365 : vector<8x256xf32>
      %367 = math.tanh %366 : vector<8x256xf32>
      %c0_131 = arith.constant 0 : index
      %c0_132 = arith.constant 0 : index
      %368 = vector.load %arg11[%c0_131, %c0_132] : memref<8x256xf32, #tpu.memory_space<vmem>>, vector<8x256xf32>
      tpu.vector_store %arg11[%c0_131, %c0_132], %367 {strides = array<i32>} : memref<8x256xf32, #tpu.memory_space<vmem>>, vector<8x256xf32>,
    } else {
    }
    return
  }
  func.func @transform_0(%arg0: i32, %arg1: i32) -> (i32, i32, i32) {
    %c0_i32 = arith.constant 0 : i32
    %c0_i32_0 = arith.constant 0 : i32
    return %arg0, %arg1, %c0_i32 : i32, i32, i32
  }
  func.func @transform_1(%arg0: i32, %arg1: i32) -> (i32, i32) {
    %c0_i32 = arith.constant 0 : i32
    %c0_i32_0 = arith.constant 0 : i32
    %c0_i32_1 = arith.constant 0 : i32
    return %c0_i32, %c0_i32_0 : i32, i32
  }
  func.func @transform_2(%arg0: i32, %arg1: i32) -> (i32, i32) {
    %c0_i32 = arith.constant 0 : i32
    %c0_i32_0 = arith.constant 0 : i32
    %c0_i32_1 = arith.constant 0 : i32
    return %c0_i32, %c0_i32_0 : i32, i32
  }
  func.func @transform_3(%arg0: i32, %arg1: i32) -> (i32, i32) {
    %c0_i32 = arith.constant 0 : i32
    %c0_i32_0 = arith.constant 0 : i32
    %c0_i32_1 = arith.constant 0 : i32
    return %c0_i32, %c0_i32_0 : i32, i32
  }
  func.func @transform_4(%arg0: i32, %arg1: i32) -> (i32, i32) {
    %c0_i32 = arith.constant 0 : i32
    %c0_i32_0 = arith.constant 0 : i32
    %c0_i32_1 = arith.constant 0 : i32
    return %c0_i32, %c0_i32_0 : i32, i32
  }
  func.func @transform_5(%arg0: i32, %arg1: i32) -> (i32, i32) {
    %c0_i32 = arith.constant 0 : i32
    %c0_i32_0 = arith.constant 0 : i32
    %c0_i32_1 = arith.constant 0 : i32
    return %c0_i32, %c0_i32_0 : i32, i32
  }
  func.func @transform_6(%arg0: i32, %arg1: i32) -> (i32, i32) {
    %c0_i32 = arith.constant 0 : i32
    %c0_i32_0 = arith.constant 0 : i32
    %c0_i32_1 = arith.constant 0 : i32
    return %c0_i32, %c0_i32_0 : i32, i32
  }
  func.func @transform_7(%arg0: i32, %arg1: i32) -> (i32, i32) {
    %c0_i32 = arith.constant 0 : i32
    %c0_i32_0 = arith.constant 0 : i32
    %c0_i32_1 = arith.constant 0 : i32
    return %c0_i32, %c0_i32_0 : i32, i32
  }
  func.func @transform_8(%arg0: i32, %arg1: i32) -> (i32, i32) {
    %c0_i32 = arith.constant 0 : i32
    %c0_i32_0 = arith.constant 0 : i32
    %c0_i32_1 = arith.constant 0 : i32
    return %c0_i32, %c0_i32_0 : i32, i32
  }
  func.func @transform_9(%arg0: i32, %arg1: i32) -> (i32, i32) {
    %c0_i32 = arith.constant 0 : i32
    %c0_i32_0 = arith.constant 0 : i32
    return %arg0, %c0_i32 : i32, i32
  }
}

</mosaic_0001>

<bundles_post_ra>
// kernel: tpu_custom_call.1
= control target key start
LH: loop header
LB: loop body
LE: loop exit
PB: predicated region body
PF: predicated region fallthrough
CT: control target
= control target key end

     0   :  { %14 = vsyncpa [#allocation8], 0  ;;  %s8970_s0 = inlined_call_operand.hbm [shape: f32[1,64,64], index: 0, kind: input, shape index: {}]   ;;  %s8971_s1 = inlined_call_operand.hbm [shape: f32[64,512], index: 1, kind: input, shape index: {}]   ;;  %s8972_s2 = inlined_call_operand.hbm [shape: f32[1,512], index: 2, kind: input, shape index: {}]   ;;  %s8973_s3 = inlined_call_operand.hbm [shape: f32[128,512], index: 3, kind: input, shape index: {}]   ;;  %s8974_s4 = inlined_call_operand.hbm [shape: f32[128,512], index: 4, kind: input, shape index: {}]   ;;  %s8975_s5 = inlined_call_operand.hbm [shape: f32[128,512], index: 5, kind: input, shape index: {}]   ;;  %s8976_s6 = inlined_call_operand.vmem [shape: f32[1,512], index: 6, kind: input, shape index: {}]   ;;  %s8977_s7 = inlined_call_operand.hbm [shape: f32[512,256], index: 7, kind: input, shape index: {}]   ;;  %s8978_s8 = inlined_call_operand.vmem [shape: f32[1,256], index: 8, kind: input, shape index: {}]   ;;  %s8979_s9 = inlined_call_operand.hbm [shape: f32[8,256], index: 9, kind: output, shape index: {}]  }
   0x1   :  { %15 = vsyncpa [#allocation11], 0 }
   0x2   :  { %16 = vsyncpa [#allocation14], 0 }
   0x3   :  { %17 = vsyncpa [#allocation17], 0  ;;  %s36_s11 = sshll.u32 %s8971_s1, 4  ;;  %s37_s11 = int_to_ptr.hbm [resolvable:$true] %s36_s11 }
   0x4   :  { %18 = vsyncpa [#allocation9], 0  ;;  %s5107_s12 = smov [#allocation10]   ;;  %s60_s16 = sshll.u32 %s8973_s3, 4  ;;  %s61_s16 = int_to_ptr.hbm [resolvable:$true] %s60_s16 }
   0x5   :  { %s38_s13 = sshll.u32 %s5107_s12, 4  ;;  %s5108_s17 = smov 512   ;;  %s39_s13 = int_to_ptr.vmem [resolvable:$true] %s38_s13 }
   0x6   :  { %s5109_s18 = smov 32   ;;  %s5110_s19 = smov [#allocation13]  }
   0x7   :  { %44 = dma.hbm_to_vmem [thread:$0]  %s37_s11, 4096, %s39_s13, [#allocation11], %s5108_s17, %s5108_s17, %s5109_s18  }
   0x8   :  { %s62_s20 = sshll.u32 %s5110_s19, 4  ;;  %s86_s22 = sshll.u32 %s8975_s5, 4  ;;  %s63_s20 = int_to_ptr.vmem [resolvable:$true] %s62_s20  ;;  %s87_s22 = int_to_ptr.hbm [resolvable:$true] %s86_s22 }
   0x9   :  { %68 = dma.hbm_to_vmem [thread:$0]  %s61_s16, 8192, %s63_s20, [#allocation14], %s5108_s17, %s5108_s17, %s5109_s18  }
   0xa   :  { %s23_s24 = sshll.u32 %s8970_s0, 4  ;;  %s5111_s25 = smov [#allocation16]   ;;  %s24_s24 = int_to_ptr.hbm [resolvable:$true] %s23_s24 }
   0xb   :  { %s88_s26 = sshll.u32 %s5111_s25, 4  ;;  %s5112_s27 = smov [#allocation7]   ;;  %s89_s26 = int_to_ptr.vmem [resolvable:$true] %s88_s26 }
   0xc   :  { %94 = dma.hbm_to_vmem [thread:$0]  %s87_s22, 8192, %s89_s26, [#allocation17], %s5108_s17, %s5108_s17, %s5109_s18  }
   0xd   :  { %s25_s5 = sshll.u32 %s5112_s27, 4  ;;  %s5113_s28 = smov 128   ;;  %s26_s5 = int_to_ptr.vmem [resolvable:$true] %s25_s5 }
   0xe   :  { %s5114_s29 = smov 8   ;;  %s50_s11 = sshll.u32 %s8972_s2, 4  ;;  %s51_s11 = int_to_ptr.hbm [resolvable:$true] %s50_s11 }
   0xf   :  { %31 = dma.hbm_to_vmem [thread:$0]  %s24_s24, 1024, %s26_s5, [#allocation8], %s5113_s28, %s5113_s28, %s5114_s29  }
  0x10   :  { %s5115_s0 = smov [#allocation12]   ;;  %s73_s15 = sshll.u32 %s8974_s4, 4  ;;  %s74_s15 = int_to_ptr.hbm [resolvable:$true] %s73_s15 }
  0x11   :  { %s52_s12 = sshll.u32 %s5115_s0, 4  ;;  %s5116_s16 = smov [#allocation15]   ;;  %s53_s12 = int_to_ptr.vmem [resolvable:$true] %s52_s12 }
  0x12   :  { %55 = dma.hbm_to_vmem [thread:$0]  %s51_s11, 64, %s53_s12, [#allocation11]  }
  0x13   :  { %s75_s19 = sshll.u32 %s5116_s16, 4  ;;  %s101_s1 = sshll.u32 %s8977_s7, 4  ;;  %s76_s19 = int_to_ptr.vmem [resolvable:$true] %s75_s19  ;;  %s102_s1 = int_to_ptr.hbm [resolvable:$true] %s101_s1 }
  0x14   :  { %81 = dma.hbm_to_vmem [thread:$0]  %s74_s15, 8192, %s76_s19, [#allocation14], %s5108_s17, %s5108_s17, %s5109_s18  }
  0x15   :  { %s5117_s2 = smov [#allocation18]   ;;  %s5118_s3 = smov 256  }
  0x16   :  { %s103_s22 = sshll.u32 %s5117_s2, 4  ;;  %s5119_s23 = smov 16   ;;  %s104_s22 = int_to_ptr.vmem [resolvable:$true] %s103_s22 }
  0x17   :  { %109 = dma.hbm_to_vmem [thread:$0]  %s102_s1, 16384, %s104_s22, [#allocation17], %s5118_s3, %s5118_s3, %s5119_s23  }
  0x18   :  { %5097 = dma.done.wait [#allocation8], 1024  }
  0x19   :  { %5098 = vsyncadd [#allocation8], 4294966272 }
  0x1a   :  { %5099 = dma.done.wait [#allocation11], 4160  }
  0x1b   :  { %5100 = vsyncadd [#allocation11], 4294963136 }
  0x1c   :  { %5101 = dma.done.wait [#allocation14], 16384  }
  0x1d   :  { %5102 = vsyncadd [#allocation14], 4294950912 }
  0x1e   :  { %5103 = dma.done.wait [#allocation17], 24576  }
  0x1f   :  { %5104 = vsyncadd [#allocation17], 4294942720  ;;  %v184_v0 = vld [vmem:[#allocation10 + $0xe0] sm:$0xff]  ;;  %v185_v1 = vld [vmem:[#allocation10 + $0xe8] sm:$0xff]  ;;  %vm198_vm0 = vcmask 523264   ;;  %s3961_s26 = sshll.u32 %s8979_s9, 4  ;;  %s3962_s26 = int_to_ptr.hbm [resolvable:$true] %s3961_s26 }
  0x20   :  { %v186_v2 = vld [vmem:[#allocation10 + $0xf0] sm:$0xff]  ;;  %231 = vmatpush.msra.mxu0 %v184_v0  ;;  %272 = vmatpush.msra.mxu1 %v185_v1  ;;  %v187_v3 = vld [vmem:[#allocation10 + $0xf8] sm:$0xff]  ;;  %v180_v4 = vld [vmem:[#allocation10 + $0xc0] sm:$0xff] }
  0x21   :  { %v181_v5 = vld [vmem:[#allocation10 + $0xc8] sm:$0xff]  ;;  %313 = vmatpush.msra.mxu2 %v186_v2  ;;  %354 = vmatpush.msra.mxu3 %v187_v3  ;;  %v182_v6 = vld [vmem:[#allocation10 + $0xd0] sm:$0xff]  ;;  %v183_v7 = vld [vmem:[#allocation10 + $0xd8] sm:$0xff] }
  0x22   :  { %v176_v8 = vld [vmem:[#allocation10 + $0xa0] sm:$0xff]  ;;  %232 = vmatpush.msra.mxu0 %v180_v4  ;;  %273 = vmatpush.msra.mxu1 %v181_v5  ;;  %v177_v9 = vld [vmem:[#allocation10 + $0xa8] sm:$0xff]  ;;  %v178_v10 = vld [vmem:[#allocation10 + $0xb0] sm:$0xff] }
  0x23   :  { %v179_v11 = vld [vmem:[#allocation10 + $0xb8] sm:$0xff]  ;;  %314 = vmatpush.msra.mxu2 %v182_v6  ;;  %355 = vmatpush.msra.mxu3 %v183_v7  ;;  %v172_v12 = vld [vmem:[#allocation10 + $0x80] sm:$0xff]  ;;  %v173_v13 = vld [vmem:[#allocation10 + $0x88] sm:$0xff] }
  0x24   :  { %233 = vmatpush.msra.mxu0 %v176_v8  ;;  %274 = vmatpush.msra.mxu1 %v177_v9  ;;  %v174_v14 = vld [vmem:[#allocation10 + $0x90] sm:$0xff]  ;;  %v175_v15 = vld [vmem:[#allocation10 + $0x98] sm:$0xff]  ;;  %v168_v16 = vld [vmem:[#allocation10 + $0x60] sm:$0xff] }
  0x25   :  { %315 = vmatpush.msra.mxu2 %v178_v10  ;;  %356 = vmatpush.msra.mxu3 %v179_v11  ;;  %v169_v17 = vld [vmem:[#allocation10 + $0x68] sm:$0xff]  ;;  %v170_v18 = vld [vmem:[#allocation10 + $0x70] sm:$0xff]  ;;  %v171_v19 = vld [vmem:[#allocation10 + $0x78] sm:$0xff] }
  0x26   :  { %234 = vmatpush.msra.mxu0 %v172_v12  ;;  %275 = vmatpush.msra.mxu1 %v173_v13  ;;  %v164_v20 = vld [vmem:[#allocation10 + $0x40] sm:$0xff]  ;;  %v165_v21 = vld [vmem:[#allocation10 + $0x48] sm:$0xff]  ;;  %v166_v22 = vld [vmem:[#allocation10 + $0x50] sm:$0xff] }
  0x27   :  { %316 = vmatpush.msra.mxu2 %v174_v14  ;;  %357 = vmatpush.msra.mxu3 %v175_v15  ;;  %v167_v23 = vld [vmem:[#allocation10 + $0x58] sm:$0xff]  ;;  %v160_v24 = vld [vmem:[#allocation10 + $0x20] sm:$0xff]  ;;  %v161_v25 = vld [vmem:[#allocation10 + $0x28] sm:$0xff] }
  0x28   :  { %235 = vmatpush.msra.mxu0 %v168_v16  ;;  %276 = vmatpush.msra.mxu1 %v169_v17  ;;  %v162_v26 = vld [vmem:[#allocation10 + $0x30] sm:$0xff]  ;;  %v163_v27 = vld [vmem:[#allocation10 + $0x38] sm:$0xff]  ;;  %v156_v28 = vld [vmem:[#allocation10] sm:$0xff] }
  0x29   :  { %317 = vmatpush.msra.mxu2 %v170_v18  ;;  %358 = vmatpush.msra.mxu3 %v171_v19  ;;  %v157_v29 = vld [vmem:[#allocation10 + $0x8] sm:$0xff]  ;;  %v158_v30 = vld [vmem:[#allocation10 + $0x10] sm:$0xff]  ;;  %v159_v31 = vld [vmem:[#allocation10 + $0x18] sm:$0xff] }
  0x2a   :  { %236 = vmatpush.msra.mxu0 %v164_v20  ;;  %277 = vmatpush.msra.mxu1 %v165_v21  ;;  %v148_v32 = vld [vmem:[#allocation7] sm:$0xff]  ;;  %v5207_v34 = vld [vmem:[#allocation13 + $0x1e8] sm:$0xff]  ;;  %v5211_v35 = vld [vmem:[#allocation13 + $0x1f0] sm:$0xff] }
  0x2b   :  { %318 = vmatpush.msra.mxu2 %v166_v22  ;;  %359 = vmatpush.msra.mxu3 %v167_v23  ;;  %v5205_v33 = vld [vmem:[#allocation13 + $0x1e0] sm:$0xff]  ;;  %v5213_v36 = vld [vmem:[#allocation13 + $0x1f8] sm:$0xff]  ;;  %v5219_v38 = vld [vmem:[#allocation13 + $0x1c8] sm:$0xff] }
  0x2c   :  { %237 = vmatpush.msra.mxu0 %v160_v24  ;;  %278 = vmatpush.msra.mxu1 %v161_v25  ;;  %v5217_v37 = vld [vmem:[#allocation13 + $0x1c0] sm:$0xff]  ;;  %v5223_v39 = vld [vmem:[#allocation13 + $0x1d0] sm:$0xff]  ;;  %v5225_v40 = vld [vmem:[#allocation13 + $0x1d8] sm:$0xff] }
  0x2d   :  { %319 = vmatpush.msra.mxu2 %v162_v26  ;;  %360 = vmatpush.msra.mxu3 %v163_v27  ;;  %v5228_v41 = vld [vmem:[#allocation13 + $0x1a0] sm:$0xff]  ;;  %v5230_v42 = vld [vmem:[#allocation13 + $0x1a8] sm:$0xff]  ;;  %v5235_v43 = vld [vmem:[#allocation13 + $0x1b0] sm:$0xff] }
  0x2e   :  { %238 = vmatpush.msra.mxu0 %v156_v28  ;;  %279 = vmatpush.msra.mxu1 %v157_v29  ;;  %v5237_v44 = vld [vmem:[#allocation13 + $0x1b8] sm:$0xff]  ;;  %v149_v45 = vld [vmem:[#allocation7 + $0x8] sm:$0xff]  ;;  %v5251_v48 = vld [vmem:[#allocation13 + $0x190] sm:$0xff] }
  0x2f   :  { %320 = vmatpush.msra.mxu2 %v158_v30  ;;  %361 = vmatpush.msra.mxu3 %v159_v31  ;;  %v5243_v46 = vld [vmem:[#allocation13 + $0x180] sm:$0xff]  ;;  %v5245_v47 = vld [vmem:[#allocation13 + $0x188] sm:$0xff]  ;;  %v5253_v49 = vld [vmem:[#allocation13 + $0x198] sm:$0xff] }
  0x30   :  { %3974 = vmatmul.msk.f32.vlgmr.msra.gmra.mxu0 %vm198_vm0, %v148_v32  ;;  %3982 = vmatmul.msk.f32.vlgmr.msra.gmra.mxu1 %vm198_vm0, %v148_v32  ;;  %v5257_v50 = vld [vmem:[#allocation13 + $0x160] sm:$0xff]  ;;  %v5259_v51 = vld [vmem:[#allocation13 + $0x168] sm:$0xff]  ;;  %v5263_v52 = vld [vmem:[#allocation13 + $0x170] sm:$0xff] }
  0x31   :  { %3990 = vmatmul.msk.f32.vlgmr.msra.gmra.mxu2 %vm198_vm0, %v148_v32  ;;  %3998 = vmatmul.msk.f32.vlgmr.msra.gmra.mxu3 %vm198_vm0, %v148_v32  ;;  %v5265_v53 = vld [vmem:[#allocation13 + $0x178] sm:$0xff]  ;;  %v5268_v54 = vld [vmem:[#allocation13 + $0x140] sm:$0xff]  ;;  %v5270_v55 = vld [vmem:[#allocation13 + $0x148] sm:$0xff] }
  0x32   :  { %501 = vmatpush.msrb.mxu0 %v5205_v33  ;;  %521 = vmatpush.msrb.mxu1 %v5207_v34  ;;  %v5275_v56 = vld [vmem:[#allocation13 + $0x150] sm:$0xff]  ;;  %v5277_v57 = vld [vmem:[#allocation13 + $0x158] sm:$0xff]  ;;  %v5283_v59 = vld [vmem:[#allocation13 + $0x120] sm:$0xff] }
  0x33   :  { %541 = vmatpush.msrb.mxu2 %v5211_v35  ;;  %561 = vmatpush.msrb.mxu3 %v5213_v36  ;;  %v150_v58 = vld [vmem:[#allocation7 + $0x10] sm:$0xff]  ;;  %v5293_v62 = vld [vmem:[#allocation13 + $0x138] sm:$0xff]  ;;  %v5297_v63 = vld [vmem:[#allocation13 + $0x100] sm:$0xff] }
  0x34   :  { %502 = vmatpush.msrb.mxu0 %v5217_v37  ;;  %522 = vmatpush.msrb.mxu1 %v5219_v38  ;;  %v5285_v60 = vld [vmem:[#allocation13 + $0x128] sm:$0xff]  ;;  %v5291_v61 = vld [vmem:[#allocation13 + $0x130] sm:$0xff]  ;;  %v5305_v2 = vld [vmem:[#allocation13 + $0x118] sm:$0xff] }
  0x35   :  { %542 = vmatpush.msrb.mxu2 %v5223_v39  ;;  %562 = vmatpush.msrb.mxu3 %v5225_v40  ;;  %v5299_v0 = vld [vmem:[#allocation13 + $0x108] sm:$0xff]  ;;  %v5303_v1 = vld [vmem:[#allocation13 + $0x110] sm:$0xff]  ;;  %v5308_v3 = vld [vmem:[#allocation13 + $0xe0] sm:$0xff] }
  0x36   :  { %503 = vmatpush.msrb.mxu0 %v5228_v41  ;;  %523 = vmatpush.msrb.mxu1 %v5230_v42  ;;  %v5310_v4 = vld [vmem:[#allocation13 + $0xe8] sm:$0xff]  ;;  %v5315_v5 = vld [vmem:[#allocation13 + $0xf0] sm:$0xff]  ;;  %v5317_v6 = vld [vmem:[#allocation13 + $0xf8] sm:$0xff] }
  0x37   :  { %543 = vmatpush.msrb.mxu2 %v5235_v43  ;;  %563 = vmatpush.msrb.mxu3 %v5237_v44  ;;  %v151_v7 = vld [vmem:[#allocation7 + $0x18] sm:$0xff]  ;;  %v5323_v8 = vld [vmem:[#allocation13 + $0xc0] sm:$0xff]  ;;  %v5325_v9 = vld [vmem:[#allocation13 + $0xc8] sm:$0xff] }
  0x38   :  { %3975 = vmatmul.msk.f32.gmra.mxu0 %vm198_vm0, %v149_v45  ;;  %3983 = vmatmul.msk.f32.gmra.mxu1 %vm198_vm0, %v149_v45  ;;  %v5331_v10 = vld [vmem:[#allocation13 + $0xd0] sm:$0xff]  ;;  %v5333_v11 = vld [vmem:[#allocation13 + $0xd8] sm:$0xff]  ;;  %v5337_v12 = vld [vmem:[#allocation13 + $0xa0] sm:$0xff] }
  0x39   :  { %3991 = vmatmul.msk.f32.gmra.mxu2 %vm198_vm0, %v149_v45  ;;  %3999 = vmatmul.msk.f32.gmra.mxu3 %vm198_vm0, %v149_v45  ;;  %v5339_v13 = vld [vmem:[#allocation13 + $0xa8] sm:$0xff]  ;;  %v5343_v14 = vld [vmem:[#allocation13 + $0xb0] sm:$0xff]  ;;  %v5345_v15 = vld [vmem:[#allocation13 + $0xb8] sm:$0xff] }
  0x3a   :  { %504 = vmatpush.msrb.mxu0 %v5243_v46  ;;  %524 = vmatpush.msrb.mxu1 %v5245_v47  ;;  %v5348_v16 = vld [vmem:[#allocation13 + $0x80] sm:$0xff]  ;;  %v5350_v17 = vld [vmem:[#allocation13 + $0x88] sm:$0xff]  ;;  %v5355_v18 = vld [vmem:[#allocation13 + $0x90] sm:$0xff] }
  0x3b   :  { %544 = vmatpush.msrb.mxu2 %v5251_v48  ;;  %564 = vmatpush.msrb.mxu3 %v5253_v49  ;;  %v5357_v19 = vld [vmem:[#allocation13 + $0x98] sm:$0xff]  ;;  %v5363_v21 = vld [vmem:[#allocation13 + $0x60] sm:$0xff]  ;;  %v5365_v22 = vld [vmem:[#allocation13 + $0x68] sm:$0xff] }
  0x3c   :  { %505 = vmatpush.msrb.mxu0 %v5257_v50  ;;  %525 = vmatpush.msrb.mxu1 %v5259_v51  ;;  %v152_v20 = vld [vmem:[#allocation7 + $0x20] sm:$0xff]  ;;  %9628 = vst [vmem:[#allocation25_spill] sm:$0xff] %v5363_v21  ;;  %v5371_v23 = vld [vmem:[#allocation13 + $0x70] sm:$0xff]  ;;  %v5379_v26 = vld [vmem:[#allocation13 + $0x48] sm:$0xff] }
  0x3d   :  { %545 = vmatpush.msrb.mxu2 %v5263_v52  ;;  %565 = vmatpush.msrb.mxu3 %v5265_v53  ;;  %9629 = vst [vmem:[#allocation26_spill] sm:$0xff] %v5365_v22  ;;  %v5373_v24 = vld [vmem:[#allocation13 + $0x78] sm:$0xff]  ;;  %v5377_v25 = vld [vmem:[#allocation13 + $0x40] sm:$0xff]  ;;  %v5383_v27 = vld [vmem:[#allocation13 + $0x50] sm:$0xff] }
  0x3e   :  { %506 = vmatpush.msrb.mxu0 %v5268_v54  ;;  %526 = vmatpush.msrb.mxu1 %v5270_v55  ;;  %9630 = vst [vmem:[#allocation27_spill] sm:$0xff] %v5371_v23  ;;  %v5385_v28 = vld [vmem:[#allocation13 + $0x58] sm:$0xff]  ;;  %v5388_v29 = vld [vmem:[#allocation13 + $0x20] sm:$0xff]  ;;  %v5390_v30 = vld [vmem:[#allocation13 + $0x28] sm:$0xff] }
  0x3f   :  { %546 = vmatpush.msrb.mxu2 %v5275_v56  ;;  %566 = vmatpush.msrb.mxu3 %v5277_v57  ;;  %9631 = vst [vmem:[#allocation28_spill] sm:$0xff] %v5373_v24  ;;  %v5395_v31 = vld [vmem:[#allocation13 + $0x30] sm:$0xff]  ;;  %v5397_v32 = vld [vmem:[#allocation13 + $0x38] sm:$0xff]  ;;  %v153_v45 = vld [vmem:[#allocation7 + $0x28] sm:$0xff] }
  0x40   :  { %3976 = vmatmul.msk.f32.gmra.mxu0 %vm198_vm0, %v150_v58  ;;  %3984 = vmatmul.msk.f32.gmra.mxu1 %vm198_vm0, %v150_v58  ;;  %9632 = vst [vmem:[#allocation29_spill] sm:$0xff] %v5377_v25 }
  0x41   :  { %3992 = vmatmul.msk.f32.gmra.mxu2 %vm198_vm0, %v150_v58  ;;  %4000 = vmatmul.msk.f32.gmra.mxu3 %vm198_vm0, %v150_v58  ;;  %9633 = vst [vmem:[#allocation30_spill] sm:$0xff] %v5379_v26  ;;  %v5403_v58 = vld [vmem:[#allocation13] sm:$0xff] }
  0x42   :  { %507 = vmatpush.msrb.mxu0 %v5283_v59  ;;  %527 = vmatpush.msrb.mxu1 %v5285_v60  ;;  %9634 = vst [vmem:[#allocation31_spill] sm:$0xff] %v5383_v27 }
  0x43   :  { %547 = vmatpush.msrb.mxu2 %v5291_v61  ;;  %567 = vmatpush.msrb.mxu3 %v5293_v62  ;;  %9635 = vst [vmem:[#allocation32_spill] sm:$0xff] %v5385_v28 }
  0x44   :  { %508 = vmatpush.msrb.mxu0 %v5297_v63  ;;  %528 = vmatpush.msrb.mxu1 %v5299_v0  ;;  %9636 = vst [vmem:[#allocation33_spill] sm:$0xff] %v5388_v29 }
  0x45   :  { %548 = vmatpush.msrb.mxu2 %v5303_v1  ;;  %568 = vmatpush.msrb.mxu3 %v5305_v2  ;;  %9637 = vst [vmem:[#allocation34_spill] sm:$0xff] %v5390_v30 }
  0x46   :  { %509 = vmatpush.msrb.mxu0 %v5308_v3  ;;  %529 = vmatpush.msrb.mxu1 %v5310_v4  ;;  %9638 = vst [vmem:[#allocation35_spill] sm:$0xff] %v5395_v31 }
  0x47   :  { %549 = vmatpush.msrb.mxu2 %v5315_v5  ;;  %569 = vmatpush.msrb.mxu3 %v5317_v6  ;;  %9639 = vst [vmem:[#allocation36_spill] sm:$0xff] %v5397_v32 }
  0x48   :  { %3977 = vmatmul.msk.f32.gmra.mxu0 %vm198_vm0, %v151_v7  ;;  %3985 = vmatmul.msk.f32.gmra.mxu1 %vm198_vm0, %v151_v7  ;;  %9640 = vst [vmem:[#allocation37_spill] sm:$0xff] %v5403_v58 }
  0x49   :  { %3993 = vmatmul.msk.f32.gmra.mxu2 %vm198_vm0, %v151_v7  ;;  %4001 = vmatmul.msk.f32.gmra.mxu3 %vm198_vm0, %v151_v7  ;;  %v5405_v7 = vld [vmem:[#allocation13 + $0x8] sm:$0xff] }
  0x4a   :  { %510 = vmatpush.msrb.mxu0 %v5323_v8  ;;  %530 = vmatpush.msrb.mxu1 %v5325_v9  ;;  %9641 = vst [vmem:[#allocation38_spill] sm:$0xff] %v5405_v7 }
  0x4b   :  { %550 = vmatpush.msrb.mxu2 %v5331_v10  ;;  %570 = vmatpush.msrb.mxu3 %v5333_v11 }
  0x4c   :  { %511 = vmatpush.msrb.mxu0 %v5337_v12  ;;  %531 = vmatpush.msrb.mxu1 %v5339_v13 }
  0x4d   :  { %551 = vmatpush.msrb.mxu2 %v5343_v14  ;;  %571 = vmatpush.msrb.mxu3 %v5345_v15 }
  0x4e   :  { %512 = vmatpush.msrb.mxu0 %v5348_v16  ;;  %532 = vmatpush.msrb.mxu1 %v5350_v17 }
  0x4f   :  { %552 = vmatpush.msrb.mxu2 %v5355_v18  ;;  %572 = vmatpush.msrb.mxu3 %v5357_v19 }
  0x50   :  { %3978 = vmatmul.msk.f32.gmra.mxu0 %vm198_vm0, %v152_v20  ;;  %3986 = vmatmul.msk.f32.gmra.mxu1 %vm198_vm0, %v152_v20 }
  0x51   :  { %3994 = vmatmul.msk.f32.gmra.mxu2 %vm198_vm0, %v152_v20  ;;  %4002 = vmatmul.msk.f32.gmra.mxu3 %vm198_vm0, %v152_v20  ;;  %v5411_v20 = vld [vmem:[#allocation13 + $0x10] sm:$0xff] }
  0x52   :  { %513 = vmatpush.msrb.mxu0 %v5363_v21  ;;  %533 = vmatpush.msrb.mxu1 %v5365_v22  ;;  %9642 = vst [vmem:[#allocation39_spill] sm:$0xff] %v5411_v20  ;;  %v5597_v22 = vld [vmem:[#allocation16 + $0x70] sm:$0xff]  ;;  %v5665_v21 = vld [vmem:[#allocation15 + $0x1c8] sm:$0xff] }
  0x53   :  { %553 = vmatpush.msrb.mxu2 %v5371_v23  ;;  %573 = vmatpush.msrb.mxu3 %v5373_v24  ;;  %v5541_v24 = vld [vmem:[#allocation16 + $0xf0] sm:$0xff]  ;;  %v5581_v23 = vld [vmem:[#allocation16 + $0x98] sm:$0xff]  ;;  %9698 = vst [vmem:[#allocation95_spill] sm:$0xff] %v5597_v22 }
  0x54   :  { %514 = vmatpush.msrb.mxu0 %v5377_v25  ;;  %534 = vmatpush.msrb.mxu1 %v5379_v26  ;;  %v5525_v25 = vld [vmem:[#allocation16 + $0x118] sm:$0xff]  ;;  %9678 = vst [vmem:[#allocation75_spill] sm:$0xff] %v5541_v24 }
  0x55   :  { %554 = vmatpush.msrb.mxu2 %v5383_v27  ;;  %574 = vmatpush.msrb.mxu3 %v5385_v28  ;;  %v5413_v27 = vld [vmem:[#allocation13 + $0x18] sm:$0xff]  ;;  %9675 = vst [vmem:[#allocation72_spill] sm:$0xff] %v5525_v25 }
  0x56   :  { %515 = vmatpush.msrb.mxu0 %v5388_v29  ;;  %535 = vmatpush.msrb.mxu1 %v5390_v30  ;;  %9643 = vst [vmem:[#allocation40_spill] sm:$0xff] %v5413_v27  ;;  %v5453_v30 = vld [vmem:[#allocation16 + $0x1d8] sm:$0xff]  ;;  %v5465_v29 = vld [vmem:[#allocation16 + $0x180] sm:$0xff] }
  0x57   :  { %555 = vmatpush.msrb.mxu2 %v5395_v31  ;;  %575 = vmatpush.msrb.mxu3 %v5397_v32  ;;  %v154_v32 = vld [vmem:[#allocation7 + $0x30] sm:$0xff]  ;;  %v155_v31 = vld [vmem:[#allocation7 + $0x38] sm:$0xff]  ;;  %9651 = vst [vmem:[#allocation48_spill] sm:$0xff] %v5453_v30 }
  0x58   :  { %3979 = vmatmul.msk.f32.gmra.mxu0 %vm198_vm0, %v153_v45  ;;  %3987 = vmatmul.msk.f32.gmra.mxu1 %vm198_vm0, %v153_v45  ;;  %9656 = vst [vmem:[#allocation53_spill] sm:$0xff] %v5465_v29  ;;  %v5473_v28 = vld [vmem:[#allocation16 + $0x198] sm:$0xff] }
  0x59   :  { %3995 = vmatmul.msk.f32.gmra.mxu2 %vm198_vm0, %v153_v45  ;;  %4003 = vmatmul.msk.f32.gmra.mxu3 %vm198_vm0, %v153_v45  ;;  %v8987_v45 = vmov 0.0   ;;  %9659 = vst [vmem:[#allocation56_spill] sm:$0xff] %v5473_v28 }
  0x5a   :  { %516 = vmatpush.msrb.mxu0 %v5403_v58  ;;  %536 = vmatpush.msrb.mxu1 %v5405_v7  ;;  %v5445_v7 = vld [vmem:[#allocation16 + $0x1c0] sm:$0xff]  ;;  %v5447_v58 = vld [vmem:[#allocation16 + $0x1c8] sm:$0xff]  ;;  %9693 = vst [vmem:[#allocation90_spill] sm:$0xff] %v5581_v23 }
  0x5b   :  { %556 = vmatpush.msrb.mxu2 %v5411_v20  ;;  %576 = vmatpush.msrb.mxu3 %v5413_v27  ;;  %v5433_v27 = vld [vmem:[#allocation16 + $0x1e0] sm:$0xff]  ;;  %v5437_v20 = vld [vmem:[#allocation16 + $0x1f0] sm:$0xff]  ;;  %9648 = vst [vmem:[#allocation45_spill] sm:$0xff] %v5445_v7 }
  0x5c   :  { %9644 = vst [vmem:[#allocation41_spill] sm:$0xff] %v5433_v27  ;;  %776 = vmatpush.msra.mxu0 %v5433_v27  ;;  %v5455_v27 = vld [vmem:[#allocation16 + $0x1a0] sm:$0xff] }
  0x5d   :  { %9646 = vst [vmem:[#allocation43_spill] sm:$0xff] %v5437_v20  ;;  %816 = vmatpush.msra.mxu2 %v5437_v20  ;;  %v5463_v20 = vld [vmem:[#allocation16 + $0x1b8] sm:$0xff] }
  0x5e   :  { %9649 = vst [vmem:[#allocation46_spill] sm:$0xff] %v5447_v58  ;;  %777 = vmatpush.msra.mxu0 %v5445_v7  ;;  %v5471_v7 = vld [vmem:[#allocation16 + $0x190] sm:$0xff] }
  0x5f   :  { %9652 = vst [vmem:[#allocation49_spill] sm:$0xff] %v5455_v27 }
  0x60   :  { %3980 = vmatmul.msk.f32.gmra.mxu0 %vm198_vm0, %v154_v32  ;;  %3988 = vmatmul.msk.f32.gmra.mxu1 %vm198_vm0, %v154_v32  ;;  %9655 = vst [vmem:[#allocation52_spill] sm:$0xff] %v5463_v20 }
  0x61   :  { %3996 = vmatmul.msk.f32.gmra.mxu2 %vm198_vm0, %v154_v32  ;;  %4004 = vmatmul.msk.f32.gmra.mxu3 %vm198_vm0, %v154_v32  ;;  %v5435_v32 = vld [vmem:[#allocation16 + $0x1e8] sm:$0xff]  ;;  %9658 = vst [vmem:[#allocation55_spill] sm:$0xff] %v5471_v7 }
  0x62   :  { %9645 = vst [vmem:[#allocation42_spill] sm:$0xff] %v5435_v32  ;;  %796 = vmatpush.msra.mxu1 %v5435_v32  ;;  %v5457_v32 = vld [vmem:[#allocation16 + $0x1a8] sm:$0xff]  ;;  %778 = vmatpush.msra.mxu0 %v5455_v27  ;;  %v5481_v27 = vld [vmem:[#allocation16 + $0x160] sm:$0xff] }
  0x63   :  { %9653 = vst [vmem:[#allocation50_spill] sm:$0xff] %v5457_v32 }
  0x64   :  { %797 = vmatpush.msra.mxu1 %v5447_v58  ;;  %v5469_v58 = vld [vmem:[#allocation16 + $0x188] sm:$0xff]  ;;  %779 = vmatpush.msra.mxu0 %v5465_v29  ;;  %9660 = vst [vmem:[#allocation57_spill] sm:$0xff] %v5481_v27  ;;  %v5493_v29 = vld [vmem:[#allocation16 + $0x178] sm:$0xff] }
  0x65   :  { %9657 = vst [vmem:[#allocation54_spill] sm:$0xff] %v5469_v58 }
  0x66   :  { %798 = vmatpush.msra.mxu1 %v5457_v32  ;;  %v5483_v32 = vld [vmem:[#allocation16 + $0x168] sm:$0xff]  ;;  %780 = vmatpush.msra.mxu0 %v5481_v27  ;;  %9663 = vst [vmem:[#allocation60_spill] sm:$0xff] %v5493_v29  ;;  %v5507_v27 = vld [vmem:[#allocation16 + $0x120] sm:$0xff] }
  0x67   :  { %9661 = vst [vmem:[#allocation58_spill] sm:$0xff] %v5483_v32 }
  0x68   :  { %3981 = vmatmul.msk.f32.gmra.mxu0 %vm198_vm0, %v155_v31  ;;  %3989 = vmatmul.msk.f32.gmra.mxu1 %vm198_vm0, %v155_v31  ;;  %9668 = vst [vmem:[#allocation65_spill] sm:$0xff] %v5507_v27 }
  0x69   :  { %3997 = vmatmul.msk.f32.gmra.mxu2 %vm198_vm0, %v155_v31  ;;  %4005 = vmatmul.msk.f32.gmra.mxu3 %vm198_vm0, %v155_v31  ;;  %v5441_v31 = vld [vmem:[#allocation16 + $0x1f8] sm:$0xff]  ;;  %9723 = vst [vmem:[#allocation120_spill] sm:$0xff] %v5665_v21 }
  0x6a   :  { %9647 = vst [vmem:[#allocation44_spill] sm:$0xff] %v5441_v31  ;;  %836 = vmatpush.msra.mxu3 %v5441_v31  ;;  %v5461_v31 = vld [vmem:[#allocation16 + $0x1b0] sm:$0xff]  ;;  %799 = vmatpush.msra.mxu1 %v5469_v58 }
  0x6b   :  { %9654 = vst [vmem:[#allocation51_spill] sm:$0xff] %v5461_v31  ;;  %v5501_v58 = vld [vmem:[#allocation16 + $0x150] sm:$0xff] }
  0x6c   :  { %837 = vmatpush.msra.mxu3 %v5453_v30  ;;  %v5485_v30 = vld [vmem:[#allocation16 + $0x170] sm:$0xff]  ;;  %800 = vmatpush.msra.mxu1 %v5483_v32  ;;  %9666 = vst [vmem:[#allocation63_spill] sm:$0xff] %v5501_v58  ;;  %v5509_v32 = vld [vmem:[#allocation16 + $0x128] sm:$0xff] }
  0x6d   :  { %9662 = vst [vmem:[#allocation59_spill] sm:$0xff] %v5485_v30 }
  0x6e   :  { %838 = vmatpush.msra.mxu3 %v5463_v20  ;;  %v5505_v20 = vld [vmem:[#allocation16 + $0x158] sm:$0xff]  ;;  %9669 = vst [vmem:[#allocation66_spill] sm:$0xff] %v5509_v32 }
  0x6f   :  { %9667 = vst [vmem:[#allocation64_spill] sm:$0xff] %v5505_v20 }
  0x70   :  { %517 = vmatmul.f32.vlgmr.msrb.gmra.mxu0 %v8987_v45  ;;  %537 = vmatmul.f32.vlgmr.msrb.gmra.mxu1 %v8987_v45 }
  0x71   :  { %557 = vmatmul.f32.vlgmr.msrb.gmra.mxu2 %v8987_v45  ;;  %577 = vmatmul.f32.vlgmr.msrb.gmra.mxu3 %v8987_v45  ;;  %v5449_v45 = vld [vmem:[#allocation16 + $0x1d0] sm:$0xff] }
  0x72   :  { %9650 = vst [vmem:[#allocation47_spill] sm:$0xff] %v5449_v45  ;;  %817 = vmatpush.msra.mxu2 %v5449_v45  ;;  %839 = vmatpush.msra.mxu3 %v5473_v28  ;;  %v5497_v28 = vld [vmem:[#allocation16 + $0x140] sm:$0xff] }
  0x73   :  { %9664 = vst [vmem:[#allocation61_spill] sm:$0xff] %v5497_v28  ;;  %781 = vmatpush.msra.mxu0 %v5497_v28  ;;  %v5523_v28 = vld [vmem:[#allocation16 + $0x110] sm:$0xff] }
  0x74   :  { %818 = vmatpush.msra.mxu2 %v5461_v31  ;;  %840 = vmatpush.msra.mxu3 %v5493_v29  ;;  %v5513_v29 = vld [vmem:[#allocation16 + $0x130] sm:$0xff]  ;;  %v5517_v31 = vld [vmem:[#allocation16 + $0x100] sm:$0xff]  ;;  %9674 = vst [vmem:[#allocation71_spill] sm:$0xff] %v5523_v28 }
  0x75   :  { %9670 = vst [vmem:[#allocation67_spill] sm:$0xff] %v5513_v29  ;;  %782 = vmatpush.msra.mxu0 %v5507_v27  ;;  %v5539_v27 = vld [vmem:[#allocation16 + $0xe8] sm:$0xff] }
  0x76   :  { %819 = vmatpush.msra.mxu2 %v5471_v7  ;;  %v5499_v7 = vld [vmem:[#allocation16 + $0x148] sm:$0xff]  ;;  %841 = vmatpush.msra.mxu3 %v5505_v20  ;;  %9672 = vst [vmem:[#allocation69_spill] sm:$0xff] %v5517_v31 }
  0x77   :  { %9665 = vst [vmem:[#allocation62_spill] sm:$0xff] %v5499_v7  ;;  %801 = vmatpush.msra.mxu1 %v5499_v7  ;;  %v5521_v7 = vld [vmem:[#allocation16 + $0x108] sm:$0xff]  ;;  %783 = vmatpush.msra.mxu0 %v5517_v31  ;;  %v5557_v31 = vld [vmem:[#allocation16 + $0xd0] sm:$0xff] }
  0x78   :  { %820 = vmatpush.msra.mxu2 %v5485_v30  ;;  %v5515_v30 = vld [vmem:[#allocation16 + $0x138] sm:$0xff]  ;;  %9673 = vst [vmem:[#allocation70_spill] sm:$0xff] %v5521_v7 }
  0x79   :  { %9671 = vst [vmem:[#allocation68_spill] sm:$0xff] %v5515_v30  ;;  %802 = vmatpush.msra.mxu1 %v5509_v32  ;;  %842 = vmatpush.msra.mxu3 %v5515_v30  ;;  %v5537_v32 = vld [vmem:[#allocation16 + $0xe0] sm:$0xff] }
  0x7a   :  { %821 = vmatpush.msra.mxu2 %v5501_v58  ;;  %9676 = vst [vmem:[#allocation73_spill] sm:$0xff] %v5537_v32  ;;  %784 = vmatpush.msra.mxu0 %v5537_v32  ;;  %v5573_v32 = vld [vmem:[#allocation16 + $0x80] sm:$0xff] }
  0x7b   :  { %803 = vmatpush.msra.mxu1 %v5521_v7  ;;  %843 = vmatpush.msra.mxu3 %v5525_v25  ;;  %9677 = vst [vmem:[#allocation74_spill] sm:$0xff] %v5539_v27  ;;  %v5549_v7 = vld [vmem:[#allocation16 + $0xf8] sm:$0xff]  ;;  %v5553_v25 = vld [vmem:[#allocation16 + $0xc0] sm:$0xff] }
  0x7c   :  { %822 = vmatpush.msra.mxu2 %v5513_v29  ;;  %9681 = vst [vmem:[#allocation78_spill] sm:$0xff] %v5549_v7  ;;  %785 = vmatpush.msra.mxu0 %v5553_v25 }
  0x7d   :  { %804 = vmatpush.msra.mxu1 %v5539_v27  ;;  %844 = vmatpush.msra.mxu3 %v5549_v7  ;;  %9682 = vst [vmem:[#allocation79_spill] sm:$0xff] %v5553_v25  ;;  %v5565_v27 = vld [vmem:[#allocation16 + $0xa8] sm:$0xff]  ;;  %v5569_v7 = vld [vmem:[#allocation16 + $0xb0] sm:$0xff] }
  0x7e   :  { %823 = vmatpush.msra.mxu2 %v5523_v28  ;;  %v5555_v28 = vld [vmem:[#allocation16 + $0xc8] sm:$0xff]  ;;  %9684 = vst [vmem:[#allocation81_spill] sm:$0xff] %v5557_v31  ;;  %v5579_v25 = vld [vmem:[#allocation16 + $0x90] sm:$0xff] }
  0x7f   :  { %9683 = vst [vmem:[#allocation80_spill] sm:$0xff] %v5555_v28  ;;  %805 = vmatpush.msra.mxu1 %v5555_v28  ;;  %v5577_v28 = vld [vmem:[#allocation16 + $0x88] sm:$0xff] }
  0x80   :  { %824 = vmatpush.msra.mxu2 %v5541_v24  ;;  %9687 = vst [vmem:[#allocation84_spill] sm:$0xff] %v5565_v27  ;;  %v5571_v24 = vld [vmem:[#allocation16 + $0xb8] sm:$0xff] }
  0x81   :  { %9688 = vst [vmem:[#allocation85_spill] sm:$0xff] %v5569_v7  ;;  %806 = vmatpush.msra.mxu1 %v5565_v27  ;;  %v5593_v27 = vld [vmem:[#allocation16 + $0x60] sm:$0xff] }
  0x82   :  { %825 = vmatpush.msra.mxu2 %v5557_v31  ;;  %9689 = vst [vmem:[#allocation86_spill] sm:$0xff] %v5571_v24 }
  0x83   :  { %9690 = vst [vmem:[#allocation87_spill] sm:$0xff] %v5573_v32  ;;  %807 = vmatpush.msra.mxu1 %v5577_v28 }
  0x84   :  { %9691 = vst [vmem:[#allocation88_spill] sm:$0xff] %v5577_v28  ;;  %826 = vmatpush.msra.mxu2 %v5569_v7  ;;  %v5637_v28 = vld [vmem:[#allocation16 + $0x18] sm:$0xff] }
  0x85   :  { %9692 = vst [vmem:[#allocation89_spill] sm:$0xff] %v5579_v25 }
  0x86   :  { %827 = vmatpush.msra.mxu2 %v5579_v25  ;;  %9696 = vst [vmem:[#allocation93_spill] sm:$0xff] %v5593_v27  ;;  %v5613_v25 = vld [vmem:[#allocation16 + $0x50] sm:$0xff] }
  0x87   :  { %9704 = vst [vmem:[#allocation101_spill] sm:$0xff] %v5613_v25 }
  0x88   :  { %828 = vmatpush.msra.mxu2 %v5597_v22  ;;  %v5627_v22 = vld [vmem:[#allocation16 + $0x38] sm:$0xff]  ;;  %9713 = vst [vmem:[#allocation110_spill] sm:$0xff] %v5637_v28 }
  0x89   :  { %9709 = vst [vmem:[#allocation106_spill] sm:$0xff] %v5627_v22 }
  0x8a   :  { %829 = vmatpush.msra.mxu2 %v5613_v25  ;;  %v5645_v25 = vld [vmem:[#allocation15 + $0x1e8] sm:$0xff] }
  0x8b   :  { %9715 = vst [vmem:[#allocation112_spill] sm:$0xff] %v5645_v25 }
  0xad   :  { %v5487_v45 = vpop.f32.mrf.mxu0  ;;  %v5489_v26 = vpop.f32.mrf.mxu1 }
  0xb4   :  { %v5531_v20 = vpop.f32.mrf.mxu2  ;;  %v5533_v58 = vpop.f32.mrf.mxu3 }
  0xb5   :  { %v5543_v29 = vpop.f32.mrf.mxu0  ;;  %v5545_v30 = vpop.f32.mrf.mxu1 }
  0xb6   :  { %9679 = vst [vmem:[#allocation76_spill] sm:$0xff] %v5543_v29  ;;  %v5563_v29 = vld [vmem:[#allocation16 + $0xa0] sm:$0xff] }
  0xb7   :  { %9680 = vst [vmem:[#allocation77_spill] sm:$0xff] %v5545_v30  ;;  %v5561_v30 = vld [vmem:[#allocation16 + $0xd8] sm:$0xff]  ;;  %786 = vmatpush.msra.mxu0 %v5563_v29 }
  0xb8   :  { %9685 = vst [vmem:[#allocation82_spill] sm:$0xff] %v5561_v30  ;;  %845 = vmatpush.msra.mxu3 %v5561_v30 }
  0xb9   :  { %9686 = vst [vmem:[#allocation83_spill] sm:$0xff] %v5563_v29  ;;  %787 = vmatpush.msra.mxu0 %v5573_v32  ;;  %v5595_v29 = vld [vmem:[#allocation16 + $0x68] sm:$0xff] }
  0xba   :  { %846 = vmatpush.msra.mxu3 %v5571_v24  ;;  %9697 = vst [vmem:[#allocation94_spill] sm:$0xff] %v5595_v29  ;;  %808 = vmatpush.msra.mxu1 %v5595_v29  ;;  %v5621_v29 = vld [vmem:[#allocation16 + $0x28] sm:$0xff] }
  0xbb   :  { %788 = vmatpush.msra.mxu0 %v5593_v27  ;;  %9707 = vst [vmem:[#allocation104_spill] sm:$0xff] %v5621_v29  ;;  %v5629_v27 = vld [vmem:[#allocation16] sm:$0xff] }
  0xbc   :  { %v5587_v30 = vpop.f32.mrf.mxu2  ;;  %v5589_v31 = vpop.f32.mrf.mxu3  ;;  %847 = vmatpush.msra.mxu3 %v5581_v23  ;;  %v5611_v23 = vld [vmem:[#allocation16 + $0x48] sm:$0xff]  ;;  %9710 = vst [vmem:[#allocation107_spill] sm:$0xff] %v5629_v27 }
  0xbd   :  { %9694 = vst [vmem:[#allocation91_spill] sm:$0xff] %v5587_v30  ;;  %v5599_v7 = vpop.f32.mrf.mxu0  ;;  %v5601_v24 = vpop.f32.mrf.mxu1  ;;  %v5605_v30 = vld [vmem:[#allocation16 + $0x78] sm:$0xff]  ;;  %809 = vmatpush.msra.mxu1 %v5611_v23 }
  0xbe   :  { %9695 = vst [vmem:[#allocation92_spill] sm:$0xff] %v5589_v31  ;;  %848 = vmatpush.msra.mxu3 %v5605_v30  ;;  %v5609_v31 = vld [vmem:[#allocation16 + $0x40] sm:$0xff] }
  0xbf   :  { %9699 = vst [vmem:[#allocation96_spill] sm:$0xff] %v5599_v7  ;;  %789 = vmatpush.msra.mxu0 %v5609_v31  ;;  %v5619_v7 = vld [vmem:[#allocation16 + $0x20] sm:$0xff]  ;;  %810 = vmatpush.msra.mxu1 %v5621_v29 }
  0xc0   :  { %9700 = vst [vmem:[#allocation97_spill] sm:$0xff] %v5601_v24  ;;  %v5617_v24 = vld [vmem:[#allocation16 + $0x58] sm:$0xff] }
  0xc1   :  { %9701 = vst [vmem:[#allocation98_spill] sm:$0xff] %v5605_v30  ;;  %849 = vmatpush.msra.mxu3 %v5617_v24  ;;  %v5625_v30 = vld [vmem:[#allocation16 + $0x30] sm:$0xff]  ;;  %790 = vmatpush.msra.mxu0 %v5619_v7 }
  0xc2   :  { %9702 = vst [vmem:[#allocation99_spill] sm:$0xff] %v5609_v31  ;;  %v5635_v31 = vld [vmem:[#allocation16 + $0x10] sm:$0xff]  ;;  %830 = vmatpush.msra.mxu2 %v5625_v30 }
  0xc3   :  { %9703 = vst [vmem:[#allocation100_spill] sm:$0xff] %v5611_v23  ;;  %v5633_v23 = vld [vmem:[#allocation16 + $0x8] sm:$0xff]  ;;  %850 = vmatpush.msra.mxu3 %v5627_v22  ;;  %791 = vmatpush.msra.mxu0 %v5629_v27 }
  0xc4   :  { %9705 = vst [vmem:[#allocation102_spill] sm:$0xff] %v5617_v24  ;;  %811 = vmatpush.msra.mxu1 %v5633_v23  ;;  %v5643_v24 = vld [vmem:[#allocation15 + $0x1e0] sm:$0xff]  ;;  %v5649_v29 = vpop.f32.mrf.mxu2  ;;  %v5651_v32 = vpop.f32.mrf.mxu3  ;;  %831 = vmatpush.msra.mxu2 %v5635_v31 }
  0xc5   :  { %9706 = vst [vmem:[#allocation103_spill] sm:$0xff] %v5619_v7  ;;  %v5647_v7 = vld [vmem:[#allocation15 + $0x1f0] sm:$0xff]  ;;  %851 = vmatpush.msra.mxu3 %v5637_v28  ;;  %v5657_v22 = vpop.f32.mrf.mxu0  ;;  %v5659_v27 = vpop.f32.mrf.mxu1  ;;  %856 = vmatpush.msrb.mxu0 %v5643_v24  ;;  %v5673_v28 = vld [vmem:[#allocation15 + $0x1a0] sm:$0xff] }
  0xc6   :  { %9708 = vst [vmem:[#allocation105_spill] sm:$0xff] %v5625_v30  ;;  %v5655_v30 = vld [vmem:[#allocation15 + $0x1f8] sm:$0xff]  ;;  %876 = vmatpush.msrb.mxu1 %v5645_v25  ;;  %896 = vmatpush.msrb.mxu2 %v5647_v7 }
  0xc7   :  { %9711 = vst [vmem:[#allocation108_spill] sm:$0xff] %v5633_v23  ;;  %v5663_v23 = vld [vmem:[#allocation15 + $0x1c0] sm:$0xff]  ;;  %916 = vmatpush.msrb.mxu3 %v5655_v30  ;;  %v5681_v25 = vld [vmem:[#allocation15 + $0x1b8] sm:$0xff] }
  0xc8   :  { %9712 = vst [vmem:[#allocation109_spill] sm:$0xff] %v5635_v31  ;;  %857 = vmatpush.msrb.mxu0 %v5663_v23  ;;  %877 = vmatpush.msrb.mxu1 %v5665_v21  ;;  %v5703_v21 = vld [vmem:[#allocation15 + $0x170] sm:$0xff]  ;;  %v5721_v31 = vld [vmem:[#allocation15 + $0x148] sm:$0xff] }
  0xc9   :  { %9714 = vst [vmem:[#allocation111_spill] sm:$0xff] %v5643_v24  ;;  %v5691_v24 = vld [vmem:[#allocation15 + $0x190] sm:$0xff] }
  0xca   :  { %9716 = vst [vmem:[#allocation113_spill] sm:$0xff] %v5647_v7  ;;  %v5685_v7 = vld [vmem:[#allocation15 + $0x180] sm:$0xff]  ;;  %858 = vmatpush.msrb.mxu0 %v5673_v28 }
  0xcb   :  { %9717 = vst [vmem:[#allocation114_spill] sm:$0xff] %v5649_v29  ;;  %v5667_v29 = vld [vmem:[#allocation15 + $0x1d0] sm:$0xff] }
  0xcc   :  { %9718 = vst [vmem:[#allocation115_spill] sm:$0xff] %v5651_v32  ;;  %v5671_v32 = vld [vmem:[#allocation15 + $0x1d8] sm:$0xff]  ;;  %897 = vmatpush.msrb.mxu2 %v5667_v29  ;;  %859 = vmatpush.msrb.mxu0 %v5685_v7 }
  0xcd   :  { %9719 = vst [vmem:[#allocation116_spill] sm:$0xff] %v5655_v30  ;;  %917 = vmatpush.msrb.mxu3 %v5671_v32  ;;  %v5687_v30 = vld [vmem:[#allocation15 + $0x188] sm:$0xff] }
  0xce   :  { %9720 = vst [vmem:[#allocation117_spill] sm:$0xff] %v5657_v22  ;;  %v5675_v22 = vld [vmem:[#allocation15 + $0x1a8] sm:$0xff] }
  0xcf   :  { %9721 = vst [vmem:[#allocation118_spill] sm:$0xff] %v5659_v27  ;;  %v5679_v27 = vld [vmem:[#allocation15 + $0x1b0] sm:$0xff]  ;;  %878 = vmatpush.msrb.mxu1 %v5675_v22  ;;  %918 = vmatpush.msrb.mxu3 %v5681_v25 }
  0xd0   :  { %9722 = vst [vmem:[#allocation119_spill] sm:$0xff] %v5663_v23  ;;  %v5693_v23 = vld [vmem:[#allocation15 + $0x198] sm:$0xff]  ;;  %898 = vmatpush.msrb.mxu2 %v5679_v27 }
  0xd1   :  { %9724 = vst [vmem:[#allocation121_spill] sm:$0xff] %v5667_v29  ;;  %879 = vmatpush.msrb.mxu1 %v5687_v30  ;;  %v5701_v29 = vld [vmem:[#allocation15 + $0x168] sm:$0xff]  ;;  %919 = vmatpush.msrb.mxu3 %v5693_v23 }
  0xd2   :  { %9725 = vst [vmem:[#allocation122_spill] sm:$0xff] %v5671_v32  ;;  %v5699_v32 = vld [vmem:[#allocation15 + $0x160] sm:$0xff]  ;;  %899 = vmatpush.msrb.mxu2 %v5691_v24 }
  0xd3   :  { %9726 = vst [vmem:[#allocation123_spill] sm:$0xff] %v5673_v28  ;;  %v5705_v28 = vpop.f32.mrf.mxu2  ;;  %860 = vmatpush.msrb.mxu0 %v5699_v32  ;;  %880 = vmatpush.msrb.mxu1 %v5701_v29 }
  0xd4   :  { %9727 = vst [vmem:[#allocation124_spill] sm:$0xff] %v5675_v22  ;;  %v5707_v22 = vpop.f32.mrf.mxu3  ;;  %900 = vmatpush.msrb.mxu2 %v5703_v21 }
  0xd5   :  { %9728 = vst [vmem:[#allocation125_spill] sm:$0xff] %v5679_v27  ;;  %v5711_v27 = vld [vmem:[#allocation15 + $0x178] sm:$0xff]  ;;  %881 = vmatpush.msrb.mxu1 %v5721_v31 }
  0xd6   :  { %9729 = vst [vmem:[#allocation126_spill] sm:$0xff] %v5681_v25  ;;  %v5713_v25 = vpop.f32.mrf.mxu0  ;;  %920 = vmatpush.msrb.mxu3 %v5711_v27 }
  0xd7   :  { %9730 = vst [vmem:[#allocation127_spill] sm:$0xff] %v5685_v7  ;;  %v5715_v7 = vpop.f32.mrf.mxu1 }
  0xd8   :  { %9731 = vst [vmem:[#allocation128_spill] sm:$0xff] %v5687_v30  ;;  %v5719_v30 = vld [vmem:[#allocation15 + $0x140] sm:$0xff] }
  0xd9   :  { %9732 = vst [vmem:[#allocation129_spill] sm:$0xff] %v5699_v32  ;;  %861 = vmatpush.msrb.mxu0 %v5719_v30  ;;  %v5739_v32 = vld [vmem:[#allocation15 + $0x138] sm:$0xff] }
  0xda   :  { %9733 = vst [vmem:[#allocation130_spill] sm:$0xff] %v5701_v29  ;;  %v5735_v29 = vld [vmem:[#allocation15 + $0x130] sm:$0xff] }
  0xdb   :  { %9734 = vst [vmem:[#allocation131_spill] sm:$0xff] %v5703_v21  ;;  %v5751_v21 = vld [vmem:[#allocation15 + $0x118] sm:$0xff] }
  0xdc   :  { %9735 = vst [vmem:[#allocation132_spill] sm:$0xff] %v5705_v28  ;;  %v5723_v28 = vld [vmem:[#allocation15 + $0x150] sm:$0xff] }
  0xdd   :  { %9736 = vst [vmem:[#allocation133_spill] sm:$0xff] %v5707_v22  ;;  %v5727_v22 = vld [vmem:[#allocation15 + $0x158] sm:$0xff]  ;;  %901 = vmatpush.msrb.mxu2 %v5723_v28 }
  0xde   :  { %9737 = vst [vmem:[#allocation134_spill] sm:$0xff] %v5711_v27  ;;  %921 = vmatpush.msrb.mxu3 %v5727_v22  ;;  %v5743_v27 = vld [vmem:[#allocation15 + $0x100] sm:$0xff] }
  0xdf   :  { %9738 = vst [vmem:[#allocation135_spill] sm:$0xff] %v5713_v25  ;;  %v5733_v25 = vld [vmem:[#allocation15 + $0x128] sm:$0xff]  ;;  %902 = vmatpush.msrb.mxu2 %v5735_v29 }
  0xe0   :  { %9739 = vst [vmem:[#allocation136_spill] sm:$0xff] %v5715_v7  ;;  %v5731_v7 = vld [vmem:[#allocation15 + $0x120] sm:$0xff]  ;;  %882 = vmatpush.msrb.mxu1 %v5733_v25  ;;  %922 = vmatpush.msrb.mxu3 %v5739_v32 }
  0xe1   :  { %9740 = vst [vmem:[#allocation137_spill] sm:$0xff] %v5719_v30  ;;  %862 = vmatpush.msrb.mxu0 %v5731_v7  ;;  %v5745_v30 = vld [vmem:[#allocation15 + $0x108] sm:$0xff] }
  0xe2   :  { %9741 = vst [vmem:[#allocation138_spill] sm:$0xff] %v5721_v31  ;;  %v5747_v31 = vld [vmem:[#allocation15 + $0x110] sm:$0xff]  ;;  %883 = vmatpush.msrb.mxu1 %v5745_v30  ;;  %923 = vmatpush.msrb.mxu3 %v5751_v21 }
  0xe3   :  { %9742 = vst [vmem:[#allocation139_spill] sm:$0xff] %v5723_v28  ;;  %863 = vmatpush.msrb.mxu0 %v5743_v27  ;;  %903 = vmatpush.msrb.mxu2 %v5747_v31  ;;  %v5763_v28 = vld [vmem:[#allocation15 + $0xf0] sm:$0xff] }
  0xe4   :  { %9743 = vst [vmem:[#allocation140_spill] sm:$0xff] %v5727_v22  ;;  %v5755_v22 = vpop.f32.mrf.mxu2 }
  0xe5   :  { %9744 = vst [vmem:[#allocation141_spill] sm:$0xff] %v5731_v7  ;;  %v5761_v7 = vld [vmem:[#allocation15 + $0xe8] sm:$0xff]  ;;  %904 = vmatpush.msrb.mxu2 %v5763_v28 }
  0xe6   :  { %9745 = vst [vmem:[#allocation142_spill] sm:$0xff] %v5733_v25  ;;  %v5759_v25 = vld [vmem:[#allocation15 + $0xe0] sm:$0xff]  ;;  %884 = vmatpush.msrb.mxu1 %v5761_v7 }
  0xe7   :  { %9746 = vst [vmem:[#allocation143_spill] sm:$0xff] %v5735_v29  ;;  %v5765_v29 = vpop.f32.mrf.mxu0  ;;  %864 = vmatpush.msrb.mxu0 %v5759_v25 }
  0xe8   :  { %9747 = vst [vmem:[#allocation144_spill] sm:$0xff] %v5739_v32  ;;  %v5767_v32 = vpop.f32.mrf.mxu1 }
  0xe9   :  { %9748 = vst [vmem:[#allocation145_spill] sm:$0xff] %v5743_v27  ;;  %v5781_v27 = vld [vmem:[#allocation15 + $0xd0] sm:$0xff] }
  0xea   :  { %9749 = vst [vmem:[#allocation146_spill] sm:$0xff] %v5745_v30  ;;  %v5771_v30 = vld [vmem:[#allocation15 + $0xf8] sm:$0xff]  ;;  %905 = vmatpush.msrb.mxu2 %v5781_v27 }
  0xeb   :  { %9750 = vst [vmem:[#allocation147_spill] sm:$0xff] %v5747_v31  ;;  %924 = vmatpush.msrb.mxu3 %v5771_v30  ;;  %v5779_v31 = vld [vmem:[#allocation15 + $0xc8] sm:$0xff] }
  0xec   :  { %9751 = vst [vmem:[#allocation148_spill] sm:$0xff] %v5751_v21  ;;  %v5777_v21 = vld [vmem:[#allocation15 + $0xc0] sm:$0xff]  ;;  %885 = vmatpush.msrb.mxu1 %v5779_v31 }
  0xed   :  { %9752 = vst [vmem:[#allocation149_spill] sm:$0xff] %v5755_v22  ;;  %v5773_v22 = vpop.f32.mrf.mxu3  ;;  %865 = vmatpush.msrb.mxu0 %v5777_v21 }
  0xee   :  { %9753 = vst [vmem:[#allocation150_spill] sm:$0xff] %v5759_v25 }
  0xef   :  { %9754 = vst [vmem:[#allocation151_spill] sm:$0xff] %v5761_v7  ;;  %v5821_v7 = vpop.f32.mrf.mxu0 }
  0xf0   :  { %9755 = vst [vmem:[#allocation152_spill] sm:$0xff] %v5763_v28  ;;  %v5797_v28 = vld [vmem:[#allocation15 + $0xb8] sm:$0xff]  ;;  %v5823_v25 = vpop.f32.mrf.mxu1 }
  0xf1   :  { %9756 = vst [vmem:[#allocation153_spill] sm:$0xff] %v5765_v29  ;;  %v5789_v29 = vld [vmem:[#allocation15 + $0xa0] sm:$0xff] }
  0xf2   :  { %9757 = vst [vmem:[#allocation154_spill] sm:$0xff] %v5767_v32  ;;  %v5785_v32 = vld [vmem:[#allocation15 + $0xd8] sm:$0xff]  ;;  %866 = vmatpush.msrb.mxu0 %v5789_v29 }
  0xf3   :  { %9758 = vst [vmem:[#allocation155_spill] sm:$0xff] %v5771_v30  ;;  %925 = vmatpush.msrb.mxu3 %v5785_v32  ;;  %v5793_v30 = vld [vmem:[#allocation15 + $0xb0] sm:$0xff] }
  0xf4   :  { %9759 = vst [vmem:[#allocation156_spill] sm:$0xff] %v5773_v22  ;;  %v5791_v22 = vld [vmem:[#allocation15 + $0xa8] sm:$0xff]  ;;  %906 = vmatpush.msrb.mxu2 %v5793_v30 }
  0xf5   :  { %9760 = vst [vmem:[#allocation157_spill] sm:$0xff] %v5777_v21  ;;  %886 = vmatpush.msrb.mxu1 %v5791_v22  ;;  %926 = vmatpush.msrb.mxu3 %v5797_v28  ;;  %v5809_v21 = vld [vmem:[#allocation15 + $0x98] sm:$0xff] }
  0xf6   :  { %9761 = vst [vmem:[#allocation158_spill] sm:$0xff] %v5779_v31  ;;  %v5801_v31 = vld [vmem:[#allocation15 + $0x80] sm:$0xff] }
  0xf7   :  { %9762 = vst [vmem:[#allocation159_spill] sm:$0xff] %v5781_v27  ;;  %v5803_v27 = vld [vmem:[#allocation15 + $0x88] sm:$0xff]  ;;  %867 = vmatpush.msrb.mxu0 %v5801_v31  ;;  %927 = vmatpush.msrb.mxu3 %v5809_v21 }
  0xf8   :  { %9763 = vst [vmem:[#allocation160_spill] sm:$0xff] %v5785_v32  ;;  %v5805_v32 = vld [vmem:[#allocation15 + $0x90] sm:$0xff]  ;;  %887 = vmatpush.msrb.mxu1 %v5803_v27 }
  0xf9   :  { %9764 = vst [vmem:[#allocation161_spill] sm:$0xff] %v5789_v29  ;;  %v5811_v29 = vpop.f32.mrf.mxu2  ;;  %907 = vmatpush.msrb.mxu2 %v5805_v32 }
  0xfa   :  { %9765 = vst [vmem:[#allocation162_spill] sm:$0xff] %v5791_v22  ;;  %v5819_v22 = vld [vmem:[#allocation15 + $0x70] sm:$0xff] }
  0xfb   :  { %9766 = vst [vmem:[#allocation163_spill] sm:$0xff] %v5793_v30  ;;  %v5815_v30 = vld [vmem:[#allocation15 + $0x60] sm:$0xff]  ;;  %908 = vmatpush.msrb.mxu2 %v5819_v22 }
  0xfc   :  { %9767 = vst [vmem:[#allocation164_spill] sm:$0xff] %v5797_v28  ;;  %v5817_v28 = vld [vmem:[#allocation15 + $0x68] sm:$0xff]  ;;  %868 = vmatpush.msrb.mxu0 %v5815_v30 }
  0xfd   :  { %9768 = vst [vmem:[#allocation165_spill] sm:$0xff] %v5803_v27  ;;  %888 = vmatpush.msrb.mxu1 %v5817_v28  ;;  %v5827_v27 = vld [vmem:[#allocation15 + $0x78] sm:$0xff] }
  0xfe   :  { %9769 = vst [vmem:[#allocation166_spill] sm:$0xff] %v5805_v32  ;;  %928 = vmatpush.msrb.mxu3 %v5827_v27  ;;  %v5835_v32 = vld [vmem:[#allocation15 + $0x50] sm:$0xff] }
  0xff   :  { %9770 = vst [vmem:[#allocation167_spill] sm:$0xff] %v5809_v21  ;;  %v5833_v21 = vld [vmem:[#allocation15 + $0x48] sm:$0xff]  ;;  %909 = vmatpush.msrb.mxu2 %v5835_v32 }
 0x100   :  { %9771 = vst [vmem:[#allocation168_spill] sm:$0xff] %v5811_v29  ;;  %v5831_v29 = vld [vmem:[#allocation15 + $0x40] sm:$0xff]  ;;  %889 = vmatpush.msrb.mxu1 %v5833_v21 }
 0x101   :  { %9772 = vst [vmem:[#allocation169_spill] sm:$0xff] %v5815_v30  ;;  %869 = vmatpush.msrb.mxu0 %v5831_v29  ;;  %v9791_v30 = vmov 0.0  }
 0x102   :  { %9773 = vst [vmem:[#allocation170_spill] sm:$0xff] %v5817_v28  ;;  %v5849_v28 = vld [vmem:[#allocation15 + $0x30] sm:$0xff]  ;;  %792 = vmatmul.f32.vlgmr.msra.gmra.mxu0 %v9791_v30  ;;  %812 = vmatmul.f32.vlgmr.msra.gmra.mxu1 %v9791_v30 }
 0x103   :  { %9774 = vst [vmem:[#allocation171_spill] sm:$0xff] %v5819_v22  ;;  %v5845_v22 = vld [vmem:[#allocation15 + $0x20] sm:$0xff]  ;;  %910 = vmatpush.msrb.mxu2 %v5849_v28  ;;  %852 = vmatmul.f32.vlgmr.msra.gmra.mxu3 %v9791_v30 }
 0x104   :  { %9775 = vst [vmem:[#allocation172_spill] sm:$0xff] %v5821_v7  ;;  %v5841_v7 = vpop.f32.mrf.mxu3  ;;  %870 = vmatpush.msrb.mxu0 %v5845_v22  ;;  %832 = vmatmul.f32.vlgmr.msra.gmra.mxu2 %v9791_v30  ;;  %v9813_v30 = vld [vmem:[#allocation40_spill] sm:$0xff] }
 0x105   :  { %9776 = vst [vmem:[#allocation173_spill] sm:$0xff] %v5823_v25  ;;  %v5839_v25 = vld [vmem:[#allocation15 + $0x58] sm:$0xff] }
 0x106   :  { %9777 = vst [vmem:[#allocation174_spill] sm:$0xff] %v5827_v27  ;;  %929 = vmatpush.msrb.mxu3 %v5839_v25  ;;  %v5847_v27 = vld [vmem:[#allocation15 + $0x28] sm:$0xff] }
 0x107   :  { %9778 = vst [vmem:[#allocation175_spill] sm:$0xff] %v5831_v29  ;;  %890 = vmatpush.msrb.mxu1 %v5847_v27  ;;  %v5853_v29 = vld [vmem:[#allocation15 + $0x38] sm:$0xff] }
 0x108   :  { %9779 = vst [vmem:[#allocation176_spill] sm:$0xff] %v5833_v21  ;;  %930 = vmatpush.msrb.mxu3 %v5853_v29  ;;  %v5865_v21 = vld [vmem:[#allocation15 + $0x18] sm:$0xff] }
 0x109   :  { %9780 = vst [vmem:[#allocation177_spill] sm:$0xff] %v5835_v32  ;;  %v5859_v32 = vld [vmem:[#allocation15 + $0x8] sm:$0xff] }
 0x10a   :  { %9781 = vst [vmem:[#allocation178_spill] sm:$0xff] %v5839_v25  ;;  %v5861_v25 = vld [vmem:[#allocation15 + $0x10] sm:$0xff]  ;;  %891 = vmatpush.msrb.mxu1 %v5859_v32  ;;  %931 = vmatpush.msrb.mxu3 %v5865_v21 }
 0x10b   :  { %9782 = vst [vmem:[#allocation179_spill] sm:$0xff] %v5841_v7  ;;  %v5857_v7 = vld [vmem:[#allocation15] sm:$0xff]  ;;  %911 = vmatpush.msrb.mxu2 %v5861_v25 }
 0x10c   :  { %9783 = vst [vmem:[#allocation180_spill] sm:$0xff] %v5845_v22  ;;  %871 = vmatpush.msrb.mxu0 %v5857_v7  ;;  %v5867_v22 = vpop.f32.mrf.mxu2  ;;  %1027 = vmatpush.msra.mxu1 %v5207_v34 }
 0x10d   :  { %9784 = vst [vmem:[#allocation181_spill] sm:$0xff] %v5847_v27  ;;  %v5875_v27 = vpop.f32.mrf.mxu1  ;;  %1047 = vmatpush.msra.mxu2 %v5211_v35  ;;  %1067 = vmatpush.msra.mxu3 %v5213_v36 }
 0x10e   :  { %9785 = vst [vmem:[#allocation182_spill] sm:$0xff] %v5849_v28  ;;  %v5871_v28 = vld [vmem:[#allocation12] sm:$0xf]  ;;  %1007 = vmatpush.msra.mxu0 %v5205_v33  ;;  %1028 = vmatpush.msra.mxu1 %v5219_v38 }
 0x10f   :  { %9786 = vst [vmem:[#allocation183_spill] sm:$0xff] %v5853_v29  ;;  %v5873_v29 = vpop.f32.mrf.mxu0  ;;  %1048 = vmatpush.msra.mxu2 %v5223_v39  ;;  %1068 = vmatpush.msra.mxu3 %v5225_v40  ;;  %v5912_v40 = vperm.slane %v5871_v28, 2 }
 0x110   :  { %9787 = vst [vmem:[#allocation184_spill] sm:$0xff] %v5865_v21  ;;  %v5887_v21 = vperm.slane %v5871_v28, 1  ;;  %1008 = vmatpush.msra.mxu0 %v5217_v37  ;;  %1029 = vmatpush.msra.mxu1 %v5230_v42 }
 0x111   :  { %9788 = vst [vmem:[#allocation185_spill] sm:$0xff] %v5867_v22  ;;  %v5884_v22 = vperm.slane %v5871_v28, 0  ;;  %1049 = vmatpush.msra.mxu2 %v5235_v43  ;;  %1069 = vmatpush.msra.mxu3 %v5237_v44  ;;  %v323_v43 = vadd.f32 %v5531_v20, %v5912_v40 }
 0x112   :  { %9789 = vst [vmem:[#allocation186_spill] sm:$0xff] %v5873_v29  ;;  %1009 = vmatpush.msra.mxu0 %v5228_v41  ;;  %v282_v34 = vadd.f32 %v5489_v26, %v5887_v21  ;;  %1030 = vmatpush.msra.mxu1 %v5245_v47  ;;  %v6375_v29 = vld [vmem:[#allocation13 + $0x78] sm:$0xff] }
 0x113   :  { %9790 = vst [vmem:[#allocation187_spill] sm:$0xff] %v5875_v27  ;;  %v5893_v27 = vpop.f32.mrf.mxu3  ;;  %v241_v33 = vadd.f32 %v5487_v45, %v5884_v22  ;;  %1050 = vmatpush.msra.mxu2 %v5251_v48  ;;  %1070 = vmatpush.msra.mxu3 %v5253_v49 }
 0x114   :  { %9792 = vst [vmem:[#allocation188_spill] sm:$0xff] %v5884_v22  ;;  %v5903_v35 = vpop.f32.mrf.mxu2  ;;  %1010 = vmatpush.msra.mxu0 %v5243_v46  ;;  %1031 = vmatpush.msra.mxu1 %v5259_v51 }
 0x115   :  { %9793 = vst [vmem:[#allocation189_spill] sm:$0xff] %v5887_v21  ;;  %v538_v37 = vpop.f32.mrf.mxu1  ;;  %1051 = vmatpush.msra.mxu2 %v5263_v52  ;;  %1071 = vmatpush.msra.mxu3 %v5265_v53  ;;  %v5947_v53 = vperm.slane %v5871_v28, 3  ;;  %v9812_v28 = vld [vmem:[#allocation39_spill] sm:$0xff] }
 0x116   :  { %9794 = vst [vmem:[#allocation190_spill] sm:$0xff] %v5893_v27  ;;  %v582_v39 = vadd.f32 %v538_v37, %v282_v34  ;;  %1011 = vmatpush.msra.mxu0 %v5257_v50  ;;  %1032 = vmatpush.msra.mxu1 %v5270_v55  ;;  %v6378_v27 = vld [vmem:[#allocation13 + $0x40] sm:$0xff] }
 0x117   :  { %9795 = vst [vmem:[#allocation191_spill] sm:$0xff] %v5903_v35  ;;  %v518_v36 = vpop.f32.mrf.mxu0  ;;  %1052 = vmatpush.msra.mxu2 %v5275_v56  ;;  %1072 = vmatpush.msra.mxu3 %v5277_v57  ;;  %v364_v56 = vadd.f32 %v5533_v58, %v5947_v53  ;;  %v9798_v57 = vld [vmem:[#allocation25_spill] sm:$0xff] }
 0x118   :  { %v581_v38 = vadd.f32 %v518_v36, %v241_v33  ;;  %9796 = vst [vmem:[#allocation192_spill] sm:$0xff] %v5912_v40  ;;  %v4007_v42 = vmul.f32 -1.442695, %v582_v39  ;;  %1012 = vmatpush.msra.mxu0 %v5268_v54  ;;  %1033 = vmatpush.msra.mxu1 %v5285_v60  ;;  %v6372_v35 = vld [vmem:[#allocation13 + $0x70] sm:$0xff] }
 0x119   :  { %1053 = vmatpush.msra.mxu2 %v5291_v61  ;;  %1073 = vmatpush.msra.mxu3 %v5293_v62  ;;  %v9800_v61 = vld [vmem:[#allocation27_spill] sm:$0xff]  ;;  %v9801_v62 = vld [vmem:[#allocation28_spill] sm:$0xff] }
 0x11a   :  { %v4006_v41 = vmul.f32 -1.442695, %v581_v38  ;;  %1013 = vmatpush.msra.mxu0 %v5283_v59  ;;  %1034 = vmatpush.msra.mxu1 %v5299_v0  ;;  %v9799_v59 = vld [vmem:[#allocation26_spill] sm:$0xff] }
 0x11b   :  { %v5926_v44 = vpop.f32.mrf.mxu3  ;;  %1054 = vmatpush.msra.mxu2 %v5303_v1  ;;  %1074 = vmatpush.msra.mxu3 %v5305_v2  ;;  %v9802_v1 = vld [vmem:[#allocation29_spill] sm:$0xff]  ;;  %v9803_v2 = vld [vmem:[#allocation30_spill] sm:$0xff] }
 0x11c   :  { %4069 = vpow2.f32 %v4006_v41  ;;  %9797 = vst [vmem:[#allocation193_spill] sm:$0xff] %v5926_v44  ;;  %v558_v46 = vpop.f32.mrf.mxu2  ;;  %1014 = vmatpush.msra.mxu0 %v5297_v63  ;;  %1035 = vmatpush.msra.mxu1 %v5310_v4  ;;  %v6369_v44 = vld [vmem:[#allocation13 + $0x68] sm:$0xff] }
 0x11d   :  { %4071 = vpow2.f32 %v4007_v42  ;;  %v583_v47 = vadd.f32 %v558_v46, %v323_v43  ;;  %1055 = vmatpush.msra.mxu2 %v5315_v5  ;;  %1075 = vmatpush.msra.mxu3 %v5317_v6  ;;  %v9804_v5 = vld [vmem:[#allocation31_spill] sm:$0xff]  ;;  %v9805_v6 = vld [vmem:[#allocation32_spill] sm:$0xff] }
 0x11e   :  { %1015 = vmatpush.msra.mxu0 %v5308_v3  ;;  %1036 = vmatpush.msra.mxu1 %v5325_v9  ;;  %v9806_v9 = vld [vmem:[#allocation33_spill] sm:$0xff] }
 0x11f   :  { %v4008_v48 = vmul.f32 -1.442695, %v583_v47  ;;  %1056 = vmatpush.msra.mxu2 %v5331_v10  ;;  %1076 = vmatpush.msra.mxu3 %v5333_v11  ;;  %v9807_v10 = vld [vmem:[#allocation34_spill] sm:$0xff] }
 0x120   :  { %1016 = vmatpush.msra.mxu0 %v5323_v8  ;;  %1037 = vmatpush.msra.mxu1 %v5339_v13  ;;  %v9809_v13 = vld [vmem:[#allocation36_spill] sm:$0xff] }
 0x121   :  { %4073 = vpow2.f32 %v4008_v48  ;;  %1057 = vmatpush.msra.mxu2 %v5343_v14  ;;  %1077 = vmatpush.msra.mxu3 %v5345_v15 }
 0x122   :  { %v4070_v49 = vpop.eup %4069  ;;  %1017 = vmatpush.msra.mxu0 %v5337_v12  ;;  %1038 = vmatpush.msra.mxu1 %v5350_v17  ;;  %v9808_v12 = vld [vmem:[#allocation35_spill] sm:$0xff]  ;;  %v9811_v17 = vld [vmem:[#allocation38_spill] sm:$0xff] }
 0x123   :  { %v4072_v50 = vpop.eup %4071  ;;  %v5938_v51 = vadd.f32 1.0, %v4070_v49  ;;  %v578_v54 = vpop.f32.mrf.mxu3  ;;  %1058 = vmatpush.msra.mxu2 %v5355_v18  ;;  %1078 = vmatpush.msra.mxu3 %v5357_v19 }
 0x124   :  { %v5942_v52 = vadd.f32 1.0, %v4072_v50  ;;  %1018 = vmatpush.msra.mxu0 %v5348_v16  ;;  %1039 = vmatpush.msra.mxu1 %v9799_v59  ;;  %v584_v0 = vadd.f32 %v578_v54, %v364_v56  ;;  %v9810_v16 = vld [vmem:[#allocation37_spill] sm:$0xff] }
 0x125   :  { %4075 = vrcp.f32 %v5938_v51  ;;  %1059 = vmatpush.msra.mxu2 %v9800_v61  ;;  %1079 = vmatpush.msra.mxu3 %v9801_v62  ;;  %v608_v15 = vand.u32 2147483648, %v5938_v51  ;;  %v606_v26 = vand.u32 2147483647, %v5938_v51  ;;  %vm602_vm3 = vweird.f32 %v5938_v51 }
 0x126   :  { %4077 = vrcp.f32 %v5942_v52  ;;  %1019 = vmatpush.msra.mxu0 %v9798_v57  ;;  %1040 = vmatpush.msra.mxu1 %v9803_v2  ;;  %v623_v18 = vand.u32 2147483648, %v5942_v52  ;;  %v621_v20 = vand.u32 2147483647, %v5942_v52  ;;  %vm617_vm4 = vweird.f32 %v5942_v52  ;;  %v9817_v2 = vld [vmem:[#allocation44_spill] sm:$0xff] }
 0x127   :  { %v4074_v55 = vpop.eup %4073  ;;  %1060 = vmatpush.msra.mxu2 %v9804_v5  ;;  %1080 = vmatpush.msra.mxu3 %v9805_v6  ;;  %v609_v36 = vor.u32 1.1754944e-38, %v608_v15  ;;  %vm607_vm6 = vcmp.eq.f32.partialorder %v606_v26, 8.507059e+37  ;;  %v9821_v5 = vld [vmem:[#allocation48_spill] sm:$0xff]  ;;  %v9822_v6 = vld [vmem:[#allocation49_spill] sm:$0xff]  ;;  %v9835_v26 = vld [vmem:[#allocation62_spill] sm:$0xff] }
 0x128   :  { %v5963_v60 = vadd.f32 1.0, %v4074_v55  ;;  %1020 = vmatpush.msra.mxu0 %v9802_v1  ;;  %1041 = vmatpush.msra.mxu1 %v9807_v10  ;;  %v624_v38 = vor.u32 1.1754944e-38, %v623_v18  ;;  %vm622_vm8 = vcmp.eq.f32.partialorder %v621_v20, 8.507059e+37  ;;  %v9816_v1 = vld [vmem:[#allocation43_spill] sm:$0xff]  ;;  %v9825_v10 = vld [vmem:[#allocation52_spill] sm:$0xff]  ;;  %v9830_v15 = vld [vmem:[#allocation57_spill] sm:$0xff] }
 0x129   :  { %1061 = vmatpush.msra.mxu2 %v9808_v12  ;;  %1081 = vmatpush.msra.mxu3 %v9809_v13  ;;  %v9827_v12 = vld [vmem:[#allocation54_spill] sm:$0xff]  ;;  %v9828_v13 = vld [vmem:[#allocation55_spill] sm:$0xff]  ;;  %v9833_v18 = vld [vmem:[#allocation60_spill] sm:$0xff]  ;;  %9969 = vst [vmem:[#allocation48_spill] sm:$0xff] %v6375_v29 }
 0x12a   :  { %4079 = vrcp.f32 %v5963_v60  ;;  %1021 = vmatpush.msra.mxu0 %v9806_v9  ;;  %1042 = vmatpush.msra.mxu1 %v9811_v17  ;;  %v638_v54 = vand.u32 2147483648, %v5963_v60  ;;  %vm632_vm10 = vweird.f32 %v5963_v60  ;;  %v636_v55 = vand.u32 2147483647, %v5963_v60  ;;  %v9824_v9 = vld [vmem:[#allocation51_spill] sm:$0xff]  ;;  %v9839_v20 = vld [vmem:[#allocation66_spill] sm:$0xff]  ;;  %9970 = vst [vmem:[#allocation49_spill] sm:$0xff] %v6378_v27 }
 0x12b   :  { %v4076_v63 = vpop.eup %4075  ;;  %4081 = vtanh.f32 %v584_v0  ;;  %1062 = vmatpush.msra.mxu2 %v9812_v28  ;;  %1082 = vmatpush.msra.mxu3 %v9813_v30  ;;  %v9815_v0 = vld [vmem:[#allocation42_spill] sm:$0xff]  ;;  %v9832_v17 = vld [vmem:[#allocation59_spill] sm:$0xff]  ;;  %v9837_v30 = vld [vmem:[#allocation64_spill] sm:$0xff] }
 0x12c   :  { %v4078_v3 = vpop.eup %4077  ;;  %v598_v4 = vmul.f32 %v4076_v63, %v5938_v51  ;;  %1022 = vmatpush.msra.mxu0 %v9810_v16  ;;  %vm603_vm1 = vweird.f32 %v4076_v63  ;;  %v639_v57 = vor.u32 1.1754944e-38, %v638_v54  ;;  %vm637_vm12 = vcmp.eq.f32.partialorder %v636_v55, 8.507059e+37  ;;  %v9831_v16 = vld [vmem:[#allocation58_spill] sm:$0xff]  ;;  %v9836_v28 = vld [vmem:[#allocation63_spill] sm:$0xff]  ;;  %v9856_v54 = vld [vmem:[#allocation85_spill] sm:$0xff] }
 0x12d   :  { %v613_v8 = vmul.f32 %v4078_v3, %v5942_v52  ;;  %vm618_vm2 = vweird.f32 %v4078_v3  ;;  %vm604_vm5 = vmor %vm602_vm3, %vm603_vm1  ;;  %v9857_v55 = vld [vmem:[#allocation86_spill] sm:$0xff] }
 0x12e   :  { %v599_v11 = vsub.f32 1.0, %v598_v4  ;;  %vm619_vm7 = vmor %vm617_vm4, %vm618_vm2  ;;  %v9820_v4 = vld [vmem:[#allocation47_spill] sm:$0xff] }
 0x12f   :  { %v614_v14 = vsub.f32 1.0, %v613_v8  ;;  %v9823_v8 = vld [vmem:[#allocation50_spill] sm:$0xff]  ;;  %9968 = vst [vmem:[#allocation47_spill] sm:$0xff] %v6372_v35 }
 0x130   :  { %v600_v19 = vmul.f32 %v4076_v63, %v599_v11  ;;  %v4080_v45 = vpop.eup %4079  ;;  %v9826_v11 = vld [vmem:[#allocation53_spill] sm:$0xff] }
 0x131   :  { %v615_v58 = vmul.f32 %v4078_v3, %v614_v14  ;;  %v628_v34 = vmul.f32 %v4080_v45, %v5963_v60  ;;  %v4082_v41 = vpop.eup %4081  ;;  %vm633_vm9 = vweird.f32 %v4080_v45  ;;  %v9818_v60 = vld [vmem:[#allocation45_spill] sm:$0xff]  ;;  %v9829_v14 = vld [vmem:[#allocation56_spill] sm:$0xff] }
 0x132   :  { %v601_v33 = vadd.f32 %v4076_v63, %v600_v19  ;;  %vm634_vm11 = vmor %vm632_vm10, %vm633_vm9  ;;  %v9834_v19 = vld [vmem:[#allocation61_spill] sm:$0xff] }
 0x133   :  { %v616_v37 = vadd.f32 %v4078_v3, %v615_v58  ;;  %v629_v42 = vsub.f32 1.0, %v628_v34  ;;  %v9838_v58 = vld [vmem:[#allocation65_spill] sm:$0xff] }
 0x134   :  { %v605_v39 = vsel %vm604_vm5, %v4076_v63, %v601_v33  ;;  %v9814_v63 = vld [vmem:[#allocation41_spill] sm:$0xff]  ;;  %v9841_v33 = vld [vmem:[#allocation68_spill] sm:$0xff] }
 0x135   :  { %v610_v43 = vsel %vm607_vm6, %v609_v36, %v605_v39  ;;  %v620_v46 = vsel %vm619_vm7, %v4078_v3, %v616_v37  ;;  %v630_v49 = vmul.f32 %v4080_v45, %v629_v42  ;;  %v9819_v3 = vld [vmem:[#allocation46_spill] sm:$0xff]  ;;  %v9842_v34 = vld [vmem:[#allocation69_spill] sm:$0xff]  ;;  %v9844_v37 = vld [vmem:[#allocation71_spill] sm:$0xff] }
 0x136   :  { %v625_v47 = vsel %vm622_vm8, %v624_v38, %v620_v46  ;;  %v644_v48 = vmul.f32 %v4082_v41, %v610_v43  ;;  %v9843_v36 = vld [vmem:[#allocation70_spill] sm:$0xff]  ;;  %v9845_v38 = vld [vmem:[#allocation72_spill] sm:$0xff]  ;;  %v9846_v39 = vld [vmem:[#allocation73_spill] sm:$0xff]  ;;  %9967 = vst [vmem:[#allocation46_spill] sm:$0xff] %v6369_v44 }
 0x137   :  { %v643_v50 = vmul.f32 0.0, %v625_v47  ;;  %v631_v52 = vadd.f32 %v4080_v45, %v630_v49  ;;  %v9847_v41 = vld [vmem:[#allocation74_spill] sm:$0xff]  ;;  %v9848_v42 = vld [vmem:[#allocation75_spill] sm:$0xff]  ;;  %v9851_v47 = vld [vmem:[#allocation80_spill] sm:$0xff] }
 0x138   :  { %v9849_v43 = vld [vmem:[#allocation78_spill] sm:$0xff]  ;;  %v9850_v46 = vld [vmem:[#allocation79_spill] sm:$0xff] }
 0x139   :  { %v5989_v51 = vadd.f32 %v644_v48, %v643_v50  ;;  %v635_v56 = vsel %vm634_vm11, %v4080_v45, %v631_v52  ;;  %v9840_v45 = vld [vmem:[#allocation67_spill] sm:$0xff]  ;;  %v9852_v48 = vld [vmem:[#allocation81_spill] sm:$0xff]  ;;  %v9853_v49 = vld [vmem:[#allocation82_spill] sm:$0xff] }
 0x13a   :  { %v640_v61 = vsel %vm637_vm12, %v639_v57, %v635_v56  ;;  %v9854_v50 = vld [vmem:[#allocation83_spill] sm:$0xff]  ;;  %v9855_v52 = vld [vmem:[#allocation84_spill] sm:$0xff] }
 0x13b   :  { %4083 = vtanh.f32 %v5989_v51  ;;  %v9858_v56 = vld [vmem:[#allocation87_spill] sm:$0xff]  ;;  %v9859_v57 = vld [vmem:[#allocation88_spill] sm:$0xff] }
 0x141   :  { %v4084_v59 = vpop.eup %4083 }
 0x142   :  { %v647_v62 = vmul.f32 %v4084_v59, %v640_v61  ;;  %v9860_v59 = vld [vmem:[#allocation89_spill] sm:$0xff]  ;;  %v9861_v61 = vld [vmem:[#allocation90_spill] sm:$0xff] }
 0x144   :  { %872 = vmatmul.f32.vlgmr.msrb.gmra.mxu0 %v647_v62  ;;  %892 = vmatmul.f32.vlgmr.msrb.gmra.mxu1 %v647_v62 }
 0x145   :  { %912 = vmatmul.f32.vlgmr.msrb.gmra.mxu2 %v647_v62  ;;  %932 = vmatmul.f32.vlgmr.msrb.gmra.mxu3 %v647_v62 }
 0x146   :  { %1154 = vmatpush.msrb.mxu0 %v9814_v63  ;;  %1174 = vmatpush.msrb.mxu1 %v9815_v0  ;;  %v9863_v63 = vld [vmem:[#allocation94_spill] sm:$0xff]  ;;  %v9864_v0 = vld [vmem:[#allocation95_spill] sm:$0xff] }
 0x147   :  { %1194 = vmatpush.msrb.mxu2 %v9816_v1  ;;  %1214 = vmatpush.msrb.mxu3 %v9817_v2  ;;  %v9865_v1 = vld [vmem:[#allocation98_spill] sm:$0xff]  ;;  %v9866_v2 = vld [vmem:[#allocation99_spill] sm:$0xff] }
 0x148   :  { %1155 = vmatpush.msrb.mxu0 %v9818_v60  ;;  %1175 = vmatpush.msrb.mxu1 %v9819_v3  ;;  %v9867_v60 = vld [vmem:[#allocation100_spill] sm:$0xff]  ;;  %v9868_v3 = vld [vmem:[#allocation101_spill] sm:$0xff] }
 0x149   :  { %1195 = vmatpush.msrb.mxu2 %v9820_v4  ;;  %1215 = vmatpush.msrb.mxu3 %v9821_v5  ;;  %v9869_v4 = vld [vmem:[#allocation102_spill] sm:$0xff]  ;;  %v9870_v5 = vld [vmem:[#allocation103_spill] sm:$0xff] }
 0x14a   :  { %1156 = vmatpush.msrb.mxu0 %v9822_v6  ;;  %1176 = vmatpush.msrb.mxu1 %v9823_v8  ;;  %v9871_v6 = vld [vmem:[#allocation104_spill] sm:$0xff]  ;;  %v9872_v8 = vld [vmem:[#allocation105_spill] sm:$0xff] }
 0x14b   :  { %1196 = vmatpush.msrb.mxu2 %v9824_v9  ;;  %1216 = vmatpush.msrb.mxu3 %v9825_v10  ;;  %v9873_v9 = vld [vmem:[#allocation106_spill] sm:$0xff]  ;;  %v9874_v10 = vld [vmem:[#allocation107_spill] sm:$0xff] }
 0x14c   :  { %1023 = vmatmul.f32.vlgmr.msra.gmra.mxu0 %v647_v62  ;;  %1043 = vmatmul.f32.vlgmr.msra.gmra.mxu1 %v647_v62 }
 0x14d   :  { %1063 = vmatmul.f32.vlgmr.msra.gmra.mxu2 %v647_v62  ;;  %1083 = vmatmul.f32.vlgmr.msra.gmra.mxu3 %v647_v62  ;;  %v9862_v62 = vld [vmem:[#allocation93_spill] sm:$0xff] }
 0x14e   :  { %1157 = vmatpush.msrb.mxu0 %v9826_v11  ;;  %1177 = vmatpush.msrb.mxu1 %v9827_v12  ;;  %v9875_v11 = vld [vmem:[#allocation108_spill] sm:$0xff]  ;;  %v9876_v12 = vld [vmem:[#allocation109_spill] sm:$0xff] }
 0x14f   :  { %1197 = vmatpush.msrb.mxu2 %v9828_v13  ;;  %1217 = vmatpush.msrb.mxu3 %v9829_v14  ;;  %v9877_v13 = vld [vmem:[#allocation110_spill] sm:$0xff]  ;;  %v9878_v14 = vld [vmem:[#allocation111_spill] sm:$0xff] }
 0x150   :  { %1158 = vmatpush.msrb.mxu0 %v9830_v15  ;;  %1178 = vmatpush.msrb.mxu1 %v9831_v16  ;;  %v9879_v15 = vld [vmem:[#allocation112_spill] sm:$0xff]  ;;  %v9880_v16 = vld [vmem:[#allocation113_spill] sm:$0xff] }
 0x151   :  { %1198 = vmatpush.msrb.mxu2 %v9832_v17  ;;  %1218 = vmatpush.msrb.mxu3 %v9833_v18  ;;  %v9881_v17 = vld [vmem:[#allocation116_spill] sm:$0xff]  ;;  %v9882_v18 = vld [vmem:[#allocation119_spill] sm:$0xff] }
 0x152   :  { %1159 = vmatpush.msrb.mxu0 %v9834_v19  ;;  %1179 = vmatpush.msrb.mxu1 %v9835_v26  ;;  %v9883_v19 = vld [vmem:[#allocation120_spill] sm:$0xff]  ;;  %v9884_v26 = vld [vmem:[#allocation121_spill] sm:$0xff] }
 0x153   :  { %1199 = vmatpush.msrb.mxu2 %v9836_v28  ;;  %1219 = vmatpush.msrb.mxu3 %v9837_v30  ;;  %v9885_v28 = vld [vmem:[#allocation122_spill] sm:$0xff]  ;;  %v9886_v30 = vld [vmem:[#allocation123_spill] sm:$0xff] }
 0x154   :  { %1160 = vmatpush.msrb.mxu0 %v9838_v58  ;;  %1180 = vmatpush.msrb.mxu1 %v9839_v20  ;;  %v9887_v58 = vld [vmem:[#allocation124_spill] sm:$0xff]  ;;  %v9888_v20 = vld [vmem:[#allocation125_spill] sm:$0xff] }
 0x155   :  { %1200 = vmatpush.msrb.mxu2 %v9840_v45  ;;  %1220 = vmatpush.msrb.mxu3 %v9841_v33  ;;  %v9889_v45 = vld [vmem:[#allocation126_spill] sm:$0xff]  ;;  %v9890_v33 = vld [vmem:[#allocation127_spill] sm:$0xff] }
 0x156   :  { %1161 = vmatpush.msrb.mxu0 %v9842_v34  ;;  %1181 = vmatpush.msrb.mxu1 %v9843_v36  ;;  %v9891_v34 = vld [vmem:[#allocation128_spill] sm:$0xff]  ;;  %v9892_v36 = vld [vmem:[#allocation129_spill] sm:$0xff] }
 0x157   :  { %1201 = vmatpush.msrb.mxu2 %v9844_v37  ;;  %1221 = vmatpush.msrb.mxu3 %v9845_v38  ;;  %v9893_v37 = vld [vmem:[#allocation130_spill] sm:$0xff]  ;;  %v9894_v38 = vld [vmem:[#allocation131_spill] sm:$0xff] }
 0x158   :  { %1162 = vmatpush.msrb.mxu0 %v9846_v39  ;;  %1182 = vmatpush.msrb.mxu1 %v9847_v41  ;;  %v9895_v39 = vld [vmem:[#allocation134_spill] sm:$0xff]  ;;  %v9896_v41 = vld [vmem:[#allocation137_spill] sm:$0xff] }
 0x159   :  { %1202 = vmatpush.msrb.mxu2 %v9848_v42  ;;  %1222 = vmatpush.msrb.mxu3 %v9849_v43  ;;  %v9897_v42 = vld [vmem:[#allocation138_spill] sm:$0xff]  ;;  %v9898_v43 = vld [vmem:[#allocation139_spill] sm:$0xff] }
 0x15a   :  { %1163 = vmatpush.msrb.mxu0 %v9850_v46  ;;  %1183 = vmatpush.msrb.mxu1 %v9851_v47  ;;  %v9899_v46 = vld [vmem:[#allocation140_spill] sm:$0xff]  ;;  %v9900_v47 = vld [vmem:[#allocation141_spill] sm:$0xff] }
 0x15b   :  { %1203 = vmatpush.msrb.mxu2 %v9852_v48  ;;  %1223 = vmatpush.msrb.mxu3 %v9853_v49  ;;  %v9903_v48 = vld [vmem:[#allocation144_spill] sm:$0xff]  ;;  %v9904_v49 = vld [vmem:[#allocation145_spill] sm:$0xff] }
 0x15c   :  { %1164 = vmatpush.msrb.mxu0 %v9854_v50  ;;  %1184 = vmatpush.msrb.mxu1 %v9855_v52  ;;  %v9905_v50 = vld [vmem:[#allocation146_spill] sm:$0xff]  ;;  %v9906_v52 = vld [vmem:[#allocation147_spill] sm:$0xff] }
 0x15d   :  { %1204 = vmatpush.msrb.mxu2 %v9856_v54  ;;  %1224 = vmatpush.msrb.mxu3 %v9857_v55  ;;  %v9907_v54 = vld [vmem:[#allocation148_spill] sm:$0xff]  ;;  %v9908_v55 = vld [vmem:[#allocation150_spill] sm:$0xff] }
 0x15e   :  { %1165 = vmatpush.msrb.mxu0 %v9858_v56  ;;  %1185 = vmatpush.msrb.mxu1 %v9859_v57  ;;  %v9909_v56 = vld [vmem:[#allocation151_spill] sm:$0xff]  ;;  %v9910_v57 = vld [vmem:[#allocation152_spill] sm:$0xff] }
 0x15f   :  { %1205 = vmatpush.msrb.mxu2 %v9860_v59  ;;  %1225 = vmatpush.msrb.mxu3 %v9861_v61  ;;  %v9911_v59 = vld [vmem:[#allocation155_spill] sm:$0xff]  ;;  %v9912_v61 = vld [vmem:[#allocation157_spill] sm:$0xff] }
 0x160   :  { %1166 = vmatpush.msrb.mxu0 %v9862_v62  ;;  %1186 = vmatpush.msrb.mxu1 %v9863_v63  ;;  %v9913_v62 = vld [vmem:[#allocation158_spill] sm:$0xff]  ;;  %v9914_v63 = vld [vmem:[#allocation159_spill] sm:$0xff] }
 0x161   :  { %1206 = vmatpush.msrb.mxu2 %v9864_v0  ;;  %1226 = vmatpush.msrb.mxu3 %v9865_v1  ;;  %v9915_v0 = vld [vmem:[#allocation160_spill] sm:$0xff]  ;;  %v9916_v1 = vld [vmem:[#allocation161_spill] sm:$0xff] }
 0x162   :  { %1167 = vmatpush.msrb.mxu0 %v9866_v2  ;;  %1187 = vmatpush.msrb.mxu1 %v9867_v60  ;;  %v9917_v2 = vld [vmem:[#allocation162_spill] sm:$0xff]  ;;  %v9918_v60 = vld [vmem:[#allocation163_spill] sm:$0xff] }
 0x163   :  { %1207 = vmatpush.msrb.mxu2 %v9868_v3  ;;  %1227 = vmatpush.msrb.mxu3 %v9869_v4  ;;  %v9919_v3 = vld [vmem:[#allocation164_spill] sm:$0xff]  ;;  %v9920_v4 = vld [vmem:[#allocation165_spill] sm:$0xff] }
 0x164   :  { %1168 = vmatpush.msrb.mxu0 %v9870_v5  ;;  %1188 = vmatpush.msrb.mxu1 %v9871_v6  ;;  %v9921_v5 = vld [vmem:[#allocation166_spill] sm:$0xff]  ;;  %v9922_v6 = vld [vmem:[#allocation167_spill] sm:$0xff] }
 0x165   :  { %1208 = vmatpush.msrb.mxu2 %v9872_v8  ;;  %1228 = vmatpush.msrb.mxu3 %v9873_v9  ;;  %v9923_v8 = vld [vmem:[#allocation169_spill] sm:$0xff]  ;;  %v9924_v9 = vld [vmem:[#allocation170_spill] sm:$0xff] }
 0x166   :  { %1169 = vmatpush.msrb.mxu0 %v9874_v10  ;;  %1189 = vmatpush.msrb.mxu1 %v9875_v11  ;;  %v9925_v10 = vld [vmem:[#allocation171_spill] sm:$0xff]  ;;  %v9926_v11 = vld [vmem:[#allocation174_spill] sm:$0xff] }
 0x167   :  { %1209 = vmatpush.msrb.mxu2 %v9876_v12  ;;  %1229 = vmatpush.msrb.mxu3 %v9877_v13  ;;  %v9927_v12 = vld [vmem:[#allocation175_spill] sm:$0xff]  ;;  %v9928_v13 = vld [vmem:[#allocation176_spill] sm:$0xff] }
 0x168   :  { %1234 = vmatpush.msra.mxu0 %v9878_v14  ;;  %1254 = vmatpush.msra.mxu1 %v9879_v15  ;;  %v9929_v14 = vld [vmem:[#allocation177_spill] sm:$0xff]  ;;  %v9931_v15 = vld [vmem:[#allocation180_spill] sm:$0xff] }
 0x169   :  { %1274 = vmatpush.msra.mxu2 %v9880_v16  ;;  %1294 = vmatpush.msra.mxu3 %v9881_v17  ;;  %v9932_v16 = vld [vmem:[#allocation181_spill] sm:$0xff]  ;;  %v9933_v17 = vld [vmem:[#allocation182_spill] sm:$0xff] }
 0x16a   :  { %1235 = vmatpush.msra.mxu0 %v9882_v18  ;;  %1255 = vmatpush.msra.mxu1 %v9883_v19  ;;  %v9934_v18 = vld [vmem:[#allocation183_spill] sm:$0xff]  ;;  %v9935_v19 = vld [vmem:[#allocation184_spill] sm:$0xff] }
 0x16b   :  { %1275 = vmatpush.msra.mxu2 %v9884_v26  ;;  %1295 = vmatpush.msra.mxu3 %v9885_v28 }
 0x16c   :  { %1236 = vmatpush.msra.mxu0 %v9886_v30  ;;  %1256 = vmatpush.msra.mxu1 %v9887_v58  ;;  %v423_v30 = vld [vmem:[%s8976_s6] sm:$0xf] }
 0x16d   :  { %1276 = vmatpush.msra.mxu2 %v9888_v20  ;;  %1296 = vmatpush.msra.mxu3 %v9889_v45  ;;  %v6126_v45 = vperm.slane %v423_v30, 0 }
 0x16e   :  { %1237 = vmatpush.msra.mxu0 %v9890_v33  ;;  %1257 = vmatpush.msra.mxu1 %v9891_v34  ;;  %v6128_v33 = vperm.slane %v423_v30, 1 }
 0x16f   :  { %1277 = vmatpush.msra.mxu2 %v5691_v24  ;;  %1297 = vmatpush.msra.mxu3 %v5693_v23  ;;  %v9901_v24 = vld [vmem:[#allocation142_spill] sm:$0xff]  ;;  %v9902_v23 = vld [vmem:[#allocation143_spill] sm:$0xff]  ;;  %9936 = vst [vmem:[#allocation25_spill] sm:$0xff] %v6126_v45 }
 0x170   :  { %1238 = vmatpush.msra.mxu0 %v9892_v36  ;;  %1258 = vmatpush.msra.mxu1 %v9893_v37  ;;  %9937 = vst [vmem:[#allocation26_spill] sm:$0xff] %v6128_v33 }
 0x171   :  { %1278 = vmatpush.msra.mxu2 %v9894_v38  ;;  %1298 = vmatpush.msra.mxu3 %v9895_v39 }
 0x172   :  { %1239 = vmatpush.msra.mxu0 %v9896_v41  ;;  %1259 = vmatpush.msra.mxu1 %v9897_v42  ;;  %v6132_v41 = vperm.slane %v423_v30, 2  ;;  %v9939_v42 = vld [vmem:[#allocation76_spill] sm:$0xff] }
 0x173   :  { %1279 = vmatpush.msra.mxu2 %v9898_v43  ;;  %1299 = vmatpush.msra.mxu3 %v9899_v46  ;;  %v244_v43 = vadd.f32 %v9939_v42, %v5884_v22  ;;  %v9940_v46 = vld [vmem:[#allocation77_spill] sm:$0xff] }
 0x174   :  { %1240 = vmatpush.msra.mxu0 %v9900_v47  ;;  %1260 = vmatpush.msra.mxu1 %v9901_v24  ;;  %9938 = vst [vmem:[#allocation27_spill] sm:$0xff] %v6132_v41  ;;  %v285_v47 = vadd.f32 %v9940_v46, %v5887_v21 }
 0x175   :  { %1280 = vmatpush.msra.mxu2 %v9902_v23  ;;  %1300 = vmatpush.msra.mxu3 %v9903_v48 }
 0x176   :  { %1241 = vmatpush.msra.mxu0 %v9904_v49  ;;  %1261 = vmatpush.msra.mxu1 %v9905_v50 }
 0x177   :  { %1281 = vmatpush.msra.mxu2 %v9906_v52  ;;  %1301 = vmatpush.msra.mxu3 %v9907_v54 }
 0x178   :  { %1242 = vmatpush.msra.mxu0 %v9908_v55  ;;  %1262 = vmatpush.msra.mxu1 %v9909_v56 }
 0x179   :  { %1282 = vmatpush.msra.mxu2 %v9910_v57  ;;  %1302 = vmatpush.msra.mxu3 %v9911_v59 }
 0x17a   :  { %1243 = vmatpush.msra.mxu0 %v9912_v61  ;;  %1263 = vmatpush.msra.mxu1 %v9913_v62  ;;  %v6139_v62 = vperm.slane %v423_v30, 3 }
 0x17b   :  { %1283 = vmatpush.msra.mxu2 %v9914_v63  ;;  %1303 = vmatpush.msra.mxu3 %v9915_v0 }
 0x17c   :  { %1244 = vmatpush.msra.mxu0 %v9916_v1  ;;  %1264 = vmatpush.msra.mxu1 %v9917_v2  ;;  %9941 = vst [vmem:[#allocation28_spill] sm:$0xff] %v6139_v62 }
 0x17d   :  { %1284 = vmatpush.msra.mxu2 %v9918_v60  ;;  %1304 = vmatpush.msra.mxu3 %v9919_v3  ;;  %v9942_v3 = vld [vmem:[#allocation91_spill] sm:$0xff] }
 0x17e   :  { %1245 = vmatpush.msra.mxu0 %v5801_v31  ;;  %1265 = vmatpush.msra.mxu1 %v9920_v4  ;;  %v9930_v31 = vld [vmem:[#allocation178_spill] sm:$0xff]  ;;  %v326_v4 = vadd.f32 %v9942_v3, %v5912_v40 }
 0x17f   :  { %1285 = vmatpush.msra.mxu2 %v9921_v5  ;;  %1305 = vmatpush.msra.mxu3 %v9922_v6  ;;  %v793_v26 = vpop.f32.mrf.mxu0  ;;  %v813_v28 = vpop.f32.mrf.mxu1 }
 0x180   :  { %1246 = vmatpush.msra.mxu0 %v9923_v8  ;;  %1266 = vmatpush.msra.mxu1 %v9924_v9 }
 0x181   :  { %1286 = vmatpush.msra.mxu2 %v9925_v10  ;;  %1306 = vmatpush.msra.mxu3 %v9926_v11 }
 0x182   :  { %1247 = vmatpush.msra.mxu0 %v9927_v12  ;;  %1267 = vmatpush.msra.mxu1 %v9928_v13 }
 0x183   :  { %1287 = vmatpush.msra.mxu2 %v9929_v14  ;;  %1307 = vmatpush.msra.mxu3 %v9930_v31 }
 0x184   :  { %1248 = vmatpush.msra.mxu0 %v9931_v15  ;;  %1268 = vmatpush.msra.mxu1 %v9932_v16  ;;  %v9943_v15 = vld [vmem:[#allocation92_spill] sm:$0xff] }
 0x185   :  { %1288 = vmatpush.msra.mxu2 %v9933_v17  ;;  %1308 = vmatpush.msra.mxu3 %v9934_v18  ;;  %v367_v16 = vadd.f32 %v9943_v15, %v5947_v53 }
 0x186   :  { %1249 = vmatpush.msra.mxu0 %v5857_v7  ;;  %1269 = vmatpush.msra.mxu1 %v5859_v32  ;;  %v853_v20 = vpop.f32.mrf.mxu3 }
 0x187   :  { %1289 = vmatpush.msra.mxu2 %v5861_v25  ;;  %1309 = vmatpush.msra.mxu3 %v9935_v19  ;;  %v833_v58 = vpop.f32.mrf.mxu2 }
 0x1c1   :  { %v873_v34 = vpop.f32.mrf.mxu0  ;;  %v893_v7 = vpop.f32.mrf.mxu1 }
 0x1c2   :  { %v874_v36 = vadd.f32 %v873_v34, %v793_v26  ;;  %v894_v32 = vadd.f32 %v893_v7, %v813_v28 }
 0x1c4   :  { %v936_v25 = vadd.f32 %v874_v36, %v6126_v45  ;;  %v937_v37 = vadd.f32 %v894_v32, %v6128_v33 }
 0x1c6   :  { %v4009_v38 = vmul.f32 -1.442695, %v936_v25  ;;  %v4010_v39 = vmul.f32 -1.442695, %v937_v37 }
 0x1c8   :  { %4085 = vpow2.f32 %v4009_v38  ;;  %v913_v24 = vpop.f32.mrf.mxu2  ;;  %v933_v55 = vpop.f32.mrf.mxu3 }
 0x1c9   :  { %4087 = vpow2.f32 %v4010_v39  ;;  %v914_v23 = vadd.f32 %v913_v24, %v833_v58  ;;  %v1024_v48 = vpop.f32.mrf.mxu0  ;;  %v1044_v49 = vpop.f32.mrf.mxu1  ;;  %v934_v63 = vadd.f32 %v933_v55, %v853_v20 }
 0x1ca   :  { %v1087_v50 = vadd.f32 %v1024_v48, %v244_v43  ;;  %v1088_v52 = vadd.f32 %v1044_v49, %v285_v47 }
 0x1cb   :  { %v938_v54 = vadd.f32 %v914_v23, %v6132_v41  ;;  %v939_v5 = vadd.f32 %v934_v63, %v6139_v62 }
 0x1cc   :  { %v4012_v56 = vmul.f32 -1.442695, %v1087_v50  ;;  %v4013_v57 = vmul.f32 -1.442695, %v1088_v52 }
 0x1cd   :  { %v4011_v59 = vmul.f32 -1.442695, %v938_v54 }
 0x1ce   :  { %v4086_v61 = vpop.eup %4085  ;;  %4089 = vpow2.f32 %v4012_v56 }
 0x1cf   :  { %v4088_v0 = vpop.eup %4087  ;;  %v949_v1 = vadd.f32 1.0, %v4086_v61  ;;  %4091 = vpow2.f32 %v4011_v59 }
 0x1d0   :  { %v950_v2 = vadd.f32 1.0, %v4088_v0  ;;  %4093 = vpow2.f32 %v4013_v57  ;;  %v1064_v60 = vpop.f32.mrf.mxu2  ;;  %v1084_v14 = vpop.f32.mrf.mxu3 }
 0x1d1   :  { %4095 = vrcp.f32 %v949_v1  ;;  %v1089_v6 = vadd.f32 %v1064_v60, %v326_v4  ;;  %v961_v17 = vand.u32 2147483647, %v949_v1  ;;  %v963_v30 = vand.u32 2147483648, %v949_v1 }
 0x1d2   :  { %4097 = vrcp.f32 %v950_v2  ;;  %v978_v28 = vand.u32 2147483648, %v950_v2  ;;  %v976_v20 = vand.u32 2147483647, %v950_v2  ;;  %v1090_v34 = vadd.f32 %v1084_v14, %v367_v16 }
 0x1d3   :  { %4099 = vtanh.f32 %v939_v5  ;;  %v4014_v13 = vmul.f32 -1.442695, %v1089_v6  ;;  %vm972_vm13 = vweird.f32 %v950_v2  ;;  %vm957_vm14 = vweird.f32 %v949_v1 }
 0x1d4   :  { %v4090_v8 = vpop.eup %4089  ;;  %vm6155_vm15 = vcmp.eq.f32.partialorder %v961_v17, 8.507059e+37  ;;  %v979_v37 = vor.u32 1.1754944e-38, %v978_v28  ;;  %v964_v39 = vor.u32 1.1754944e-38, %v963_v30  ;;  %vm6159_vm2 = vcmp.eq.f32.partialorder %v976_v20, 8.507059e+37 }
 0x1d5   :  { %v4092_v9 = vpop.eup %4091  ;;  %v6144_v10 = vadd.f32 1.0, %v4090_v8 }
 0x1d6   :  { %v4094_v11 = vpop.eup %4093  ;;  %v6146_v12 = vadd.f32 1.0, %v4092_v9 }
 0x1d7   :  { %v4096_v31 = vpop.eup %4095  ;;  %4101 = vrcp.f32 %v6144_v10  ;;  %v6151_v18 = vadd.f32 1.0, %v4094_v11  ;;  %vm1108_vm3 = vweird.f32 %v6144_v10  ;;  %v1112_v48 = vand.u32 2147483647, %v6144_v10 }
 0x1d8   :  { %v4098_v19 = vpop.eup %4097  ;;  %v953_v26 = vmul.f32 %v4096_v31, %v949_v1  ;;  %4103 = vrcp.f32 %v6146_v12  ;;  %vm958_vm0 = vweird.f32 %v4096_v31  ;;  %v1114_v54 = vand.u32 2147483648, %v6144_v10 }
 0x1d9   :  { %v968_v58 = vmul.f32 %v4098_v19, %v950_v2  ;;  %4105 = vrcp.f32 %v6151_v18  ;;  %v4100_v25 = vpop.eup %4099  ;;  %vm973_vm1 = vweird.f32 %v4098_v19  ;;  %vm959_vm4 = vmor %vm957_vm14, %vm958_vm0  ;;  %vm1123_vm5 = vweird.f32 %v6151_v18 }
 0x1da   :  { %v954_v7 = vsub.f32 1.0, %v953_v26  ;;  %4107 = vpow2.f32 %v4014_v13  ;;  %vm974_vm6 = vmor %vm972_vm13, %vm973_vm1  ;;  %v1129_v8 = vand.u32 2147483648, %v6151_v18  ;;  %v1127_v9 = vand.u32 2147483647, %v6151_v18 }
 0x1db   :  { %v969_v36 = vsub.f32 1.0, %v968_v58  ;;  %4109 = vtanh.f32 %v1090_v34  ;;  %vm1113_vm10 = vcmp.eq.f32.partialorder %v1112_v48, 8.507059e+37  ;;  %v1115_v15 = vor.u32 1.1754944e-38, %v1114_v54  ;;  %v6228_v54 = vld [vmem:[#allocation13 + $0x1c0] sm:$0xff] }
 0x1dc   :  { %v955_v38 = vmul.f32 %v4096_v31, %v954_v7  ;;  %vm987_vm11 = vweird.f32 %v6146_v12  ;;  %v1130_v26 = vor.u32 1.1754944e-38, %v1129_v8  ;;  %vm1128_vm14 = vcmp.eq.f32.partialorder %v1127_v9, 8.507059e+37  ;;  %v6263_v8 = vld [vmem:[#allocation13 + $0x198] sm:$0xff]  ;;  %v6270_v9 = vld [vmem:[#allocation13 + $0x160] sm:$0xff] }
 0x1dd   :  { %v4102_v42 = vpop.eup %4101  ;;  %v970_v43 = vmul.f32 %v4098_v19, %v969_v36  ;;  %v991_v20 = vand.u32 2147483647, %v6146_v12  ;;  %v6354_v48 = vld [vmem:[#allocation13 + $0x80] sm:$0xff] }
 0x1de   :  { %v6163_v47 = vpop.eup %4103  ;;  %v956_v24 = vadd.f32 %v4096_v31, %v955_v38  ;;  %v1104_v23 = vmul.f32 %v4102_v42, %v6144_v10  ;;  %vm1109_vm7 = vweird.f32 %v4102_v42  ;;  %v993_v10 = vand.u32 2147483648, %v6146_v12  ;;  %9962 = vst [vmem:[#allocation41_spill] sm:$0xff] %v6354_v48 }
 0x1df   :  { %v4106_v49 = vpop.eup %4105  ;;  %v983_v50 = vmul.f32 %v6163_v47, %v6146_v12  ;;  %v971_v52 = vadd.f32 %v4098_v19, %v970_v43  ;;  %vm1110_vm9 = vmor %vm1108_vm3, %vm1109_vm7  ;;  %vm988_vm12 = vweird.f32 %v6163_v47  ;;  %vm992_vm0 = vcmp.eq.f32.partialorder %v991_v20, 8.507059e+37  ;;  %v6309_v20 = vld [vmem:[#allocation13 + $0x108] sm:$0xff] }
 0x1e0   :  { %v4108_v55 = vpop.eup %4107  ;;  %v960_v56 = vsel %vm959_vm4, %v4096_v31, %v956_v24  ;;  %v1105_v57 = vsub.f32 1.0, %v1104_v23  ;;  %v1119_v59 = vmul.f32 %v4106_v49, %v6151_v18  ;;  %vm1124_vm8 = vweird.f32 %v4106_v49  ;;  %v6213_v23 = vld [vmem:[#allocation13 + $0x1e8] sm:$0xff] }
 0x1e1   :  { %v984_v61 = vsub.f32 1.0, %v983_v50  ;;  %v965_v63 = vsel %vm6155_vm15, %v964_v39, %v960_v56  ;;  %v975_v0 = vsel %vm974_vm6, %v4098_v19, %v971_v52  ;;  %v6178_v1 = vadd.f32 1.0, %v4108_v55  ;;  %v4110_v6 = vpop.eup %4109  ;;  %vm1125_vm13 = vmor %vm1123_vm5, %vm1124_vm8  ;;  %v6223_v50 = vld [vmem:[#allocation13 + $0x1f8] sm:$0xff]  ;;  %v6231_v55 = vld [vmem:[#allocation13 + $0x1c8] sm:$0xff] }
 0x1e2   :  { %v980_v60 = vsel %vm6159_vm2, %v979_v37, %v975_v0  ;;  %v999_v3 = vmul.f32 %v4100_v25, %v965_v63  ;;  %v1120_v4 = vsub.f32 1.0, %v1119_v59  ;;  %v1106_v5 = vmul.f32 %v4102_v42, %v1105_v57  ;;  %vm989_vm15 = vmor %vm987_vm11, %vm988_vm12  ;;  %v6234_v59 = vld [vmem:[#allocation13 + $0x1d0] sm:$0xff]  ;;  %v6240_v63 = vld [vmem:[#allocation13 + $0x1a0] sm:$0xff] }
 0x1e3   :  { %v998_v2 = vmul.f32 0.0, %v980_v60  ;;  %4111 = vrcp.f32 %v6178_v1  ;;  %v985_v14 = vmul.f32 %v6163_v47, %v984_v61  ;;  %v994_v25 = vor.u32 1.1754944e-38, %v993_v10  ;;  %v6237_v61 = vld [vmem:[#allocation13 + $0x1d8] sm:$0xff]  ;;  %v6243_v0 = vld [vmem:[#allocation13 + $0x1a8] sm:$0xff]  ;;  %v6246_v60 = vld [vmem:[#allocation13 + $0x1b0] sm:$0xff] }
 0x1e4   :  { %v1121_v11 = vmul.f32 %v4106_v49, %v1120_v4  ;;  %v1107_v13 = vadd.f32 %v4102_v42, %v1106_v5  ;;  %v1144_v12 = vand.u32 2147483648, %v6178_v1  ;;  %vm1138_vm2 = vweird.f32 %v6178_v1  ;;  %v6254_v5 = vld [vmem:[#allocation13 + $0x180] sm:$0xff]  ;;  %v6300_v10 = vld [vmem:[#allocation13 + $0x130] sm:$0xff] }
 0x1e5   :  { %v6186_v31 = vadd.f32 %v999_v3, %v998_v2  ;;  %v986_v19 = vadd.f32 %v6163_v47, %v985_v14  ;;  %v6249_v3 = vld [vmem:[#allocation13 + $0x1b8] sm:$0xff]  ;;  %v6260_v2 = vld [vmem:[#allocation13 + $0x190] sm:$0xff] }
 0x1e6   :  { %v1111_v16 = vsel %vm1110_vm9, %v4102_v42, %v1107_v13  ;;  %v1122_v17 = vadd.f32 %v4106_v49, %v1121_v11  ;;  %v1145_v57 = vor.u32 1.1754944e-38, %v1144_v12  ;;  %v6273_v11 = vld [vmem:[#allocation13 + $0x168] sm:$0xff]  ;;  %v6276_v13 = vld [vmem:[#allocation13 + $0x170] sm:$0xff]  ;;  %v6279_v14 = vld [vmem:[#allocation13 + $0x178] sm:$0xff] }
 0x1e7   :  { %4113 = vtanh.f32 %v6186_v31  ;;  %v1116_v28 = vsel %vm1113_vm10, %v1115_v15, %v1111_v16  ;;  %v990_v18 = vsel %vm989_vm15, %v6163_v47, %v986_v19  ;;  %v6210_v47 = vld [vmem:[#allocation13 + $0x1e0] sm:$0xff]  ;;  %v6285_v16 = vld [vmem:[#allocation13 + $0x148] sm:$0xff]  ;;  %v6291_v19 = vld [vmem:[#allocation13 + $0x158] sm:$0xff] }
 0x1e8   :  { %v1126_v30 = vsel %vm1125_vm13, %v4106_v49, %v1122_v17  ;;  %v1150_v58 = vmul.f32 %v4110_v6, %v1116_v28  ;;  %v995_v42 = vsel %vm992_vm0, %v994_v25, %v990_v18  ;;  %v6220_v49 = vld [vmem:[#allocation13 + $0x1f0] sm:$0xff]  ;;  %v6257_v6 = vld [vmem:[#allocation13 + $0x188] sm:$0xff]  ;;  %v6282_v15 = vld [vmem:[#allocation13 + $0x140] sm:$0xff] }
 0x1e9   :  { %v4112_v34 = vpop.eup %4111  ;;  %v1131_v7 = vsel %vm1128_vm14, %v1130_v26, %v1126_v30  ;;  %v6288_v17 = vld [vmem:[#allocation13 + $0x150] sm:$0xff]  ;;  %v6294_v26 = vld [vmem:[#allocation13 + $0x120] sm:$0xff]  ;;  %v6297_v28 = vld [vmem:[#allocation13 + $0x128] sm:$0xff] }
 0x1ea   :  { %v1134_v36 = vmul.f32 %v4112_v34, %v6178_v1  ;;  %v1149_v32 = vmul.f32 %v1131_v7, %v5989_v51  ;;  %vm1139_vm1 = vweird.f32 %v4112_v34  ;;  %v1142_v51 = vand.u32 2147483647, %v6178_v1  ;;  %v6303_v30 = vld [vmem:[#allocation13 + $0x138] sm:$0xff]  ;;  %v6324_v18 = vld [vmem:[#allocation13 + $0xf0] sm:$0xff] }
 0x1eb   :  { %vm6216_vm3 = vmor %vm1138_vm2, %vm1139_vm1  ;;  %v6315_v7 = vld [vmem:[#allocation13 + $0x118] sm:$0xff]  ;;  %9952 = vst [vmem:[#allocation31_spill] sm:$0xff] %v6324_v18  ;;  %v6348_v12 = vld [vmem:[#allocation13 + $0xb0] sm:$0xff] }
 0x1ec   :  { %v1135_v37 = vsub.f32 1.0, %v1134_v36  ;;  %v6204_v38 = vadd.f32 %v1150_v58, %v1149_v32  ;;  %vm1143_vm4 = vcmp.eq.f32.partialorder %v1142_v51, 8.507059e+37  ;;  %v6306_v58 = vld [vmem:[#allocation13 + $0x100] sm:$0xff]  ;;  %v6321_v32 = vld [vmem:[#allocation13 + $0xe8] sm:$0xff]  ;;  %v6327_v25 = vld [vmem:[#allocation13 + $0xf8] sm:$0xff]  ;;  %9960 = vst [vmem:[#allocation39_spill] sm:$0xff] %v6348_v12 }
 0x1ed   :  { %v4114_v39 = vpop.eup %4113  ;;  %v6318_v36 = vld [vmem:[#allocation13 + $0xe0] sm:$0xff]  ;;  %9951 = vst [vmem:[#allocation30_spill] sm:$0xff] %v6321_v32  ;;  %v6351_v51 = vld [vmem:[#allocation13 + $0xb8] sm:$0xff] }
 0x1ee   :  { %v1136_v43 = vmul.f32 %v4112_v34, %v1135_v37  ;;  %v1002_v46 = vmul.f32 %v4114_v39, %v995_v42  ;;  %4115 = vtanh.f32 %v6204_v38  ;;  %9950 = vst [vmem:[#allocation29_spill] sm:$0xff] %v6318_v36  ;;  %v6330_v37 = vld [vmem:[#allocation13 + $0xc0] sm:$0xff]  ;;  %v6333_v39 = vld [vmem:[#allocation13 + $0xc8] sm:$0xff]  ;;  %v6336_v42 = vld [vmem:[#allocation13 + $0xd0] sm:$0xff] }
 0x1ef   :  { %9953 = vst [vmem:[#allocation32_spill] sm:$0xff] %v6327_v25 }
 0x1f0   :  { %v1137_v24 = vadd.f32 %v4112_v34, %v1136_v43  ;;  %1170 = vmatmul.f32.vlgmr.msrb.gmra.mxu0 %v1002_v46  ;;  %1190 = vmatmul.f32.vlgmr.msrb.gmra.mxu1 %v1002_v46  ;;  %9954 = vst [vmem:[#allocation33_spill] sm:$0xff] %v6330_v37  ;;  %v6339_v43 = vld [vmem:[#allocation13 + $0xd8] sm:$0xff] }
 0x1f1   :  { %1210 = vmatmul.f32.vlgmr.msrb.gmra.mxu2 %v1002_v46  ;;  %1230 = vmatmul.f32.vlgmr.msrb.gmra.mxu3 %v1002_v46  ;;  %9955 = vst [vmem:[#allocation34_spill] sm:$0xff] %v6333_v39  ;;  %v6342_v46 = vld [vmem:[#allocation13 + $0xa0] sm:$0xff] }
 0x1f2   :  { %1385 = vmatpush.msrb.mxu0 %v6210_v47  ;;  %1405 = vmatpush.msrb.mxu1 %v6213_v23  ;;  %v1141_v52 = vsel %vm6216_vm3, %v4112_v34, %v1137_v24  ;;  %v6312_v34 = vld [vmem:[#allocation13 + $0x110] sm:$0xff]  ;;  %9956 = vst [vmem:[#allocation35_spill] sm:$0xff] %v6336_v42  ;;  %v6345_v24 = vld [vmem:[#allocation13 + $0xa8] sm:$0xff] }
 0x1f3   :  { %1425 = vmatpush.msrb.mxu2 %v6220_v49  ;;  %1445 = vmatpush.msrb.mxu3 %v6223_v50  ;;  %v1146_v1 = vsel %vm1143_vm4, %v1145_v57, %v1141_v52  ;;  %9957 = vst [vmem:[#allocation36_spill] sm:$0xff] %v6339_v43  ;;  %v6357_v52 = vld [vmem:[#allocation13 + $0x88] sm:$0xff]  ;;  %v6363_v57 = vld [vmem:[#allocation13 + $0x98] sm:$0xff] }
 0x1f4   :  { %1386 = vmatpush.msrb.mxu0 %v6228_v54  ;;  %1406 = vmatpush.msrb.mxu1 %v6231_v55  ;;  %v4116_v56 = vpop.eup %4115  ;;  %9958 = vst [vmem:[#allocation37_spill] sm:$0xff] %v6342_v46 }
 0x1f5   :  { %1426 = vmatpush.msrb.mxu2 %v6234_v59  ;;  %1446 = vmatpush.msrb.mxu3 %v6237_v61  ;;  %v6252_v4 = vmul.f32 %v4116_v56, %v1146_v1  ;;  %9959 = vst [vmem:[#allocation38_spill] sm:$0xff] %v6345_v24  ;;  %v6360_v56 = vld [vmem:[#allocation13 + $0x90] sm:$0xff]  ;;  %v6366_v1 = vld [vmem:[#allocation13 + $0x60] sm:$0xff] }
 0x1f6   :  { %1387 = vmatpush.msrb.mxu0 %v6240_v63  ;;  %1407 = vmatpush.msrb.mxu1 %v6243_v0  ;;  %9961 = vst [vmem:[#allocation40_spill] sm:$0xff] %v6351_v51 }
 0x1f7   :  { %1427 = vmatpush.msrb.mxu2 %v6246_v60  ;;  %1447 = vmatpush.msrb.mxu3 %v6249_v3  ;;  %9963 = vst [vmem:[#allocation42_spill] sm:$0xff] %v6357_v52 }
 0x1f8   :  { %1388 = vmatpush.msrb.mxu0 %v6254_v5  ;;  %1408 = vmatpush.msrb.mxu1 %v6257_v6  ;;  %9964 = vst [vmem:[#allocation43_spill] sm:$0xff] %v6360_v56 }
 0x1f9   :  { %1428 = vmatpush.msrb.mxu2 %v6260_v2  ;;  %1448 = vmatpush.msrb.mxu3 %v6263_v8  ;;  %9965 = vst [vmem:[#allocation44_spill] sm:$0xff] %v6363_v57 }
 0x1fa   :  { %1250 = vmatmul.f32.vlgmr.msra.gmra.mxu0 %v6252_v4  ;;  %1270 = vmatmul.f32.vlgmr.msra.gmra.mxu1 %v6252_v4  ;;  %9966 = vst [vmem:[#allocation45_spill] sm:$0xff] %v6366_v1 }
 0x1fb   :  { %1290 = vmatmul.f32.vlgmr.msra.gmra.mxu2 %v6252_v4  ;;  %1310 = vmatmul.f32.vlgmr.msra.gmra.mxu3 %v6252_v4 }
 0x1fc   :  { %1389 = vmatpush.msrb.mxu0 %v6270_v9  ;;  %1409 = vmatpush.msrb.mxu1 %v6273_v11 }
 0x1fd   :  { %1429 = vmatpush.msrb.mxu2 %v6276_v13  ;;  %1449 = vmatpush.msrb.mxu3 %v6279_v14 }
 0x1fe   :  { %1390 = vmatpush.msrb.mxu0 %v6282_v15  ;;  %1410 = vmatpush.msrb.mxu1 %v6285_v16 }
 0x1ff   :  { %1430 = vmatpush.msrb.mxu2 %v6288_v17  ;;  %1450 = vmatpush.msrb.mxu3 %v6291_v19 }
 0x200   :  { %1391 = vmatpush.msrb.mxu0 %v6294_v26  ;;  %1411 = vmatpush.msrb.mxu1 %v6297_v28 }
 0x201   :  { %1431 = vmatpush.msrb.mxu2 %v6300_v10  ;;  %1451 = vmatpush.msrb.mxu3 %v6303_v30 }
 0x202   :  { %1392 = vmatpush.msrb.mxu0 %v6306_v58  ;;  %1412 = vmatpush.msrb.mxu1 %v6309_v20 }
 0x203   :  { %1432 = vmatpush.msrb.mxu2 %v6312_v34  ;;  %1452 = vmatpush.msrb.mxu3 %v6315_v7 }
 0x204   :  { %1393 = vmatpush.msrb.mxu0 %v6318_v36  ;;  %1413 = vmatpush.msrb.mxu1 %v6321_v32 }
 0x205   :  { %1433 = vmatpush.msrb.mxu2 %v6324_v18  ;;  %1453 = vmatpush.msrb.mxu3 %v6327_v25  ;;  %v10112_v18 = vld [vmem:[#allocation114_spill] sm:$0xff] }
 0x206   :  { %1394 = vmatpush.msrb.mxu0 %v6330_v37  ;;  %1414 = vmatpush.msrb.mxu1 %v6333_v39 }
 0x207   :  { %1434 = vmatpush.msrb.mxu2 %v6336_v42  ;;  %1454 = vmatpush.msrb.mxu3 %v6339_v43 }
 0x208   :  { %1395 = vmatpush.msrb.mxu0 %v6342_v46  ;;  %1415 = vmatpush.msrb.mxu1 %v6345_v24 }
 0x209   :  { %1435 = vmatpush.msrb.mxu2 %v6348_v12  ;;  %1455 = vmatpush.msrb.mxu3 %v6351_v51 }
 0x20a   :  { %1396 = vmatpush.msrb.mxu0 %v6354_v48  ;;  %1416 = vmatpush.msrb.mxu1 %v6357_v52 }
 0x20b   :  { %1436 = vmatpush.msrb.mxu2 %v6360_v56  ;;  %1456 = vmatpush.msrb.mxu3 %v6363_v57  ;;  %v6381_v57 = vld [vmem:[#allocation13 + $0x48] sm:$0xff] }
 0x20c   :  { %1397 = vmatpush.msrb.mxu0 %v6366_v1  ;;  %1417 = vmatpush.msrb.mxu1 %v6369_v44  ;;  %9971 = vst [vmem:[#allocation50_spill] sm:$0xff] %v6381_v57  ;;  %v6384_v1 = vld [vmem:[#allocation13 + $0x50] sm:$0xff]  ;;  %v6387_v44 = vld [vmem:[#allocation13 + $0x58] sm:$0xff] }
 0x20d   :  { %1437 = vmatpush.msrb.mxu2 %v6372_v35  ;;  %1457 = vmatpush.msrb.mxu3 %v6375_v29  ;;  %9972 = vst [vmem:[#allocation51_spill] sm:$0xff] %v6384_v1  ;;  %v6390_v35 = vld [vmem:[#allocation13 + $0x20] sm:$0xff]  ;;  %v6393_v29 = vld [vmem:[#allocation13 + $0x28] sm:$0xff] }
 0x20e   :  { %1398 = vmatpush.msrb.mxu0 %v6378_v27  ;;  %1418 = vmatpush.msrb.mxu1 %v6381_v57  ;;  %9973 = vst [vmem:[#allocation52_spill] sm:$0xff] %v6387_v44  ;;  %v6396_v27 = vld [vmem:[#allocation13 + $0x30] sm:$0xff]  ;;  %v6399_v57 = vld [vmem:[#allocation13 + $0x38] sm:$0xff] }
 0x20f   :  { %1438 = vmatpush.msrb.mxu2 %v6384_v1  ;;  %1458 = vmatpush.msrb.mxu3 %v6387_v44  ;;  %9974 = vst [vmem:[#allocation53_spill] sm:$0xff] %v6390_v35  ;;  %v6402_v1 = vld [vmem:[#allocation13] sm:$0xff]  ;;  %v6405_v44 = vld [vmem:[#allocation13 + $0x8] sm:$0xff] }
 0x210   :  { %1399 = vmatpush.msrb.mxu0 %v6390_v35  ;;  %9975 = vst [vmem:[#allocation54_spill] sm:$0xff] %v6393_v29  ;;  %1419 = vmatpush.msrb.mxu1 %v6393_v29  ;;  %v6408_v35 = vld [vmem:[#allocation13 + $0x10] sm:$0xff]  ;;  %v6411_v29 = vld [vmem:[#allocation13 + $0x18] sm:$0xff] }
 0x211   :  { %9976 = vst [vmem:[#allocation55_spill] sm:$0xff] %v6396_v27  ;;  %1439 = vmatpush.msrb.mxu2 %v6396_v27  ;;  %1459 = vmatpush.msrb.mxu3 %v6399_v57 }
 0x212   :  { %9977 = vst [vmem:[#allocation56_spill] sm:$0xff] %v6399_v57  ;;  %1400 = vmatpush.msrb.mxu0 %v6402_v1  ;;  %1420 = vmatpush.msrb.mxu1 %v6405_v44  ;;  %v6430_v57 = vld [vmem:[#allocation16 + $0x1c0] sm:$0xff] }
 0x213   :  { %9978 = vst [vmem:[#allocation57_spill] sm:$0xff] %v6402_v1  ;;  %1440 = vmatpush.msrb.mxu2 %v6408_v35  ;;  %1460 = vmatpush.msrb.mxu3 %v6411_v29  ;;  %v6418_v1 = vld [vmem:[#allocation16 + $0x1e0] sm:$0xff] }
 0x214   :  { %9979 = vst [vmem:[#allocation58_spill] sm:$0xff] %v6405_v44  ;;  %1401 = vmatmul.f32.vlgmr.msrb.gmra.mxu0 %v6252_v4  ;;  %1421 = vmatmul.f32.vlgmr.msrb.gmra.mxu1 %v6252_v4  ;;  %v6421_v44 = vld [vmem:[#allocation16 + $0x1e8] sm:$0xff] }
 0x215   :  { %9980 = vst [vmem:[#allocation59_spill] sm:$0xff] %v6408_v35  ;;  %1441 = vmatmul.f32.vlgmr.msrb.gmra.mxu2 %v6252_v4  ;;  %1461 = vmatmul.f32.vlgmr.msrb.gmra.mxu3 %v6252_v4  ;;  %v6424_v35 = vld [vmem:[#allocation16 + $0x1f0] sm:$0xff]  ;;  %v6433_v4 = vld [vmem:[#allocation16 + $0x1c8] sm:$0xff] }
 0x216   :  { %9981 = vst [vmem:[#allocation60_spill] sm:$0xff] %v6411_v29  ;;  %1532 = vmatpush.msra.mxu0 %v6418_v1  ;;  %1552 = vmatpush.msra.mxu1 %v6421_v44  ;;  %v6427_v29 = vld [vmem:[#allocation16 + $0x1f8] sm:$0xff] }
 0x217   :  { %9982 = vst [vmem:[#allocation61_spill] sm:$0xff] %v6418_v1  ;;  %1572 = vmatpush.msra.mxu2 %v6424_v35  ;;  %1592 = vmatpush.msra.mxu3 %v6427_v29  ;;  %v6436_v1 = vld [vmem:[#allocation16 + $0x1d0] sm:$0xff] }
 0x218   :  { %9983 = vst [vmem:[#allocation62_spill] sm:$0xff] %v6421_v44  ;;  %1533 = vmatpush.msra.mxu0 %v6430_v57  ;;  %1553 = vmatpush.msra.mxu1 %v6433_v4  ;;  %v6439_v44 = vld [vmem:[#allocation16 + $0x1d8] sm:$0xff] }
 0x219   :  { %9984 = vst [vmem:[#allocation63_spill] sm:$0xff] %v6424_v35  ;;  %1573 = vmatpush.msra.mxu2 %v6436_v1  ;;  %1593 = vmatpush.msra.mxu3 %v6439_v44  ;;  %v6442_v35 = vld [vmem:[#allocation16 + $0x1a0] sm:$0xff] }
 0x21a   :  { %9985 = vst [vmem:[#allocation64_spill] sm:$0xff] %v6427_v29  ;;  %1534 = vmatpush.msra.mxu0 %v6442_v35  ;;  %v6445_v29 = vld [vmem:[#allocation16 + $0x1a8] sm:$0xff] }
 0x21b   :  { %9986 = vst [vmem:[#allocation65_spill] sm:$0xff] %v6430_v57  ;;  %1554 = vmatpush.msra.mxu1 %v6445_v29  ;;  %v6448_v57 = vld [vmem:[#allocation16 + $0x1b0] sm:$0xff] }
 0x21c   :  { %9987 = vst [vmem:[#allocation66_spill] sm:$0xff] %v6433_v4  ;;  %1574 = vmatpush.msra.mxu2 %v6448_v57  ;;  %v6451_v4 = vld [vmem:[#allocation16 + $0x1b8] sm:$0xff] }
 0x21d   :  { %9988 = vst [vmem:[#allocation67_spill] sm:$0xff] %v6436_v1  ;;  %1594 = vmatpush.msra.mxu3 %v6451_v4  ;;  %v6454_v1 = vld [vmem:[#allocation16 + $0x180] sm:$0xff] }
 0x21e   :  { %9989 = vst [vmem:[#allocation68_spill] sm:$0xff] %v6439_v44  ;;  %1535 = vmatpush.msra.mxu0 %v6454_v1  ;;  %v6457_v44 = vld [vmem:[#allocation16 + $0x188] sm:$0xff] }
 0x21f   :  { %9990 = vst [vmem:[#allocation69_spill] sm:$0xff] %v6442_v35  ;;  %1555 = vmatpush.msra.mxu1 %v6457_v44  ;;  %v6460_v35 = vld [vmem:[#allocation16 + $0x190] sm:$0xff] }
 0x220   :  { %9991 = vst [vmem:[#allocation70_spill] sm:$0xff] %v6445_v29  ;;  %1575 = vmatpush.msra.mxu2 %v6460_v35  ;;  %v6463_v29 = vld [vmem:[#allocation16 + $0x198] sm:$0xff] }
 0x221   :  { %9992 = vst [vmem:[#allocation71_spill] sm:$0xff] %v6448_v57  ;;  %1595 = vmatpush.msra.mxu3 %v6463_v29  ;;  %v6466_v57 = vld [vmem:[#allocation16 + $0x160] sm:$0xff] }
 0x222   :  { %9993 = vst [vmem:[#allocation72_spill] sm:$0xff] %v6451_v4  ;;  %1536 = vmatpush.msra.mxu0 %v6466_v57  ;;  %v6469_v4 = vld [vmem:[#allocation16 + $0x168] sm:$0xff] }
 0x223   :  { %9994 = vst [vmem:[#allocation73_spill] sm:$0xff] %v6454_v1  ;;  %1556 = vmatpush.msra.mxu1 %v6469_v4  ;;  %v6472_v1 = vld [vmem:[#allocation16 + $0x170] sm:$0xff] }
 0x224   :  { %9995 = vst [vmem:[#allocation74_spill] sm:$0xff] %v6457_v44  ;;  %1576 = vmatpush.msra.mxu2 %v6472_v1  ;;  %v6475_v44 = vld [vmem:[#allocation16 + $0x178] sm:$0xff] }
 0x225   :  { %9996 = vst [vmem:[#allocation75_spill] sm:$0xff] %v6460_v35  ;;  %1596 = vmatpush.msra.mxu3 %v6475_v44  ;;  %v6478_v35 = vld [vmem:[#allocation16 + $0x140] sm:$0xff] }
 0x226   :  { %9997 = vst [vmem:[#allocation78_spill] sm:$0xff] %v6463_v29  ;;  %1537 = vmatpush.msra.mxu0 %v6478_v35  ;;  %v6481_v29 = vld [vmem:[#allocation16 + $0x148] sm:$0xff] }
 0x227   :  { %9998 = vst [vmem:[#allocation79_spill] sm:$0xff] %v6466_v57  ;;  %1557 = vmatpush.msra.mxu1 %v6481_v29  ;;  %v6484_v57 = vld [vmem:[#allocation16 + $0x150] sm:$0xff] }
 0x228   :  { %9999 = vst [vmem:[#allocation80_spill] sm:$0xff] %v6469_v4  ;;  %1577 = vmatpush.msra.mxu2 %v6484_v57  ;;  %v6487_v4 = vld [vmem:[#allocation16 + $0x158] sm:$0xff] }
 0x229   :  { %10000 = vst [vmem:[#allocation81_spill] sm:$0xff] %v6472_v1  ;;  %1597 = vmatpush.msra.mxu3 %v6487_v4  ;;  %v6490_v1 = vld [vmem:[#allocation16 + $0x120] sm:$0xff] }
 0x22a   :  { %10001 = vst [vmem:[#allocation82_spill] sm:$0xff] %v6475_v44  ;;  %1538 = vmatpush.msra.mxu0 %v6490_v1  ;;  %v6493_v44 = vld [vmem:[#allocation16 + $0x128] sm:$0xff] }
 0x22b   :  { %10002 = vst [vmem:[#allocation83_spill] sm:$0xff] %v6478_v35  ;;  %1558 = vmatpush.msra.mxu1 %v6493_v44  ;;  %v6496_v35 = vld [vmem:[#allocation16 + $0x130] sm:$0xff] }
 0x22c   :  { %10003 = vst [vmem:[#allocation84_spill] sm:$0xff] %v6481_v29  ;;  %1578 = vmatpush.msra.mxu2 %v6496_v35  ;;  %v6499_v29 = vld [vmem:[#allocation16 + $0x138] sm:$0xff] }
 0x22d   :  { %10004 = vst [vmem:[#allocation85_spill] sm:$0xff] %v6484_v57  ;;  %1598 = vmatpush.msra.mxu3 %v6499_v29  ;;  %v6502_v57 = vld [vmem:[#allocation16 + $0x100] sm:$0xff] }
 0x22e   :  { %10005 = vst [vmem:[#allocation86_spill] sm:$0xff] %v6487_v4  ;;  %1539 = vmatpush.msra.mxu0 %v6502_v57  ;;  %v6505_v4 = vld [vmem:[#allocation16 + $0x108] sm:$0xff] }
 0x22f   :  { %10006 = vst [vmem:[#allocation87_spill] sm:$0xff] %v6490_v1  ;;  %1559 = vmatpush.msra.mxu1 %v6505_v4  ;;  %v6508_v1 = vld [vmem:[#allocation16 + $0x110] sm:$0xff] }
 0x230   :  { %10007 = vst [vmem:[#allocation88_spill] sm:$0xff] %v6493_v44  ;;  %1579 = vmatpush.msra.mxu2 %v6508_v1  ;;  %v6511_v44 = vld [vmem:[#allocation16 + $0x118] sm:$0xff] }
 0x231   :  { %10008 = vst [vmem:[#allocation89_spill] sm:$0xff] %v6496_v35  ;;  %1599 = vmatpush.msra.mxu3 %v6511_v44  ;;  %v6514_v35 = vld [vmem:[#allocation16 + $0xe0] sm:$0xff] }
 0x232   :  { %10009 = vst [vmem:[#allocation90_spill] sm:$0xff] %v6499_v29  ;;  %1540 = vmatpush.msra.mxu0 %v6514_v35  ;;  %v6517_v29 = vld [vmem:[#allocation16 + $0xe8] sm:$0xff] }
 0x233   :  { %10010 = vst [vmem:[#allocation93_spill] sm:$0xff] %v6502_v57  ;;  %1560 = vmatpush.msra.mxu1 %v6517_v29  ;;  %v6520_v57 = vld [vmem:[#allocation16 + $0xf0] sm:$0xff] }
 0x234   :  { %10011 = vst [vmem:[#allocation94_spill] sm:$0xff] %v6505_v4  ;;  %1580 = vmatpush.msra.mxu2 %v6520_v57  ;;  %v6523_v4 = vld [vmem:[#allocation16 + $0xf8] sm:$0xff] }
 0x235   :  { %10012 = vst [vmem:[#allocation95_spill] sm:$0xff] %v6508_v1  ;;  %1600 = vmatpush.msra.mxu3 %v6523_v4  ;;  %v6526_v1 = vld [vmem:[#allocation16 + $0xc0] sm:$0xff] }
 0x236   :  { %10013 = vst [vmem:[#allocation98_spill] sm:$0xff] %v6511_v44  ;;  %1541 = vmatpush.msra.mxu0 %v6526_v1  ;;  %v6529_v44 = vld [vmem:[#allocation16 + $0xc8] sm:$0xff] }
 0x237   :  { %10014 = vst [vmem:[#allocation99_spill] sm:$0xff] %v6514_v35  ;;  %1561 = vmatpush.msra.mxu1 %v6529_v44  ;;  %v6532_v35 = vld [vmem:[#allocation16 + $0xd0] sm:$0xff] }
 0x238   :  { %10015 = vst [vmem:[#allocation100_spill] sm:$0xff] %v6517_v29  ;;  %1581 = vmatpush.msra.mxu2 %v6532_v35  ;;  %v6535_v29 = vld [vmem:[#allocation16 + $0xd8] sm:$0xff] }
 0x239   :  { %10016 = vst [vmem:[#allocation101_spill] sm:$0xff] %v6520_v57  ;;  %1601 = vmatpush.msra.mxu3 %v6535_v29  ;;  %v6538_v57 = vld [vmem:[#allocation16 + $0xa0] sm:$0xff] }
 0x23a   :  { %10017 = vst [vmem:[#allocation102_spill] sm:$0xff] %v6523_v4  ;;  %1542 = vmatpush.msra.mxu0 %v6538_v57  ;;  %v6541_v4 = vld [vmem:[#allocation16 + $0xa8] sm:$0xff] }
 0x23b   :  { %10018 = vst [vmem:[#allocation103_spill] sm:$0xff] %v6526_v1  ;;  %1562 = vmatpush.msra.mxu1 %v6541_v4  ;;  %v6544_v1 = vld [vmem:[#allocation16 + $0xb0] sm:$0xff] }
 0x23c   :  { %10019 = vst [vmem:[#allocation104_spill] sm:$0xff] %v6529_v44  ;;  %1582 = vmatpush.msra.mxu2 %v6544_v1  ;;  %v6547_v44 = vld [vmem:[#allocation16 + $0xb8] sm:$0xff] }
 0x23d   :  { %10020 = vst [vmem:[#allocation105_spill] sm:$0xff] %v6532_v35  ;;  %1602 = vmatpush.msra.mxu3 %v6547_v44  ;;  %v6550_v35 = vld [vmem:[#allocation16 + $0x80] sm:$0xff] }
 0x23e   :  { %10021 = vst [vmem:[#allocation106_spill] sm:$0xff] %v6535_v29  ;;  %1543 = vmatpush.msra.mxu0 %v6550_v35  ;;  %v6553_v29 = vld [vmem:[#allocation16 + $0x88] sm:$0xff] }
 0x23f   :  { %10022 = vst [vmem:[#allocation107_spill] sm:$0xff] %v6538_v57  ;;  %1563 = vmatpush.msra.mxu1 %v6553_v29  ;;  %v6556_v57 = vld [vmem:[#allocation16 + $0x90] sm:$0xff] }
 0x240   :  { %10023 = vst [vmem:[#allocation108_spill] sm:$0xff] %v6541_v4  ;;  %1583 = vmatpush.msra.mxu2 %v6556_v57  ;;  %v6559_v4 = vld [vmem:[#allocation16 + $0x98] sm:$0xff] }
 0x241   :  { %10024 = vst [vmem:[#allocation109_spill] sm:$0xff] %v6544_v1  ;;  %1603 = vmatpush.msra.mxu3 %v6559_v4  ;;  %v6562_v1 = vld [vmem:[#allocation16 + $0x60] sm:$0xff] }
 0x242   :  { %10025 = vst [vmem:[#allocation110_spill] sm:$0xff] %v6547_v44  ;;  %1544 = vmatpush.msra.mxu0 %v6562_v1  ;;  %v6565_v44 = vld [vmem:[#allocation16 + $0x68] sm:$0xff] }
 0x243   :  { %10026 = vst [vmem:[#allocation111_spill] sm:$0xff] %v6550_v35  ;;  %1564 = vmatpush.msra.mxu1 %v6565_v44  ;;  %v6568_v35 = vld [vmem:[#allocation16 + $0x70] sm:$0xff] }
 0x244   :  { %10027 = vst [vmem:[#allocation112_spill] sm:$0xff] %v6553_v29  ;;  %1584 = vmatpush.msra.mxu2 %v6568_v35  ;;  %v6571_v29 = vld [vmem:[#allocation16 + $0x78] sm:$0xff] }
 0x245   :  { %10028 = vst [vmem:[#allocation113_spill] sm:$0xff] %v6556_v57  ;;  %1604 = vmatpush.msra.mxu3 %v6571_v29  ;;  %v6574_v57 = vld [vmem:[#allocation16 + $0x40] sm:$0xff] }
 0x246   :  { %10029 = vst [vmem:[#allocation116_spill] sm:$0xff] %v6559_v4  ;;  %1545 = vmatpush.msra.mxu0 %v6574_v57  ;;  %v6577_v4 = vld [vmem:[#allocation16 + $0x48] sm:$0xff] }
 0x247   :  { %10030 = vst [vmem:[#allocation119_spill] sm:$0xff] %v6562_v1  ;;  %1565 = vmatpush.msra.mxu1 %v6577_v4  ;;  %v6580_v1 = vld [vmem:[#allocation16 + $0x50] sm:$0xff] }
 0x248   :  { %10031 = vst [vmem:[#allocation120_spill] sm:$0xff] %v6565_v44  ;;  %1585 = vmatpush.msra.mxu2 %v6580_v1  ;;  %v6583_v44 = vld [vmem:[#allocation16 + $0x58] sm:$0xff] }
 0x249   :  { %10032 = vst [vmem:[#allocation121_spill] sm:$0xff] %v6568_v35  ;;  %1605 = vmatpush.msra.mxu3 %v6583_v44  ;;  %v6586_v35 = vld [vmem:[#allocation16 + $0x20] sm:$0xff] }
 0x24a   :  { %10033 = vst [vmem:[#allocation122_spill] sm:$0xff] %v6571_v29  ;;  %1546 = vmatpush.msra.mxu0 %v6586_v35  ;;  %v6589_v29 = vld [vmem:[#allocation16 + $0x28] sm:$0xff] }
 0x24b   :  { %10034 = vst [vmem:[#allocation123_spill] sm:$0xff] %v6574_v57  ;;  %1566 = vmatpush.msra.mxu1 %v6589_v29  ;;  %v6592_v57 = vld [vmem:[#allocation16 + $0x30] sm:$0xff] }
 0x24c   :  { %10035 = vst [vmem:[#allocation124_spill] sm:$0xff] %v6577_v4  ;;  %1586 = vmatpush.msra.mxu2 %v6592_v57  ;;  %v6595_v4 = vld [vmem:[#allocation16 + $0x38] sm:$0xff] }
 0x24d   :  { %10036 = vst [vmem:[#allocation125_spill] sm:$0xff] %v6580_v1  ;;  %1606 = vmatpush.msra.mxu3 %v6595_v4  ;;  %v6598_v1 = vld [vmem:[#allocation16] sm:$0xff] }
 0x24e   :  { %10037 = vst [vmem:[#allocation126_spill] sm:$0xff] %v6583_v44  ;;  %1547 = vmatpush.msra.mxu0 %v6598_v1  ;;  %v6601_v44 = vld [vmem:[#allocation16 + $0x8] sm:$0xff] }
 0x24f   :  { %10038 = vst [vmem:[#allocation127_spill] sm:$0xff] %v6586_v35  ;;  %1567 = vmatpush.msra.mxu1 %v6601_v44  ;;  %v6604_v35 = vld [vmem:[#allocation16 + $0x10] sm:$0xff] }
 0x250   :  { %10039 = vst [vmem:[#allocation128_spill] sm:$0xff] %v6589_v29  ;;  %1587 = vmatpush.msra.mxu2 %v6604_v35  ;;  %v6607_v29 = vld [vmem:[#allocation16 + $0x18] sm:$0xff] }
 0x251   :  { %10040 = vst [vmem:[#allocation129_spill] sm:$0xff] %v6592_v57  ;;  %1607 = vmatpush.msra.mxu3 %v6607_v29  ;;  %v6610_v57 = vld [vmem:[#allocation15 + $0x1e0] sm:$0xff] }
 0x252   :  { %10041 = vst [vmem:[#allocation130_spill] sm:$0xff] %v6595_v4  ;;  %1612 = vmatpush.msrb.mxu0 %v6610_v57  ;;  %v6613_v4 = vld [vmem:[#allocation15 + $0x1e8] sm:$0xff] }
 0x253   :  { %10042 = vst [vmem:[#allocation131_spill] sm:$0xff] %v6598_v1  ;;  %1632 = vmatpush.msrb.mxu1 %v6613_v4  ;;  %v6616_v1 = vld [vmem:[#allocation15 + $0x1f0] sm:$0xff] }
 0x254   :  { %10043 = vst [vmem:[#allocation134_spill] sm:$0xff] %v6601_v44  ;;  %1652 = vmatpush.msrb.mxu2 %v6616_v1  ;;  %v6619_v44 = vld [vmem:[#allocation15 + $0x1f8] sm:$0xff] }
 0x255   :  { %10044 = vst [vmem:[#allocation137_spill] sm:$0xff] %v6604_v35  ;;  %1672 = vmatpush.msrb.mxu3 %v6619_v44  ;;  %v6622_v35 = vld [vmem:[#allocation15 + $0x1c0] sm:$0xff] }
 0x256   :  { %10045 = vst [vmem:[#allocation138_spill] sm:$0xff] %v6607_v29  ;;  %1613 = vmatpush.msrb.mxu0 %v6622_v35  ;;  %v6625_v29 = vld [vmem:[#allocation15 + $0x1c8] sm:$0xff] }
 0x257   :  { %10046 = vst [vmem:[#allocation139_spill] sm:$0xff] %v6610_v57  ;;  %1633 = vmatpush.msrb.mxu1 %v6625_v29  ;;  %v6628_v57 = vld [vmem:[#allocation15 + $0x1d0] sm:$0xff] }
 0x258   :  { %10047 = vst [vmem:[#allocation140_spill] sm:$0xff] %v6613_v4  ;;  %1653 = vmatpush.msrb.mxu2 %v6628_v57  ;;  %v6631_v4 = vld [vmem:[#allocation15 + $0x1d8] sm:$0xff] }
 0x259   :  { %10048 = vst [vmem:[#allocation141_spill] sm:$0xff] %v6616_v1  ;;  %1673 = vmatpush.msrb.mxu3 %v6631_v4  ;;  %v6634_v1 = vld [vmem:[#allocation15 + $0x1a0] sm:$0xff] }
 0x25a   :  { %10049 = vst [vmem:[#allocation142_spill] sm:$0xff] %v6619_v44  ;;  %1614 = vmatpush.msrb.mxu0 %v6634_v1  ;;  %v6637_v44 = vld [vmem:[#allocation15 + $0x1a8] sm:$0xff] }
 0x25b   :  { %10050 = vst [vmem:[#allocation143_spill] sm:$0xff] %v6622_v35  ;;  %1634 = vmatpush.msrb.mxu1 %v6637_v44  ;;  %v6640_v35 = vld [vmem:[#allocation15 + $0x1b0] sm:$0xff] }
 0x25c   :  { %10051 = vst [vmem:[#allocation144_spill] sm:$0xff] %v6625_v29  ;;  %1654 = vmatpush.msrb.mxu2 %v6640_v35  ;;  %v6643_v29 = vld [vmem:[#allocation15 + $0x1b8] sm:$0xff] }
 0x25d   :  { %10052 = vst [vmem:[#allocation145_spill] sm:$0xff] %v6628_v57  ;;  %1674 = vmatpush.msrb.mxu3 %v6643_v29  ;;  %v6646_v57 = vld [vmem:[#allocation15 + $0x180] sm:$0xff] }
 0x25e   :  { %10053 = vst [vmem:[#allocation146_spill] sm:$0xff] %v6631_v4  ;;  %1615 = vmatpush.msrb.mxu0 %v6646_v57  ;;  %v6649_v4 = vld [vmem:[#allocation15 + $0x188] sm:$0xff] }
 0x25f   :  { %10054 = vst [vmem:[#allocation147_spill] sm:$0xff] %v6634_v1  ;;  %1635 = vmatpush.msrb.mxu1 %v6649_v4  ;;  %v6652_v1 = vld [vmem:[#allocation15 + $0x190] sm:$0xff] }
 0x260   :  { %10055 = vst [vmem:[#allocation148_spill] sm:$0xff] %v6637_v44  ;;  %1655 = vmatpush.msrb.mxu2 %v6652_v1  ;;  %v6655_v44 = vld [vmem:[#allocation15 + $0x198] sm:$0xff] }
 0x261   :  { %10056 = vst [vmem:[#allocation150_spill] sm:$0xff] %v6640_v35  ;;  %1675 = vmatpush.msrb.mxu3 %v6655_v44  ;;  %v6658_v35 = vld [vmem:[#allocation15 + $0x160] sm:$0xff] }
 0x262   :  { %10057 = vst [vmem:[#allocation151_spill] sm:$0xff] %v6643_v29  ;;  %1616 = vmatpush.msrb.mxu0 %v6658_v35  ;;  %v6661_v29 = vld [vmem:[#allocation15 + $0x168] sm:$0xff] }
 0x263   :  { %10058 = vst [vmem:[#allocation152_spill] sm:$0xff] %v6646_v57  ;;  %1636 = vmatpush.msrb.mxu1 %v6661_v29  ;;  %v6664_v57 = vld [vmem:[#allocation15 + $0x170] sm:$0xff] }
 0x264   :  { %10059 = vst [vmem:[#allocation155_spill] sm:$0xff] %v6649_v4  ;;  %1656 = vmatpush.msrb.mxu2 %v6664_v57  ;;  %v6667_v4 = vld [vmem:[#allocation15 + $0x178] sm:$0xff] }
 0x265   :  { %10060 = vst [vmem:[#allocation157_spill] sm:$0xff] %v6652_v1  ;;  %1676 = vmatpush.msrb.mxu3 %v6667_v4  ;;  %v6670_v1 = vld [vmem:[#allocation15 + $0x140] sm:$0xff] }
 0x266   :  { %10061 = vst [vmem:[#allocation158_spill] sm:$0xff] %v6655_v44  ;;  %1617 = vmatpush.msrb.mxu0 %v6670_v1  ;;  %v6673_v44 = vld [vmem:[#allocation15 + $0x148] sm:$0xff] }
 0x267   :  { %10062 = vst [vmem:[#allocation159_spill] sm:$0xff] %v6658_v35  ;;  %1637 = vmatpush.msrb.mxu1 %v6673_v44  ;;  %v6676_v35 = vld [vmem:[#allocation15 + $0x150] sm:$0xff] }
 0x268   :  { %10063 = vst [vmem:[#allocation160_spill] sm:$0xff] %v6661_v29  ;;  %1657 = vmatpush.msrb.mxu2 %v6676_v35  ;;  %v6679_v29 = vld [vmem:[#allocation15 + $0x158] sm:$0xff] }
 0x269   :  { %10064 = vst [vmem:[#allocation161_spill] sm:$0xff] %v6664_v57  ;;  %1677 = vmatpush.msrb.mxu3 %v6679_v29  ;;  %v6682_v57 = vld [vmem:[#allocation15 + $0x120] sm:$0xff] }
 0x26a   :  { %10065 = vst [vmem:[#allocation162_spill] sm:$0xff] %v6667_v4  ;;  %1618 = vmatpush.msrb.mxu0 %v6682_v57  ;;  %v6685_v4 = vld [vmem:[#allocation15 + $0x128] sm:$0xff] }
 0x26b   :  { %10066 = vst [vmem:[#allocation163_spill] sm:$0xff] %v6670_v1  ;;  %1638 = vmatpush.msrb.mxu1 %v6685_v4  ;;  %v6688_v1 = vld [vmem:[#allocation15 + $0x130] sm:$0xff] }
 0x26c   :  { %10067 = vst [vmem:[#allocation164_spill] sm:$0xff] %v6673_v44  ;;  %1658 = vmatpush.msrb.mxu2 %v6688_v1  ;;  %v6691_v44 = vld [vmem:[#allocation15 + $0x138] sm:$0xff] }
 0x26d   :  { %10068 = vst [vmem:[#allocation165_spill] sm:$0xff] %v6676_v35  ;;  %1678 = vmatpush.msrb.mxu3 %v6691_v44  ;;  %v6694_v35 = vld [vmem:[#allocation15 + $0x100] sm:$0xff]  ;;  %v1191_v27 = vpop.f32.mrf.mxu1 }
 0x26e   :  { %10069 = vst [vmem:[#allocation166_spill] sm:$0xff] %v6679_v29  ;;  %1619 = vmatpush.msrb.mxu0 %v6694_v35  ;;  %v6697_v29 = vld [vmem:[#allocation15 + $0x108] sm:$0xff] }
 0x26f   :  { %10070 = vst [vmem:[#allocation167_spill] sm:$0xff] %v6682_v57  ;;  %1639 = vmatpush.msrb.mxu1 %v6697_v29  ;;  %v6700_v57 = vld [vmem:[#allocation15 + $0x110] sm:$0xff] }
 0x270   :  { %10071 = vst [vmem:[#allocation169_spill] sm:$0xff] %v6685_v4  ;;  %1659 = vmatpush.msrb.mxu2 %v6700_v57  ;;  %v6703_v4 = vld [vmem:[#allocation15 + $0x118] sm:$0xff] }
 0x271   :  { %10072 = vst [vmem:[#allocation170_spill] sm:$0xff] %v6688_v1  ;;  %1679 = vmatpush.msrb.mxu3 %v6703_v4  ;;  %v6706_v1 = vld [vmem:[#allocation15 + $0xe0] sm:$0xff] }
 0x272   :  { %10073 = vst [vmem:[#allocation171_spill] sm:$0xff] %v6691_v44  ;;  %1620 = vmatpush.msrb.mxu0 %v6706_v1  ;;  %v6709_v44 = vld [vmem:[#allocation15 + $0xe8] sm:$0xff] }
 0x273   :  { %10074 = vst [vmem:[#allocation174_spill] sm:$0xff] %v6694_v35  ;;  %1640 = vmatpush.msrb.mxu1 %v6709_v44  ;;  %v6712_v35 = vld [vmem:[#allocation15 + $0xf0] sm:$0xff] }
 0x274   :  { %10075 = vst [vmem:[#allocation175_spill] sm:$0xff] %v6697_v29  ;;  %1660 = vmatpush.msrb.mxu2 %v6712_v35  ;;  %v6715_v29 = vld [vmem:[#allocation15 + $0xf8] sm:$0xff]  ;;  %v1211_v56 = vpop.f32.mrf.mxu2 }
 0x275   :  { %10076 = vst [vmem:[#allocation176_spill] sm:$0xff] %v6700_v57  ;;  %1680 = vmatpush.msrb.mxu3 %v6715_v29  ;;  %v6718_v57 = vld [vmem:[#allocation15 + $0xc0] sm:$0xff] }
 0x276   :  { %10077 = vst [vmem:[#allocation177_spill] sm:$0xff] %v6703_v4  ;;  %1621 = vmatpush.msrb.mxu0 %v6718_v57  ;;  %v6721_v4 = vld [vmem:[#allocation15 + $0xc8] sm:$0xff] }
 0x277   :  { %10078 = vst [vmem:[#allocation178_spill] sm:$0xff] %v6706_v1  ;;  %1641 = vmatpush.msrb.mxu1 %v6721_v4  ;;  %v6724_v1 = vld [vmem:[#allocation15 + $0xd0] sm:$0xff]  ;;  %v1271_v52 = vpop.f32.mrf.mxu1 }
 0x278   :  { %10079 = vst [vmem:[#allocation180_spill] sm:$0xff] %v6709_v44  ;;  %1661 = vmatpush.msrb.mxu2 %v6724_v1  ;;  %v6727_v44 = vld [vmem:[#allocation15 + $0xd8] sm:$0xff]  ;;  %v1272_v51 = vadd.f32 %v1271_v52, %v1191_v27 }
 0x279   :  { %10080 = vst [vmem:[#allocation181_spill] sm:$0xff] %v6712_v35  ;;  %1681 = vmatpush.msrb.mxu3 %v6727_v44  ;;  %v6730_v35 = vld [vmem:[#allocation15 + $0xa0] sm:$0xff] }
 0x27a   :  { %10081 = vst [vmem:[#allocation182_spill] sm:$0xff] %v6715_v29  ;;  %1622 = vmatpush.msrb.mxu0 %v6730_v35  ;;  %v6733_v29 = vld [vmem:[#allocation15 + $0xa8] sm:$0xff]  ;;  %v1315_v12 = vadd.f32 %v1272_v51, %v6128_v33 }
 0x27b   :  { %10082 = vst [vmem:[#allocation183_spill] sm:$0xff] %v6718_v57  ;;  %1642 = vmatpush.msrb.mxu1 %v6733_v29  ;;  %v6736_v57 = vld [vmem:[#allocation15 + $0xb0] sm:$0xff] }
 0x27c   :  { %10083 = vst [vmem:[#allocation184_spill] sm:$0xff] %v6721_v4  ;;  %1662 = vmatpush.msrb.mxu2 %v6736_v57  ;;  %v6739_v4 = vld [vmem:[#allocation15 + $0xb8] sm:$0xff]  ;;  %v4016_v46 = vmul.f32 -1.442695, %v1315_v12 }
 0x27d   :  { %10084 = vst [vmem:[#allocation76_spill] sm:$0xff] %v6724_v1  ;;  %1682 = vmatpush.msrb.mxu3 %v6739_v4  ;;  %v6742_v1 = vld [vmem:[#allocation15 + $0x80] sm:$0xff] }
 0x27e   :  { %10085 = vst [vmem:[#allocation77_spill] sm:$0xff] %v6727_v44  ;;  %1623 = vmatpush.msrb.mxu0 %v6742_v1  ;;  %v6745_v44 = vld [vmem:[#allocation15 + $0x88] sm:$0xff] }
 0x27f   :  { %10086 = vst [vmem:[#allocation91_spill] sm:$0xff] %v6730_v35  ;;  %1643 = vmatpush.msrb.mxu1 %v6745_v44  ;;  %v6748_v35 = vld [vmem:[#allocation15 + $0x90] sm:$0xff] }
 0x280   :  { %10087 = vst [vmem:[#allocation92_spill] sm:$0xff] %v6733_v29  ;;  %1663 = vmatpush.msrb.mxu2 %v6748_v35  ;;  %v6751_v29 = vld [vmem:[#allocation15 + $0x98] sm:$0xff] }
 0x281   :  { %10088 = vst [vmem:[#allocation194_spill] sm:$0xff] %v6736_v57  ;;  %1683 = vmatpush.msrb.mxu3 %v6751_v29  ;;  %v6754_v57 = vld [vmem:[#allocation15 + $0x60] sm:$0xff] }
 0x282   :  { %10089 = vst [vmem:[#allocation195_spill] sm:$0xff] %v6739_v4  ;;  %1624 = vmatpush.msrb.mxu0 %v6754_v57  ;;  %v6757_v4 = vld [vmem:[#allocation15 + $0x68] sm:$0xff] }
 0x283   :  { %10090 = vst [vmem:[#allocation196_spill] sm:$0xff] %v6742_v1  ;;  %1644 = vmatpush.msrb.mxu1 %v6757_v4  ;;  %v6760_v1 = vld [vmem:[#allocation15 + $0x70] sm:$0xff] }
 0x284   :  { %10091 = vst [vmem:[#allocation197_spill] sm:$0xff] %v6745_v44  ;;  %1664 = vmatpush.msrb.mxu2 %v6760_v1  ;;  %v6763_v44 = vld [vmem:[#allocation15 + $0x78] sm:$0xff] }
 0x285   :  { %10092 = vst [vmem:[#allocation198_spill] sm:$0xff] %v6748_v35  ;;  %1684 = vmatpush.msrb.mxu3 %v6763_v44  ;;  %v6766_v35 = vld [vmem:[#allocation15 + $0x40] sm:$0xff] }
 0x286   :  { %10093 = vst [vmem:[#allocation199_spill] sm:$0xff] %v6751_v29  ;;  %1625 = vmatpush.msrb.mxu0 %v6766_v35  ;;  %v6769_v29 = vld [vmem:[#allocation15 + $0x48] sm:$0xff] }
 0x287   :  { %10094 = vst [vmem:[#allocation200_spill] sm:$0xff] %v6754_v57  ;;  %1645 = vmatpush.msrb.mxu1 %v6769_v29  ;;  %v6772_v57 = vld [vmem:[#allocation15 + $0x50] sm:$0xff] }
 0x288   :  { %10095 = vst [vmem:[#allocation201_spill] sm:$0xff] %v6757_v4  ;;  %1665 = vmatpush.msrb.mxu2 %v6772_v57  ;;  %v6775_v4 = vld [vmem:[#allocation15 + $0x58] sm:$0xff] }
 0x289   :  { %10096 = vst [vmem:[#allocation202_spill] sm:$0xff] %v6760_v1  ;;  %1685 = vmatpush.msrb.mxu3 %v6775_v4  ;;  %v6778_v1 = vld [vmem:[#allocation15 + $0x20] sm:$0xff] }
 0x28a   :  { %10097 = vst [vmem:[#allocation203_spill] sm:$0xff] %v6763_v44  ;;  %1626 = vmatpush.msrb.mxu0 %v6778_v1  ;;  %v6781_v44 = vld [vmem:[#allocation15 + $0x28] sm:$0xff] }
 0x28b   :  { %10098 = vst [vmem:[#allocation204_spill] sm:$0xff] %v6766_v35  ;;  %1646 = vmatpush.msrb.mxu1 %v6781_v44  ;;  %v6784_v35 = vld [vmem:[#allocation15 + $0x30] sm:$0xff] }
 0x28c   :  { %10099 = vst [vmem:[#allocation205_spill] sm:$0xff] %v6769_v29  ;;  %1666 = vmatpush.msrb.mxu2 %v6784_v35  ;;  %v6787_v29 = vld [vmem:[#allocation15 + $0x38] sm:$0xff] }
 0x28d   :  { %10100 = vst [vmem:[#allocation206_spill] sm:$0xff] %v6772_v57  ;;  %1686 = vmatpush.msrb.mxu3 %v6787_v29  ;;  %v6790_v57 = vld [vmem:[#allocation15] sm:$0xff] }
 0x28e   :  { %10101 = vst [vmem:[#allocation207_spill] sm:$0xff] %v6775_v4  ;;  %1627 = vmatpush.msrb.mxu0 %v6790_v57  ;;  %v6793_v4 = vld [vmem:[#allocation15 + $0x8] sm:$0xff] }
 0x28f   :  { %10102 = vst [vmem:[#allocation208_spill] sm:$0xff] %v6778_v1  ;;  %1647 = vmatpush.msrb.mxu1 %v6793_v4  ;;  %v6796_v1 = vld [vmem:[#allocation15 + $0x10] sm:$0xff] }
 0x290   :  { %10103 = vst [vmem:[#allocation209_spill] sm:$0xff] %v6781_v44  ;;  %1667 = vmatpush.msrb.mxu2 %v6796_v1  ;;  %v6799_v44 = vld [vmem:[#allocation15 + $0x18] sm:$0xff] }
 0x291   :  { %10104 = vst [vmem:[#allocation210_spill] sm:$0xff] %v6784_v35  ;;  %1687 = vmatpush.msrb.mxu3 %v6799_v44  ;;  %v1171_v35 = vpop.f32.mrf.mxu0 }
 0x292   :  { %10105 = vst [vmem:[#allocation211_spill] sm:$0xff] %v6787_v29 }
 0x293   :  { %10106 = vst [vmem:[#allocation212_spill] sm:$0xff] %v6790_v57 }
 0x294   :  { %10107 = vst [vmem:[#allocation213_spill] sm:$0xff] %v6793_v4  ;;  %v1231_v4 = vpop.f32.mrf.mxu3 }
 0x295   :  { %10108 = vst [vmem:[#allocation214_spill] sm:$0xff] %v6796_v1  ;;  %v1291_v1 = vpop.f32.mrf.mxu2 }
 0x296   :  { %10109 = vst [vmem:[#allocation215_spill] sm:$0xff] %v6799_v44  ;;  %v1292_v43 = vadd.f32 %v1291_v1, %v1211_v56 }
 0x298   :  { %v1316_v44 = vadd.f32 %v1292_v43, %v6132_v41 }
 0x299   :  { %v1251_v29 = vpop.f32.mrf.mxu0 }
 0x29a   :  { %v1252_v48 = vadd.f32 %v1251_v29, %v1171_v35  ;;  %v4017_v42 = vmul.f32 -1.442695, %v1316_v44  ;;  %v10110_v44 = vld [vmem:[#allocation96_spill] sm:$0xff] }
 0x29b   :  { %v247_v43 = vadd.f32 %v10110_v44, %v5884_v22  ;;  %v329_v44 = vadd.f32 %v10112_v18, %v5912_v40 }
 0x29c   :  { %v1314_v57 = vadd.f32 %v1252_v48, %v6126_v45  ;;  %v1311_v29 = vpop.f32.mrf.mxu3 }
 0x29d   :  { %v1312_v35 = vadd.f32 %v1311_v29, %v1231_v4 }
 0x29e   :  { %v4015_v24 = vmul.f32 -1.442695, %v1314_v57 }
 0x2a0   :  { %4117 = vpow2.f32 %v4015_v24  ;;  %v1317_v24 = vadd.f32 %v1312_v35, %v6139_v62  ;;  %v1422_v62 = vpop.f32.mrf.mxu1 }
 0x2a1   :  { %4119 = vpow2.f32 %v4016_v46  ;;  %v1402_v35 = vpop.f32.mrf.mxu0 }
 0x2a2   :  { %4121 = vpow2.f32 %v4017_v42  ;;  %v10111_v42 = vld [vmem:[#allocation97_spill] sm:$0xff]  ;;  %v1465_v33 = vadd.f32 %v1402_v35, %v247_v43 }
 0x2a6   :  { %v4118_v39 = vpop.eup %4117 }
 0x2a7   :  { %v4120_v37 = vpop.eup %4119  ;;  %v1327_v25 = vadd.f32 1.0, %v4118_v39 }
 0x2a8   :  { %v1328_v27 = vadd.f32 1.0, %v4120_v37  ;;  %v4122_v51 = vpop.eup %4121  ;;  %v288_v37 = vadd.f32 %v10111_v42, %v5887_v21 }
 0x2a9   :  { %4123 = vrcp.f32 %v1327_v25  ;;  %v6805_v48 = vadd.f32 1.0, %v4122_v51  ;;  %v1339_v57 = vand.u32 2147483647, %v1327_v25  ;;  %v1341_v29 = vand.u32 2147483648, %v1327_v25 }
 0x2aa   :  { %4125 = vrcp.f32 %v1328_v27  ;;  %v1356_v4 = vand.u32 2147483648, %v1328_v27  ;;  %v1354_v51 = vand.u32 2147483647, %v1328_v27  ;;  %v1466_v45 = vadd.f32 %v1422_v62, %v288_v37 }
 0x2ab   :  { %4127 = vrcp.f32 %v6805_v48  ;;  %vm1335_vm7 = vweird.f32 %v1327_v25  ;;  %vm1350_vm8 = vweird.f32 %v1328_v27  ;;  %vm1340_vm10 = vcmp.eq.f32.partialorder %v1339_v57, 8.507059e+37 }
 0x2ac   :  { %4129 = vtanh.f32 %v1317_v24  ;;  %v4018_v24 = vmul.f32 -1.442695, %v1465_v33  ;;  %v1342_v32 = vor.u32 1.1754944e-38, %v1341_v29  ;;  %v1357_v62 = vor.u32 1.1754944e-38, %v1356_v4  ;;  %v1442_v33 = vpop.f32.mrf.mxu2 }
 0x2ad   :  { %vm1355_vm12 = vcmp.eq.f32.partialorder %v1354_v51, 8.507059e+37  ;;  %vm1365_vm14 = vweird.f32 %v6805_v48  ;;  %v1462_v51 = vpop.f32.mrf.mxu3 }
 0x2ae   :  { %4131 = vpow2.f32 %v4018_v24 }
 0x2af   :  { %v4124_v12 = vpop.eup %4123 }
 0x2b0   :  { %v4126_v46 = vpop.eup %4125  ;;  %v1331_v52 = vmul.f32 %v4124_v12, %v1327_v25  ;;  %vm1336_vm5 = vweird.f32 %v4124_v12 }
 0x2b1   :  { %v1346_v39 = vmul.f32 %v4126_v46, %v1328_v27  ;;  %vm1351_vm6 = vweird.f32 %v4126_v46  ;;  %v4128_v42 = vpop.eup %4127  ;;  %vm1337_vm9 = vmor %vm1335_vm7, %vm1336_vm5 }
 0x2b2   :  { %v1332_v56 = vsub.f32 1.0, %v1331_v52  ;;  %v1361_v21 = vmul.f32 %v4128_v42, %v6805_v48  ;;  %v4130_v36 = vpop.eup %4129  ;;  %vm1352_vm11 = vmor %vm1350_vm8, %vm1351_vm6  ;;  %vm1366_vm13 = vweird.f32 %v4128_v42 }
 0x2b3   :  { %v1347_v1 = vsub.f32 1.0, %v1346_v39  ;;  %v4019_v39 = vmul.f32 -1.442695, %v1466_v45  ;;  %vm1367_vm15 = vmor %vm1365_vm14, %vm1366_vm13 }
 0x2b4   :  { %v1333_v41 = vmul.f32 %v4124_v12, %v1332_v56  ;;  %v1362_v18 = vsub.f32 1.0, %v1361_v21  ;;  %v4132_v29 = vpop.eup %4131 }
 0x2b5   :  { %v1348_v22 = vmul.f32 %v4126_v46, %v1347_v1  ;;  %4133 = vpow2.f32 %v4019_v39  ;;  %v1467_v1 = vadd.f32 %v1442_v33, %v329_v44  ;;  %v6820_v21 = vadd.f32 1.0, %v4132_v29 }
 0x2b6   :  { %v1334_v52 = vadd.f32 %v4124_v12, %v1333_v41  ;;  %v1363_v35 = vmul.f32 %v4128_v42, %v1362_v18 }
 0x2b7   :  { %v1349_v56 = vadd.f32 %v4126_v46, %v1348_v22  ;;  %v4020_v22 = vmul.f32 -1.442695, %v1467_v1  ;;  %v1490_v1 = vand.u32 2147483647, %v6820_v21  ;;  %vm1486_vm3 = vweird.f32 %v6820_v21 }
 0x2b8   :  { %v1338_v43 = vsel %vm1337_vm9, %v4124_v12, %v1334_v52  ;;  %v1364_v40 = vadd.f32 %v4128_v42, %v1363_v35  ;;  %v10113_v52 = vld [vmem:[#allocation115_spill] sm:$0xff] }
 0x2b9   :  { %v1343_v37 = vsel %vm1340_vm10, %v1342_v32, %v1338_v43  ;;  %v1353_v25 = vsel %vm1352_vm11, %v4126_v46, %v1349_v56  ;;  %v1371_v32 = vand.u32 2147483648, %v6805_v48  ;;  %v370_v24 = vadd.f32 %v10113_v52, %v5947_v53  ;;  %v10133_v52 = vld [vmem:[#allocation48_spill] sm:$0xff] }
 0x2ba   :  { %v1358_v27 = vsel %vm1355_vm12, %v1357_v62, %v1353_v25  ;;  %v1377_v41 = vmul.f32 %v4130_v36, %v1343_v37  ;;  %v1368_v36 = vsel %vm1367_vm15, %v4128_v42, %v1364_v40  ;;  %vm1491_vm7 = vcmp.eq.f32.partialorder %v1490_v1, 8.507059e+37  ;;  %v10149_v1 = vld [vmem:[#allocation64_spill] sm:$0xff] }
 0x2bb   :  { %v1376_v45 = vmul.f32 %v1358_v27, %v6186_v31  ;;  %v4134_v12 = vpop.eup %4133  ;;  %v1369_v31 = vand.u32 2147483647, %v6805_v48  ;;  %v1372_v4 = vor.u32 1.1754944e-38, %v1371_v32  ;;  %v1468_v48 = vadd.f32 %v1462_v51, %v370_v24  ;;  %v10126_v32 = vld [vmem:[#allocation41_spill] sm:$0xff]  ;;  %v10131_v51 = vld [vmem:[#allocation46_spill] sm:$0xff] }
 0x2bc   :  { %v6823_v46 = vadd.f32 1.0, %v4134_v12  ;;  %v10134_v24 = vld [vmem:[#allocation49_spill] sm:$0xff] }
 0x2bd   :  { %v6817_v57 = vadd.f32 %v1377_v41, %v1376_v45  ;;  %vm1370_vm0 = vcmp.eq.f32.partialorder %v1369_v31, 8.507059e+37  ;;  %v1492_v41 = vand.u32 2147483648, %v6820_v21  ;;  %v10128_v31 = vld [vmem:[#allocation43_spill] sm:$0xff] }
 0x2be   :  { %v1373_v39 = vsel %vm1370_vm0, %v1372_v4, %v1368_v36  ;;  %v1507_v33 = vand.u32 2147483648, %v6823_v46  ;;  %vm1501_vm4 = vweird.f32 %v6823_v46  ;;  %v10129_v36 = vld [vmem:[#allocation44_spill] sm:$0xff]  ;;  %v10130_v4 = vld [vmem:[#allocation45_spill] sm:$0xff] }
 0x2bf   :  { %4135 = vtanh.f32 %v6817_v57 }
 0x2c0   :  { %4137 = vpow2.f32 %v4020_v22 }
 0x2c1   :  { %4139 = vrcp.f32 %v6820_v21 }
 0x2c2   :  { %4141 = vrcp.f32 %v6823_v46 }
 0x2c5   :  { %v4136_v44 = vpop.eup %4135 }
 0x2c6   :  { %v4138_v56 = vpop.eup %4137  ;;  %v1380_v62 = vmul.f32 %v4136_v44, %v1373_v39  ;;  %v10132_v44 = vld [vmem:[#allocation47_spill] sm:$0xff]  ;;  %v10135_v39 = vld [vmem:[#allocation50_spill] sm:$0xff] }
 0x2c7   :  { %v4140_v43 = vpop.eup %4139  ;;  %v6831_v18 = vadd.f32 1.0, %v4138_v56  ;;  %v10136_v56 = vld [vmem:[#allocation51_spill] sm:$0xff] }
 0x2c8   :  { %v4142_v37 = vpop.eup %4141  ;;  %v1482_v25 = vmul.f32 %v4140_v43, %v6820_v21  ;;  %1548 = vmatmul.f32.vlgmr.msra.gmra.mxu0 %v1380_v62  ;;  %1568 = vmatmul.f32.vlgmr.msra.gmra.mxu1 %v1380_v62  ;;  %vm1487_vm1 = vweird.f32 %v4140_v43  ;;  %v10125_v21 = vld [vmem:[#allocation40_spill] sm:$0xff] }
 0x2c9   :  { %v1497_v40 = vmul.f32 %v4142_v37, %v6823_v46  ;;  %4143 = vrcp.f32 %v6831_v18  ;;  %1588 = vmatmul.f32.vlgmr.msra.gmra.mxu2 %v1380_v62  ;;  %1608 = vmatmul.f32.vlgmr.msra.gmra.mxu3 %v1380_v62  ;;  %vm1502_vm2 = vweird.f32 %v4142_v37  ;;  %vm1488_vm5 = vmor %vm1486_vm3, %vm1487_vm1  ;;  %vm1516_vm10 = vweird.f32 %v6831_v18  ;;  %v10137_v62 = vld [vmem:[#allocation52_spill] sm:$0xff] }
 0x2ca   :  { %v1483_v42 = vsub.f32 1.0, %v1482_v25  ;;  %1763 = vmatpush.msra.mxu0 %v6210_v47  ;;  %1783 = vmatpush.msra.mxu1 %v6213_v23  ;;  %4145 = vtanh.f32 %v1468_v48  ;;  %v1505_v23 = vand.u32 2147483647, %v6823_v46  ;;  %vm1503_vm6 = vmor %vm1501_vm4, %vm1502_vm2  ;;  %v10127_v46 = vld [vmem:[#allocation42_spill] sm:$0xff]  ;;  %v10140_v48 = vld [vmem:[#allocation55_spill] sm:$0xff] }
 0x2cb   :  { %v1498_v27 = vsub.f32 1.0, %v1497_v40  ;;  %1803 = vmatpush.msra.mxu2 %v6220_v49  ;;  %1823 = vmatpush.msra.mxu3 %v6223_v50  ;;  %v10142_v25 = vld [vmem:[#allocation57_spill] sm:$0xff]  ;;  %v10143_v40 = vld [vmem:[#allocation58_spill] sm:$0xff] }
 0x2cc   :  { %v1484_v45 = vmul.f32 %v4140_v43, %v1483_v42  ;;  %1764 = vmatpush.msra.mxu0 %v6228_v54  ;;  %1784 = vmatpush.msra.mxu1 %v6231_v55  ;;  %v1493_v54 = vor.u32 1.1754944e-38, %v1492_v41  ;;  %vm1506_vm8 = vcmp.eq.f32.partialorder %v1505_v23, 8.507059e+37  ;;  %v10144_v42 = vld [vmem:[#allocation59_spill] sm:$0xff]  ;;  %v10146_v41 = vld [vmem:[#allocation61_spill] sm:$0xff]  ;;  %v10151_v23 = vld [vmem:[#allocation66_spill] sm:$0xff] }
 0x2cd   :  { %v1499_v47 = vmul.f32 %v4142_v37, %v1498_v27  ;;  %1804 = vmatpush.msra.mxu2 %v6234_v59  ;;  %1824 = vmatpush.msra.mxu3 %v6237_v61  ;;  %v1508_v59 = vor.u32 1.1754944e-38, %v1507_v33  ;;  %v10145_v27 = vld [vmem:[#allocation60_spill] sm:$0xff]  ;;  %v10147_v33 = vld [vmem:[#allocation62_spill] sm:$0xff] }
 0x2ce   :  { %v1485_v49 = vadd.f32 %v4140_v43, %v1484_v45  ;;  %1765 = vmatpush.msra.mxu0 %v6240_v63  ;;  %1785 = vmatpush.msra.mxu1 %v6243_v0  ;;  %v10148_v45 = vld [vmem:[#allocation63_spill] sm:$0xff] }
 0x2cf   :  { %v4144_v50 = vpop.eup %4143  ;;  %v1500_v55 = vadd.f32 %v4142_v37, %v1499_v47  ;;  %1805 = vmatpush.msra.mxu2 %v6246_v60  ;;  %1825 = vmatpush.msra.mxu3 %v6249_v3  ;;  %v10150_v47 = vld [vmem:[#allocation65_spill] sm:$0xff] }
 0x2d0   :  { %v1512_v61 = vmul.f32 %v4144_v50, %v6831_v18  ;;  %v1489_v35 = vsel %vm1488_vm5, %v4140_v43, %v1485_v49  ;;  %1766 = vmatpush.msra.mxu0 %v6254_v5  ;;  %1786 = vmatpush.msra.mxu1 %v6257_v6  ;;  %v4146_v63 = vpop.eup %4145  ;;  %vm1517_vm9 = vweird.f32 %v4144_v50  ;;  %v10138_v43 = vld [vmem:[#allocation53_spill] sm:$0xff]  ;;  %v10152_v49 = vld [vmem:[#allocation67_spill] sm:$0xff] }
 0x2d1   :  { %v1494_v0 = vsel %vm1491_vm7, %v1493_v54, %v1489_v35  ;;  %v1504_v22 = vsel %vm1503_vm6, %v4142_v37, %v1500_v55  ;;  %1806 = vmatpush.msra.mxu2 %v6260_v2  ;;  %1826 = vmatpush.msra.mxu3 %v6263_v8  ;;  %v1520_v8 = vand.u32 2147483647, %v6831_v18  ;;  %vm1518_vm11 = vmor %vm1516_vm10, %vm1517_vm9  ;;  %v10141_v37 = vld [vmem:[#allocation56_spill] sm:$0xff]  ;;  %v10154_v54 = vld [vmem:[#allocation69_spill] sm:$0xff] }
 0x2d2   :  { %v1513_v60 = vsub.f32 1.0, %v1512_v61  ;;  %v1509_v3 = vsel %vm1506_vm8, %v1508_v59, %v1504_v22  ;;  %v1528_v29 = vmul.f32 %v4146_v63, %v1494_v0  ;;  %1767 = vmatpush.msra.mxu0 %v6270_v9  ;;  %1787 = vmatpush.msra.mxu1 %v6273_v11  ;;  %v10114_v11 = vld [vmem:[#allocation29_spill] sm:$0xff]  ;;  %v10155_v55 = vld [vmem:[#allocation70_spill] sm:$0xff]  ;;  %v10156_v59 = vld [vmem:[#allocation71_spill] sm:$0xff] }
 0x2d3   :  { %v1527_v12 = vmul.f32 %v1509_v3, %v6204_v38  ;;  %1807 = vmatpush.msra.mxu2 %v6276_v13  ;;  %1827 = vmatpush.msra.mxu3 %v6279_v14  ;;  %v1522_v38 = vand.u32 2147483648, %v6831_v18  ;;  %v10115_v13 = vld [vmem:[#allocation30_spill] sm:$0xff]  ;;  %vm1521_vm12 = vcmp.eq.f32.partialorder %v1520_v8, 8.507059e+37  ;;  %v10157_v61 = vld [vmem:[#allocation72_spill] sm:$0xff]  ;;  %v10158_v35 = vld [vmem:[#allocation73_spill] sm:$0xff] }
 0x2d4   :  { %v1514_v5 = vmul.f32 %v4144_v50, %v1513_v60  ;;  %1768 = vmatpush.msra.mxu0 %v6282_v15  ;;  %1788 = vmatpush.msra.mxu1 %v6285_v16  ;;  %v10116_v15 = vld [vmem:[#allocation31_spill] sm:$0xff]  ;;  %v10117_v16 = vld [vmem:[#allocation32_spill] sm:$0xff]  ;;  %v10139_v18 = vld [vmem:[#allocation54_spill] sm:$0xff] }
 0x2d5   :  { %v6868_v6 = vadd.f32 %v1528_v29, %v1527_v12  ;;  %1808 = vmatpush.msra.mxu2 %v6288_v17  ;;  %1828 = vmatpush.msra.mxu3 %v6291_v19  ;;  %v1523_v14 = vor.u32 1.1754944e-38, %v1522_v38  ;;  %v10118_v17 = vld [vmem:[#allocation33_spill] sm:$0xff]  ;;  %v10119_v19 = vld [vmem:[#allocation34_spill] sm:$0xff]  ;;  %v10160_v0 = vld [vmem:[#allocation75_spill] sm:$0xff] }
 0x2d6   :  { %v1515_v2 = vadd.f32 %v4144_v50, %v1514_v5  ;;  %1769 = vmatpush.msra.mxu0 %v6294_v26  ;;  %1789 = vmatpush.msra.mxu1 %v6297_v28  ;;  %v10159_v63 = vld [vmem:[#allocation74_spill] sm:$0xff]  ;;  %v10162_v60 = vld [vmem:[#allocation79_spill] sm:$0xff]  ;;  %v10163_v3 = vld [vmem:[#allocation80_spill] sm:$0xff] }
 0x2d7   :  { %4147 = vtanh.f32 %v6868_v6  ;;  %1809 = vmatpush.msra.mxu2 %v6300_v10  ;;  %1829 = vmatpush.msra.mxu3 %v6303_v30  ;;  %v10120_v10 = vld [vmem:[#allocation35_spill] sm:$0xff]  ;;  %v10121_v30 = vld [vmem:[#allocation36_spill] sm:$0xff]  ;;  %v10161_v22 = vld [vmem:[#allocation78_spill] sm:$0xff] }
 0x2d8   :  { %1770 = vmatpush.msra.mxu0 %v6306_v58  ;;  %1790 = vmatpush.msra.mxu1 %v6309_v20  ;;  %v1519_v9 = vsel %vm1518_vm11, %v4144_v50, %v1515_v2  ;;  %v10122_v20 = vld [vmem:[#allocation37_spill] sm:$0xff]  ;;  %v10153_v50 = vld [vmem:[#allocation68_spill] sm:$0xff]  ;;  %v10165_v12 = vld [vmem:[#allocation82_spill] sm:$0xff] }
 0x2d9   :  { %1810 = vmatpush.msra.mxu2 %v6312_v34  ;;  %1830 = vmatpush.msra.mxu3 %v6315_v7  ;;  %v1524_v28 = vsel %vm1521_vm12, %v1523_v14, %v1519_v9  ;;  %v10123_v34 = vld [vmem:[#allocation38_spill] sm:$0xff]  ;;  %v10124_v7 = vld [vmem:[#allocation39_spill] sm:$0xff]  ;;  %v10164_v29 = vld [vmem:[#allocation81_spill] sm:$0xff] }
 0x2da   :  { %1771 = vmatpush.msra.mxu0 %v10114_v11  ;;  %1791 = vmatpush.msra.mxu1 %v10115_v13  ;;  %v10166_v5 = vld [vmem:[#allocation83_spill] sm:$0xff]  ;;  %v10167_v2 = vld [vmem:[#allocation84_spill] sm:$0xff]  ;;  %v10168_v38 = vld [vmem:[#allocation85_spill] sm:$0xff] }
 0x2db   :  { %1811 = vmatpush.msra.mxu2 %v10116_v15  ;;  %1831 = vmatpush.msra.mxu3 %v10117_v16  ;;  %v10169_v8 = vld [vmem:[#allocation86_spill] sm:$0xff]  ;;  %v10170_v9 = vld [vmem:[#allocation87_spill] sm:$0xff]  ;;  %v10171_v11 = vld [vmem:[#allocation88_spill] sm:$0xff] }
 0x2dc   :  { %1772 = vmatpush.msra.mxu0 %v10118_v17  ;;  %1792 = vmatpush.msra.mxu1 %v10119_v19  ;;  %v10172_v13 = vld [vmem:[#allocation89_spill] sm:$0xff]  ;;  %v10173_v14 = vld [vmem:[#allocation90_spill] sm:$0xff]  ;;  %v10176_v17 = vld [vmem:[#allocation95_spill] sm:$0xff] }
 0x2dd   :  { %v4148_v26 = vpop.eup %4147  ;;  %1812 = vmatpush.msra.mxu2 %v10120_v10  ;;  %1832 = vmatpush.msra.mxu3 %v10121_v30  ;;  %v10174_v15 = vld [vmem:[#allocation93_spill] sm:$0xff]  ;;  %v10175_v16 = vld [vmem:[#allocation94_spill] sm:$0xff] }
 0x2de   :  { %v1531_v58 = vmul.f32 %v4148_v26, %v1524_v28  ;;  %1773 = vmatpush.msra.mxu0 %v10122_v20  ;;  %1793 = vmatpush.msra.mxu1 %v10123_v34  ;;  %v10177_v19 = vld [vmem:[#allocation98_spill] sm:$0xff]  ;;  %v10178_v26 = vld [vmem:[#allocation99_spill] sm:$0xff]  ;;  %v10179_v28 = vld [vmem:[#allocation100_spill] sm:$0xff] }
 0x2df   :  { %1813 = vmatpush.msra.mxu2 %v10124_v7  ;;  %1833 = vmatpush.msra.mxu3 %v10125_v21  ;;  %v10180_v10 = vld [vmem:[#allocation101_spill] sm:$0xff]  ;;  %v10181_v30 = vld [vmem:[#allocation102_spill] sm:$0xff]  ;;  %v10183_v20 = vld [vmem:[#allocation104_spill] sm:$0xff] }
 0x2e0   :  { %1628 = vmatmul.f32.vlgmr.msrb.gmra.mxu0 %v1531_v58  ;;  %1648 = vmatmul.f32.vlgmr.msrb.gmra.mxu1 %v1531_v58  ;;  %v10184_v34 = vld [vmem:[#allocation105_spill] sm:$0xff]  ;;  %v10185_v7 = vld [vmem:[#allocation106_spill] sm:$0xff]  ;;  %v10186_v21 = vld [vmem:[#allocation107_spill] sm:$0xff] }
 0x2e1   :  { %1668 = vmatmul.f32.vlgmr.msrb.gmra.mxu2 %v1531_v58  ;;  %1688 = vmatmul.f32.vlgmr.msrb.gmra.mxu3 %v1531_v58 }
 0x2e2   :  { %1774 = vmatpush.msra.mxu0 %v10126_v32  ;;  %1794 = vmatpush.msra.mxu1 %v10127_v46  ;;  %v10187_v32 = vld [vmem:[#allocation108_spill] sm:$0xff]  ;;  %v10188_v46 = vld [vmem:[#allocation109_spill] sm:$0xff] }
 0x2e3   :  { %1814 = vmatpush.msra.mxu2 %v10128_v31  ;;  %1834 = vmatpush.msra.mxu3 %v10129_v36  ;;  %v10189_v31 = vld [vmem:[#allocation110_spill] sm:$0xff]  ;;  %v10190_v36 = vld [vmem:[#allocation111_spill] sm:$0xff] }
 0x2e4   :  { %1775 = vmatpush.msra.mxu0 %v10130_v4  ;;  %1795 = vmatpush.msra.mxu1 %v10131_v51  ;;  %v10191_v4 = vld [vmem:[#allocation112_spill] sm:$0xff]  ;;  %v10192_v51 = vld [vmem:[#allocation113_spill] sm:$0xff] }
 0x2e5   :  { %1815 = vmatpush.msra.mxu2 %v10132_v44  ;;  %1835 = vmatpush.msra.mxu3 %v10133_v52  ;;  %v10193_v44 = vld [vmem:[#allocation116_spill] sm:$0xff]  ;;  %v10194_v52 = vld [vmem:[#allocation119_spill] sm:$0xff] }
 0x2e6   :  { %1776 = vmatpush.msra.mxu0 %v10134_v24  ;;  %1796 = vmatpush.msra.mxu1 %v10135_v39  ;;  %v10195_v24 = vld [vmem:[#allocation120_spill] sm:$0xff]  ;;  %v10196_v39 = vld [vmem:[#allocation121_spill] sm:$0xff] }
 0x2e7   :  { %1816 = vmatpush.msra.mxu2 %v10136_v56  ;;  %1836 = vmatpush.msra.mxu3 %v10137_v62  ;;  %v10197_v56 = vld [vmem:[#allocation122_spill] sm:$0xff]  ;;  %v10198_v62 = vld [vmem:[#allocation123_spill] sm:$0xff] }
 0x2e8   :  { %1777 = vmatpush.msra.mxu0 %v10138_v43  ;;  %1797 = vmatpush.msra.mxu1 %v10139_v18  ;;  %v10199_v43 = vld [vmem:[#allocation124_spill] sm:$0xff]  ;;  %v10200_v18 = vld [vmem:[#allocation125_spill] sm:$0xff] }
 0x2e9   :  { %1817 = vmatpush.msra.mxu2 %v10140_v48  ;;  %1837 = vmatpush.msra.mxu3 %v10141_v37  ;;  %v10201_v48 = vld [vmem:[#allocation126_spill] sm:$0xff]  ;;  %v10202_v37 = vld [vmem:[#allocation127_spill] sm:$0xff] }
 0x2ea   :  { %1778 = vmatpush.msra.mxu0 %v10142_v25  ;;  %1798 = vmatpush.msra.mxu1 %v10143_v40  ;;  %v10203_v25 = vld [vmem:[#allocation128_spill] sm:$0xff]  ;;  %v10204_v40 = vld [vmem:[#allocation129_spill] sm:$0xff] }
 0x2eb   :  { %1818 = vmatpush.msra.mxu2 %v10144_v42  ;;  %1838 = vmatpush.msra.mxu3 %v10145_v27  ;;  %v10205_v42 = vld [vmem:[#allocation130_spill] sm:$0xff]  ;;  %v10206_v27 = vld [vmem:[#allocation131_spill] sm:$0xff] }
 0x2ec   :  { %1779 = vmatmul.f32.vlgmr.msra.gmra.mxu0 %v1531_v58  ;;  %1799 = vmatmul.f32.vlgmr.msra.gmra.mxu1 %v1531_v58 }
 0x2ed   :  { %1819 = vmatmul.f32.vlgmr.msra.gmra.mxu2 %v1531_v58  ;;  %1839 = vmatmul.f32.vlgmr.msra.gmra.mxu3 %v1531_v58  ;;  %v10182_v58 = vld [vmem:[#allocation103_spill] sm:$0xff] }
 0x2ee   :  { %1910 = vmatpush.msrb.mxu0 %v10146_v41  ;;  %1930 = vmatpush.msrb.mxu1 %v10147_v33  ;;  %v10207_v41 = vld [vmem:[#allocation134_spill] sm:$0xff]  ;;  %v10208_v33 = vld [vmem:[#allocation137_spill] sm:$0xff] }
 0x2ef   :  { %1950 = vmatpush.msrb.mxu2 %v10148_v45  ;;  %1970 = vmatpush.msrb.mxu3 %v10149_v1  ;;  %v10209_v45 = vld [vmem:[#allocation138_spill] sm:$0xff]  ;;  %v10210_v1 = vld [vmem:[#allocation139_spill] sm:$0xff] }
 0x2f0   :  { %1911 = vmatpush.msrb.mxu0 %v10150_v47  ;;  %1931 = vmatpush.msrb.mxu1 %v10151_v23  ;;  %v10211_v47 = vld [vmem:[#allocation140_spill] sm:$0xff]  ;;  %v10212_v23 = vld [vmem:[#allocation141_spill] sm:$0xff] }
 0x2f1   :  { %1951 = vmatpush.msrb.mxu2 %v10152_v49  ;;  %1971 = vmatpush.msrb.mxu3 %v10153_v50  ;;  %v10213_v49 = vld [vmem:[#allocation142_spill] sm:$0xff]  ;;  %v10214_v50 = vld [vmem:[#allocation143_spill] sm:$0xff] }
 0x2f2   :  { %1912 = vmatpush.msrb.mxu0 %v10154_v54  ;;  %1932 = vmatpush.msrb.mxu1 %v10155_v55  ;;  %v10215_v54 = vld [vmem:[#allocation144_spill] sm:$0xff]  ;;  %v10216_v55 = vld [vmem:[#allocation145_spill] sm:$0xff] }
 0x2f3   :  { %1952 = vmatpush.msrb.mxu2 %v10156_v59  ;;  %1972 = vmatpush.msrb.mxu3 %v10157_v61  ;;  %v10217_v59 = vld [vmem:[#allocation146_spill] sm:$0xff]  ;;  %v10218_v61 = vld [vmem:[#allocation147_spill] sm:$0xff] }
 0x2f4   :  { %1913 = vmatpush.msrb.mxu0 %v10158_v35  ;;  %1933 = vmatpush.msrb.mxu1 %v10159_v63  ;;  %v10219_v35 = vld [vmem:[#allocation148_spill] sm:$0xff]  ;;  %v10220_v63 = vld [vmem:[#allocation150_spill] sm:$0xff] }
 0x2f5   :  { %1953 = vmatpush.msrb.mxu2 %v10160_v0  ;;  %1973 = vmatpush.msrb.mxu3 %v10161_v22  ;;  %v10221_v0 = vld [vmem:[#allocation151_spill] sm:$0xff]  ;;  %v10222_v22 = vld [vmem:[#allocation152_spill] sm:$0xff] }
 0x2f6   :  { %1914 = vmatpush.msrb.mxu0 %v10162_v60  ;;  %1934 = vmatpush.msrb.mxu1 %v10163_v3  ;;  %v10223_v60 = vld [vmem:[#allocation155_spill] sm:$0xff]  ;;  %v10224_v3 = vld [vmem:[#allocation157_spill] sm:$0xff] }
 0x2f7   :  { %1954 = vmatpush.msrb.mxu2 %v10164_v29  ;;  %1974 = vmatpush.msrb.mxu3 %v10165_v12  ;;  %v10225_v29 = vld [vmem:[#allocation158_spill] sm:$0xff]  ;;  %v10226_v12 = vld [vmem:[#allocation159_spill] sm:$0xff] }
 0x2f8   :  { %1915 = vmatpush.msrb.mxu0 %v10166_v5  ;;  %1935 = vmatpush.msrb.mxu1 %v10167_v2  ;;  %v10227_v5 = vld [vmem:[#allocation160_spill] sm:$0xff]  ;;  %v10228_v2 = vld [vmem:[#allocation161_spill] sm:$0xff] }
 0x2f9   :  { %1955 = vmatpush.msrb.mxu2 %v10168_v38  ;;  %1975 = vmatpush.msrb.mxu3 %v10169_v8  ;;  %v10229_v38 = vld [vmem:[#allocation162_spill] sm:$0xff]  ;;  %v10230_v8 = vld [vmem:[#allocation163_spill] sm:$0xff] }
 0x2fa   :  { %1916 = vmatpush.msrb.mxu0 %v10170_v9  ;;  %1936 = vmatpush.msrb.mxu1 %v10171_v11  ;;  %v10231_v9 = vld [vmem:[#allocation164_spill] sm:$0xff]  ;;  %v10232_v11 = vld [vmem:[#allocation165_spill] sm:$0xff] }
 0x2fb   :  { %1956 = vmatpush.msrb.mxu2 %v10172_v13  ;;  %1976 = vmatpush.msrb.mxu3 %v10173_v14  ;;  %v10233_v13 = vld [vmem:[#allocation166_spill] sm:$0xff]  ;;  %v10234_v14 = vld [vmem:[#allocation167_spill] sm:$0xff] }
 0x2fc   :  { %1917 = vmatpush.msrb.mxu0 %v10174_v15  ;;  %1937 = vmatpush.msrb.mxu1 %v10175_v16  ;;  %v10235_v15 = vld [vmem:[#allocation169_spill] sm:$0xff]  ;;  %v10236_v16 = vld [vmem:[#allocation170_spill] sm:$0xff] }
 0x2fd   :  { %1957 = vmatpush.msrb.mxu2 %v10176_v17  ;;  %1977 = vmatpush.msrb.mxu3 %v10177_v19  ;;  %v10237_v17 = vld [vmem:[#allocation171_spill] sm:$0xff]  ;;  %v10238_v19 = vld [vmem:[#allocation174_spill] sm:$0xff] }
 0x2fe   :  { %1918 = vmatpush.msrb.mxu0 %v10178_v26  ;;  %1938 = vmatpush.msrb.mxu1 %v10179_v28  ;;  %v10239_v26 = vld [vmem:[#allocation175_spill] sm:$0xff]  ;;  %v10240_v28 = vld [vmem:[#allocation176_spill] sm:$0xff] }
 0x2ff   :  { %1958 = vmatpush.msrb.mxu2 %v10180_v10  ;;  %1978 = vmatpush.msrb.mxu3 %v10181_v30  ;;  %v10241_v10 = vld [vmem:[#allocation177_spill] sm:$0xff]  ;;  %v10242_v30 = vld [vmem:[#allocation178_spill] sm:$0xff] }
 0x300   :  { %1919 = vmatpush.msrb.mxu0 %v10182_v58  ;;  %1939 = vmatpush.msrb.mxu1 %v10183_v20  ;;  %v10243_v58 = vld [vmem:[#allocation180_spill] sm:$0xff]  ;;  %v10244_v20 = vld [vmem:[#allocation181_spill] sm:$0xff] }
 0x301   :  { %1959 = vmatpush.msrb.mxu2 %v10184_v34  ;;  %1979 = vmatpush.msrb.mxu3 %v10185_v7  ;;  %v10245_v34 = vld [vmem:[#allocation182_spill] sm:$0xff]  ;;  %v10246_v7 = vld [vmem:[#allocation183_spill] sm:$0xff] }
 0x302   :  { %1920 = vmatpush.msrb.mxu0 %v10186_v21  ;;  %1940 = vmatpush.msrb.mxu1 %v10187_v32  ;;  %v10247_v21 = vld [vmem:[#allocation184_spill] sm:$0xff] }
 0x303   :  { %1960 = vmatpush.msrb.mxu2 %v10188_v46  ;;  %1980 = vmatpush.msrb.mxu3 %v10189_v31  ;;  %v10248_v32 = vld [vmem:[#allocation76_spill] sm:$0xff]  ;;  %v10249_v46 = vld [vmem:[#allocation77_spill] sm:$0xff]  ;;  %v10250_v31 = vld [vmem:[#allocation91_spill] sm:$0xff] }
 0x304   :  { %1921 = vmatpush.msrb.mxu0 %v10190_v36  ;;  %1941 = vmatpush.msrb.mxu1 %v10191_v4  ;;  %v10251_v36 = vld [vmem:[#allocation92_spill] sm:$0xff]  ;;  %v10252_v4 = vld [vmem:[#allocation194_spill] sm:$0xff] }
 0x305   :  { %1961 = vmatpush.msrb.mxu2 %v10192_v51  ;;  %1981 = vmatpush.msrb.mxu3 %v10193_v44  ;;  %v10253_v51 = vld [vmem:[#allocation195_spill] sm:$0xff]  ;;  %v10254_v44 = vld [vmem:[#allocation196_spill] sm:$0xff] }
 0x306   :  { %1922 = vmatpush.msrb.mxu0 %v10194_v52  ;;  %1942 = vmatpush.msrb.mxu1 %v10195_v24  ;;  %v10255_v52 = vld [vmem:[#allocation197_spill] sm:$0xff]  ;;  %v10256_v24 = vld [vmem:[#allocation198_spill] sm:$0xff] }
 0x307   :  { %1962 = vmatpush.msrb.mxu2 %v10196_v39  ;;  %1982 = vmatpush.msrb.mxu3 %v10197_v56  ;;  %v10257_v39 = vld [vmem:[#allocation199_spill] sm:$0xff]  ;;  %v10258_v56 = vld [vmem:[#allocation200_spill] sm:$0xff] }
 0x308   :  { %1923 = vmatpush.msrb.mxu0 %v10198_v62  ;;  %1943 = vmatpush.msrb.mxu1 %v10199_v43  ;;  %v10259_v62 = vld [vmem:[#allocation201_spill] sm:$0xff]  ;;  %v10260_v43 = vld [vmem:[#allocation202_spill] sm:$0xff] }
 0x309   :  { %1963 = vmatpush.msrb.mxu2 %v10200_v18  ;;  %1983 = vmatpush.msrb.mxu3 %v10201_v48  ;;  %v10261_v18 = vld [vmem:[#allocation203_spill] sm:$0xff]  ;;  %v10262_v48 = vld [vmem:[#allocation204_spill] sm:$0xff] }
 0x30a   :  { %1924 = vmatpush.msrb.mxu0 %v10202_v37  ;;  %1944 = vmatpush.msrb.mxu1 %v10203_v25  ;;  %v10263_v37 = vld [vmem:[#allocation205_spill] sm:$0xff]  ;;  %v10264_v25 = vld [vmem:[#allocation206_spill] sm:$0xff] }
 0x30b   :  { %1964 = vmatpush.msrb.mxu2 %v10204_v40  ;;  %1984 = vmatpush.msrb.mxu3 %v10205_v42  ;;  %v10265_v40 = vld [vmem:[#allocation207_spill] sm:$0xff]  ;;  %v10266_v42 = vld [vmem:[#allocation208_spill] sm:$0xff] }
 0x30c   :  { %1925 = vmatpush.msrb.mxu0 %v10206_v27  ;;  %1945 = vmatpush.msrb.mxu1 %v10207_v41  ;;  %v10267_v27 = vld [vmem:[#allocation209_spill] sm:$0xff]  ;;  %v10268_v41 = vld [vmem:[#allocation210_spill] sm:$0xff] }
 0x30d   :  { %1965 = vmatpush.msrb.mxu2 %v10208_v33  ;;  %1985 = vmatpush.msrb.mxu3 %v10209_v45  ;;  %v10269_v33 = vld [vmem:[#allocation211_spill] sm:$0xff]  ;;  %v10270_v45 = vld [vmem:[#allocation212_spill] sm:$0xff] }
 0x30e   :  { %1990 = vmatpush.msra.mxu0 %v10210_v1  ;;  %2010 = vmatpush.msra.mxu1 %v10211_v47  ;;  %v10271_v1 = vld [vmem:[#allocation213_spill] sm:$0xff]  ;;  %v10272_v47 = vld [vmem:[#allocation214_spill] sm:$0xff] }
 0x30f   :  { %2030 = vmatpush.msra.mxu2 %v10212_v23  ;;  %2050 = vmatpush.msra.mxu3 %v10213_v49  ;;  %v10273_v23 = vld [vmem:[#allocation215_spill] sm:$0xff] }
 0x310   :  { %1991 = vmatpush.msra.mxu0 %v10214_v50  ;;  %2011 = vmatpush.msra.mxu1 %v10215_v54 }
 0x311   :  { %2031 = vmatpush.msra.mxu2 %v10216_v55  ;;  %2051 = vmatpush.msra.mxu3 %v10217_v59 }
 0x312   :  { %1992 = vmatpush.msra.mxu0 %v10218_v61  ;;  %2012 = vmatpush.msra.mxu1 %v10219_v35 }
 0x313   :  { %2032 = vmatpush.msra.mxu2 %v10220_v63  ;;  %2052 = vmatpush.msra.mxu3 %v10221_v0  ;;  %v10274_v63 = vld [vmem:[#allocation25_spill] sm:$0xff] }
 0x314   :  { %1993 = vmatpush.msra.mxu0 %v10222_v22  ;;  %2013 = vmatpush.msra.mxu1 %v10223_v60  ;;  %v10275_v22 = vld [vmem:[#allocation26_spill] sm:$0xff] }
 0x315   :  { %2033 = vmatpush.msra.mxu2 %v10224_v3  ;;  %2053 = vmatpush.msra.mxu3 %v10225_v29 }
 0x316   :  { %1994 = vmatpush.msra.mxu0 %v10226_v12  ;;  %2014 = vmatpush.msra.mxu1 %v10227_v5 }
 0x317   :  { %2034 = vmatpush.msra.mxu2 %v10228_v2  ;;  %2054 = vmatpush.msra.mxu3 %v10229_v38  ;;  %v10276_v38 = vld [vmem:[#allocation27_spill] sm:$0xff] }
 0x318   :  { %1995 = vmatpush.msra.mxu0 %v10230_v8  ;;  %2015 = vmatpush.msra.mxu1 %v10231_v9  ;;  %v10277_v9 = vld [vmem:[#allocation188_spill] sm:$0xff] }
 0x319   :  { %2035 = vmatpush.msra.mxu2 %v10232_v11  ;;  %2055 = vmatpush.msra.mxu3 %v10233_v13  ;;  %v10278_v11 = vld [vmem:[#allocation117_spill] sm:$0xff] }
 0x31a   :  { %1996 = vmatpush.msra.mxu0 %v10234_v14  ;;  %2016 = vmatpush.msra.mxu1 %v10235_v15  ;;  %v250_v13 = vadd.f32 %v10278_v11, %v10277_v9  ;;  %v10279_v14 = vld [vmem:[#allocation189_spill] sm:$0xff]  ;;  %v10280_v15 = vld [vmem:[#allocation118_spill] sm:$0xff] }
 0x31b   :  { %2036 = vmatpush.msra.mxu2 %v10236_v16  ;;  %2056 = vmatpush.msra.mxu3 %v10237_v17  ;;  %v291_v16 = vadd.f32 %v10280_v15, %v10279_v14 }
 0x31c   :  { %1997 = vmatpush.msra.mxu0 %v10238_v19  ;;  %2017 = vmatpush.msra.mxu1 %v10239_v26 }
 0x31d   :  { %2037 = vmatpush.msra.mxu2 %v10240_v28  ;;  %2057 = vmatpush.msra.mxu3 %v10241_v10 }
 0x31e   :  { %1998 = vmatpush.msra.mxu0 %v10242_v30  ;;  %2018 = vmatpush.msra.mxu1 %v10243_v58 }
 0x31f   :  { %2038 = vmatpush.msra.mxu2 %v10244_v20  ;;  %2058 = vmatpush.msra.mxu3 %v10245_v34 }
 0x320   :  { %1999 = vmatpush.msra.mxu0 %v10246_v7  ;;  %2019 = vmatpush.msra.mxu1 %v10247_v21 }
 0x321   :  { %2039 = vmatpush.msra.mxu2 %v10248_v32  ;;  %2059 = vmatpush.msra.mxu3 %v10249_v46 }
 0x322   :  { %2000 = vmatpush.msra.mxu0 %v10250_v31  ;;  %2020 = vmatpush.msra.mxu1 %v10251_v36  ;;  %v10281_v31 = vld [vmem:[#allocation192_spill] sm:$0xff] }
 0x323   :  { %2040 = vmatpush.msra.mxu2 %v10252_v4  ;;  %2060 = vmatpush.msra.mxu3 %v10253_v51  ;;  %v10282_v36 = vld [vmem:[#allocation132_spill] sm:$0xff] }
 0x324   :  { %2001 = vmatpush.msra.mxu0 %v10254_v44  ;;  %2021 = vmatpush.msra.mxu1 %v10255_v52  ;;  %v332_v4 = vadd.f32 %v10282_v36, %v10281_v31 }
 0x325   :  { %2041 = vmatpush.msra.mxu2 %v10256_v24  ;;  %2061 = vmatpush.msra.mxu3 %v10257_v39  ;;  %v10283_v39 = vld [vmem:[#allocation28_spill] sm:$0xff] }
 0x326   :  { %2002 = vmatpush.msra.mxu0 %v10258_v56  ;;  %2022 = vmatpush.msra.mxu1 %v10259_v62 }
 0x327   :  { %2042 = vmatpush.msra.mxu2 %v10260_v43  ;;  %2062 = vmatpush.msra.mxu3 %v10261_v18 }
 0x328   :  { %2003 = vmatpush.msra.mxu0 %v10262_v48  ;;  %2023 = vmatpush.msra.mxu1 %v10263_v37 }
 0x329   :  { %2043 = vmatpush.msra.mxu2 %v10264_v25  ;;  %2063 = vmatpush.msra.mxu3 %v10265_v40 }
 0x32a   :  { %2004 = vmatpush.msra.mxu0 %v10266_v42  ;;  %2024 = vmatpush.msra.mxu1 %v10267_v27 }
 0x32b   :  { %2044 = vmatpush.msra.mxu2 %v10268_v41  ;;  %2064 = vmatpush.msra.mxu3 %v10269_v33 }
 0x32c   :  { %2005 = vmatpush.msra.mxu0 %v10270_v45  ;;  %2025 = vmatpush.msra.mxu1 %v10271_v1 }
 0x32d   :  { %2045 = vmatpush.msra.mxu2 %v10272_v47  ;;  %2065 = vmatpush.msra.mxu3 %v10273_v23 }
 0x345   :  { %v1549_v49 = vpop.f32.mrf.mxu0  ;;  %v1569_v50 = vpop.f32.mrf.mxu1 }
 0x34c   :  { %v1589_v54 = vpop.f32.mrf.mxu2  ;;  %v1609_v12 = vpop.f32.mrf.mxu3 }
 0x35d   :  { %v1629_v55 = vpop.f32.mrf.mxu0  ;;  %v1649_v59 = vpop.f32.mrf.mxu1 }
 0x35e   :  { %v1630_v61 = vadd.f32 %v1629_v55, %v1549_v49  ;;  %v1650_v35 = vadd.f32 %v1649_v59, %v1569_v50  ;;  %v10284_v59 = vld [vmem:[#allocation133_spill] sm:$0xff] }
 0x360   :  { %v1692_v0 = vadd.f32 %v1630_v61, %v10274_v63  ;;  %v1693_v60 = vadd.f32 %v1650_v35, %v10275_v22  ;;  %v373_v61 = vadd.f32 %v10284_v59, %v5947_v53 }
 0x362   :  { %v4021_v3 = vmul.f32 -1.442695, %v1692_v0  ;;  %v4022_v29 = vmul.f32 -1.442695, %v1693_v60 }
 0x364   :  { %4149 = vpow2.f32 %v4021_v3  ;;  %v1669_v5 = vpop.f32.mrf.mxu2  ;;  %v1689_v34 = vpop.f32.mrf.mxu3 }
 0x365   :  { %4151 = vpow2.f32 %v4022_v29  ;;  %v1670_v2 = vadd.f32 %v1669_v5, %v1589_v54  ;;  %v1690_v46 = vadd.f32 %v1689_v34, %v1609_v12 }
 0x367   :  { %v1694_v8 = vadd.f32 %v1670_v2, %v10276_v38  ;;  %v1695_v56 = vadd.f32 %v1690_v46, %v10283_v39 }
 0x369   :  { %v4023_v17 = vmul.f32 -1.442695, %v1694_v8  ;;  %v1780_v19 = vpop.f32.mrf.mxu0  ;;  %v1800_v26 = vpop.f32.mrf.mxu1 }
 0x36a   :  { %v4150_v28 = vpop.eup %4149  ;;  %v1843_v10 = vadd.f32 %v1780_v19, %v250_v13  ;;  %v1844_v30 = vadd.f32 %v1800_v26, %v291_v16 }
 0x36b   :  { %v4152_v58 = vpop.eup %4151  ;;  %v1705_v20 = vadd.f32 1.0, %v4150_v28  ;;  %4153 = vpow2.f32 %v4023_v17 }
 0x36c   :  { %v1706_v7 = vadd.f32 1.0, %v4152_v58  ;;  %v4024_v21 = vmul.f32 -1.442695, %v1843_v10  ;;  %v4025_v32 = vmul.f32 -1.442695, %v1844_v30 }
 0x36d   :  { %4155 = vrcp.f32 %v1705_v20  ;;  %v1717_v33 = vand.u32 2147483647, %v1705_v20  ;;  %v1719_v45 = vand.u32 2147483648, %v1705_v20  ;;  %vm1713_vm0 = vweird.f32 %v1705_v20 }
 0x36e   :  { %4157 = vrcp.f32 %v1706_v7  ;;  %v1734_v47 = vand.u32 2147483648, %v1706_v7  ;;  %v1732_v50 = vand.u32 2147483647, %v1706_v7  ;;  %vm1728_vm15 = vweird.f32 %v1706_v7 }
 0x36f   :  { %4159 = vpow2.f32 %v4024_v21  ;;  %vm1718_vm2 = vcmp.eq.f32.partialorder %v1717_v33, 8.507059e+37  ;;  %v1720_v3 = vor.u32 1.1754944e-38, %v1719_v45 }
 0x370   :  { %4161 = vpow2.f32 %v4025_v32  ;;  %v1820_v51 = vpop.f32.mrf.mxu2  ;;  %v1840_v54 = vpop.f32.mrf.mxu3  ;;  %v1735_v5 = vor.u32 1.1754944e-38, %v1734_v47  ;;  %vm1733_vm4 = vcmp.eq.f32.partialorder %v1732_v50, 8.507059e+37 }
 0x371   :  { %v4154_v44 = vpop.eup %4153  ;;  %v1845_v52 = vadd.f32 %v1820_v51, %v332_v4  ;;  %v1846_v11 = vadd.f32 %v1840_v54, %v373_v61 }
 0x372   :  { %v7053_v24 = vadd.f32 1.0, %v4154_v44 }
 0x373   :  { %v4156_v62 = vpop.eup %4155  ;;  %v4026_v43 = vmul.f32 -1.442695, %v1845_v52 }
 0x374   :  { %v4158_v18 = vpop.eup %4157  ;;  %v1709_v48 = vmul.f32 %v4156_v62, %v1705_v20  ;;  %4163 = vrcp.f32 %v7053_v24  ;;  %vm1714_vm13 = vweird.f32 %v4156_v62  ;;  %vm1743_vm5 = vweird.f32 %v7053_v24 }
 0x375   :  { %v4160_v37 = vpop.eup %4159  ;;  %v1724_v25 = vmul.f32 %v4158_v18, %v1706_v7  ;;  %4165 = vpow2.f32 %v4026_v43  ;;  %vm1729_vm14 = vweird.f32 %v4158_v18  ;;  %vm1715_vm1 = vmor %vm1713_vm0, %vm1714_vm13  ;;  %v1749_v32 = vand.u32 2147483648, %v7053_v24 }
 0x376   :  { %v4162_v40 = vpop.eup %4161  ;;  %v1710_v42 = vsub.f32 1.0, %v1709_v48  ;;  %4167 = vtanh.f32 %v1695_v56  ;;  %v7057_v27 = vadd.f32 1.0, %v4160_v37  ;;  %vm1730_vm3 = vmor %vm1728_vm15, %vm1729_vm14  ;;  %v7210_v48 = vld [vmem:[#allocation13 + $0x138] sm:$0xff] }
 0x377   :  { %v1725_v41 = vsub.f32 1.0, %v1724_v25  ;;  %v7059_v1 = vadd.f32 1.0, %v4162_v40 }
 0x378   :  { %v1711_v23 = vmul.f32 %v4156_v62, %v1710_v42  ;;  %4169 = vrcp.f32 %v7057_v27  ;;  %v1868_v21 = vand.u32 2147483647, %v7057_v27  ;;  %v1870_v36 = vand.u32 2147483648, %v7057_v27 }
 0x379   :  { %v1726_v49 = vmul.f32 %v4158_v18, %v1725_v41  ;;  %4171 = vrcp.f32 %v7059_v1  ;;  %v1885_v4 = vand.u32 2147483648, %v7059_v1  ;;  %v1883_v56 = vand.u32 2147483647, %v7059_v1 }
 0x37a   :  { %v7063_v55 = vpop.eup %4163  ;;  %v1712_v35 = vadd.f32 %v4156_v62, %v1711_v23  ;;  %vm1879_vm9 = vweird.f32 %v7059_v1  ;;  %vm1864_vm10 = vweird.f32 %v7057_v27  ;;  %vm1869_vm13 = vcmp.eq.f32.partialorder %v1868_v21, 8.507059e+37  ;;  %v7167_v21 = vld [vmem:[#allocation13 + $0x190] sm:$0xff] }
 0x37b   :  { %v4166_v0 = vpop.eup %4165  ;;  %v1739_v60 = vmul.f32 %v7063_v55, %v7053_v24  ;;  %v1727_v29 = vadd.f32 %v4158_v18, %v1726_v49  ;;  %vm1744_vm6 = vweird.f32 %v7063_v55  ;;  %v1871_v25 = vor.u32 1.1754944e-38, %v1870_v36  ;;  %v7176_v36 = vld [vmem:[#allocation13 + $0x168] sm:$0xff] }
 0x37c   :  { %v4168_v12 = vpop.eup %4167  ;;  %v1716_v2 = vsel %vm1715_vm1, %v4156_v62, %v1712_v35  ;;  %v7070_v8 = vadd.f32 1.0, %v4166_v0  ;;  %v1747_v62 = vand.u32 2147483647, %v7053_v24  ;;  %vm7097_vm11 = vmor %vm1743_vm5, %vm1744_vm6  ;;  %v1886_v41 = vor.u32 1.1754944e-38, %v1885_v4  ;;  %v7186_v4 = vld [vmem:[#allocation13 + $0x178] sm:$0xff] }
 0x37d   :  { %v1740_v13 = vsub.f32 1.0, %v1739_v60  ;;  %v1721_v15 = vsel %vm1718_vm2, %v1720_v3, %v1716_v2  ;;  %v1731_v16 = vsel %vm1730_vm3, %v4158_v18, %v1727_v29  ;;  %vm1884_vm15 = vcmp.eq.f32.partialorder %v1883_v56, 8.507059e+37  ;;  %v7112_v60 = vld [vmem:[#allocation13 + $0x1e0] sm:$0xff]  ;;  %v7120_v29 = vld [vmem:[#allocation13 + $0x1f0] sm:$0xff]  ;;  %v7198_v56 = vld [vmem:[#allocation13 + $0x158] sm:$0xff] }
 0x37e   :  { %v4170_v17 = vpop.eup %4169  ;;  %v1736_v19 = vsel %vm1733_vm4, %v1735_v5, %v1731_v16  ;;  %v1755_v26 = vmul.f32 %v4168_v12, %v1721_v15  ;;  %4173 = vrcp.f32 %v7070_v8  ;;  %vm1748_vm0 = vcmp.eq.f32.partialorder %v1747_v62, 8.507059e+37  ;;  %v7123_v12 = vld [vmem:[#allocation13 + $0x1f8] sm:$0xff]  ;;  %v7132_v2 = vld [vmem:[#allocation13 + $0x1c0] sm:$0xff] }
 0x37f   :  { %v4172_v28 = vpop.eup %4171  ;;  %v1754_v10 = vmul.f32 %v1736_v19, %v6817_v57  ;;  %v1860_v30 = vmul.f32 %v4170_v17, %v7057_v27  ;;  %4175 = vtanh.f32 %v1846_v11  ;;  %v1741_v20 = vmul.f32 %v7063_v55, %v1740_v13  ;;  %v7135_v11 = vld [vmem:[#allocation13 + $0x1c8] sm:$0xff]  ;;  %v7141_v13 = vld [vmem:[#allocation13 + $0x1d0] sm:$0xff]  ;;  %v7144_v15 = vld [vmem:[#allocation13 + $0x1d8] sm:$0xff] }
 0x380   :  { %v1875_v58 = vmul.f32 %v4172_v28, %v7059_v1  ;;  %vm1865_vm7 = vweird.f32 %v4170_v17  ;;  %vm1880_vm8 = vweird.f32 %v4172_v28  ;;  %v1750_v27 = vor.u32 1.1754944e-38, %v1749_v32  ;;  %v7150_v19 = vld [vmem:[#allocation13 + $0x1a8] sm:$0xff]  ;;  %v7170_v32 = vld [vmem:[#allocation13 + $0x198] sm:$0xff]  ;;  %v7201_v62 = vld [vmem:[#allocation13 + $0x120] sm:$0xff] }
 0x381   :  { %v7078_v34 = vadd.f32 %v1755_v26, %v1754_v10  ;;  %v1861_v7 = vsub.f32 1.0, %v1860_v30  ;;  %v1742_v57 = vadd.f32 %v7063_v55, %v1741_v20  ;;  %vm1866_vm12 = vmor %vm1864_vm10, %vm1865_vm7  ;;  %v1900_v0 = vand.u32 2147483648, %v7070_v8  ;;  %v7153_v26 = vld [vmem:[#allocation13 + $0x1b0] sm:$0xff]  ;;  %v7162_v20 = vld [vmem:[#allocation13 + $0x188] sm:$0xff] }
 0x382   :  { %v1876_v46 = vsub.f32 1.0, %v1875_v58  ;;  %vm1881_vm14 = vmor %vm1879_vm9, %vm1880_vm8  ;;  %vm1894_vm2 = vweird.f32 %v7070_v8  ;;  %v1898_v3 = vand.u32 2147483647, %v7070_v8  ;;  %v7159_v58 = vld [vmem:[#allocation13 + $0x180] sm:$0xff] }
 0x383   :  { %4177 = vtanh.f32 %v7078_v34  ;;  %v1862_v51 = vmul.f32 %v4170_v17, %v1861_v7  ;;  %v1746_v42 = vsel %vm7097_vm11, %v7063_v55, %v1742_v57  ;;  %v1901_v16 = vor.u32 1.1754944e-38, %v1900_v0  ;;  %v7183_v57 = vld [vmem:[#allocation13 + $0x170] sm:$0xff]  ;;  %v7273_v5 = vld [vmem:[#allocation13 + $0x60] sm:$0xff] }
 0x384   :  { %v7087_v44 = vpop.eup %4173  ;;  %v1877_v52 = vmul.f32 %v4172_v28, %v1876_v46  ;;  %v1751_v54 = vsel %vm1748_vm0, %v1750_v27, %v1746_v42  ;;  %vm1899_vm4 = vcmp.eq.f32.partialorder %v1898_v3, 8.507059e+37  ;;  %v7173_v46 = vld [vmem:[#allocation13 + $0x160] sm:$0xff]  ;;  %v7222_v42 = vld [vmem:[#allocation13 + $0x118] sm:$0xff]  ;;  %v7267_v0 = vld [vmem:[#allocation13 + $0x90] sm:$0xff]  ;;  %10305 = vst [vmem:[#allocation41_spill] sm:$0xff] %v7273_v5 }
 0x385   :  { %v1890_v43 = vmul.f32 %v7087_v44, %v7070_v8  ;;  %v1863_v18 = vadd.f32 %v4170_v17, %v1862_v51  ;;  %v4176_v37 = vpop.eup %4175  ;;  %vm1895_vm1 = vweird.f32 %v7087_v44  ;;  %v7189_v51 = vld [vmem:[#allocation13 + $0x140] sm:$0xff]  ;;  %v7234_v27 = vld [vmem:[#allocation13 + $0xf8] sm:$0xff]  ;;  %10303 = vst [vmem:[#allocation39_spill] sm:$0xff] %v7267_v0 }
 0x386   :  { %v1878_v40 = vadd.f32 %v4172_v28, %v1877_v52  ;;  %vm7128_vm3 = vmor %vm1894_vm2, %vm1895_vm1  ;;  %v7195_v52 = vld [vmem:[#allocation13 + $0x150] sm:$0xff]  ;;  %10292 = vst [vmem:[#allocation115_spill] sm:$0xff] %v7234_v27  ;;  %v7270_v3 = vld [vmem:[#allocation13 + $0x98] sm:$0xff] }
 0x387   :  { %v1891_v33 = vsub.f32 1.0, %v1890_v43  ;;  %v1867_v45 = vsel %vm1866_vm12, %v4170_v17, %v1863_v18  ;;  %v7147_v17 = vld [vmem:[#allocation13 + $0x1a0] sm:$0xff]  ;;  %v7204_v43 = vld [vmem:[#allocation13 + $0x128] sm:$0xff]  ;;  %v7207_v18 = vld [vmem:[#allocation13 + $0x130] sm:$0xff]  ;;  %10304 = vst [vmem:[#allocation40_spill] sm:$0xff] %v7270_v3 }
 0x388   :  { %v1872_v1 = vsel %vm1869_vm13, %v1871_v25, %v1867_v45  ;;  %v1882_v24 = vsel %vm1881_vm14, %v4172_v28, %v1878_v40  ;;  %v7156_v28 = vld [vmem:[#allocation13 + $0x1b8] sm:$0xff]  ;;  %v7216_v25 = vld [vmem:[#allocation13 + $0x108] sm:$0xff]  ;;  %v7219_v40 = vld [vmem:[#allocation13 + $0x110] sm:$0xff] }
 0x389   :  { %v4178_v47 = vpop.eup %4177  ;;  %v1892_v23 = vmul.f32 %v7087_v44, %v1891_v33  ;;  %v1887_v49 = vsel %vm1884_vm15, %v1886_v41, %v1882_v24  ;;  %v1906_v50 = vmul.f32 %v4176_v37, %v1872_v1  ;;  %v7213_v37 = vld [vmem:[#allocation13 + $0x100] sm:$0xff]  ;;  %v7228_v33 = vld [vmem:[#allocation13 + $0xe8] sm:$0xff]  ;;  %v7231_v45 = vld [vmem:[#allocation13 + $0xf0] sm:$0xff] }
 0x38a   :  { %v1905_v59 = vmul.f32 %v1887_v49, %v6868_v6  ;;  %v1758_v61 = vmul.f32 %v4178_v47, %v1751_v54  ;;  %v7115_v6 = vld [vmem:[#allocation13 + $0x1e8] sm:$0xff]  ;;  %v7225_v41 = vld [vmem:[#allocation13 + $0xe0] sm:$0xff]  ;;  %10290 = vst [vmem:[#allocation97_spill] sm:$0xff] %v7228_v33  ;;  %v7243_v47 = vld [vmem:[#allocation13 + $0xd0] sm:$0xff] }
 0x38b   :  { %v1893_v55 = vadd.f32 %v7087_v44, %v1892_v23  ;;  %10289 = vst [vmem:[#allocation96_spill] sm:$0xff] %v7225_v41  ;;  %v7237_v1 = vld [vmem:[#allocation13 + $0xc0] sm:$0xff]  ;;  %v7240_v24 = vld [vmem:[#allocation13 + $0xc8] sm:$0xff]  ;;  %v7246_v23 = vld [vmem:[#allocation13 + $0xd8] sm:$0xff] }
 0x38c   :  { %v7106_v35 = vadd.f32 %v1906_v50, %v1905_v59  ;;  %1926 = vmatmul.f32.vlgmr.msrb.gmra.mxu0 %v1758_v61  ;;  %1946 = vmatmul.f32.vlgmr.msrb.gmra.mxu1 %v1758_v61  ;;  %10291 = vst [vmem:[#allocation114_spill] sm:$0xff] %v7231_v45  ;;  %v7249_v49 = vld [vmem:[#allocation13 + $0xa0] sm:$0xff]  ;;  %v7252_v50 = vld [vmem:[#allocation13 + $0xa8] sm:$0xff]  ;;  %v7255_v54 = vld [vmem:[#allocation13 + $0xb0] sm:$0xff] }
 0x38d   :  { %1966 = vmatmul.f32.vlgmr.msrb.gmra.mxu2 %v1758_v61  ;;  %1986 = vmatmul.f32.vlgmr.msrb.gmra.mxu3 %v1758_v61  ;;  %v1897_v8 = vsel %vm7128_vm3, %v7087_v44, %v1893_v55  ;;  %v7192_v44 = vld [vmem:[#allocation13 + $0x148] sm:$0xff]  ;;  %10293 = vst [vmem:[#allocation29_spill] sm:$0xff] %v7237_v1  ;;  %v7258_v59 = vld [vmem:[#allocation13 + $0xb8] sm:$0xff]  ;;  %v7261_v61 = vld [vmem:[#allocation13 + $0x80] sm:$0xff] }
 0x38e   :  { %4179 = vtanh.f32 %v7106_v35  ;;  %2141 = vmatpush.msrb.mxu0 %v7112_v60  ;;  %2161 = vmatpush.msrb.mxu1 %v7115_v6  ;;  %v1902_v30 = vsel %vm1899_vm4, %v1901_v16, %v1897_v8  ;;  %10294 = vst [vmem:[#allocation30_spill] sm:$0xff] %v7240_v24  ;;  %v7264_v55 = vld [vmem:[#allocation13 + $0x88] sm:$0xff]  ;;  %v7279_v16 = vld [vmem:[#allocation13 + $0x70] sm:$0xff] }
 0x38f   :  { %2181 = vmatpush.msrb.mxu2 %v7120_v29  ;;  %2201 = vmatpush.msrb.mxu3 %v7123_v12  ;;  %10295 = vst [vmem:[#allocation31_spill] sm:$0xff] %v7243_v47  ;;  %v7276_v8 = vld [vmem:[#allocation13 + $0x68] sm:$0xff] }
 0x390   :  { %2142 = vmatpush.msrb.mxu0 %v7132_v2  ;;  %2162 = vmatpush.msrb.mxu1 %v7135_v11  ;;  %10296 = vst [vmem:[#allocation32_spill] sm:$0xff] %v7246_v23 }
 0x391   :  { %2182 = vmatpush.msrb.mxu2 %v7141_v13  ;;  %2202 = vmatpush.msrb.mxu3 %v7144_v15  ;;  %10297 = vst [vmem:[#allocation33_spill] sm:$0xff] %v7249_v49 }
 0x392   :  { %2143 = vmatpush.msrb.mxu0 %v7147_v17  ;;  %2163 = vmatpush.msrb.mxu1 %v7150_v19  ;;  %10298 = vst [vmem:[#allocation34_spill] sm:$0xff] %v7252_v50 }
 0x393   :  { %2183 = vmatpush.msrb.mxu2 %v7153_v26  ;;  %2203 = vmatpush.msrb.mxu3 %v7156_v28  ;;  %10299 = vst [vmem:[#allocation35_spill] sm:$0xff] %v7255_v54 }
 0x394   :  { %v4180_v10 = vpop.eup %4179  ;;  %2144 = vmatpush.msrb.mxu0 %v7159_v58  ;;  %2164 = vmatpush.msrb.mxu1 %v7162_v20  ;;  %10300 = vst [vmem:[#allocation36_spill] sm:$0xff] %v7258_v59 }
 0x395   :  { %v7165_v7 = vmul.f32 %v4180_v10, %v1902_v30  ;;  %2184 = vmatpush.msrb.mxu2 %v7167_v21  ;;  %2204 = vmatpush.msrb.mxu3 %v7170_v32  ;;  %10301 = vst [vmem:[#allocation37_spill] sm:$0xff] %v7261_v61  ;;  %v7282_v10 = vld [vmem:[#allocation13 + $0x78] sm:$0xff]  ;;  %v7285_v30 = vld [vmem:[#allocation13 + $0x40] sm:$0xff] }
 0x396   :  { %2145 = vmatpush.msrb.mxu0 %v7173_v46  ;;  %2165 = vmatpush.msrb.mxu1 %v7176_v36  ;;  %10302 = vst [vmem:[#allocation38_spill] sm:$0xff] %v7264_v55 }
 0x397   :  { %2006 = vmatmul.f32.vlgmr.msra.gmra.mxu0 %v7165_v7  ;;  %2026 = vmatmul.f32.vlgmr.msra.gmra.mxu1 %v7165_v7  ;;  %10306 = vst [vmem:[#allocation42_spill] sm:$0xff] %v7276_v8 }
 0x398   :  { %2046 = vmatmul.f32.vlgmr.msra.gmra.mxu2 %v7165_v7  ;;  %2066 = vmatmul.f32.vlgmr.msra.gmra.mxu3 %v7165_v7  ;;  %10307 = vst [vmem:[#allocation43_spill] sm:$0xff] %v7279_v16 }
 0x399   :  { %2185 = vmatpush.msrb.mxu2 %v7183_v57  ;;  %2205 = vmatpush.msrb.mxu3 %v7186_v4  ;;  %10308 = vst [vmem:[#allocation44_spill] sm:$0xff] %v7282_v10 }
 0x39a   :  { %2146 = vmatpush.msrb.mxu0 %v7189_v51  ;;  %2166 = vmatpush.msrb.mxu1 %v7192_v44  ;;  %10309 = vst [vmem:[#allocation45_spill] sm:$0xff] %v7285_v30 }
 0x39b   :  { %2186 = vmatpush.msrb.mxu2 %v7195_v52  ;;  %2206 = vmatpush.msrb.mxu3 %v7198_v56 }
 0x39c   :  { %2147 = vmatpush.msrb.mxu0 %v7201_v62  ;;  %2167 = vmatpush.msrb.mxu1 %v7204_v43 }
 0x39d   :  { %2187 = vmatpush.msrb.mxu2 %v7207_v18  ;;  %2207 = vmatpush.msrb.mxu3 %v7210_v48 }
 0x39e   :  { %2148 = vmatpush.msrb.mxu0 %v7213_v37  ;;  %2168 = vmatpush.msrb.mxu1 %v7216_v25 }
 0x39f   :  { %2188 = vmatpush.msrb.mxu2 %v7219_v40  ;;  %2208 = vmatpush.msrb.mxu3 %v7222_v42 }
 0x3a0   :  { %2149 = vmatpush.msrb.mxu0 %v7225_v41  ;;  %2169 = vmatpush.msrb.mxu1 %v7228_v33 }
 0x3a1   :  { %2189 = vmatpush.msrb.mxu2 %v7231_v45  ;;  %2209 = vmatpush.msrb.mxu3 %v7234_v27 }
 0x3a2   :  { %2150 = vmatpush.msrb.mxu0 %v7237_v1  ;;  %2170 = vmatpush.msrb.mxu1 %v7240_v24 }
 0x3a3   :  { %2190 = vmatpush.msrb.mxu2 %v7243_v47  ;;  %2210 = vmatpush.msrb.mxu3 %v7246_v23 }
 0x3a4   :  { %2151 = vmatpush.msrb.mxu0 %v7249_v49  ;;  %2171 = vmatpush.msrb.mxu1 %v7252_v50 }
 0x3a5   :  { %2191 = vmatpush.msrb.mxu2 %v7255_v54  ;;  %2211 = vmatpush.msrb.mxu3 %v7258_v59 }
 0x3a6   :  { %2152 = vmatpush.msrb.mxu0 %v7261_v61  ;;  %2172 = vmatpush.msrb.mxu1 %v7264_v55 }
 0x3a7   :  { %2192 = vmatpush.msrb.mxu2 %v7267_v0  ;;  %2212 = vmatpush.msrb.mxu3 %v7270_v3  ;;  %v7288_v3 = vld [vmem:[#allocation13 + $0x48] sm:$0xff] }
 0x3a8   :  { %2153 = vmatpush.msrb.mxu0 %v7273_v5  ;;  %2173 = vmatpush.msrb.mxu1 %v7276_v8  ;;  %10310 = vst [vmem:[#allocation46_spill] sm:$0xff] %v7288_v3  ;;  %v7291_v5 = vld [vmem:[#allocation13 + $0x50] sm:$0xff]  ;;  %v7294_v8 = vld [vmem:[#allocation13 + $0x58] sm:$0xff] }
 0x3a9   :  { %2193 = vmatpush.msrb.mxu2 %v7279_v16  ;;  %2213 = vmatpush.msrb.mxu3 %v7282_v10  ;;  %10311 = vst [vmem:[#allocation47_spill] sm:$0xff] %v7291_v5  ;;  %v7297_v16 = vld [vmem:[#allocation13 + $0x20] sm:$0xff]  ;;  %v7300_v10 = vld [vmem:[#allocation13 + $0x28] sm:$0xff] }
 0x3aa   :  { %2154 = vmatpush.msrb.mxu0 %v7285_v30  ;;  %2174 = vmatpush.msrb.mxu1 %v7288_v3  ;;  %10312 = vst [vmem:[#allocation48_spill] sm:$0xff] %v7294_v8  ;;  %v7303_v30 = vld [vmem:[#allocation13 + $0x30] sm:$0xff]  ;;  %v7306_v3 = vld [vmem:[#allocation13 + $0x38] sm:$0xff] }
 0x3ab   :  { %2194 = vmatpush.msrb.mxu2 %v7291_v5  ;;  %2214 = vmatpush.msrb.mxu3 %v7294_v8  ;;  %10313 = vst [vmem:[#allocation49_spill] sm:$0xff] %v7297_v16  ;;  %v7309_v5 = vld [vmem:[#allocation13] sm:$0xff]  ;;  %v7312_v8 = vld [vmem:[#allocation13 + $0x8] sm:$0xff] }
 0x3ac   :  { %2155 = vmatpush.msrb.mxu0 %v7297_v16  ;;  %10314 = vst [vmem:[#allocation50_spill] sm:$0xff] %v7300_v10  ;;  %2175 = vmatpush.msrb.mxu1 %v7300_v10  ;;  %v7315_v16 = vld [vmem:[#allocation13 + $0x10] sm:$0xff]  ;;  %v7318_v10 = vld [vmem:[#allocation13 + $0x18] sm:$0xff] }
 0x3ad   :  { %10315 = vst [vmem:[#allocation51_spill] sm:$0xff] %v7303_v30  ;;  %2195 = vmatpush.msrb.mxu2 %v7303_v30  ;;  %2215 = vmatpush.msrb.mxu3 %v7306_v3 }
 0x3ae   :  { %10316 = vst [vmem:[#allocation52_spill] sm:$0xff] %v7306_v3  ;;  %2156 = vmatpush.msrb.mxu0 %v7309_v5  ;;  %2176 = vmatpush.msrb.mxu1 %v7312_v8  ;;  %v7337_v3 = vld [vmem:[#allocation16 + $0x1c0] sm:$0xff] }
 0x3af   :  { %10317 = vst [vmem:[#allocation53_spill] sm:$0xff] %v7309_v5  ;;  %2196 = vmatpush.msrb.mxu2 %v7315_v16  ;;  %2216 = vmatpush.msrb.mxu3 %v7318_v10  ;;  %v7325_v5 = vld [vmem:[#allocation16 + $0x1e0] sm:$0xff] }
 0x3b0   :  { %10318 = vst [vmem:[#allocation54_spill] sm:$0xff] %v7312_v8  ;;  %2157 = vmatmul.f32.vlgmr.msrb.gmra.mxu0 %v7165_v7  ;;  %2177 = vmatmul.f32.vlgmr.msrb.gmra.mxu1 %v7165_v7  ;;  %v7328_v8 = vld [vmem:[#allocation16 + $0x1e8] sm:$0xff] }
 0x3b1   :  { %10319 = vst [vmem:[#allocation55_spill] sm:$0xff] %v7315_v16  ;;  %2197 = vmatmul.f32.vlgmr.msrb.gmra.mxu2 %v7165_v7  ;;  %2217 = vmatmul.f32.vlgmr.msrb.gmra.mxu3 %v7165_v7  ;;  %v7331_v16 = vld [vmem:[#allocation16 + $0x1f0] sm:$0xff]  ;;  %v7340_v7 = vld [vmem:[#allocation16 + $0x1c8] sm:$0xff] }
 0x3b2   :  { %10320 = vst [vmem:[#allocation56_spill] sm:$0xff] %v7318_v10  ;;  %2288 = vmatpush.msra.mxu0 %v7325_v5  ;;  %2308 = vmatpush.msra.mxu1 %v7328_v8  ;;  %v7334_v10 = vld [vmem:[#allocation16 + $0x1f8] sm:$0xff] }
 0x3b3   :  { %10321 = vst [vmem:[#allocation57_spill] sm:$0xff] %v7325_v5  ;;  %2328 = vmatpush.msra.mxu2 %v7331_v16  ;;  %2348 = vmatpush.msra.mxu3 %v7334_v10  ;;  %v7343_v5 = vld [vmem:[#allocation16 + $0x1d0] sm:$0xff] }
 0x3b4   :  { %10322 = vst [vmem:[#allocation58_spill] sm:$0xff] %v7328_v8  ;;  %2289 = vmatpush.msra.mxu0 %v7337_v3  ;;  %2309 = vmatpush.msra.mxu1 %v7340_v7  ;;  %v7346_v8 = vld [vmem:[#allocation16 + $0x1d8] sm:$0xff] }
 0x3b5   :  { %10323 = vst [vmem:[#allocation59_spill] sm:$0xff] %v7331_v16  ;;  %2329 = vmatpush.msra.mxu2 %v7343_v5  ;;  %2349 = vmatpush.msra.mxu3 %v7346_v8  ;;  %v7349_v16 = vld [vmem:[#allocation16 + $0x1a0] sm:$0xff] }
 0x3b6   :  { %10324 = vst [vmem:[#allocation60_spill] sm:$0xff] %v7334_v10  ;;  %2290 = vmatpush.msra.mxu0 %v7349_v16  ;;  %v7352_v10 = vld [vmem:[#allocation16 + $0x1a8] sm:$0xff] }
 0x3b7   :  { %10325 = vst [vmem:[#allocation61_spill] sm:$0xff] %v7337_v3  ;;  %2310 = vmatpush.msra.mxu1 %v7352_v10  ;;  %v7355_v3 = vld [vmem:[#allocation16 + $0x1b0] sm:$0xff] }
 0x3b8   :  { %10326 = vst [vmem:[#allocation62_spill] sm:$0xff] %v7340_v7  ;;  %2330 = vmatpush.msra.mxu2 %v7355_v3  ;;  %v7358_v7 = vld [vmem:[#allocation16 + $0x1b8] sm:$0xff] }
 0x3b9   :  { %10327 = vst [vmem:[#allocation63_spill] sm:$0xff] %v7343_v5  ;;  %2350 = vmatpush.msra.mxu3 %v7358_v7  ;;  %v7361_v5 = vld [vmem:[#allocation16 + $0x180] sm:$0xff] }
 0x3ba   :  { %10328 = vst [vmem:[#allocation64_spill] sm:$0xff] %v7346_v8  ;;  %2291 = vmatpush.msra.mxu0 %v7361_v5  ;;  %v7364_v8 = vld [vmem:[#allocation16 + $0x188] sm:$0xff] }
 0x3bb   :  { %10329 = vst [vmem:[#allocation65_spill] sm:$0xff] %v7349_v16  ;;  %2311 = vmatpush.msra.mxu1 %v7364_v8  ;;  %v7367_v16 = vld [vmem:[#allocation16 + $0x190] sm:$0xff] }
 0x3bc   :  { %10330 = vst [vmem:[#allocation66_spill] sm:$0xff] %v7352_v10  ;;  %2331 = vmatpush.msra.mxu2 %v7367_v16  ;;  %v7370_v10 = vld [vmem:[#allocation16 + $0x198] sm:$0xff] }
 0x3bd   :  { %10331 = vst [vmem:[#allocation67_spill] sm:$0xff] %v7355_v3  ;;  %2351 = vmatpush.msra.mxu3 %v7370_v10  ;;  %v7373_v3 = vld [vmem:[#allocation16 + $0x160] sm:$0xff] }
 0x3be   :  { %10332 = vst [vmem:[#allocation68_spill] sm:$0xff] %v7358_v7  ;;  %2292 = vmatpush.msra.mxu0 %v7373_v3  ;;  %v7376_v7 = vld [vmem:[#allocation16 + $0x168] sm:$0xff] }
 0x3bf   :  { %10333 = vst [vmem:[#allocation69_spill] sm:$0xff] %v7361_v5  ;;  %2312 = vmatpush.msra.mxu1 %v7376_v7  ;;  %v7379_v5 = vld [vmem:[#allocation16 + $0x170] sm:$0xff] }
 0x3c0   :  { %10334 = vst [vmem:[#allocation70_spill] sm:$0xff] %v7364_v8  ;;  %2332 = vmatpush.msra.mxu2 %v7379_v5  ;;  %v7382_v8 = vld [vmem:[#allocation16 + $0x178] sm:$0xff] }
 0x3c1   :  { %10335 = vst [vmem:[#allocation71_spill] sm:$0xff] %v7367_v16  ;;  %2352 = vmatpush.msra.mxu3 %v7382_v8  ;;  %v7385_v16 = vld [vmem:[#allocation16 + $0x140] sm:$0xff] }
 0x3c2   :  { %10336 = vst [vmem:[#allocation72_spill] sm:$0xff] %v7370_v10  ;;  %2293 = vmatpush.msra.mxu0 %v7385_v16  ;;  %v7388_v10 = vld [vmem:[#allocation16 + $0x148] sm:$0xff] }
 0x3c3   :  { %10337 = vst [vmem:[#allocation73_spill] sm:$0xff] %v7373_v3  ;;  %2313 = vmatpush.msra.mxu1 %v7388_v10  ;;  %v7391_v3 = vld [vmem:[#allocation16 + $0x150] sm:$0xff] }
 0x3c4   :  { %10338 = vst [vmem:[#allocation74_spill] sm:$0xff] %v7376_v7  ;;  %2333 = vmatpush.msra.mxu2 %v7391_v3  ;;  %v7394_v7 = vld [vmem:[#allocation16 + $0x158] sm:$0xff] }
 0x3c5   :  { %10339 = vst [vmem:[#allocation75_spill] sm:$0xff] %v7379_v5  ;;  %2353 = vmatpush.msra.mxu3 %v7394_v7  ;;  %v7397_v5 = vld [vmem:[#allocation16 + $0x120] sm:$0xff] }
 0x3c6   :  { %10340 = vst [vmem:[#allocation78_spill] sm:$0xff] %v7382_v8  ;;  %2294 = vmatpush.msra.mxu0 %v7397_v5  ;;  %v7400_v8 = vld [vmem:[#allocation16 + $0x128] sm:$0xff] }
 0x3c7   :  { %10341 = vst [vmem:[#allocation79_spill] sm:$0xff] %v7385_v16  ;;  %2314 = vmatpush.msra.mxu1 %v7400_v8  ;;  %v7403_v16 = vld [vmem:[#allocation16 + $0x130] sm:$0xff] }
 0x3c8   :  { %10342 = vst [vmem:[#allocation80_spill] sm:$0xff] %v7388_v10  ;;  %2334 = vmatpush.msra.mxu2 %v7403_v16  ;;  %v7406_v10 = vld [vmem:[#allocation16 + $0x138] sm:$0xff] }
 0x3c9   :  { %10343 = vst [vmem:[#allocation81_spill] sm:$0xff] %v7391_v3  ;;  %2354 = vmatpush.msra.mxu3 %v7406_v10  ;;  %v7409_v3 = vld [vmem:[#allocation16 + $0x100] sm:$0xff] }
 0x3ca   :  { %10344 = vst [vmem:[#allocation82_spill] sm:$0xff] %v7394_v7  ;;  %2295 = vmatpush.msra.mxu0 %v7409_v3  ;;  %v7412_v7 = vld [vmem:[#allocation16 + $0x108] sm:$0xff] }
 0x3cb   :  { %10345 = vst [vmem:[#allocation83_spill] sm:$0xff] %v7397_v5  ;;  %2315 = vmatpush.msra.mxu1 %v7412_v7  ;;  %v7415_v5 = vld [vmem:[#allocation16 + $0x110] sm:$0xff] }
 0x3cc   :  { %10346 = vst [vmem:[#allocation84_spill] sm:$0xff] %v7400_v8  ;;  %2335 = vmatpush.msra.mxu2 %v7415_v5  ;;  %v7418_v8 = vld [vmem:[#allocation16 + $0x118] sm:$0xff] }
 0x3cd   :  { %10347 = vst [vmem:[#allocation85_spill] sm:$0xff] %v7403_v16  ;;  %2355 = vmatpush.msra.mxu3 %v7418_v8  ;;  %v7421_v16 = vld [vmem:[#allocation16 + $0xe0] sm:$0xff] }
 0x3ce   :  { %10348 = vst [vmem:[#allocation86_spill] sm:$0xff] %v7406_v10  ;;  %2296 = vmatpush.msra.mxu0 %v7421_v16  ;;  %v7424_v10 = vld [vmem:[#allocation16 + $0xe8] sm:$0xff] }
 0x3cf   :  { %10349 = vst [vmem:[#allocation87_spill] sm:$0xff] %v7409_v3  ;;  %2316 = vmatpush.msra.mxu1 %v7424_v10  ;;  %v7427_v3 = vld [vmem:[#allocation16 + $0xf0] sm:$0xff] }
 0x3d0   :  { %10350 = vst [vmem:[#allocation88_spill] sm:$0xff] %v7412_v7  ;;  %2336 = vmatpush.msra.mxu2 %v7427_v3  ;;  %v7430_v7 = vld [vmem:[#allocation16 + $0xf8] sm:$0xff] }
 0x3d1   :  { %10351 = vst [vmem:[#allocation89_spill] sm:$0xff] %v7415_v5  ;;  %2356 = vmatpush.msra.mxu3 %v7430_v7  ;;  %v7433_v5 = vld [vmem:[#allocation16 + $0xc0] sm:$0xff] }
 0x3d2   :  { %10352 = vst [vmem:[#allocation90_spill] sm:$0xff] %v7418_v8  ;;  %2297 = vmatpush.msra.mxu0 %v7433_v5  ;;  %v7436_v8 = vld [vmem:[#allocation16 + $0xc8] sm:$0xff] }
 0x3d3   :  { %10353 = vst [vmem:[#allocation93_spill] sm:$0xff] %v7421_v16  ;;  %2317 = vmatpush.msra.mxu1 %v7436_v8  ;;  %v7439_v16 = vld [vmem:[#allocation16 + $0xd0] sm:$0xff] }
 0x3d4   :  { %10354 = vst [vmem:[#allocation94_spill] sm:$0xff] %v7424_v10  ;;  %2337 = vmatpush.msra.mxu2 %v7439_v16  ;;  %v7442_v10 = vld [vmem:[#allocation16 + $0xd8] sm:$0xff] }
 0x3d5   :  { %10355 = vst [vmem:[#allocation95_spill] sm:$0xff] %v7427_v3  ;;  %2357 = vmatpush.msra.mxu3 %v7442_v10  ;;  %v7445_v3 = vld [vmem:[#allocation16 + $0xa0] sm:$0xff] }
 0x3d6   :  { %10356 = vst [vmem:[#allocation98_spill] sm:$0xff] %v7430_v7  ;;  %2298 = vmatpush.msra.mxu0 %v7445_v3  ;;  %v7448_v7 = vld [vmem:[#allocation16 + $0xa8] sm:$0xff] }
 0x3d7   :  { %10357 = vst [vmem:[#allocation99_spill] sm:$0xff] %v7433_v5  ;;  %2318 = vmatpush.msra.mxu1 %v7448_v7  ;;  %v7451_v5 = vld [vmem:[#allocation16 + $0xb0] sm:$0xff] }
 0x3d8   :  { %10358 = vst [vmem:[#allocation100_spill] sm:$0xff] %v7436_v8  ;;  %2338 = vmatpush.msra.mxu2 %v7451_v5  ;;  %v7454_v8 = vld [vmem:[#allocation16 + $0xb8] sm:$0xff] }
 0x3d9   :  { %10359 = vst [vmem:[#allocation101_spill] sm:$0xff] %v7439_v16  ;;  %2358 = vmatpush.msra.mxu3 %v7454_v8  ;;  %v7457_v16 = vld [vmem:[#allocation16 + $0x80] sm:$0xff] }
 0x3da   :  { %10360 = vst [vmem:[#allocation102_spill] sm:$0xff] %v7442_v10  ;;  %2299 = vmatpush.msra.mxu0 %v7457_v16  ;;  %v7460_v10 = vld [vmem:[#allocation16 + $0x88] sm:$0xff] }
 0x3db   :  { %10361 = vst [vmem:[#allocation103_spill] sm:$0xff] %v7445_v3  ;;  %2319 = vmatpush.msra.mxu1 %v7460_v10  ;;  %v7463_v3 = vld [vmem:[#allocation16 + $0x90] sm:$0xff] }
 0x3dc   :  { %10362 = vst [vmem:[#allocation104_spill] sm:$0xff] %v7448_v7  ;;  %2339 = vmatpush.msra.mxu2 %v7463_v3  ;;  %v7466_v7 = vld [vmem:[#allocation16 + $0x98] sm:$0xff] }
 0x3dd   :  { %10363 = vst [vmem:[#allocation105_spill] sm:$0xff] %v7451_v5  ;;  %2359 = vmatpush.msra.mxu3 %v7466_v7  ;;  %v7469_v5 = vld [vmem:[#allocation16 + $0x60] sm:$0xff] }
 0x3de   :  { %10364 = vst [vmem:[#allocation106_spill] sm:$0xff] %v7454_v8  ;;  %2300 = vmatpush.msra.mxu0 %v7469_v5  ;;  %v7472_v8 = vld [vmem:[#allocation16 + $0x68] sm:$0xff] }
 0x3df   :  { %10365 = vst [vmem:[#allocation107_spill] sm:$0xff] %v7457_v16  ;;  %2320 = vmatpush.msra.mxu1 %v7472_v8  ;;  %v7475_v16 = vld [vmem:[#allocation16 + $0x70] sm:$0xff] }
 0x3e0   :  { %10366 = vst [vmem:[#allocation108_spill] sm:$0xff] %v7460_v10  ;;  %2340 = vmatpush.msra.mxu2 %v7475_v16  ;;  %v7478_v10 = vld [vmem:[#allocation16 + $0x78] sm:$0xff] }
 0x3e1   :  { %10367 = vst [vmem:[#allocation109_spill] sm:$0xff] %v7463_v3  ;;  %2360 = vmatpush.msra.mxu3 %v7478_v10  ;;  %v7481_v3 = vld [vmem:[#allocation16 + $0x40] sm:$0xff] }
 0x3e2   :  { %10368 = vst [vmem:[#allocation110_spill] sm:$0xff] %v7466_v7  ;;  %2301 = vmatpush.msra.mxu0 %v7481_v3  ;;  %v7484_v7 = vld [vmem:[#allocation16 + $0x48] sm:$0xff] }
 0x3e3   :  { %10369 = vst [vmem:[#allocation111_spill] sm:$0xff] %v7469_v5  ;;  %2321 = vmatpush.msra.mxu1 %v7484_v7  ;;  %v7487_v5 = vld [vmem:[#allocation16 + $0x50] sm:$0xff] }
 0x3e4   :  { %10370 = vst [vmem:[#allocation112_spill] sm:$0xff] %v7472_v8  ;;  %2341 = vmatpush.msra.mxu2 %v7487_v5  ;;  %v7490_v8 = vld [vmem:[#allocation16 + $0x58] sm:$0xff] }
 0x3e5   :  { %10371 = vst [vmem:[#allocation113_spill] sm:$0xff] %v7475_v16  ;;  %2361 = vmatpush.msra.mxu3 %v7490_v8  ;;  %v7493_v16 = vld [vmem:[#allocation16 + $0x20] sm:$0xff] }
 0x3e6   :  { %10372 = vst [vmem:[#allocation116_spill] sm:$0xff] %v7478_v10  ;;  %2302 = vmatpush.msra.mxu0 %v7493_v16  ;;  %v7496_v10 = vld [vmem:[#allocation16 + $0x28] sm:$0xff] }
 0x3e7   :  { %10373 = vst [vmem:[#allocation119_spill] sm:$0xff] %v7481_v3  ;;  %2322 = vmatpush.msra.mxu1 %v7496_v10  ;;  %v7499_v3 = vld [vmem:[#allocation16 + $0x30] sm:$0xff] }
 0x3e8   :  { %10374 = vst [vmem:[#allocation120_spill] sm:$0xff] %v7484_v7  ;;  %2342 = vmatpush.msra.mxu2 %v7499_v3  ;;  %v7502_v7 = vld [vmem:[#allocation16 + $0x38] sm:$0xff] }
 0x3e9   :  { %10375 = vst [vmem:[#allocation121_spill] sm:$0xff] %v7487_v5  ;;  %2362 = vmatpush.msra.mxu3 %v7502_v7  ;;  %v7505_v5 = vld [vmem:[#allocation16] sm:$0xff] }
 0x3ea   :  { %10376 = vst [vmem:[#allocation122_spill] sm:$0xff] %v7490_v8  ;;  %2303 = vmatpush.msra.mxu0 %v7505_v5  ;;  %v7508_v8 = vld [vmem:[#allocation16 + $0x8] sm:$0xff] }
 0x3eb   :  { %10377 = vst [vmem:[#allocation123_spill] sm:$0xff] %v7493_v16  ;;  %2323 = vmatpush.msra.mxu1 %v7508_v8  ;;  %v7511_v16 = vld [vmem:[#allocation16 + $0x10] sm:$0xff] }
 0x3ec   :  { %10378 = vst [vmem:[#allocation124_spill] sm:$0xff] %v7496_v10  ;;  %2343 = vmatpush.msra.mxu2 %v7511_v16  ;;  %v7514_v10 = vld [vmem:[#allocation16 + $0x18] sm:$0xff] }
 0x3ed   :  { %10379 = vst [vmem:[#allocation125_spill] sm:$0xff] %v7499_v3  ;;  %2363 = vmatpush.msra.mxu3 %v7514_v10  ;;  %v7517_v3 = vld [vmem:[#allocation15 + $0x1e0] sm:$0xff] }
 0x3ee   :  { %10380 = vst [vmem:[#allocation126_spill] sm:$0xff] %v7502_v7  ;;  %2368 = vmatpush.msrb.mxu0 %v7517_v3  ;;  %v7520_v7 = vld [vmem:[#allocation15 + $0x1e8] sm:$0xff] }
 0x3ef   :  { %10381 = vst [vmem:[#allocation127_spill] sm:$0xff] %v7505_v5  ;;  %2388 = vmatpush.msrb.mxu1 %v7520_v7  ;;  %v7523_v5 = vld [vmem:[#allocation15 + $0x1f0] sm:$0xff] }
 0x3f0   :  { %10382 = vst [vmem:[#allocation128_spill] sm:$0xff] %v7508_v8  ;;  %2408 = vmatpush.msrb.mxu2 %v7523_v5  ;;  %v7526_v8 = vld [vmem:[#allocation15 + $0x1f8] sm:$0xff] }
 0x3f1   :  { %10383 = vst [vmem:[#allocation129_spill] sm:$0xff] %v7511_v16  ;;  %2428 = vmatpush.msrb.mxu3 %v7526_v8  ;;  %v7529_v16 = vld [vmem:[#allocation15 + $0x1c0] sm:$0xff] }
 0x3f2   :  { %10384 = vst [vmem:[#allocation130_spill] sm:$0xff] %v7514_v10  ;;  %2369 = vmatpush.msrb.mxu0 %v7529_v16  ;;  %v7532_v10 = vld [vmem:[#allocation15 + $0x1c8] sm:$0xff] }
 0x3f3   :  { %10385 = vst [vmem:[#allocation131_spill] sm:$0xff] %v7517_v3  ;;  %2389 = vmatpush.msrb.mxu1 %v7532_v10  ;;  %v7535_v3 = vld [vmem:[#allocation15 + $0x1d0] sm:$0xff] }
 0x3f4   :  { %10386 = vst [vmem:[#allocation134_spill] sm:$0xff] %v7520_v7  ;;  %2409 = vmatpush.msrb.mxu2 %v7535_v3  ;;  %v7538_v7 = vld [vmem:[#allocation15 + $0x1d8] sm:$0xff] }
 0x3f5   :  { %10387 = vst [vmem:[#allocation137_spill] sm:$0xff] %v7523_v5  ;;  %2429 = vmatpush.msrb.mxu3 %v7538_v7  ;;  %v7541_v5 = vld [vmem:[#allocation15 + $0x1a0] sm:$0xff] }
 0x3f6   :  { %10388 = vst [vmem:[#allocation138_spill] sm:$0xff] %v7526_v8  ;;  %2370 = vmatpush.msrb.mxu0 %v7541_v5  ;;  %v7544_v8 = vld [vmem:[#allocation15 + $0x1a8] sm:$0xff] }
 0x3f7   :  { %10389 = vst [vmem:[#allocation139_spill] sm:$0xff] %v7529_v16  ;;  %2390 = vmatpush.msrb.mxu1 %v7544_v8  ;;  %v7547_v16 = vld [vmem:[#allocation15 + $0x1b0] sm:$0xff] }
 0x3f8   :  { %10390 = vst [vmem:[#allocation140_spill] sm:$0xff] %v7532_v10  ;;  %2410 = vmatpush.msrb.mxu2 %v7547_v16  ;;  %v7550_v10 = vld [vmem:[#allocation15 + $0x1b8] sm:$0xff] }
 0x3f9   :  { %10391 = vst [vmem:[#allocation141_spill] sm:$0xff] %v7535_v3  ;;  %2430 = vmatpush.msrb.mxu3 %v7550_v10  ;;  %v7553_v3 = vld [vmem:[#allocation15 + $0x180] sm:$0xff] }
 0x3fa   :  { %10392 = vst [vmem:[#allocation142_spill] sm:$0xff] %v7538_v7  ;;  %2371 = vmatpush.msrb.mxu0 %v7553_v3  ;;  %v7556_v7 = vld [vmem:[#allocation15 + $0x188] sm:$0xff] }
 0x3fb   :  { %10393 = vst [vmem:[#allocation143_spill] sm:$0xff] %v7541_v5  ;;  %2391 = vmatpush.msrb.mxu1 %v7556_v7  ;;  %v7559_v5 = vld [vmem:[#allocation15 + $0x190] sm:$0xff] }
 0x3fc   :  { %10394 = vst [vmem:[#allocation144_spill] sm:$0xff] %v7544_v8  ;;  %2411 = vmatpush.msrb.mxu2 %v7559_v5  ;;  %v7562_v8 = vld [vmem:[#allocation15 + $0x198] sm:$0xff] }
 0x3fd   :  { %10395 = vst [vmem:[#allocation145_spill] sm:$0xff] %v7547_v16  ;;  %2431 = vmatpush.msrb.mxu3 %v7562_v8  ;;  %v7565_v16 = vld [vmem:[#allocation15 + $0x160] sm:$0xff] }
 0x3fe   :  { %10396 = vst [vmem:[#allocation146_spill] sm:$0xff] %v7550_v10  ;;  %2372 = vmatpush.msrb.mxu0 %v7565_v16  ;;  %v7568_v10 = vld [vmem:[#allocation15 + $0x168] sm:$0xff] }
 0x3ff   :  { %10397 = vst [vmem:[#allocation147_spill] sm:$0xff] %v7553_v3  ;;  %2392 = vmatpush.msrb.mxu1 %v7568_v10  ;;  %v7571_v3 = vld [vmem:[#allocation15 + $0x170] sm:$0xff] }
 0x400   :  { %10398 = vst [vmem:[#allocation148_spill] sm:$0xff] %v7556_v7  ;;  %2412 = vmatpush.msrb.mxu2 %v7571_v3  ;;  %v7574_v7 = vld [vmem:[#allocation15 + $0x178] sm:$0xff] }
 0x401   :  { %10399 = vst [vmem:[#allocation150_spill] sm:$0xff] %v7559_v5  ;;  %2432 = vmatpush.msrb.mxu3 %v7574_v7  ;;  %v7577_v5 = vld [vmem:[#allocation15 + $0x140] sm:$0xff] }
 0x402   :  { %10400 = vst [vmem:[#allocation151_spill] sm:$0xff] %v7562_v8  ;;  %2373 = vmatpush.msrb.mxu0 %v7577_v5  ;;  %v7580_v8 = vld [vmem:[#allocation15 + $0x148] sm:$0xff] }
 0x403   :  { %10401 = vst [vmem:[#allocation152_spill] sm:$0xff] %v7565_v16  ;;  %2393 = vmatpush.msrb.mxu1 %v7580_v8  ;;  %v7583_v16 = vld [vmem:[#allocation15 + $0x150] sm:$0xff] }
 0x404   :  { %10402 = vst [vmem:[#allocation155_spill] sm:$0xff] %v7568_v10  ;;  %2413 = vmatpush.msrb.mxu2 %v7583_v16  ;;  %v7586_v10 = vld [vmem:[#allocation15 + $0x158] sm:$0xff] }
 0x405   :  { %10403 = vst [vmem:[#allocation157_spill] sm:$0xff] %v7571_v3  ;;  %2433 = vmatpush.msrb.mxu3 %v7586_v10  ;;  %v7589_v3 = vld [vmem:[#allocation15 + $0x120] sm:$0xff] }
 0x406   :  { %10404 = vst [vmem:[#allocation158_spill] sm:$0xff] %v7574_v7  ;;  %2374 = vmatpush.msrb.mxu0 %v7589_v3  ;;  %v7592_v7 = vld [vmem:[#allocation15 + $0x128] sm:$0xff] }
 0x407   :  { %10405 = vst [vmem:[#allocation159_spill] sm:$0xff] %v7577_v5  ;;  %2394 = vmatpush.msrb.mxu1 %v7592_v7  ;;  %v7595_v5 = vld [vmem:[#allocation15 + $0x130] sm:$0xff] }
 0x408   :  { %10406 = vst [vmem:[#allocation160_spill] sm:$0xff] %v7580_v8  ;;  %2414 = vmatpush.msrb.mxu2 %v7595_v5  ;;  %v7598_v8 = vld [vmem:[#allocation15 + $0x138] sm:$0xff] }
 0x409   :  { %10407 = vst [vmem:[#allocation161_spill] sm:$0xff] %v7583_v16  ;;  %2434 = vmatpush.msrb.mxu3 %v7598_v8  ;;  %v7601_v16 = vld [vmem:[#allocation15 + $0x100] sm:$0xff]  ;;  %v1947_v30 = vpop.f32.mrf.mxu1 }
 0x40a   :  { %10408 = vst [vmem:[#allocation162_spill] sm:$0xff] %v7586_v10  ;;  %2375 = vmatpush.msrb.mxu0 %v7601_v16  ;;  %v7604_v10 = vld [vmem:[#allocation15 + $0x108] sm:$0xff] }
 0x40b   :  { %10409 = vst [vmem:[#allocation163_spill] sm:$0xff] %v7589_v3  ;;  %2395 = vmatpush.msrb.mxu1 %v7604_v10  ;;  %v7607_v3 = vld [vmem:[#allocation15 + $0x110] sm:$0xff] }
 0x40c   :  { %10410 = vst [vmem:[#allocation164_spill] sm:$0xff] %v7592_v7  ;;  %2415 = vmatpush.msrb.mxu2 %v7607_v3  ;;  %v7610_v7 = vld [vmem:[#allocation15 + $0x118] sm:$0xff] }
 0x40d   :  { %10411 = vst [vmem:[#allocation165_spill] sm:$0xff] %v7595_v5  ;;  %2435 = vmatpush.msrb.mxu3 %v7610_v7  ;;  %v7613_v5 = vld [vmem:[#allocation15 + $0xe0] sm:$0xff] }
 0x40e   :  { %10412 = vst [vmem:[#allocation166_spill] sm:$0xff] %v7598_v8  ;;  %2376 = vmatpush.msrb.mxu0 %v7613_v5  ;;  %v7616_v8 = vld [vmem:[#allocation15 + $0xe8] sm:$0xff] }
 0x40f   :  { %10413 = vst [vmem:[#allocation167_spill] sm:$0xff] %v7601_v16  ;;  %2396 = vmatpush.msrb.mxu1 %v7616_v8  ;;  %v7619_v16 = vld [vmem:[#allocation15 + $0xf0] sm:$0xff] }
 0x410   :  { %10414 = vst [vmem:[#allocation169_spill] sm:$0xff] %v7604_v10  ;;  %2416 = vmatpush.msrb.mxu2 %v7619_v16  ;;  %v7622_v10 = vld [vmem:[#allocation15 + $0xf8] sm:$0xff]  ;;  %v1967_v0 = vpop.f32.mrf.mxu2 }
 0x411   :  { %10415 = vst [vmem:[#allocation170_spill] sm:$0xff] %v7607_v3  ;;  %2436 = vmatpush.msrb.mxu3 %v7622_v10  ;;  %v7625_v3 = vld [vmem:[#allocation15 + $0xc0] sm:$0xff] }
 0x412   :  { %10416 = vst [vmem:[#allocation171_spill] sm:$0xff] %v7610_v7  ;;  %2377 = vmatpush.msrb.mxu0 %v7625_v3  ;;  %v7628_v7 = vld [vmem:[#allocation15 + $0xc8] sm:$0xff] }
 0x413   :  { %10417 = vst [vmem:[#allocation174_spill] sm:$0xff] %v7613_v5  ;;  %2397 = vmatpush.msrb.mxu1 %v7628_v7  ;;  %v7631_v5 = vld [vmem:[#allocation15 + $0xd0] sm:$0xff] }
 0x414   :  { %10418 = vst [vmem:[#allocation175_spill] sm:$0xff] %v7616_v8  ;;  %2417 = vmatpush.msrb.mxu2 %v7631_v5  ;;  %v7634_v8 = vld [vmem:[#allocation15 + $0xd8] sm:$0xff]  ;;  %v2027_v55 = vpop.f32.mrf.mxu1 }
 0x415   :  { %10419 = vst [vmem:[#allocation176_spill] sm:$0xff] %v7619_v16  ;;  %2437 = vmatpush.msrb.mxu3 %v7634_v8  ;;  %v7637_v16 = vld [vmem:[#allocation15 + $0xa0] sm:$0xff]  ;;  %v2028_v59 = vadd.f32 %v2027_v55, %v1947_v30 }
 0x416   :  { %10420 = vst [vmem:[#allocation177_spill] sm:$0xff] %v7622_v10  ;;  %2378 = vmatpush.msrb.mxu0 %v7637_v16  ;;  %v7640_v10 = vld [vmem:[#allocation15 + $0xa8] sm:$0xff] }
 0x417   :  { %10421 = vst [vmem:[#allocation178_spill] sm:$0xff] %v7625_v3  ;;  %2398 = vmatpush.msrb.mxu1 %v7640_v10  ;;  %v7643_v3 = vld [vmem:[#allocation15 + $0xb0] sm:$0xff]  ;;  %v2071_v54 = vadd.f32 %v2028_v59, %v10275_v22 }
 0x418   :  { %10422 = vst [vmem:[#allocation180_spill] sm:$0xff] %v7628_v7  ;;  %2418 = vmatpush.msrb.mxu2 %v7643_v3  ;;  %v7646_v7 = vld [vmem:[#allocation15 + $0xb8] sm:$0xff] }
 0x419   :  { %10423 = vst [vmem:[#allocation181_spill] sm:$0xff] %v7631_v5  ;;  %2438 = vmatpush.msrb.mxu3 %v7646_v7  ;;  %v7649_v5 = vld [vmem:[#allocation15 + $0x80] sm:$0xff]  ;;  %v4028_v49 = vmul.f32 -1.442695, %v2071_v54 }
 0x41a   :  { %10424 = vst [vmem:[#allocation182_spill] sm:$0xff] %v7634_v8  ;;  %2379 = vmatpush.msrb.mxu0 %v7649_v5  ;;  %v7652_v8 = vld [vmem:[#allocation15 + $0x88] sm:$0xff] }
 0x41b   :  { %10425 = vst [vmem:[#allocation183_spill] sm:$0xff] %v7637_v16  ;;  %2399 = vmatpush.msrb.mxu1 %v7652_v8  ;;  %v7655_v16 = vld [vmem:[#allocation15 + $0x90] sm:$0xff] }
 0x41c   :  { %10426 = vst [vmem:[#allocation184_spill] sm:$0xff] %v7640_v10  ;;  %2419 = vmatpush.msrb.mxu2 %v7655_v16  ;;  %v7658_v10 = vld [vmem:[#allocation15 + $0x98] sm:$0xff] }
 0x41d   :  { %10427 = vst [vmem:[#allocation76_spill] sm:$0xff] %v7643_v3  ;;  %2439 = vmatpush.msrb.mxu3 %v7658_v10  ;;  %v7661_v3 = vld [vmem:[#allocation15 + $0x60] sm:$0xff] }
 0x41e   :  { %10428 = vst [vmem:[#allocation77_spill] sm:$0xff] %v7646_v7  ;;  %2380 = vmatpush.msrb.mxu0 %v7661_v3  ;;  %v7664_v7 = vld [vmem:[#allocation15 + $0x68] sm:$0xff] }
 0x41f   :  { %10429 = vst [vmem:[#allocation91_spill] sm:$0xff] %v7649_v5  ;;  %2400 = vmatpush.msrb.mxu1 %v7664_v7  ;;  %v7667_v5 = vld [vmem:[#allocation15 + $0x70] sm:$0xff] }
 0x420   :  { %10430 = vst [vmem:[#allocation92_spill] sm:$0xff] %v7652_v8  ;;  %2420 = vmatpush.msrb.mxu2 %v7667_v5  ;;  %v7670_v8 = vld [vmem:[#allocation15 + $0x78] sm:$0xff] }
 0x421   :  { %10431 = vst [vmem:[#allocation194_spill] sm:$0xff] %v7655_v16  ;;  %2440 = vmatpush.msrb.mxu3 %v7670_v8  ;;  %v7673_v16 = vld [vmem:[#allocation15 + $0x40] sm:$0xff] }
 0x422   :  { %10432 = vst [vmem:[#allocation195_spill] sm:$0xff] %v7658_v10  ;;  %2381 = vmatpush.msrb.mxu0 %v7673_v16  ;;  %v7676_v10 = vld [vmem:[#allocation15 + $0x48] sm:$0xff] }
 0x423   :  { %10433 = vst [vmem:[#allocation196_spill] sm:$0xff] %v7661_v3  ;;  %2401 = vmatpush.msrb.mxu1 %v7676_v10  ;;  %v7679_v3 = vld [vmem:[#allocation15 + $0x50] sm:$0xff] }
 0x424   :  { %10434 = vst [vmem:[#allocation197_spill] sm:$0xff] %v7664_v7  ;;  %2421 = vmatpush.msrb.mxu2 %v7679_v3  ;;  %v7682_v7 = vld [vmem:[#allocation15 + $0x58] sm:$0xff] }
 0x425   :  { %10435 = vst [vmem:[#allocation198_spill] sm:$0xff] %v7667_v5  ;;  %2441 = vmatpush.msrb.mxu3 %v7682_v7  ;;  %v7685_v5 = vld [vmem:[#allocation15 + $0x20] sm:$0xff] }
 0x426   :  { %10436 = vst [vmem:[#allocation199_spill] sm:$0xff] %v7670_v8  ;;  %2382 = vmatpush.msrb.mxu0 %v7685_v5  ;;  %v7688_v8 = vld [vmem:[#allocation15 + $0x28] sm:$0xff] }
 0x427   :  { %10437 = vst [vmem:[#allocation200_spill] sm:$0xff] %v7673_v16  ;;  %2402 = vmatpush.msrb.mxu1 %v7688_v8  ;;  %v7691_v16 = vld [vmem:[#allocation15 + $0x30] sm:$0xff] }
 0x428   :  { %10438 = vst [vmem:[#allocation201_spill] sm:$0xff] %v7676_v10  ;;  %2422 = vmatpush.msrb.mxu2 %v7691_v16  ;;  %v7694_v10 = vld [vmem:[#allocation15 + $0x38] sm:$0xff] }
 0x429   :  { %10439 = vst [vmem:[#allocation202_spill] sm:$0xff] %v7679_v3  ;;  %2442 = vmatpush.msrb.mxu3 %v7694_v10  ;;  %v7697_v3 = vld [vmem:[#allocation15] sm:$0xff] }
 0x42a   :  { %10440 = vst [vmem:[#allocation203_spill] sm:$0xff] %v7682_v7  ;;  %2383 = vmatpush.msrb.mxu0 %v7697_v3  ;;  %v7700_v7 = vld [vmem:[#allocation15 + $0x8] sm:$0xff] }
 0x42b   :  { %10441 = vst [vmem:[#allocation204_spill] sm:$0xff] %v7685_v5  ;;  %2403 = vmatpush.msrb.mxu1 %v7700_v7  ;;  %v7703_v5 = vld [vmem:[#allocation15 + $0x10] sm:$0xff] }
 0x42c   :  { %10442 = vst [vmem:[#allocation205_spill] sm:$0xff] %v7688_v8  ;;  %2423 = vmatpush.msrb.mxu2 %v7703_v5  ;;  %v7706_v8 = vld [vmem:[#allocation15 + $0x18] sm:$0xff] }
 0x42d   :  { %10443 = vst [vmem:[#allocation206_spill] sm:$0xff] %v7691_v16  ;;  %2443 = vmatpush.msrb.mxu3 %v7706_v8  ;;  %v1927_v16 = vpop.f32.mrf.mxu0 }
 0x42e   :  { %10444 = vst [vmem:[#allocation207_spill] sm:$0xff] %v7694_v10 }
 0x42f   :  { %10445 = vst [vmem:[#allocation208_spill] sm:$0xff] %v7697_v3 }
 0x430   :  { %10446 = vst [vmem:[#allocation209_spill] sm:$0xff] %v7700_v7  ;;  %v1987_v7 = vpop.f32.mrf.mxu3 }
 0x431   :  { %10447 = vst [vmem:[#allocation210_spill] sm:$0xff] %v7703_v5  ;;  %v2047_v5 = vpop.f32.mrf.mxu2 }
 0x432   :  { %10448 = vst [vmem:[#allocation211_spill] sm:$0xff] %v7706_v8  ;;  %v2048_v23 = vadd.f32 %v2047_v5, %v1967_v0 }
 0x434   :  { %v2072_v8 = vadd.f32 %v2048_v23, %v10276_v38  ;;  %v10449_v23 = vld [vmem:[#allocation135_spill] sm:$0xff] }
 0x435   :  { %v2007_v10 = vpop.f32.mrf.mxu0 }
 0x436   :  { %v2008_v61 = vadd.f32 %v2007_v10, %v1927_v16  ;;  %v4029_v47 = vmul.f32 -1.442695, %v2072_v8 }
 0x438   :  { %v2070_v3 = vadd.f32 %v2008_v61, %v10274_v63  ;;  %v2067_v16 = vpop.f32.mrf.mxu3 }
 0x439   :  { %v2068_v61 = vadd.f32 %v2067_v16, %v1987_v7  ;;  %v2178_v7 = vpop.f32.mrf.mxu1 }
 0x43a   :  { %v4027_v50 = vmul.f32 -1.442695, %v2070_v3  ;;  %v253_v3 = vadd.f32 %v10449_v23, %v10277_v9 }
 0x43c   :  { %4181 = vpow2.f32 %v4027_v50  ;;  %v2073_v50 = vadd.f32 %v2068_v61, %v10283_v39 }
 0x43d   :  { %4183 = vpow2.f32 %v4028_v49  ;;  %v2158_v30 = vpop.f32.mrf.mxu0 }
 0x43e   :  { %4185 = vpow2.f32 %v4029_v47  ;;  %v2221_v61 = vadd.f32 %v2158_v30, %v253_v3 }
 0x440   :  { %v4030_v23 = vmul.f32 -1.442695, %v2221_v61 }
 0x442   :  { %v4182_v24 = vpop.eup %4181 }
 0x443   :  { %v4184_v1 = vpop.eup %4183  ;;  %v2083_v27 = vadd.f32 1.0, %v4182_v24  ;;  %v10450_v24 = vld [vmem:[#allocation136_spill] sm:$0xff] }
 0x444   :  { %v2084_v55 = vadd.f32 1.0, %v4184_v1  ;;  %v4186_v59 = vpop.eup %4185  ;;  %v294_v47 = vadd.f32 %v10450_v24, %v10279_v14  ;;  %v10451_v24 = vld [vmem:[#allocation149_spill] sm:$0xff] }
 0x445   :  { %4187 = vrcp.f32 %v2083_v27  ;;  %v7712_v10 = vadd.f32 1.0, %v4186_v59  ;;  %v2095_v8 = vand.u32 2147483647, %v2083_v27  ;;  %v2097_v59 = vand.u32 2147483648, %v2083_v27 }
 0x446   :  { %4189 = vrcp.f32 %v2084_v55  ;;  %v2222_v39 = vadd.f32 %v2178_v7, %v294_v47  ;;  %v2112_v38 = vand.u32 2147483648, %v2084_v55  ;;  %v2110_v63 = vand.u32 2147483647, %v2084_v55 }
 0x447   :  { %4191 = vrcp.f32 %v7712_v10  ;;  %vm2106_vm7 = vweird.f32 %v2084_v55  ;;  %vm2091_vm8 = vweird.f32 %v2083_v27  ;;  %v2098_v3 = vor.u32 1.1754944e-38, %v2097_v59 }
 0x448   :  { %4193 = vtanh.f32 %v2073_v50  ;;  %v4031_v9 = vmul.f32 -1.442695, %v2222_v39  ;;  %v2113_v30 = vor.u32 1.1754944e-38, %v2112_v38  ;;  %vm2096_vm11 = vcmp.eq.f32.partialorder %v2095_v8, 8.507059e+37 }
 0x449   :  { %4195 = vpow2.f32 %v4030_v23  ;;  %vm2111_vm12 = vcmp.eq.f32.partialorder %v2110_v63, 8.507059e+37  ;;  %vm2121_vm14 = vweird.f32 %v7712_v10 }
 0x44a   :  { %4197 = vpow2.f32 %v4031_v9 }
 0x44b   :  { %v4188_v54 = vpop.eup %4187 }
 0x44c   :  { %v4190_v49 = vpop.eup %4189  ;;  %v2087_v0 = vmul.f32 %v4188_v54, %v2083_v27  ;;  %vm2092_vm5 = vweird.f32 %v4188_v54 }
 0x44d   :  { %v2102_v1 = vmul.f32 %v4190_v49, %v2084_v55  ;;  %vm2107_vm6 = vweird.f32 %v4190_v49  ;;  %v4192_v33 = vpop.eup %4191  ;;  %vm2093_vm9 = vmor %vm2091_vm8, %vm2092_vm5 }
 0x44e   :  { %v2088_v5 = vsub.f32 1.0, %v2087_v0  ;;  %v335_v0 = vadd.f32 %v10451_v24, %v10281_v31  ;;  %vm2108_vm10 = vmor %vm2106_vm7, %vm2107_vm6  ;;  %v2198_v24 = vpop.f32.mrf.mxu2  ;;  %vm2122_vm13 = vweird.f32 %v4192_v33 }
 0x44f   :  { %v2103_v16 = vsub.f32 1.0, %v2102_v1  ;;  %v2117_v1 = vmul.f32 %v4192_v33, %v7712_v10  ;;  %vm2123_vm15 = vmor %vm2121_vm14, %vm2122_vm13 }
 0x450   :  { %v2089_v22 = vmul.f32 %v4188_v54, %v2088_v5  ;;  %v4194_v5 = vpop.eup %4193  ;;  %v2223_v27 = vadd.f32 %v2198_v24, %v335_v0  ;;  %v10452_v0 = vld [vmem:[#allocation156_spill] sm:$0xff] }
 0x451   :  { %v2104_v45 = vmul.f32 %v4190_v49, %v2103_v16  ;;  %v2118_v39 = vsub.f32 1.0, %v2117_v1 }
 0x452   :  { %v2090_v50 = vadd.f32 %v4188_v54, %v2089_v22  ;;  %v4032_v59 = vmul.f32 -1.442695, %v2223_v27 }
 0x453   :  { %v2105_v47 = vadd.f32 %v4190_v49, %v2104_v45  ;;  %v2119_v14 = vmul.f32 %v4192_v33, %v2118_v39  ;;  %v4196_v45 = vpop.eup %4195 }
 0x454   :  { %v2094_v7 = vsel %vm2093_vm9, %v4188_v54, %v2090_v50  ;;  %v4198_v41 = vpop.eup %4197  ;;  %v7726_v38 = vadd.f32 1.0, %v4196_v45  ;;  %4199 = vpow2.f32 %v4032_v59  ;;  %v2127_v54 = vand.u32 2147483648, %v7712_v10 }
 0x455   :  { %v2099_v16 = vsel %vm2096_vm11, %v2098_v3, %v2094_v7  ;;  %v2109_v61 = vsel %vm2108_vm10, %v4190_v49, %v2105_v47  ;;  %v2120_v9 = vadd.f32 %v4192_v33, %v2119_v14  ;;  %v7729_v63 = vadd.f32 1.0, %v4198_v41  ;;  %v2218_v49 = vpop.f32.mrf.mxu3 }
 0x456   :  { %v2114_v55 = vsel %vm2111_vm12, %v2113_v30, %v2109_v61  ;;  %v2133_v22 = vmul.f32 %v4194_v5, %v2099_v16  ;;  %v2128_v8 = vor.u32 1.1754944e-38, %v2127_v54  ;;  %v376_v50 = vadd.f32 %v10452_v0, %v5947_v53  ;;  %v10466_v54 = vld [vmem:[#allocation38_spill] sm:$0xff]  ;;  %v10472_v0 = vld [vmem:[#allocation44_spill] sm:$0xff] }
 0x457   :  { %v2132_v31 = vmul.f32 %v2114_v55, %v7078_v34  ;;  %v2125_v34 = vand.u32 2147483647, %v7712_v10  ;;  %v2248_v61 = vand.u32 2147483648, %v7726_v38  ;;  %v2263_v24 = vand.u32 2147483648, %v7729_v63 }
 0x458   :  { %v2224_v5 = vadd.f32 %v2218_v49, %v376_v50  ;;  %v2261_v59 = vand.u32 2147483647, %v7729_v63  ;;  %vm2242_vm3 = vweird.f32 %v7726_v38  ;;  %vm2257_vm4 = vweird.f32 %v7729_v63  ;;  %v10469_v49 = vld [vmem:[#allocation41_spill] sm:$0xff] }
 0x459   :  { %v7724_v23 = vadd.f32 %v2133_v22, %v2132_v31  ;;  %v2124_v31 = vsel %vm2123_vm15, %v4192_v33, %v2120_v9  ;;  %vm2126_vm0 = vcmp.eq.f32.partialorder %v2125_v34, 8.507059e+37  ;;  %v2246_v22 = vand.u32 2147483647, %v7726_v38  ;;  %v10467_v34 = vld [vmem:[#allocation39_spill] sm:$0xff]  ;;  %v10473_v50 = vld [vmem:[#allocation45_spill] sm:$0xff] }
 0x45a   :  { %v4200_v14 = vpop.eup %4199  ;;  %v2129_v3 = vsel %vm2126_vm0, %v2128_v8, %v2124_v31  ;;  %vm2262_vm8 = vcmp.eq.f32.partialorder %v2261_v59, 8.507059e+37  ;;  %v10468_v31 = vld [vmem:[#allocation40_spill] sm:$0xff]  ;;  %v10470_v8 = vld [vmem:[#allocation42_spill] sm:$0xff] }
 0x45b   :  { %4201 = vtanh.f32 %v7724_v23  ;;  %v7738_v1 = vadd.f32 1.0, %v4200_v14  ;;  %vm2247_vm7 = vcmp.eq.f32.partialorder %v2246_v22, 8.507059e+37  ;;  %v10471_v14 = vld [vmem:[#allocation43_spill] sm:$0xff]  ;;  %v10488_v22 = vld [vmem:[#allocation60_spill] sm:$0xff]  ;;  %v10490_v59 = vld [vmem:[#allocation62_spill] sm:$0xff] }
 0x45c   :  { %4203 = vrcp.f32 %v7726_v38 }
 0x45d   :  { %4205 = vrcp.f32 %v7729_v63  ;;  %vm2272_vm10 = vweird.f32 %v7738_v1 }
 0x45e   :  { %4207 = vrcp.f32 %v7738_v1 }
 0x45f   :  { %4209 = vtanh.f32 %v2224_v5  ;;  %v10478_v5 = vld [vmem:[#allocation50_spill] sm:$0xff] }
 0x461   :  { %v4202_v41 = vpop.eup %4201 }
 0x462   :  { %v4204_v47 = vpop.eup %4203  ;;  %v2136_v30 = vmul.f32 %v4202_v41, %v2129_v3  ;;  %v10474_v41 = vld [vmem:[#allocation46_spill] sm:$0xff]  ;;  %v10476_v3 = vld [vmem:[#allocation48_spill] sm:$0xff] }
 0x463   :  { %v4206_v7 = vpop.eup %4205  ;;  %v2238_v10 = vmul.f32 %v4204_v47, %v7726_v38  ;;  %vm2243_vm1 = vweird.f32 %v4204_v47 }
 0x464   :  { %v2253_v33 = vmul.f32 %v4206_v7, %v7729_v63  ;;  %2304 = vmatmul.f32.vlgmr.msra.gmra.mxu0 %v2136_v30  ;;  %2324 = vmatmul.f32.vlgmr.msra.gmra.mxu1 %v2136_v30  ;;  %vm2258_vm2 = vweird.f32 %v4206_v7  ;;  %vm2244_vm5 = vmor %vm2242_vm3, %vm2243_vm1 }
 0x465   :  { %v2239_v39 = vsub.f32 1.0, %v2238_v10  ;;  %2344 = vmatmul.f32.vlgmr.msra.gmra.mxu2 %v2136_v30  ;;  %2364 = vmatmul.f32.vlgmr.msra.gmra.mxu3 %v2136_v30  ;;  %vm2259_vm6 = vmor %vm2257_vm4, %vm2258_vm2  ;;  %v10479_v30 = vld [vmem:[#allocation51_spill] sm:$0xff]  ;;  %v10481_v10 = vld [vmem:[#allocation53_spill] sm:$0xff] }
 0x466   :  { %v2254_v16 = vsub.f32 1.0, %v2253_v33  ;;  %2519 = vmatpush.msra.mxu0 %v7112_v60  ;;  %2539 = vmatpush.msra.mxu1 %v7115_v6  ;;  %v7753_v60 = vpop.eup %4207  ;;  %v10482_v33 = vld [vmem:[#allocation54_spill] sm:$0xff] }
 0x467   :  { %v2240_v55 = vmul.f32 %v4204_v47, %v2239_v39  ;;  %2559 = vmatpush.msra.mxu2 %v7120_v29  ;;  %2579 = vmatpush.msra.mxu3 %v7123_v12  ;;  %v2268_v29 = vmul.f32 %v7753_v60, %v7738_v1  ;;  %v2249_v12 = vor.u32 1.1754944e-38, %v2248_v61  ;;  %vm2273_vm9 = vweird.f32 %v7753_v60  ;;  %v10483_v39 = vld [vmem:[#allocation55_spill] sm:$0xff]  ;;  %v10485_v61 = vld [vmem:[#allocation57_spill] sm:$0xff] }
 0x468   :  { %v2255_v27 = vmul.f32 %v4206_v7, %v2254_v16  ;;  %2520 = vmatpush.msra.mxu0 %v7132_v2  ;;  %2540 = vmatpush.msra.mxu1 %v7135_v11  ;;  %v2264_v11 = vor.u32 1.1754944e-38, %v2263_v24  ;;  %vm2274_vm11 = vmor %vm2272_vm10, %vm2273_vm9  ;;  %v10484_v16 = vld [vmem:[#allocation56_spill] sm:$0xff]  ;;  %v10486_v24 = vld [vmem:[#allocation58_spill] sm:$0xff] }
 0x469   :  { %v2241_v6 = vadd.f32 %v4204_v47, %v2240_v55  ;;  %2560 = vmatpush.msra.mxu2 %v7141_v13  ;;  %2580 = vmatpush.msra.mxu3 %v7144_v15  ;;  %v4210_v13 = vpop.eup %4209  ;;  %v2269_v15 = vsub.f32 1.0, %v2268_v29  ;;  %v10487_v55 = vld [vmem:[#allocation59_spill] sm:$0xff]  ;;  %v10493_v29 = vld [vmem:[#allocation65_spill] sm:$0xff] }
 0x46a   :  { %v2256_v2 = vadd.f32 %v4206_v7, %v2255_v27  ;;  %2521 = vmatpush.msra.mxu0 %v7147_v17  ;;  %2541 = vmatpush.msra.mxu1 %v7150_v19  ;;  %v10489_v27 = vld [vmem:[#allocation61_spill] sm:$0xff] }
 0x46b   :  { %v2245_v45 = vsel %vm2244_vm5, %v4204_v47, %v2241_v6  ;;  %2561 = vmatpush.msra.mxu2 %v7153_v26  ;;  %2581 = vmatpush.msra.mxu3 %v7156_v28  ;;  %v2270_v63 = vmul.f32 %v7753_v60, %v2269_v15  ;;  %v10477_v47 = vld [vmem:[#allocation49_spill] sm:$0xff]  ;;  %v10492_v6 = vld [vmem:[#allocation64_spill] sm:$0xff]  ;;  %v10499_v15 = vld [vmem:[#allocation71_spill] sm:$0xff] }
 0x46c   :  { %v2250_v38 = vsel %vm2247_vm7, %v2249_v12, %v2245_v45  ;;  %v2260_v9 = vsel %vm2259_vm6, %v4206_v7, %v2256_v2  ;;  %2522 = vmatpush.msra.mxu0 %v7159_v58  ;;  %2542 = vmatpush.msra.mxu1 %v7162_v20  ;;  %v2276_v20 = vand.u32 2147483647, %v7738_v1  ;;  %v10480_v7 = vld [vmem:[#allocation52_spill] sm:$0xff]  ;;  %v10494_v12 = vld [vmem:[#allocation66_spill] sm:$0xff]  ;;  %v10495_v2 = vld [vmem:[#allocation67_spill] sm:$0xff] }
 0x46d   :  { %v2265_v17 = vsel %vm2262_vm8, %v2264_v11, %v2260_v9  ;;  %v2284_v19 = vmul.f32 %v4210_v13, %v2250_v38  ;;  %2562 = vmatpush.msra.mxu2 %v7167_v21  ;;  %2582 = vmatpush.msra.mxu3 %v7170_v32  ;;  %v2271_v58 = vadd.f32 %v7753_v60, %v2270_v63  ;;  %v10496_v11 = vld [vmem:[#allocation68_spill] sm:$0xff]  ;;  %v10497_v45 = vld [vmem:[#allocation69_spill] sm:$0xff]  ;;  %v10498_v13 = vld [vmem:[#allocation70_spill] sm:$0xff] }
 0x46e   :  { %v2283_v26 = vmul.f32 %v2265_v17, %v7106_v35  ;;  %2523 = vmatpush.msra.mxu0 %v7173_v46  ;;  %2543 = vmatpush.msra.mxu1 %v7176_v36  ;;  %v2278_v35 = vand.u32 2147483648, %v7738_v1  ;;  %v10453_v46 = vld [vmem:[#allocation96_spill] sm:$0xff]  ;;  %v10454_v36 = vld [vmem:[#allocation97_spill] sm:$0xff]  ;;  %vm2277_vm12 = vcmp.eq.f32.partialorder %v2276_v20, 8.507059e+37  ;;  %v10475_v1 = vld [vmem:[#allocation47_spill] sm:$0xff] }
 0x46f   :  { %2563 = vmatpush.msra.mxu2 %v7183_v57  ;;  %2583 = vmatpush.msra.mxu3 %v7186_v4  ;;  %v2275_v21 = vsel %vm2274_vm11, %v7753_v60, %v2271_v58  ;;  %v10455_v57 = vld [vmem:[#allocation114_spill] sm:$0xff]  ;;  %v10456_v4 = vld [vmem:[#allocation115_spill] sm:$0xff]  ;;  %v10500_v38 = vld [vmem:[#allocation72_spill] sm:$0xff] }
 0x470   :  { %v7777_v28 = vadd.f32 %v2284_v19, %v2283_v26  ;;  %2524 = vmatpush.msra.mxu0 %v7189_v51  ;;  %2544 = vmatpush.msra.mxu1 %v7192_v44  ;;  %v2279_v32 = vor.u32 1.1754944e-38, %v2278_v35  ;;  %v10491_v60 = vld [vmem:[#allocation63_spill] sm:$0xff]  ;;  %v10501_v9 = vld [vmem:[#allocation73_spill] sm:$0xff]  ;;  %v10502_v17 = vld [vmem:[#allocation74_spill] sm:$0xff] }
 0x471   :  { %2564 = vmatpush.msra.mxu2 %v7195_v52  ;;  %2584 = vmatpush.msra.mxu3 %v7198_v56  ;;  %v10457_v52 = vld [vmem:[#allocation29_spill] sm:$0xff]  ;;  %v10458_v56 = vld [vmem:[#allocation30_spill] sm:$0xff]  ;;  %v10503_v19 = vld [vmem:[#allocation75_spill] sm:$0xff] }
 0x472   :  { %4211 = vtanh.f32 %v7777_v28  ;;  %2525 = vmatpush.msra.mxu0 %v7201_v62  ;;  %2545 = vmatpush.msra.mxu1 %v7204_v43  ;;  %v2280_v44 = vsel %vm2277_vm12, %v2279_v32, %v2275_v21  ;;  %v10459_v43 = vld [vmem:[#allocation31_spill] sm:$0xff]  ;;  %v10504_v63 = vld [vmem:[#allocation78_spill] sm:$0xff]  ;;  %v10506_v58 = vld [vmem:[#allocation80_spill] sm:$0xff] }
 0x473   :  { %2565 = vmatpush.msra.mxu2 %v7207_v18  ;;  %2585 = vmatpush.msra.mxu3 %v7210_v48  ;;  %v10460_v18 = vld [vmem:[#allocation32_spill] sm:$0xff]  ;;  %v10461_v48 = vld [vmem:[#allocation33_spill] sm:$0xff]  ;;  %v10505_v26 = vld [vmem:[#allocation79_spill] sm:$0xff] }
 0x474   :  { %2526 = vmatpush.msra.mxu0 %v7213_v37  ;;  %2546 = vmatpush.msra.mxu1 %v7216_v25  ;;  %v10462_v37 = vld [vmem:[#allocation34_spill] sm:$0xff]  ;;  %v10463_v25 = vld [vmem:[#allocation35_spill] sm:$0xff]  ;;  %v10507_v35 = vld [vmem:[#allocation81_spill] sm:$0xff] }
 0x475   :  { %2566 = vmatpush.msra.mxu2 %v7219_v40  ;;  %2586 = vmatpush.msra.mxu3 %v7222_v42  ;;  %v10464_v40 = vld [vmem:[#allocation36_spill] sm:$0xff]  ;;  %v10465_v42 = vld [vmem:[#allocation37_spill] sm:$0xff]  ;;  %v10508_v20 = vld [vmem:[#allocation82_spill] sm:$0xff] }
 0x476   :  { %2527 = vmatpush.msra.mxu0 %v10453_v46  ;;  %2547 = vmatpush.msra.mxu1 %v10454_v36  ;;  %v10509_v21 = vld [vmem:[#allocation83_spill] sm:$0xff]  ;;  %v10510_v32 = vld [vmem:[#allocation84_spill] sm:$0xff]  ;;  %v10511_v46 = vld [vmem:[#allocation85_spill] sm:$0xff] }
 0x477   :  { %2567 = vmatpush.msra.mxu2 %v10455_v57  ;;  %2587 = vmatpush.msra.mxu3 %v10456_v4  ;;  %v10512_v36 = vld [vmem:[#allocation86_spill] sm:$0xff]  ;;  %v10513_v57 = vld [vmem:[#allocation87_spill] sm:$0xff]  ;;  %v10514_v4 = vld [vmem:[#allocation88_spill] sm:$0xff] }
 0x478   :  { %v4212_v51 = vpop.eup %4211  ;;  %2528 = vmatpush.msra.mxu0 %v10457_v52  ;;  %2548 = vmatpush.msra.mxu1 %v10458_v56  ;;  %v10517_v52 = vld [vmem:[#allocation93_spill] sm:$0xff]  ;;  %v10518_v56 = vld [vmem:[#allocation94_spill] sm:$0xff] }
 0x479   :  { %v2287_v62 = vmul.f32 %v4212_v51, %v2280_v44  ;;  %2568 = vmatpush.msra.mxu2 %v10459_v43  ;;  %2588 = vmatpush.msra.mxu3 %v10460_v18  ;;  %v10515_v51 = vld [vmem:[#allocation89_spill] sm:$0xff]  ;;  %v10516_v44 = vld [vmem:[#allocation90_spill] sm:$0xff]  ;;  %v10521_v18 = vld [vmem:[#allocation99_spill] sm:$0xff] }
 0x47a   :  { %2529 = vmatpush.msra.mxu0 %v10461_v48  ;;  %2549 = vmatpush.msra.mxu1 %v10462_v37  ;;  %v10520_v43 = vld [vmem:[#allocation98_spill] sm:$0xff]  ;;  %v10522_v48 = vld [vmem:[#allocation100_spill] sm:$0xff]  ;;  %v10523_v37 = vld [vmem:[#allocation101_spill] sm:$0xff] }
 0x47b   :  { %2569 = vmatpush.msra.mxu2 %v10463_v25  ;;  %2589 = vmatpush.msra.mxu3 %v10464_v40  ;;  %v10524_v25 = vld [vmem:[#allocation102_spill] sm:$0xff]  ;;  %v10525_v40 = vld [vmem:[#allocation103_spill] sm:$0xff] }
 0x47c   :  { %2384 = vmatmul.f32.vlgmr.msrb.gmra.mxu0 %v2287_v62  ;;  %2404 = vmatmul.f32.vlgmr.msrb.gmra.mxu1 %v2287_v62 }
 0x47d   :  { %2424 = vmatmul.f32.vlgmr.msrb.gmra.mxu2 %v2287_v62  ;;  %2444 = vmatmul.f32.vlgmr.msrb.gmra.mxu3 %v2287_v62 }
 0x47e   :  { %2530 = vmatpush.msra.mxu0 %v10465_v42  ;;  %2550 = vmatpush.msra.mxu1 %v10466_v54  ;;  %v10526_v42 = vld [vmem:[#allocation104_spill] sm:$0xff]  ;;  %v10527_v54 = vld [vmem:[#allocation105_spill] sm:$0xff] }
 0x47f   :  { %2570 = vmatpush.msra.mxu2 %v10467_v34  ;;  %2590 = vmatpush.msra.mxu3 %v10468_v31  ;;  %v10528_v34 = vld [vmem:[#allocation106_spill] sm:$0xff]  ;;  %v10529_v31 = vld [vmem:[#allocation107_spill] sm:$0xff] }
 0x480   :  { %2531 = vmatpush.msra.mxu0 %v10469_v49  ;;  %2551 = vmatpush.msra.mxu1 %v10470_v8  ;;  %v10530_v49 = vld [vmem:[#allocation108_spill] sm:$0xff]  ;;  %v10531_v8 = vld [vmem:[#allocation109_spill] sm:$0xff] }
 0x481   :  { %2571 = vmatpush.msra.mxu2 %v10471_v14  ;;  %2591 = vmatpush.msra.mxu3 %v10472_v0  ;;  %v10532_v14 = vld [vmem:[#allocation110_spill] sm:$0xff]  ;;  %v10533_v0 = vld [vmem:[#allocation111_spill] sm:$0xff] }
 0x482   :  { %2532 = vmatpush.msra.mxu0 %v10473_v50  ;;  %2552 = vmatpush.msra.mxu1 %v10474_v41  ;;  %v10534_v50 = vld [vmem:[#allocation112_spill] sm:$0xff]  ;;  %v10535_v41 = vld [vmem:[#allocation113_spill] sm:$0xff] }
 0x483   :  { %2572 = vmatpush.msra.mxu2 %v10475_v1  ;;  %2592 = vmatpush.msra.mxu3 %v10476_v3  ;;  %v10536_v1 = vld [vmem:[#allocation116_spill] sm:$0xff]  ;;  %v10537_v3 = vld [vmem:[#allocation119_spill] sm:$0xff] }
 0x484   :  { %2533 = vmatpush.msra.mxu0 %v10477_v47  ;;  %2553 = vmatpush.msra.mxu1 %v10478_v5  ;;  %v10538_v47 = vld [vmem:[#allocation120_spill] sm:$0xff]  ;;  %v10539_v5 = vld [vmem:[#allocation121_spill] sm:$0xff] }
 0x485   :  { %2573 = vmatpush.msra.mxu2 %v10479_v30  ;;  %2593 = vmatpush.msra.mxu3 %v10480_v7  ;;  %v10540_v30 = vld [vmem:[#allocation122_spill] sm:$0xff]  ;;  %v10541_v7 = vld [vmem:[#allocation123_spill] sm:$0xff] }
 0x486   :  { %2534 = vmatpush.msra.mxu0 %v10481_v10  ;;  %2554 = vmatpush.msra.mxu1 %v10482_v33  ;;  %v10542_v10 = vld [vmem:[#allocation124_spill] sm:$0xff]  ;;  %v10543_v33 = vld [vmem:[#allocation125_spill] sm:$0xff] }
 0x487   :  { %2574 = vmatpush.msra.mxu2 %v10483_v39  ;;  %2594 = vmatpush.msra.mxu3 %v10484_v16  ;;  %v10544_v39 = vld [vmem:[#allocation126_spill] sm:$0xff]  ;;  %v10545_v16 = vld [vmem:[#allocation127_spill] sm:$0xff] }
 0x488   :  { %2535 = vmatmul.f32.vlgmr.msra.gmra.mxu0 %v2287_v62  ;;  %2555 = vmatmul.f32.vlgmr.msra.gmra.mxu1 %v2287_v62 }
 0x489   :  { %2575 = vmatmul.f32.vlgmr.msra.gmra.mxu2 %v2287_v62  ;;  %2595 = vmatmul.f32.vlgmr.msra.gmra.mxu3 %v2287_v62  ;;  %v10519_v62 = vld [vmem:[#allocation95_spill] sm:$0xff] }
 0x48a   :  { %2666 = vmatpush.msrb.mxu0 %v10485_v61  ;;  %2686 = vmatpush.msrb.mxu1 %v10486_v24  ;;  %v10546_v61 = vld [vmem:[#allocation128_spill] sm:$0xff]  ;;  %v10547_v24 = vld [vmem:[#allocation129_spill] sm:$0xff] }
 0x48b   :  { %2706 = vmatpush.msrb.mxu2 %v10487_v55  ;;  %2726 = vmatpush.msrb.mxu3 %v10488_v22  ;;  %v10548_v55 = vld [vmem:[#allocation130_spill] sm:$0xff]  ;;  %v10549_v22 = vld [vmem:[#allocation131_spill] sm:$0xff] }
 0x48c   :  { %2667 = vmatpush.msrb.mxu0 %v10489_v27  ;;  %2687 = vmatpush.msrb.mxu1 %v10490_v59  ;;  %v10550_v27 = vld [vmem:[#allocation134_spill] sm:$0xff]  ;;  %v10551_v59 = vld [vmem:[#allocation137_spill] sm:$0xff] }
 0x48d   :  { %2707 = vmatpush.msrb.mxu2 %v10491_v60  ;;  %2727 = vmatpush.msrb.mxu3 %v10492_v6  ;;  %v10552_v60 = vld [vmem:[#allocation138_spill] sm:$0xff]  ;;  %v10553_v6 = vld [vmem:[#allocation139_spill] sm:$0xff] }
 0x48e   :  { %2668 = vmatpush.msrb.mxu0 %v10493_v29  ;;  %2688 = vmatpush.msrb.mxu1 %v10494_v12  ;;  %v10554_v29 = vld [vmem:[#allocation140_spill] sm:$0xff]  ;;  %v10555_v12 = vld [vmem:[#allocation141_spill] sm:$0xff] }
 0x48f   :  { %2708 = vmatpush.msrb.mxu2 %v10495_v2  ;;  %2728 = vmatpush.msrb.mxu3 %v10496_v11  ;;  %v10556_v2 = vld [vmem:[#allocation142_spill] sm:$0xff]  ;;  %v10557_v11 = vld [vmem:[#allocation143_spill] sm:$0xff] }
 0x490   :  { %2669 = vmatpush.msrb.mxu0 %v10497_v45  ;;  %2689 = vmatpush.msrb.mxu1 %v10498_v13  ;;  %v10558_v45 = vld [vmem:[#allocation144_spill] sm:$0xff]  ;;  %v10559_v13 = vld [vmem:[#allocation145_spill] sm:$0xff] }
 0x491   :  { %2709 = vmatpush.msrb.mxu2 %v10499_v15  ;;  %2729 = vmatpush.msrb.mxu3 %v10500_v38  ;;  %v10560_v15 = vld [vmem:[#allocation146_spill] sm:$0xff]  ;;  %v10561_v38 = vld [vmem:[#allocation147_spill] sm:$0xff] }
 0x492   :  { %2670 = vmatpush.msrb.mxu0 %v10501_v9  ;;  %2690 = vmatpush.msrb.mxu1 %v10502_v17  ;;  %v10562_v9 = vld [vmem:[#allocation148_spill] sm:$0xff]  ;;  %v10563_v17 = vld [vmem:[#allocation150_spill] sm:$0xff] }
 0x493   :  { %2710 = vmatpush.msrb.mxu2 %v10503_v19  ;;  %2730 = vmatpush.msrb.mxu3 %v10504_v63  ;;  %v10564_v19 = vld [vmem:[#allocation151_spill] sm:$0xff]  ;;  %v10565_v63 = vld [vmem:[#allocation152_spill] sm:$0xff] }
 0x494   :  { %2671 = vmatpush.msrb.mxu0 %v10505_v26  ;;  %2691 = vmatpush.msrb.mxu1 %v10506_v58  ;;  %v10566_v26 = vld [vmem:[#allocation155_spill] sm:$0xff]  ;;  %v10567_v58 = vld [vmem:[#allocation157_spill] sm:$0xff] }
 0x495   :  { %2711 = vmatpush.msrb.mxu2 %v10507_v35  ;;  %2731 = vmatpush.msrb.mxu3 %v10508_v20  ;;  %v10568_v35 = vld [vmem:[#allocation158_spill] sm:$0xff]  ;;  %v10569_v20 = vld [vmem:[#allocation159_spill] sm:$0xff] }
 0x496   :  { %2672 = vmatpush.msrb.mxu0 %v10509_v21  ;;  %2692 = vmatpush.msrb.mxu1 %v10510_v32  ;;  %v10570_v21 = vld [vmem:[#allocation160_spill] sm:$0xff]  ;;  %v10571_v32 = vld [vmem:[#allocation161_spill] sm:$0xff] }
 0x497   :  { %2712 = vmatpush.msrb.mxu2 %v10511_v46  ;;  %2732 = vmatpush.msrb.mxu3 %v10512_v36  ;;  %v10572_v46 = vld [vmem:[#allocation162_spill] sm:$0xff]  ;;  %v10573_v36 = vld [vmem:[#allocation163_spill] sm:$0xff] }
 0x498   :  { %2673 = vmatpush.msrb.mxu0 %v10513_v57  ;;  %2693 = vmatpush.msrb.mxu1 %v10514_v4  ;;  %v10574_v57 = vld [vmem:[#allocation164_spill] sm:$0xff]  ;;  %v10575_v4 = vld [vmem:[#allocation165_spill] sm:$0xff] }
 0x499   :  { %2713 = vmatpush.msrb.mxu2 %v10515_v51  ;;  %2733 = vmatpush.msrb.mxu3 %v10516_v44  ;;  %v10576_v51 = vld [vmem:[#allocation166_spill] sm:$0xff]  ;;  %v10577_v44 = vld [vmem:[#allocation167_spill] sm:$0xff] }
 0x49a   :  { %2674 = vmatpush.msrb.mxu0 %v10517_v52  ;;  %2694 = vmatpush.msrb.mxu1 %v10518_v56  ;;  %v10578_v52 = vld [vmem:[#allocation169_spill] sm:$0xff]  ;;  %v10579_v56 = vld [vmem:[#allocation170_spill] sm:$0xff] }
 0x49b   :  { %2714 = vmatpush.msrb.mxu2 %v10519_v62  ;;  %2734 = vmatpush.msrb.mxu3 %v10520_v43  ;;  %v10580_v62 = vld [vmem:[#allocation171_spill] sm:$0xff]  ;;  %v10581_v43 = vld [vmem:[#allocation174_spill] sm:$0xff] }
 0x49c   :  { %2675 = vmatpush.msrb.mxu0 %v10521_v18  ;;  %2695 = vmatpush.msrb.mxu1 %v10522_v48  ;;  %v10582_v18 = vld [vmem:[#allocation175_spill] sm:$0xff]  ;;  %v10583_v48 = vld [vmem:[#allocation176_spill] sm:$0xff] }
 0x49d   :  { %2715 = vmatpush.msrb.mxu2 %v10523_v37  ;;  %2735 = vmatpush.msrb.mxu3 %v10524_v25  ;;  %v10584_v37 = vld [vmem:[#allocation177_spill] sm:$0xff]  ;;  %v10585_v25 = vld [vmem:[#allocation178_spill] sm:$0xff] }
 0x49e   :  { %2676 = vmatpush.msrb.mxu0 %v10525_v40  ;;  %2696 = vmatpush.msrb.mxu1 %v10526_v42  ;;  %v10586_v40 = vld [vmem:[#allocation180_spill] sm:$0xff]  ;;  %v10587_v42 = vld [vmem:[#allocation181_spill] sm:$0xff] }
 0x49f   :  { %2716 = vmatpush.msrb.mxu2 %v10527_v54  ;;  %2736 = vmatpush.msrb.mxu3 %v10528_v34  ;;  %v10588_v54 = vld [vmem:[#allocation182_spill] sm:$0xff]  ;;  %v10589_v34 = vld [vmem:[#allocation183_spill] sm:$0xff] }
 0x4a0   :  { %2677 = vmatpush.msrb.mxu0 %v10529_v31  ;;  %2697 = vmatpush.msrb.mxu1 %v10530_v49  ;;  %v10590_v31 = vld [vmem:[#allocation184_spill] sm:$0xff] }
 0x4a1   :  { %2717 = vmatpush.msrb.mxu2 %v10531_v8  ;;  %2737 = vmatpush.msrb.mxu3 %v10532_v14  ;;  %v10591_v49 = vld [vmem:[#allocation76_spill] sm:$0xff]  ;;  %v10592_v8 = vld [vmem:[#allocation77_spill] sm:$0xff]  ;;  %v10593_v14 = vld [vmem:[#allocation91_spill] sm:$0xff] }
 0x4a2   :  { %2678 = vmatpush.msrb.mxu0 %v10533_v0  ;;  %2698 = vmatpush.msrb.mxu1 %v10534_v50  ;;  %v10594_v0 = vld [vmem:[#allocation92_spill] sm:$0xff]  ;;  %v10595_v50 = vld [vmem:[#allocation194_spill] sm:$0xff] }
 0x4a3   :  { %2718 = vmatpush.msrb.mxu2 %v10535_v41  ;;  %2738 = vmatpush.msrb.mxu3 %v10536_v1  ;;  %v10596_v41 = vld [vmem:[#allocation195_spill] sm:$0xff]  ;;  %v10597_v1 = vld [vmem:[#allocation196_spill] sm:$0xff] }
 0x4a4   :  { %2679 = vmatpush.msrb.mxu0 %v10537_v3  ;;  %2699 = vmatpush.msrb.mxu1 %v10538_v47  ;;  %v10598_v3 = vld [vmem:[#allocation197_spill] sm:$0xff]  ;;  %v10599_v47 = vld [vmem:[#allocation198_spill] sm:$0xff] }
 0x4a5   :  { %2719 = vmatpush.msrb.mxu2 %v10539_v5  ;;  %2739 = vmatpush.msrb.mxu3 %v10540_v30  ;;  %v10600_v5 = vld [vmem:[#allocation199_spill] sm:$0xff]  ;;  %v10601_v30 = vld [vmem:[#allocation200_spill] sm:$0xff] }
 0x4a6   :  { %2680 = vmatpush.msrb.mxu0 %v10541_v7  ;;  %2700 = vmatpush.msrb.mxu1 %v10542_v10  ;;  %v10602_v7 = vld [vmem:[#allocation201_spill] sm:$0xff]  ;;  %v10603_v10 = vld [vmem:[#allocation202_spill] sm:$0xff] }
 0x4a7   :  { %2720 = vmatpush.msrb.mxu2 %v10543_v33  ;;  %2740 = vmatpush.msrb.mxu3 %v10544_v39  ;;  %v10604_v33 = vld [vmem:[#allocation203_spill] sm:$0xff]  ;;  %v10605_v39 = vld [vmem:[#allocation204_spill] sm:$0xff] }
 0x4a8   :  { %2681 = vmatpush.msrb.mxu0 %v10545_v16  ;;  %2701 = vmatpush.msrb.mxu1 %v10546_v61  ;;  %v10606_v16 = vld [vmem:[#allocation205_spill] sm:$0xff]  ;;  %v10607_v61 = vld [vmem:[#allocation206_spill] sm:$0xff] }
 0x4a9   :  { %2721 = vmatpush.msrb.mxu2 %v10547_v24  ;;  %2741 = vmatpush.msrb.mxu3 %v10548_v55  ;;  %v10608_v24 = vld [vmem:[#allocation207_spill] sm:$0xff]  ;;  %v10609_v55 = vld [vmem:[#allocation208_spill] sm:$0xff] }
 0x4aa   :  { %2746 = vmatpush.msra.mxu0 %v10549_v22  ;;  %2766 = vmatpush.msra.mxu1 %v10550_v27  ;;  %v10610_v22 = vld [vmem:[#allocation209_spill] sm:$0xff]  ;;  %v10611_v27 = vld [vmem:[#allocation210_spill] sm:$0xff] }
 0x4ab   :  { %2786 = vmatpush.msra.mxu2 %v10551_v59  ;;  %2806 = vmatpush.msra.mxu3 %v10552_v60  ;;  %v10612_v59 = vld [vmem:[#allocation211_spill] sm:$0xff] }
 0x4ac   :  { %2747 = vmatpush.msra.mxu0 %v10553_v6  ;;  %2767 = vmatpush.msra.mxu1 %v10554_v29 }
 0x4ad   :  { %2787 = vmatpush.msra.mxu2 %v10555_v12  ;;  %2807 = vmatpush.msra.mxu3 %v10556_v2 }
 0x4ae   :  { %2748 = vmatpush.msra.mxu0 %v10557_v11  ;;  %2768 = vmatpush.msra.mxu1 %v10558_v45 }
 0x4af   :  { %2788 = vmatpush.msra.mxu2 %v10559_v13  ;;  %2808 = vmatpush.msra.mxu3 %v10560_v15  ;;  %v10613_v13 = vld [vmem:[#allocation25_spill] sm:$0xff] }
 0x4b0   :  { %2749 = vmatpush.msra.mxu0 %v10561_v38  ;;  %2769 = vmatpush.msra.mxu1 %v10562_v9  ;;  %v10614_v38 = vld [vmem:[#allocation26_spill] sm:$0xff] }
 0x4b1   :  { %2789 = vmatpush.msra.mxu2 %v10563_v17  ;;  %2809 = vmatpush.msra.mxu3 %v10564_v19 }
 0x4b2   :  { %2750 = vmatpush.msra.mxu0 %v10565_v63  ;;  %2770 = vmatpush.msra.mxu1 %v10566_v26 }
 0x4b3   :  { %2790 = vmatpush.msra.mxu2 %v10567_v58  ;;  %2810 = vmatpush.msra.mxu3 %v10568_v35  ;;  %v10615_v35 = vld [vmem:[#allocation27_spill] sm:$0xff] }
 0x4b4   :  { %2751 = vmatpush.msra.mxu0 %v10569_v20  ;;  %2771 = vmatpush.msra.mxu1 %v10570_v21  ;;  %v10616_v21 = vld [vmem:[#allocation188_spill] sm:$0xff] }
 0x4b5   :  { %2791 = vmatpush.msra.mxu2 %v10571_v32  ;;  %2811 = vmatpush.msra.mxu3 %v10572_v46  ;;  %v10617_v32 = vld [vmem:[#allocation153_spill] sm:$0xff] }
 0x4b6   :  { %2752 = vmatpush.msra.mxu0 %v10573_v36  ;;  %2772 = vmatpush.msra.mxu1 %v10574_v57  ;;  %v256_v46 = vadd.f32 %v10617_v32, %v10616_v21  ;;  %v10618_v36 = vld [vmem:[#allocation189_spill] sm:$0xff]  ;;  %v10619_v57 = vld [vmem:[#allocation154_spill] sm:$0xff] }
 0x4b7   :  { %2792 = vmatpush.msra.mxu2 %v10575_v4  ;;  %2812 = vmatpush.msra.mxu3 %v10576_v51  ;;  %v297_v4 = vadd.f32 %v10619_v57, %v10618_v36 }
 0x4b8   :  { %2753 = vmatpush.msra.mxu0 %v10577_v44  ;;  %2773 = vmatpush.msra.mxu1 %v10578_v52 }
 0x4b9   :  { %2793 = vmatpush.msra.mxu2 %v10579_v56  ;;  %2813 = vmatpush.msra.mxu3 %v10580_v62 }
 0x4ba   :  { %2754 = vmatpush.msra.mxu0 %v10581_v43  ;;  %2774 = vmatpush.msra.mxu1 %v10582_v18 }
 0x4bb   :  { %2794 = vmatpush.msra.mxu2 %v10583_v48  ;;  %2814 = vmatpush.msra.mxu3 %v10584_v37 }
 0x4bc   :  { %2755 = vmatpush.msra.mxu0 %v10585_v25  ;;  %2775 = vmatpush.msra.mxu1 %v10586_v40 }
 0x4bd   :  { %2795 = vmatpush.msra.mxu2 %v10587_v42  ;;  %2815 = vmatpush.msra.mxu3 %v10588_v54 }
 0x4be   :  { %2756 = vmatpush.msra.mxu0 %v10589_v34  ;;  %2776 = vmatpush.msra.mxu1 %v10590_v31  ;;  %v10620_v34 = vld [vmem:[#allocation192_spill] sm:$0xff] }
 0x4bf   :  { %2796 = vmatpush.msra.mxu2 %v10591_v49  ;;  %2816 = vmatpush.msra.mxu3 %v10592_v8  ;;  %v10621_v31 = vld [vmem:[#allocation168_spill] sm:$0xff] }
 0x4c0   :  { %2757 = vmatpush.msra.mxu0 %v10593_v14  ;;  %2777 = vmatpush.msra.mxu1 %v10594_v0  ;;  %v338_v49 = vadd.f32 %v10621_v31, %v10620_v34 }
 0x4c1   :  { %2797 = vmatpush.msra.mxu2 %v10595_v50  ;;  %2817 = vmatpush.msra.mxu3 %v10596_v41  ;;  %v10622_v41 = vld [vmem:[#allocation28_spill] sm:$0xff] }
 0x4c2   :  { %2758 = vmatpush.msra.mxu0 %v10597_v1  ;;  %2778 = vmatpush.msra.mxu1 %v10598_v3 }
 0x4c3   :  { %2798 = vmatpush.msra.mxu2 %v10599_v47  ;;  %2818 = vmatpush.msra.mxu3 %v10600_v5 }
 0x4c4   :  { %2759 = vmatpush.msra.mxu0 %v10601_v30  ;;  %2779 = vmatpush.msra.mxu1 %v10602_v7 }
 0x4c5   :  { %2799 = vmatpush.msra.mxu2 %v10603_v10  ;;  %2819 = vmatpush.msra.mxu3 %v10604_v33 }
 0x4c6   :  { %2760 = vmatpush.msra.mxu0 %v10605_v39  ;;  %2780 = vmatpush.msra.mxu1 %v10606_v16 }
 0x4c7   :  { %2800 = vmatpush.msra.mxu2 %v10607_v61  ;;  %2820 = vmatpush.msra.mxu3 %v10608_v24 }
 0x4c8   :  { %2761 = vmatpush.msra.mxu0 %v10609_v55  ;;  %2781 = vmatpush.msra.mxu1 %v10610_v22 }
 0x4c9   :  { %2801 = vmatpush.msra.mxu2 %v10611_v27  ;;  %2821 = vmatpush.msra.mxu3 %v10612_v59 }
 0x4e1   :  { %v2305_v60 = vpop.f32.mrf.mxu0  ;;  %v2325_v6 = vpop.f32.mrf.mxu1 }
 0x4e8   :  { %v2345_v29 = vpop.f32.mrf.mxu2  ;;  %v2365_v63 = vpop.f32.mrf.mxu3 }
 0x4f9   :  { %v2385_v12 = vpop.f32.mrf.mxu0  ;;  %v2405_v2 = vpop.f32.mrf.mxu1 }
 0x4fa   :  { %v2386_v11 = vadd.f32 %v2385_v12, %v2305_v60  ;;  %v2406_v45 = vadd.f32 %v2405_v2, %v2325_v6  ;;  %v10623_v2 = vld [vmem:[#allocation179_spill] sm:$0xff] }
 0x4fc   :  { %v2448_v15 = vadd.f32 %v2386_v11, %v10613_v13  ;;  %v2449_v9 = vadd.f32 %v2406_v45, %v10614_v38  ;;  %v379_v11 = vadd.f32 %v10623_v2, %v5947_v53 }
 0x4fe   :  { %v4033_v17 = vmul.f32 -1.442695, %v2448_v15  ;;  %v4034_v19 = vmul.f32 -1.442695, %v2449_v9 }
 0x500   :  { %4213 = vpow2.f32 %v4033_v17  ;;  %v2425_v26 = vpop.f32.mrf.mxu2  ;;  %v2445_v37 = vpop.f32.mrf.mxu3 }
 0x501   :  { %4215 = vpow2.f32 %v4034_v19  ;;  %v2426_v58 = vadd.f32 %v2425_v26, %v2345_v29  ;;  %v2446_v54 = vadd.f32 %v2445_v37, %v2365_v63 }
 0x503   :  { %v2450_v20 = vadd.f32 %v2426_v58, %v10615_v35  ;;  %v2451_v1 = vadd.f32 %v2446_v54, %v10622_v41 }
 0x505   :  { %v4035_v51 = vmul.f32 -1.442695, %v2450_v20  ;;  %v2536_v44 = vpop.f32.mrf.mxu0  ;;  %v2556_v52 = vpop.f32.mrf.mxu1 }
 0x506   :  { %v4214_v56 = vpop.eup %4213  ;;  %v2599_v62 = vadd.f32 %v2536_v44, %v256_v46  ;;  %v2600_v43 = vadd.f32 %v2556_v52, %v297_v4 }
 0x507   :  { %v4216_v18 = vpop.eup %4215  ;;  %v2461_v48 = vadd.f32 1.0, %v4214_v56  ;;  %4217 = vpow2.f32 %v4035_v51 }
 0x508   :  { %v2462_v25 = vadd.f32 1.0, %v4216_v18  ;;  %v4036_v40 = vmul.f32 -1.442695, %v2599_v62  ;;  %v4037_v42 = vmul.f32 -1.442695, %v2600_v43 }
 0x509   :  { %4219 = vrcp.f32 %v2461_v48  ;;  %v2473_v24 = vand.u32 2147483647, %v2461_v48  ;;  %v2475_v55 = vand.u32 2147483648, %v2461_v48  ;;  %vm2469_vm0 = vweird.f32 %v2461_v48 }
 0x50a   :  { %4221 = vrcp.f32 %v2462_v25  ;;  %v2490_v27 = vand.u32 2147483648, %v2462_v25  ;;  %v2488_v6 = vand.u32 2147483647, %v2462_v25  ;;  %vm2484_vm15 = vweird.f32 %v2462_v25 }
 0x50b   :  { %4223 = vpow2.f32 %v4036_v40  ;;  %vm2474_vm2 = vcmp.eq.f32.partialorder %v2473_v24, 8.507059e+37  ;;  %v2476_v17 = vor.u32 1.1754944e-38, %v2475_v55 }
 0x50c   :  { %4225 = vpow2.f32 %v4037_v42  ;;  %v2576_v8 = vpop.f32.mrf.mxu2  ;;  %v2596_v29 = vpop.f32.mrf.mxu3  ;;  %v2491_v26 = vor.u32 1.1754944e-38, %v2490_v27  ;;  %vm2489_vm4 = vcmp.eq.f32.partialorder %v2488_v6, 8.507059e+37 }
 0x50d   :  { %v4218_v14 = vpop.eup %4217  ;;  %v2601_v0 = vadd.f32 %v2576_v8, %v338_v49  ;;  %v2602_v32 = vadd.f32 %v2596_v29, %v379_v11 }
 0x50e   :  { %v7967_v50 = vadd.f32 1.0, %v4218_v14 }
 0x50f   :  { %v4220_v3 = vpop.eup %4219  ;;  %v4038_v47 = vmul.f32 -1.442695, %v2601_v0 }
 0x510   :  { %v4222_v5 = vpop.eup %4221  ;;  %v2465_v30 = vmul.f32 %v4220_v3, %v2461_v48  ;;  %4227 = vrcp.f32 %v7967_v50  ;;  %vm2470_vm13 = vweird.f32 %v4220_v3  ;;  %vm2499_vm5 = vweird.f32 %v7967_v50 }
 0x511   :  { %v4224_v7 = vpop.eup %4223  ;;  %v2480_v10 = vmul.f32 %v4222_v5, %v2462_v25  ;;  %4229 = vpow2.f32 %v4038_v47  ;;  %vm2485_vm14 = vweird.f32 %v4222_v5  ;;  %vm2471_vm1 = vmor %vm2469_vm0, %vm2470_vm13  ;;  %v2505_v37 = vand.u32 2147483648, %v7967_v50 }
 0x512   :  { %v4226_v33 = vpop.eup %4225  ;;  %v2466_v39 = vsub.f32 1.0, %v2465_v30  ;;  %4231 = vtanh.f32 %v2451_v1  ;;  %v7971_v16 = vadd.f32 1.0, %v4224_v7  ;;  %vm2486_vm3 = vmor %vm2484_vm15, %vm2485_vm14  ;;  %v8124_v30 = vld [vmem:[#allocation13 + $0x138] sm:$0xff] }
 0x513   :  { %v2481_v61 = vsub.f32 1.0, %v2480_v10  ;;  %v7973_v22 = vadd.f32 1.0, %v4226_v33  ;;  %v2506_v7 = vor.u32 1.1754944e-38, %v2505_v37 }
 0x514   :  { %v2467_v59 = vmul.f32 %v4220_v3, %v2466_v39  ;;  %4233 = vrcp.f32 %v7971_v16  ;;  %v2624_v42 = vand.u32 2147483647, %v7971_v16  ;;  %v2626_v31 = vand.u32 2147483648, %v7971_v16 }
 0x515   :  { %v2482_v60 = vmul.f32 %v4222_v5, %v2481_v61  ;;  %4235 = vrcp.f32 %v7973_v22  ;;  %v2639_v1 = vand.u32 2147483647, %v7973_v22  ;;  %vm2620_vm9 = vweird.f32 %v7971_v16 }
 0x516   :  { %v7977_v12 = vpop.eup %4227  ;;  %v2468_v45 = vadd.f32 %v4220_v3, %v2467_v59  ;;  %vm2635_vm11 = vweird.f32 %v7973_v22  ;;  %v2627_v33 = vor.u32 1.1754944e-38, %v2626_v31  ;;  %vm2625_vm14 = vcmp.eq.f32.partialorder %v2624_v42, 8.507059e+37  ;;  %v8084_v42 = vld [vmem:[#allocation13 + $0x198] sm:$0xff]  ;;  %v8090_v31 = vld [vmem:[#allocation13 + $0x168] sm:$0xff] }
 0x517   :  { %v4230_v15 = vpop.eup %4229  ;;  %v2495_v9 = vmul.f32 %v7977_v12, %v7967_v50  ;;  %v2483_v19 = vadd.f32 %v4222_v5, %v2482_v60  ;;  %vm2500_vm6 = vweird.f32 %v7977_v12  ;;  %vm2640_vm15 = vcmp.eq.f32.partialorder %v2639_v1, 8.507059e+37  ;;  %v8112_v1 = vld [vmem:[#allocation13 + $0x158] sm:$0xff] }
 0x518   :  { %v4232_v63 = vpop.eup %4231  ;;  %v2472_v58 = vsel %vm2471_vm1, %v4220_v3, %v2468_v45  ;;  %v7984_v20 = vadd.f32 1.0, %v4230_v15  ;;  %v2503_v3 = vand.u32 2147483647, %v7967_v50  ;;  %vm8010_vm10 = vmor %vm2499_vm5, %vm2500_vm6 }
 0x519   :  { %v2496_v46 = vsub.f32 1.0, %v2495_v9  ;;  %v2477_v57 = vsel %vm2474_vm2, %v2476_v17, %v2472_v58  ;;  %v2487_v4 = vsel %vm2486_vm3, %v4222_v5, %v2483_v19  ;;  %v8026_v9 = vld [vmem:[#allocation13 + $0x1e0] sm:$0xff]  ;;  %v8034_v19 = vld [vmem:[#allocation13 + $0x1f0] sm:$0xff] }
 0x51a   :  { %v4234_v51 = vpop.eup %4233  ;;  %v2492_v44 = vsel %vm2489_vm4, %v2491_v26, %v2487_v4  ;;  %v2511_v52 = vmul.f32 %v4232_v63, %v2477_v57  ;;  %4237 = vrcp.f32 %v7984_v20  ;;  %vm2504_vm0 = vcmp.eq.f32.partialorder %v2503_v3, 8.507059e+37  ;;  %v8037_v63 = vld [vmem:[#allocation13 + $0x1f8] sm:$0xff]  ;;  %v8046_v58 = vld [vmem:[#allocation13 + $0x1c0] sm:$0xff] }
 0x51b   :  { %v4236_v56 = vpop.eup %4235  ;;  %v2497_v62 = vmul.f32 %v7977_v12, %v2496_v46  ;;  %v2510_v43 = vmul.f32 %v2492_v44, %v7724_v23  ;;  %v2616_v18 = vmul.f32 %v4234_v51, %v7971_v16  ;;  %4239 = vtanh.f32 %v2602_v32  ;;  %v8049_v32 = vld [vmem:[#allocation13 + $0x1c8] sm:$0xff]  ;;  %v8055_v46 = vld [vmem:[#allocation13 + $0x1d0] sm:$0xff]  ;;  %v8058_v57 = vld [vmem:[#allocation13 + $0x1d8] sm:$0xff] }
 0x51c   :  { %v2631_v48 = vmul.f32 %v4236_v56, %v7973_v22  ;;  %v2641_v23 = vand.u32 2147483648, %v7973_v22  ;;  %vm2621_vm7 = vweird.f32 %v4234_v51  ;;  %vm2636_vm8 = vweird.f32 %v4236_v56  ;;  %v8064_v44 = vld [vmem:[#allocation13 + $0x1a8] sm:$0xff]  ;;  %v8115_v3 = vld [vmem:[#allocation13 + $0x120] sm:$0xff] }
 0x51d   :  { %v7993_v25 = vadd.f32 %v2511_v52, %v2510_v43  ;;  %v2617_v40 = vsub.f32 1.0, %v2616_v18  ;;  %v2498_v49 = vadd.f32 %v7977_v12, %v2497_v62  ;;  %vm2622_vm12 = vmor %vm2620_vm9, %vm2621_vm7  ;;  %v2656_v15 = vand.u32 2147483648, %v7984_v20  ;;  %v8067_v52 = vld [vmem:[#allocation13 + $0x1b0] sm:$0xff]  ;;  %v8073_v18 = vld [vmem:[#allocation13 + $0x180] sm:$0xff] }
 0x51e   :  { %v2632_v54 = vsub.f32 1.0, %v2631_v48  ;;  %vm2637_vm13 = vmor %vm2635_vm11, %vm2636_vm8  ;;  %v2642_v24 = vor.u32 1.1754944e-38, %v2641_v23  ;;  %vm2650_vm2 = vweird.f32 %v7984_v20  ;;  %v2654_v17 = vand.u32 2147483647, %v7984_v20  ;;  %v8076_v48 = vld [vmem:[#allocation13 + $0x188] sm:$0xff]  ;;  %v8100_v23 = vld [vmem:[#allocation13 + $0x178] sm:$0xff] }
 0x51f   :  { %4241 = vtanh.f32 %v7993_v25  ;;  %v2618_v8 = vmul.f32 %v4234_v51, %v2617_v40  ;;  %v2502_v61 = vsel %vm8010_vm10, %v7977_v12, %v2498_v49  ;;  %v2657_v4 = vor.u32 1.1754944e-38, %v2656_v15  ;;  %v8081_v40 = vld [vmem:[#allocation13 + $0x190] sm:$0xff]  ;;  %v8187_v26 = vld [vmem:[#allocation13 + $0x60] sm:$0xff] }
 0x520   :  { %v8001_v14 = vpop.eup %4237  ;;  %v2633_v0 = vmul.f32 %v4236_v56, %v2632_v54  ;;  %v2507_v29 = vsel %vm2504_vm0, %v2506_v7, %v2502_v61  ;;  %vm2655_vm4 = vcmp.eq.f32.partialorder %v2654_v17, 8.507059e+37  ;;  %v8087_v54 = vld [vmem:[#allocation13 + $0x160] sm:$0xff]  ;;  %v8097_v49 = vld [vmem:[#allocation13 + $0x170] sm:$0xff]  ;;  %v8184_v17 = vld [vmem:[#allocation13 + $0x98] sm:$0xff]  ;;  %10644 = vst [vmem:[#allocation29_spill] sm:$0xff] %v8187_v26 }
 0x521   :  { %v2646_v47 = vmul.f32 %v8001_v14, %v7984_v20  ;;  %v2619_v5 = vadd.f32 %v4234_v51, %v2618_v8  ;;  %v4240_v10 = vpop.eup %4239  ;;  %vm2651_vm1 = vweird.f32 %v8001_v14  ;;  %v8103_v8 = vld [vmem:[#allocation13 + $0x140] sm:$0xff]  ;;  %v8181_v15 = vld [vmem:[#allocation13 + $0x90] sm:$0xff]  ;;  %10643 = vst [vmem:[#allocation115_spill] sm:$0xff] %v8184_v17 }
 0x522   :  { %v2634_v39 = vadd.f32 %v4236_v56, %v2633_v0  ;;  %vm8042_vm3 = vmor %vm2650_vm2, %vm2651_vm1  ;;  %v8109_v0 = vld [vmem:[#allocation13 + $0x150] sm:$0xff]  ;;  %v8127_v7 = vld [vmem:[#allocation13 + $0x100] sm:$0xff]  ;;  %10642 = vst [vmem:[#allocation114_spill] sm:$0xff] %v8181_v15 }
 0x523   :  { %v2647_v16 = vsub.f32 1.0, %v2646_v47  ;;  %v2623_v55 = vsel %vm2622_vm12, %v4234_v51, %v2619_v5  ;;  %v8061_v51 = vld [vmem:[#allocation13 + $0x1a0] sm:$0xff]  ;;  %v8118_v47 = vld [vmem:[#allocation13 + $0x128] sm:$0xff]  ;;  %v8121_v5 = vld [vmem:[#allocation13 + $0x130] sm:$0xff] }
 0x524   :  { %v2628_v50 = vsel %vm2625_vm14, %v2627_v33, %v2623_v55  ;;  %v2638_v27 = vsel %vm2637_vm13, %v4236_v56, %v2634_v39  ;;  %v8070_v56 = vld [vmem:[#allocation13 + $0x1b8] sm:$0xff]  ;;  %v8133_v33 = vld [vmem:[#allocation13 + $0x110] sm:$0xff]  ;;  %v8139_v61 = vld [vmem:[#allocation13 + $0xe0] sm:$0xff] }
 0x525   :  { %v4242_v59 = vpop.eup %4241  ;;  %v2648_v60 = vmul.f32 %v8001_v14, %v2647_v16  ;;  %v2643_v22 = vsel %vm2640_vm15, %v2642_v24, %v2638_v27  ;;  %v2662_v6 = vmul.f32 %v4240_v10, %v2628_v50  ;;  %v8130_v10 = vld [vmem:[#allocation13 + $0x108] sm:$0xff]  ;;  %v8136_v39 = vld [vmem:[#allocation13 + $0x118] sm:$0xff]  ;;  %10628 = vst [vmem:[#allocation212_spill] sm:$0xff] %v8139_v61  ;;  %v8145_v16 = vld [vmem:[#allocation13 + $0xf0] sm:$0xff] }
 0x526   :  { %v2661_v2 = vmul.f32 %v2643_v22, %v7777_v28  ;;  %v2514_v11 = vmul.f32 %v4242_v59, %v2507_v29  ;;  %v8029_v28 = vld [vmem:[#allocation13 + $0x1e8] sm:$0xff]  ;;  %10630 = vst [vmem:[#allocation214_spill] sm:$0xff] %v8145_v16  ;;  %v8148_v55 = vld [vmem:[#allocation13 + $0xf8] sm:$0xff]  ;;  %v8151_v50 = vld [vmem:[#allocation13 + $0xc0] sm:$0xff] }
 0x527   :  { %v2649_v12 = vadd.f32 %v8001_v14, %v2648_v60  ;;  %v8142_v24 = vld [vmem:[#allocation13 + $0xe8] sm:$0xff]  ;;  %10631 = vst [vmem:[#allocation215_spill] sm:$0xff] %v8148_v55  ;;  %v8157_v59 = vld [vmem:[#allocation13 + $0xd0] sm:$0xff]  ;;  %v8160_v60 = vld [vmem:[#allocation13 + $0xd8] sm:$0xff] }
 0x528   :  { %v8020_v45 = vadd.f32 %v2662_v6, %v2661_v2  ;;  %2682 = vmatmul.f32.vlgmr.msrb.gmra.mxu0 %v2514_v11  ;;  %2702 = vmatmul.f32.vlgmr.msrb.gmra.mxu1 %v2514_v11  ;;  %10629 = vst [vmem:[#allocation213_spill] sm:$0xff] %v8142_v24  ;;  %v8154_v27 = vld [vmem:[#allocation13 + $0xc8] sm:$0xff]  ;;  %v8163_v22 = vld [vmem:[#allocation13 + $0xa0] sm:$0xff]  ;;  %v8169_v29 = vld [vmem:[#allocation13 + $0xb0] sm:$0xff] }
 0x529   :  { %2722 = vmatmul.f32.vlgmr.msrb.gmra.mxu2 %v2514_v11  ;;  %2742 = vmatmul.f32.vlgmr.msrb.gmra.mxu3 %v2514_v11  ;;  %v2653_v20 = vsel %vm8042_vm3, %v8001_v14, %v2649_v12  ;;  %v8106_v14 = vld [vmem:[#allocation13 + $0x148] sm:$0xff]  ;;  %10632 = vst [vmem:[#allocation117_spill] sm:$0xff] %v8151_v50  ;;  %v8172_v2 = vld [vmem:[#allocation13 + $0xb8] sm:$0xff]  ;;  %v8175_v11 = vld [vmem:[#allocation13 + $0x80] sm:$0xff] }
 0x52a   :  { %4243 = vtanh.f32 %v8020_v45  ;;  %2897 = vmatpush.msrb.mxu0 %v8026_v9  ;;  %2917 = vmatpush.msrb.mxu1 %v8029_v28  ;;  %v2658_v43 = vsel %vm2655_vm4, %v2657_v4, %v2653_v20  ;;  %10633 = vst [vmem:[#allocation118_spill] sm:$0xff] %v8154_v27  ;;  %v8166_v6 = vld [vmem:[#allocation13 + $0xa8] sm:$0xff]  ;;  %v8193_v4 = vld [vmem:[#allocation13 + $0x70] sm:$0xff] }
 0x52b   :  { %2937 = vmatpush.msrb.mxu2 %v8034_v19  ;;  %2957 = vmatpush.msrb.mxu3 %v8037_v63  ;;  %10634 = vst [vmem:[#allocation132_spill] sm:$0xff] %v8157_v59  ;;  %v8178_v12 = vld [vmem:[#allocation13 + $0x88] sm:$0xff] }
 0x52c   :  { %2898 = vmatpush.msrb.mxu0 %v8046_v58  ;;  %2918 = vmatpush.msrb.mxu1 %v8049_v32  ;;  %10635 = vst [vmem:[#allocation133_spill] sm:$0xff] %v8160_v60  ;;  %v8190_v20 = vld [vmem:[#allocation13 + $0x68] sm:$0xff] }
 0x52d   :  { %2938 = vmatpush.msrb.mxu2 %v8055_v46  ;;  %2958 = vmatpush.msrb.mxu3 %v8058_v57  ;;  %10636 = vst [vmem:[#allocation135_spill] sm:$0xff] %v8163_v22 }
 0x52e   :  { %2899 = vmatpush.msrb.mxu0 %v8061_v51  ;;  %2919 = vmatpush.msrb.mxu1 %v8064_v44  ;;  %10637 = vst [vmem:[#allocation136_spill] sm:$0xff] %v8166_v6 }
 0x52f   :  { %2939 = vmatpush.msrb.mxu2 %v8067_v52  ;;  %2959 = vmatpush.msrb.mxu3 %v8070_v56  ;;  %10638 = vst [vmem:[#allocation149_spill] sm:$0xff] %v8169_v29 }
 0x530   :  { %v4244_v62 = vpop.eup %4243  ;;  %2900 = vmatpush.msrb.mxu0 %v8073_v18  ;;  %2920 = vmatpush.msrb.mxu1 %v8076_v48  ;;  %10639 = vst [vmem:[#allocation156_spill] sm:$0xff] %v8172_v2 }
 0x531   :  { %v8079_v37 = vmul.f32 %v4244_v62, %v2658_v43  ;;  %2940 = vmatpush.msrb.mxu2 %v8081_v40  ;;  %2960 = vmatpush.msrb.mxu3 %v8084_v42  ;;  %10640 = vst [vmem:[#allocation96_spill] sm:$0xff] %v8175_v11  ;;  %v8196_v62 = vld [vmem:[#allocation13 + $0x78] sm:$0xff]  ;;  %v8199_v43 = vld [vmem:[#allocation13 + $0x40] sm:$0xff] }
 0x532   :  { %2901 = vmatpush.msrb.mxu0 %v8087_v54  ;;  %2921 = vmatpush.msrb.mxu1 %v8090_v31  ;;  %10641 = vst [vmem:[#allocation97_spill] sm:$0xff] %v8178_v12 }
 0x533   :  { %2762 = vmatmul.f32.vlgmr.msra.gmra.mxu0 %v8079_v37  ;;  %2782 = vmatmul.f32.vlgmr.msra.gmra.mxu1 %v8079_v37  ;;  %10645 = vst [vmem:[#allocation30_spill] sm:$0xff] %v8190_v20 }
 0x534   :  { %2802 = vmatmul.f32.vlgmr.msra.gmra.mxu2 %v8079_v37  ;;  %2822 = vmatmul.f32.vlgmr.msra.gmra.mxu3 %v8079_v37  ;;  %10646 = vst [vmem:[#allocation31_spill] sm:$0xff] %v8193_v4 }
 0x535   :  { %2941 = vmatpush.msrb.mxu2 %v8097_v49  ;;  %2961 = vmatpush.msrb.mxu3 %v8100_v23  ;;  %10647 = vst [vmem:[#allocation32_spill] sm:$0xff] %v8196_v62 }
 0x536   :  { %2902 = vmatpush.msrb.mxu0 %v8103_v8  ;;  %2922 = vmatpush.msrb.mxu1 %v8106_v14  ;;  %10648 = vst [vmem:[#allocation33_spill] sm:$0xff] %v8199_v43 }
 0x537   :  { %2942 = vmatpush.msrb.mxu2 %v8109_v0  ;;  %2962 = vmatpush.msrb.mxu3 %v8112_v1 }
 0x538   :  { %2903 = vmatpush.msrb.mxu0 %v8115_v3  ;;  %2923 = vmatpush.msrb.mxu1 %v8118_v47 }
 0x539   :  { %2943 = vmatpush.msrb.mxu2 %v8121_v5  ;;  %2963 = vmatpush.msrb.mxu3 %v8124_v30 }
 0x53a   :  { %2904 = vmatpush.msrb.mxu0 %v8127_v7  ;;  %2924 = vmatpush.msrb.mxu1 %v8130_v10 }
 0x53b   :  { %2944 = vmatpush.msrb.mxu2 %v8133_v33  ;;  %2964 = vmatpush.msrb.mxu3 %v8136_v39 }
 0x53c   :  { %2905 = vmatpush.msrb.mxu0 %v8139_v61  ;;  %2925 = vmatpush.msrb.mxu1 %v8142_v24 }
 0x53d   :  { %2945 = vmatpush.msrb.mxu2 %v8145_v16  ;;  %2965 = vmatpush.msrb.mxu3 %v8148_v55 }
 0x53e   :  { %2906 = vmatpush.msrb.mxu0 %v8151_v50  ;;  %2926 = vmatpush.msrb.mxu1 %v8154_v27 }
 0x53f   :  { %2946 = vmatpush.msrb.mxu2 %v8157_v59  ;;  %2966 = vmatpush.msrb.mxu3 %v8160_v60 }
 0x540   :  { %2907 = vmatpush.msrb.mxu0 %v8163_v22  ;;  %2927 = vmatpush.msrb.mxu1 %v8166_v6 }
 0x541   :  { %2947 = vmatpush.msrb.mxu2 %v8169_v29  ;;  %2967 = vmatpush.msrb.mxu3 %v8172_v2 }
 0x542   :  { %2908 = vmatpush.msrb.mxu0 %v8175_v11  ;;  %2928 = vmatpush.msrb.mxu1 %v8178_v12 }
 0x543   :  { %2948 = vmatpush.msrb.mxu2 %v8181_v15  ;;  %2968 = vmatpush.msrb.mxu3 %v8184_v17  ;;  %v8202_v17 = vld [vmem:[#allocation13 + $0x48] sm:$0xff] }
 0x544   :  { %2909 = vmatpush.msrb.mxu0 %v8187_v26  ;;  %2929 = vmatpush.msrb.mxu1 %v8190_v20  ;;  %10649 = vst [vmem:[#allocation34_spill] sm:$0xff] %v8202_v17  ;;  %v8205_v26 = vld [vmem:[#allocation13 + $0x50] sm:$0xff]  ;;  %v8208_v20 = vld [vmem:[#allocation13 + $0x58] sm:$0xff] }
 0x545   :  { %2949 = vmatpush.msrb.mxu2 %v8193_v4  ;;  %2969 = vmatpush.msrb.mxu3 %v8196_v62  ;;  %10650 = vst [vmem:[#allocation35_spill] sm:$0xff] %v8205_v26  ;;  %v8211_v4 = vld [vmem:[#allocation13 + $0x20] sm:$0xff]  ;;  %v8214_v62 = vld [vmem:[#allocation13 + $0x28] sm:$0xff] }
 0x546   :  { %2910 = vmatpush.msrb.mxu0 %v8199_v43  ;;  %2930 = vmatpush.msrb.mxu1 %v8202_v17  ;;  %10651 = vst [vmem:[#allocation36_spill] sm:$0xff] %v8208_v20  ;;  %v8217_v43 = vld [vmem:[#allocation13 + $0x30] sm:$0xff]  ;;  %v8220_v17 = vld [vmem:[#allocation13 + $0x38] sm:$0xff] }
 0x547   :  { %2950 = vmatpush.msrb.mxu2 %v8205_v26  ;;  %2970 = vmatpush.msrb.mxu3 %v8208_v20  ;;  %10652 = vst [vmem:[#allocation37_spill] sm:$0xff] %v8211_v4  ;;  %v8223_v26 = vld [vmem:[#allocation13] sm:$0xff]  ;;  %v8226_v20 = vld [vmem:[#allocation13 + $0x8] sm:$0xff] }
 0x548   :  { %2911 = vmatpush.msrb.mxu0 %v8211_v4  ;;  %10653 = vst [vmem:[#allocation38_spill] sm:$0xff] %v8214_v62  ;;  %2931 = vmatpush.msrb.mxu1 %v8214_v62  ;;  %v8229_v4 = vld [vmem:[#allocation13 + $0x10] sm:$0xff]  ;;  %v8232_v62 = vld [vmem:[#allocation13 + $0x18] sm:$0xff] }
 0x549   :  { %10654 = vst [vmem:[#allocation39_spill] sm:$0xff] %v8217_v43  ;;  %2951 = vmatpush.msrb.mxu2 %v8217_v43  ;;  %2971 = vmatpush.msrb.mxu3 %v8220_v17 }
 0x54a   :  { %10655 = vst [vmem:[#allocation40_spill] sm:$0xff] %v8220_v17  ;;  %2912 = vmatpush.msrb.mxu0 %v8223_v26  ;;  %2932 = vmatpush.msrb.mxu1 %v8226_v20  ;;  %v8251_v17 = vld [vmem:[#allocation16 + $0x1c0] sm:$0xff] }
 0x54b   :  { %10656 = vst [vmem:[#allocation41_spill] sm:$0xff] %v8223_v26  ;;  %2952 = vmatpush.msrb.mxu2 %v8229_v4  ;;  %2972 = vmatpush.msrb.mxu3 %v8232_v62  ;;  %v8239_v26 = vld [vmem:[#allocation16 + $0x1e0] sm:$0xff] }
 0x54c   :  { %10657 = vst [vmem:[#allocation42_spill] sm:$0xff] %v8226_v20  ;;  %2913 = vmatmul.f32.vlgmr.msrb.gmra.mxu0 %v8079_v37  ;;  %2933 = vmatmul.f32.vlgmr.msrb.gmra.mxu1 %v8079_v37  ;;  %v8242_v20 = vld [vmem:[#allocation16 + $0x1e8] sm:$0xff] }
 0x54d   :  { %10658 = vst [vmem:[#allocation43_spill] sm:$0xff] %v8229_v4  ;;  %2953 = vmatmul.f32.vlgmr.msrb.gmra.mxu2 %v8079_v37  ;;  %2973 = vmatmul.f32.vlgmr.msrb.gmra.mxu3 %v8079_v37  ;;  %v8245_v4 = vld [vmem:[#allocation16 + $0x1f0] sm:$0xff]  ;;  %v8254_v37 = vld [vmem:[#allocation16 + $0x1c8] sm:$0xff] }
 0x54e   :  { %10659 = vst [vmem:[#allocation44_spill] sm:$0xff] %v8232_v62  ;;  %3044 = vmatpush.msra.mxu0 %v8239_v26  ;;  %3064 = vmatpush.msra.mxu1 %v8242_v20  ;;  %v8248_v62 = vld [vmem:[#allocation16 + $0x1f8] sm:$0xff] }
 0x54f   :  { %10660 = vst [vmem:[#allocation45_spill] sm:$0xff] %v8239_v26  ;;  %3084 = vmatpush.msra.mxu2 %v8245_v4  ;;  %3104 = vmatpush.msra.mxu3 %v8248_v62  ;;  %v8257_v26 = vld [vmem:[#allocation16 + $0x1d0] sm:$0xff] }
 0x550   :  { %10661 = vst [vmem:[#allocation46_spill] sm:$0xff] %v8242_v20  ;;  %3045 = vmatpush.msra.mxu0 %v8251_v17  ;;  %3065 = vmatpush.msra.mxu1 %v8254_v37  ;;  %v8260_v20 = vld [vmem:[#allocation16 + $0x1d8] sm:$0xff] }
 0x551   :  { %10662 = vst [vmem:[#allocation47_spill] sm:$0xff] %v8245_v4  ;;  %3085 = vmatpush.msra.mxu2 %v8257_v26  ;;  %3105 = vmatpush.msra.mxu3 %v8260_v20  ;;  %v8263_v4 = vld [vmem:[#allocation16 + $0x1a0] sm:$0xff] }
 0x552   :  { %10663 = vst [vmem:[#allocation48_spill] sm:$0xff] %v8248_v62  ;;  %3046 = vmatpush.msra.mxu0 %v8263_v4  ;;  %v8266_v62 = vld [vmem:[#allocation16 + $0x1a8] sm:$0xff] }
 0x553   :  { %10664 = vst [vmem:[#allocation49_spill] sm:$0xff] %v8251_v17  ;;  %3066 = vmatpush.msra.mxu1 %v8266_v62  ;;  %v8269_v17 = vld [vmem:[#allocation16 + $0x1b0] sm:$0xff] }
 0x554   :  { %10665 = vst [vmem:[#allocation50_spill] sm:$0xff] %v8254_v37  ;;  %3086 = vmatpush.msra.mxu2 %v8269_v17  ;;  %v8272_v37 = vld [vmem:[#allocation16 + $0x1b8] sm:$0xff] }
 0x555   :  { %10666 = vst [vmem:[#allocation51_spill] sm:$0xff] %v8257_v26  ;;  %3106 = vmatpush.msra.mxu3 %v8272_v37  ;;  %v8275_v26 = vld [vmem:[#allocation16 + $0x180] sm:$0xff] }
 0x556   :  { %10667 = vst [vmem:[#allocation52_spill] sm:$0xff] %v8260_v20  ;;  %3047 = vmatpush.msra.mxu0 %v8275_v26  ;;  %v8278_v20 = vld [vmem:[#allocation16 + $0x188] sm:$0xff] }
 0x557   :  { %10668 = vst [vmem:[#allocation53_spill] sm:$0xff] %v8263_v4  ;;  %3067 = vmatpush.msra.mxu1 %v8278_v20  ;;  %v8281_v4 = vld [vmem:[#allocation16 + $0x190] sm:$0xff] }
 0x558   :  { %10669 = vst [vmem:[#allocation54_spill] sm:$0xff] %v8266_v62  ;;  %3087 = vmatpush.msra.mxu2 %v8281_v4  ;;  %v8284_v62 = vld [vmem:[#allocation16 + $0x198] sm:$0xff] }
 0x559   :  { %10670 = vst [vmem:[#allocation55_spill] sm:$0xff] %v8269_v17  ;;  %3107 = vmatpush.msra.mxu3 %v8284_v62  ;;  %v8287_v17 = vld [vmem:[#allocation16 + $0x160] sm:$0xff] }
 0x55a   :  { %10671 = vst [vmem:[#allocation56_spill] sm:$0xff] %v8272_v37  ;;  %3048 = vmatpush.msra.mxu0 %v8287_v17  ;;  %v8290_v37 = vld [vmem:[#allocation16 + $0x168] sm:$0xff] }
 0x55b   :  { %10672 = vst [vmem:[#allocation57_spill] sm:$0xff] %v8275_v26  ;;  %3068 = vmatpush.msra.mxu1 %v8290_v37  ;;  %v8293_v26 = vld [vmem:[#allocation16 + $0x170] sm:$0xff] }
 0x55c   :  { %10673 = vst [vmem:[#allocation58_spill] sm:$0xff] %v8278_v20  ;;  %3088 = vmatpush.msra.mxu2 %v8293_v26  ;;  %v8296_v20 = vld [vmem:[#allocation16 + $0x178] sm:$0xff] }
 0x55d   :  { %10674 = vst [vmem:[#allocation59_spill] sm:$0xff] %v8281_v4  ;;  %3108 = vmatpush.msra.mxu3 %v8296_v20  ;;  %v8299_v4 = vld [vmem:[#allocation16 + $0x140] sm:$0xff] }
 0x55e   :  { %10675 = vst [vmem:[#allocation60_spill] sm:$0xff] %v8284_v62  ;;  %3049 = vmatpush.msra.mxu0 %v8299_v4  ;;  %v8302_v62 = vld [vmem:[#allocation16 + $0x148] sm:$0xff] }
 0x55f   :  { %10676 = vst [vmem:[#allocation61_spill] sm:$0xff] %v8287_v17  ;;  %3069 = vmatpush.msra.mxu1 %v8302_v62  ;;  %v8305_v17 = vld [vmem:[#allocation16 + $0x150] sm:$0xff] }
 0x560   :  { %10677 = vst [vmem:[#allocation62_spill] sm:$0xff] %v8290_v37  ;;  %3089 = vmatpush.msra.mxu2 %v8305_v17  ;;  %v8308_v37 = vld [vmem:[#allocation16 + $0x158] sm:$0xff] }
 0x561   :  { %10678 = vst [vmem:[#allocation63_spill] sm:$0xff] %v8293_v26  ;;  %3109 = vmatpush.msra.mxu3 %v8308_v37  ;;  %v8311_v26 = vld [vmem:[#allocation16 + $0x120] sm:$0xff] }
 0x562   :  { %10679 = vst [vmem:[#allocation64_spill] sm:$0xff] %v8296_v20  ;;  %3050 = vmatpush.msra.mxu0 %v8311_v26  ;;  %v8314_v20 = vld [vmem:[#allocation16 + $0x128] sm:$0xff] }
 0x563   :  { %10680 = vst [vmem:[#allocation65_spill] sm:$0xff] %v8299_v4  ;;  %3070 = vmatpush.msra.mxu1 %v8314_v20  ;;  %v8317_v4 = vld [vmem:[#allocation16 + $0x130] sm:$0xff] }
 0x564   :  { %10681 = vst [vmem:[#allocation66_spill] sm:$0xff] %v8302_v62  ;;  %3090 = vmatpush.msra.mxu2 %v8317_v4  ;;  %v8320_v62 = vld [vmem:[#allocation16 + $0x138] sm:$0xff] }
 0x565   :  { %10682 = vst [vmem:[#allocation67_spill] sm:$0xff] %v8305_v17  ;;  %3110 = vmatpush.msra.mxu3 %v8320_v62  ;;  %v8323_v17 = vld [vmem:[#allocation16 + $0x100] sm:$0xff] }
 0x566   :  { %10683 = vst [vmem:[#allocation68_spill] sm:$0xff] %v8308_v37  ;;  %3051 = vmatpush.msra.mxu0 %v8323_v17  ;;  %v8326_v37 = vld [vmem:[#allocation16 + $0x108] sm:$0xff] }
 0x567   :  { %10684 = vst [vmem:[#allocation69_spill] sm:$0xff] %v8311_v26  ;;  %3071 = vmatpush.msra.mxu1 %v8326_v37  ;;  %v8329_v26 = vld [vmem:[#allocation16 + $0x110] sm:$0xff] }
 0x568   :  { %10685 = vst [vmem:[#allocation70_spill] sm:$0xff] %v8314_v20  ;;  %3091 = vmatpush.msra.mxu2 %v8329_v26  ;;  %v8332_v20 = vld [vmem:[#allocation16 + $0x118] sm:$0xff] }
 0x569   :  { %10686 = vst [vmem:[#allocation71_spill] sm:$0xff] %v8317_v4  ;;  %3111 = vmatpush.msra.mxu3 %v8332_v20  ;;  %v8335_v4 = vld [vmem:[#allocation16 + $0xe0] sm:$0xff] }
 0x56a   :  { %10687 = vst [vmem:[#allocation72_spill] sm:$0xff] %v8320_v62  ;;  %3052 = vmatpush.msra.mxu0 %v8335_v4  ;;  %v8338_v62 = vld [vmem:[#allocation16 + $0xe8] sm:$0xff] }
 0x56b   :  { %10688 = vst [vmem:[#allocation73_spill] sm:$0xff] %v8323_v17  ;;  %3072 = vmatpush.msra.mxu1 %v8338_v62  ;;  %v8341_v17 = vld [vmem:[#allocation16 + $0xf0] sm:$0xff] }
 0x56c   :  { %10689 = vst [vmem:[#allocation74_spill] sm:$0xff] %v8326_v37  ;;  %3092 = vmatpush.msra.mxu2 %v8341_v17  ;;  %v8344_v37 = vld [vmem:[#allocation16 + $0xf8] sm:$0xff] }
 0x56d   :  { %10690 = vst [vmem:[#allocation75_spill] sm:$0xff] %v8329_v26  ;;  %3112 = vmatpush.msra.mxu3 %v8344_v37  ;;  %v8347_v26 = vld [vmem:[#allocation16 + $0xc0] sm:$0xff] }
 0x56e   :  { %10691 = vst [vmem:[#allocation78_spill] sm:$0xff] %v8332_v20  ;;  %3053 = vmatpush.msra.mxu0 %v8347_v26  ;;  %v8350_v20 = vld [vmem:[#allocation16 + $0xc8] sm:$0xff] }
 0x56f   :  { %10692 = vst [vmem:[#allocation79_spill] sm:$0xff] %v8335_v4  ;;  %3073 = vmatpush.msra.mxu1 %v8350_v20  ;;  %v8353_v4 = vld [vmem:[#allocation16 + $0xd0] sm:$0xff] }
 0x570   :  { %10693 = vst [vmem:[#allocation80_spill] sm:$0xff] %v8338_v62  ;;  %3093 = vmatpush.msra.mxu2 %v8353_v4  ;;  %v8356_v62 = vld [vmem:[#allocation16 + $0xd8] sm:$0xff] }
 0x571   :  { %10694 = vst [vmem:[#allocation81_spill] sm:$0xff] %v8341_v17  ;;  %3113 = vmatpush.msra.mxu3 %v8356_v62  ;;  %v8359_v17 = vld [vmem:[#allocation16 + $0xa0] sm:$0xff] }
 0x572   :  { %10695 = vst [vmem:[#allocation82_spill] sm:$0xff] %v8344_v37  ;;  %3054 = vmatpush.msra.mxu0 %v8359_v17  ;;  %v8362_v37 = vld [vmem:[#allocation16 + $0xa8] sm:$0xff] }
 0x573   :  { %10696 = vst [vmem:[#allocation83_spill] sm:$0xff] %v8347_v26  ;;  %3074 = vmatpush.msra.mxu1 %v8362_v37  ;;  %v8365_v26 = vld [vmem:[#allocation16 + $0xb0] sm:$0xff] }
 0x574   :  { %10697 = vst [vmem:[#allocation84_spill] sm:$0xff] %v8350_v20  ;;  %3094 = vmatpush.msra.mxu2 %v8365_v26  ;;  %v8368_v20 = vld [vmem:[#allocation16 + $0xb8] sm:$0xff] }
 0x575   :  { %10698 = vst [vmem:[#allocation85_spill] sm:$0xff] %v8353_v4  ;;  %3114 = vmatpush.msra.mxu3 %v8368_v20  ;;  %v8371_v4 = vld [vmem:[#allocation16 + $0x80] sm:$0xff] }
 0x576   :  { %10699 = vst [vmem:[#allocation86_spill] sm:$0xff] %v8356_v62  ;;  %3055 = vmatpush.msra.mxu0 %v8371_v4  ;;  %v8374_v62 = vld [vmem:[#allocation16 + $0x88] sm:$0xff] }
 0x577   :  { %10700 = vst [vmem:[#allocation87_spill] sm:$0xff] %v8359_v17  ;;  %3075 = vmatpush.msra.mxu1 %v8374_v62  ;;  %v8377_v17 = vld [vmem:[#allocation16 + $0x90] sm:$0xff] }
 0x578   :  { %10701 = vst [vmem:[#allocation88_spill] sm:$0xff] %v8362_v37  ;;  %3095 = vmatpush.msra.mxu2 %v8377_v17  ;;  %v8380_v37 = vld [vmem:[#allocation16 + $0x98] sm:$0xff] }
 0x579   :  { %10702 = vst [vmem:[#allocation89_spill] sm:$0xff] %v8365_v26  ;;  %3115 = vmatpush.msra.mxu3 %v8380_v37  ;;  %v8383_v26 = vld [vmem:[#allocation16 + $0x60] sm:$0xff] }
 0x57a   :  { %10703 = vst [vmem:[#allocation90_spill] sm:$0xff] %v8368_v20  ;;  %3056 = vmatpush.msra.mxu0 %v8383_v26  ;;  %v8386_v20 = vld [vmem:[#allocation16 + $0x68] sm:$0xff] }
 0x57b   :  { %10704 = vst [vmem:[#allocation93_spill] sm:$0xff] %v8371_v4  ;;  %3076 = vmatpush.msra.mxu1 %v8386_v20  ;;  %v8389_v4 = vld [vmem:[#allocation16 + $0x70] sm:$0xff] }
 0x57c   :  { %10705 = vst [vmem:[#allocation94_spill] sm:$0xff] %v8374_v62  ;;  %3096 = vmatpush.msra.mxu2 %v8389_v4  ;;  %v8392_v62 = vld [vmem:[#allocation16 + $0x78] sm:$0xff] }
 0x57d   :  { %10706 = vst [vmem:[#allocation95_spill] sm:$0xff] %v8377_v17  ;;  %3116 = vmatpush.msra.mxu3 %v8392_v62  ;;  %v8395_v17 = vld [vmem:[#allocation16 + $0x40] sm:$0xff] }
 0x57e   :  { %10707 = vst [vmem:[#allocation98_spill] sm:$0xff] %v8380_v37  ;;  %3057 = vmatpush.msra.mxu0 %v8395_v17  ;;  %v8398_v37 = vld [vmem:[#allocation16 + $0x48] sm:$0xff] }
 0x57f   :  { %10708 = vst [vmem:[#allocation99_spill] sm:$0xff] %v8383_v26  ;;  %3077 = vmatpush.msra.mxu1 %v8398_v37  ;;  %v8401_v26 = vld [vmem:[#allocation16 + $0x50] sm:$0xff] }
 0x580   :  { %10709 = vst [vmem:[#allocation100_spill] sm:$0xff] %v8386_v20  ;;  %3097 = vmatpush.msra.mxu2 %v8401_v26  ;;  %v8404_v20 = vld [vmem:[#allocation16 + $0x58] sm:$0xff] }
 0x581   :  { %10710 = vst [vmem:[#allocation101_spill] sm:$0xff] %v8389_v4  ;;  %3117 = vmatpush.msra.mxu3 %v8404_v20  ;;  %v8407_v4 = vld [vmem:[#allocation16 + $0x20] sm:$0xff] }
 0x582   :  { %10711 = vst [vmem:[#allocation102_spill] sm:$0xff] %v8392_v62  ;;  %3058 = vmatpush.msra.mxu0 %v8407_v4  ;;  %v8410_v62 = vld [vmem:[#allocation16 + $0x28] sm:$0xff] }
 0x583   :  { %10712 = vst [vmem:[#allocation103_spill] sm:$0xff] %v8395_v17  ;;  %3078 = vmatpush.msra.mxu1 %v8410_v62  ;;  %v8413_v17 = vld [vmem:[#allocation16 + $0x30] sm:$0xff] }
 0x584   :  { %10713 = vst [vmem:[#allocation104_spill] sm:$0xff] %v8398_v37  ;;  %3098 = vmatpush.msra.mxu2 %v8413_v17  ;;  %v8416_v37 = vld [vmem:[#allocation16 + $0x38] sm:$0xff] }
 0x585   :  { %10714 = vst [vmem:[#allocation105_spill] sm:$0xff] %v8401_v26  ;;  %3118 = vmatpush.msra.mxu3 %v8416_v37  ;;  %v8419_v26 = vld [vmem:[#allocation16] sm:$0xff] }
 0x586   :  { %10715 = vst [vmem:[#allocation106_spill] sm:$0xff] %v8404_v20  ;;  %3059 = vmatpush.msra.mxu0 %v8419_v26  ;;  %v8422_v20 = vld [vmem:[#allocation16 + $0x8] sm:$0xff] }
 0x587   :  { %10716 = vst [vmem:[#allocation107_spill] sm:$0xff] %v8407_v4  ;;  %3079 = vmatpush.msra.mxu1 %v8422_v20  ;;  %v8425_v4 = vld [vmem:[#allocation16 + $0x10] sm:$0xff] }
 0x588   :  { %10717 = vst [vmem:[#allocation108_spill] sm:$0xff] %v8410_v62  ;;  %3099 = vmatpush.msra.mxu2 %v8425_v4  ;;  %v8428_v62 = vld [vmem:[#allocation16 + $0x18] sm:$0xff] }
 0x589   :  { %10718 = vst [vmem:[#allocation109_spill] sm:$0xff] %v8413_v17  ;;  %3119 = vmatpush.msra.mxu3 %v8428_v62  ;;  %v8431_v17 = vld [vmem:[#allocation15 + $0x1e0] sm:$0xff] }
 0x58a   :  { %10719 = vst [vmem:[#allocation110_spill] sm:$0xff] %v8416_v37  ;;  %3124 = vmatpush.msrb.mxu0 %v8431_v17  ;;  %v8434_v37 = vld [vmem:[#allocation15 + $0x1e8] sm:$0xff] }
 0x58b   :  { %10720 = vst [vmem:[#allocation111_spill] sm:$0xff] %v8419_v26  ;;  %3144 = vmatpush.msrb.mxu1 %v8434_v37  ;;  %v8437_v26 = vld [vmem:[#allocation15 + $0x1f0] sm:$0xff] }
 0x58c   :  { %10721 = vst [vmem:[#allocation112_spill] sm:$0xff] %v8422_v20  ;;  %3164 = vmatpush.msrb.mxu2 %v8437_v26  ;;  %v8440_v20 = vld [vmem:[#allocation15 + $0x1f8] sm:$0xff] }
 0x58d   :  { %10722 = vst [vmem:[#allocation113_spill] sm:$0xff] %v8425_v4  ;;  %3184 = vmatpush.msrb.mxu3 %v8440_v20  ;;  %v8443_v4 = vld [vmem:[#allocation15 + $0x1c0] sm:$0xff] }
 0x58e   :  { %10723 = vst [vmem:[#allocation116_spill] sm:$0xff] %v8428_v62  ;;  %3125 = vmatpush.msrb.mxu0 %v8443_v4  ;;  %v8446_v62 = vld [vmem:[#allocation15 + $0x1c8] sm:$0xff] }
 0x58f   :  { %10724 = vst [vmem:[#allocation119_spill] sm:$0xff] %v8431_v17  ;;  %3145 = vmatpush.msrb.mxu1 %v8446_v62  ;;  %v8449_v17 = vld [vmem:[#allocation15 + $0x1d0] sm:$0xff] }
 0x590   :  { %10725 = vst [vmem:[#allocation120_spill] sm:$0xff] %v8434_v37  ;;  %3165 = vmatpush.msrb.mxu2 %v8449_v17  ;;  %v8452_v37 = vld [vmem:[#allocation15 + $0x1d8] sm:$0xff] }
 0x591   :  { %10726 = vst [vmem:[#allocation121_spill] sm:$0xff] %v8437_v26  ;;  %3185 = vmatpush.msrb.mxu3 %v8452_v37  ;;  %v8455_v26 = vld [vmem:[#allocation15 + $0x1a0] sm:$0xff] }
 0x592   :  { %10727 = vst [vmem:[#allocation122_spill] sm:$0xff] %v8440_v20  ;;  %3126 = vmatpush.msrb.mxu0 %v8455_v26  ;;  %v8458_v20 = vld [vmem:[#allocation15 + $0x1a8] sm:$0xff] }
 0x593   :  { %10728 = vst [vmem:[#allocation123_spill] sm:$0xff] %v8443_v4  ;;  %3146 = vmatpush.msrb.mxu1 %v8458_v20  ;;  %v8461_v4 = vld [vmem:[#allocation15 + $0x1b0] sm:$0xff] }
 0x594   :  { %10729 = vst [vmem:[#allocation124_spill] sm:$0xff] %v8446_v62  ;;  %3166 = vmatpush.msrb.mxu2 %v8461_v4  ;;  %v8464_v62 = vld [vmem:[#allocation15 + $0x1b8] sm:$0xff] }
 0x595   :  { %10730 = vst [vmem:[#allocation125_spill] sm:$0xff] %v8449_v17  ;;  %3186 = vmatpush.msrb.mxu3 %v8464_v62  ;;  %v8467_v17 = vld [vmem:[#allocation15 + $0x180] sm:$0xff] }
 0x596   :  { %10731 = vst [vmem:[#allocation126_spill] sm:$0xff] %v8452_v37  ;;  %3127 = vmatpush.msrb.mxu0 %v8467_v17  ;;  %v8470_v37 = vld [vmem:[#allocation15 + $0x188] sm:$0xff] }
 0x597   :  { %10732 = vst [vmem:[#allocation127_spill] sm:$0xff] %v8455_v26  ;;  %3147 = vmatpush.msrb.mxu1 %v8470_v37  ;;  %v8473_v26 = vld [vmem:[#allocation15 + $0x190] sm:$0xff] }
 0x598   :  { %10733 = vst [vmem:[#allocation128_spill] sm:$0xff] %v8458_v20  ;;  %3167 = vmatpush.msrb.mxu2 %v8473_v26  ;;  %v8476_v20 = vld [vmem:[#allocation15 + $0x198] sm:$0xff] }
 0x599   :  { %10734 = vst [vmem:[#allocation129_spill] sm:$0xff] %v8461_v4  ;;  %3187 = vmatpush.msrb.mxu3 %v8476_v20  ;;  %v8479_v4 = vld [vmem:[#allocation15 + $0x160] sm:$0xff] }
 0x59a   :  { %10735 = vst [vmem:[#allocation130_spill] sm:$0xff] %v8464_v62  ;;  %3128 = vmatpush.msrb.mxu0 %v8479_v4  ;;  %v8482_v62 = vld [vmem:[#allocation15 + $0x168] sm:$0xff] }
 0x59b   :  { %10736 = vst [vmem:[#allocation131_spill] sm:$0xff] %v8467_v17  ;;  %3148 = vmatpush.msrb.mxu1 %v8482_v62  ;;  %v8485_v17 = vld [vmem:[#allocation15 + $0x170] sm:$0xff] }
 0x59c   :  { %10737 = vst [vmem:[#allocation134_spill] sm:$0xff] %v8470_v37  ;;  %3168 = vmatpush.msrb.mxu2 %v8485_v17  ;;  %v8488_v37 = vld [vmem:[#allocation15 + $0x178] sm:$0xff] }
 0x59d   :  { %10738 = vst [vmem:[#allocation137_spill] sm:$0xff] %v8473_v26  ;;  %3188 = vmatpush.msrb.mxu3 %v8488_v37  ;;  %v8491_v26 = vld [vmem:[#allocation15 + $0x140] sm:$0xff] }
 0x59e   :  { %10739 = vst [vmem:[#allocation138_spill] sm:$0xff] %v8476_v20  ;;  %3129 = vmatpush.msrb.mxu0 %v8491_v26  ;;  %v8494_v20 = vld [vmem:[#allocation15 + $0x148] sm:$0xff] }
 0x59f   :  { %10740 = vst [vmem:[#allocation139_spill] sm:$0xff] %v8479_v4  ;;  %3149 = vmatpush.msrb.mxu1 %v8494_v20  ;;  %v8497_v4 = vld [vmem:[#allocation15 + $0x150] sm:$0xff] }
 0x5a0   :  { %10741 = vst [vmem:[#allocation140_spill] sm:$0xff] %v8482_v62  ;;  %3169 = vmatpush.msrb.mxu2 %v8497_v4  ;;  %v8500_v62 = vld [vmem:[#allocation15 + $0x158] sm:$0xff] }
 0x5a1   :  { %10742 = vst [vmem:[#allocation141_spill] sm:$0xff] %v8485_v17  ;;  %3189 = vmatpush.msrb.mxu3 %v8500_v62  ;;  %v8503_v17 = vld [vmem:[#allocation15 + $0x120] sm:$0xff] }
 0x5a2   :  { %10743 = vst [vmem:[#allocation142_spill] sm:$0xff] %v8488_v37  ;;  %3130 = vmatpush.msrb.mxu0 %v8503_v17  ;;  %v8506_v37 = vld [vmem:[#allocation15 + $0x128] sm:$0xff] }
 0x5a3   :  { %10744 = vst [vmem:[#allocation143_spill] sm:$0xff] %v8491_v26  ;;  %3150 = vmatpush.msrb.mxu1 %v8506_v37  ;;  %v8509_v26 = vld [vmem:[#allocation15 + $0x130] sm:$0xff] }
 0x5a4   :  { %10745 = vst [vmem:[#allocation144_spill] sm:$0xff] %v8494_v20  ;;  %3170 = vmatpush.msrb.mxu2 %v8509_v26  ;;  %v8512_v20 = vld [vmem:[#allocation15 + $0x138] sm:$0xff] }
 0x5a5   :  { %10746 = vst [vmem:[#allocation145_spill] sm:$0xff] %v8497_v4  ;;  %3190 = vmatpush.msrb.mxu3 %v8512_v20  ;;  %v8515_v4 = vld [vmem:[#allocation15 + $0x100] sm:$0xff]  ;;  %v2703_v43 = vpop.f32.mrf.mxu1 }
 0x5a6   :  { %10747 = vst [vmem:[#allocation146_spill] sm:$0xff] %v8500_v62  ;;  %3131 = vmatpush.msrb.mxu0 %v8515_v4  ;;  %v8518_v62 = vld [vmem:[#allocation15 + $0x108] sm:$0xff] }
 0x5a7   :  { %10748 = vst [vmem:[#allocation147_spill] sm:$0xff] %v8503_v17  ;;  %3151 = vmatpush.msrb.mxu1 %v8518_v62  ;;  %v8521_v17 = vld [vmem:[#allocation15 + $0x110] sm:$0xff] }
 0x5a8   :  { %10749 = vst [vmem:[#allocation148_spill] sm:$0xff] %v8506_v37  ;;  %3171 = vmatpush.msrb.mxu2 %v8521_v17  ;;  %v8524_v37 = vld [vmem:[#allocation15 + $0x118] sm:$0xff] }
 0x5a9   :  { %10750 = vst [vmem:[#allocation150_spill] sm:$0xff] %v8509_v26  ;;  %3191 = vmatpush.msrb.mxu3 %v8524_v37  ;;  %v8527_v26 = vld [vmem:[#allocation15 + $0xe0] sm:$0xff] }
 0x5aa   :  { %10751 = vst [vmem:[#allocation151_spill] sm:$0xff] %v8512_v20  ;;  %3132 = vmatpush.msrb.mxu0 %v8527_v26  ;;  %v8530_v20 = vld [vmem:[#allocation15 + $0xe8] sm:$0xff] }
 0x5ab   :  { %10752 = vst [vmem:[#allocation152_spill] sm:$0xff] %v8515_v4  ;;  %3152 = vmatpush.msrb.mxu1 %v8530_v20  ;;  %v8533_v4 = vld [vmem:[#allocation15 + $0xf0] sm:$0xff] }
 0x5ac   :  { %10753 = vst [vmem:[#allocation155_spill] sm:$0xff] %v8518_v62  ;;  %3172 = vmatpush.msrb.mxu2 %v8533_v4  ;;  %v8536_v62 = vld [vmem:[#allocation15 + $0xf8] sm:$0xff]  ;;  %v2723_v15 = vpop.f32.mrf.mxu2 }
 0x5ad   :  { %10754 = vst [vmem:[#allocation157_spill] sm:$0xff] %v8521_v17  ;;  %3192 = vmatpush.msrb.mxu3 %v8536_v62  ;;  %v8539_v17 = vld [vmem:[#allocation15 + $0xc0] sm:$0xff] }
 0x5ae   :  { %10755 = vst [vmem:[#allocation158_spill] sm:$0xff] %v8524_v37  ;;  %3133 = vmatpush.msrb.mxu0 %v8539_v17  ;;  %v8542_v37 = vld [vmem:[#allocation15 + $0xc8] sm:$0xff] }
 0x5af   :  { %10756 = vst [vmem:[#allocation159_spill] sm:$0xff] %v8527_v26  ;;  %3153 = vmatpush.msrb.mxu1 %v8542_v37  ;;  %v8545_v26 = vld [vmem:[#allocation15 + $0xd0] sm:$0xff] }
 0x5b0   :  { %10757 = vst [vmem:[#allocation160_spill] sm:$0xff] %v8530_v20  ;;  %3173 = vmatpush.msrb.mxu2 %v8545_v26  ;;  %v8548_v20 = vld [vmem:[#allocation15 + $0xd8] sm:$0xff]  ;;  %v2783_v12 = vpop.f32.mrf.mxu1 }
 0x5b1   :  { %10758 = vst [vmem:[#allocation161_spill] sm:$0xff] %v8533_v4  ;;  %3193 = vmatpush.msrb.mxu3 %v8548_v20  ;;  %v8551_v4 = vld [vmem:[#allocation15 + $0xa0] sm:$0xff]  ;;  %v2784_v2 = vadd.f32 %v2783_v12, %v2703_v43 }
 0x5b2   :  { %10759 = vst [vmem:[#allocation162_spill] sm:$0xff] %v8536_v62  ;;  %3134 = vmatpush.msrb.mxu0 %v8551_v4  ;;  %v8554_v62 = vld [vmem:[#allocation15 + $0xa8] sm:$0xff] }
 0x5b3   :  { %10760 = vst [vmem:[#allocation163_spill] sm:$0xff] %v8539_v17  ;;  %3154 = vmatpush.msrb.mxu1 %v8554_v62  ;;  %v8557_v17 = vld [vmem:[#allocation15 + $0xb0] sm:$0xff]  ;;  %v2827_v29 = vadd.f32 %v2784_v2, %v10614_v38 }
 0x5b4   :  { %10761 = vst [vmem:[#allocation164_spill] sm:$0xff] %v8542_v37  ;;  %3174 = vmatpush.msrb.mxu2 %v8557_v17  ;;  %v8560_v37 = vld [vmem:[#allocation15 + $0xb8] sm:$0xff] }
 0x5b5   :  { %10762 = vst [vmem:[#allocation165_spill] sm:$0xff] %v8545_v26  ;;  %3194 = vmatpush.msrb.mxu3 %v8560_v37  ;;  %v8563_v26 = vld [vmem:[#allocation15 + $0x80] sm:$0xff]  ;;  %v4040_v22 = vmul.f32 -1.442695, %v2827_v29 }
 0x5b6   :  { %10763 = vst [vmem:[#allocation166_spill] sm:$0xff] %v8548_v20  ;;  %3135 = vmatpush.msrb.mxu0 %v8563_v26  ;;  %v8566_v20 = vld [vmem:[#allocation15 + $0x88] sm:$0xff] }
 0x5b7   :  { %10764 = vst [vmem:[#allocation167_spill] sm:$0xff] %v8551_v4  ;;  %3155 = vmatpush.msrb.mxu1 %v8566_v20  ;;  %v8569_v4 = vld [vmem:[#allocation15 + $0x90] sm:$0xff] }
 0x5b8   :  { %10765 = vst [vmem:[#allocation169_spill] sm:$0xff] %v8554_v62  ;;  %3175 = vmatpush.msrb.mxu2 %v8569_v4  ;;  %v8572_v62 = vld [vmem:[#allocation15 + $0x98] sm:$0xff] }
 0x5b9   :  { %10766 = vst [vmem:[#allocation170_spill] sm:$0xff] %v8557_v17  ;;  %3195 = vmatpush.msrb.mxu3 %v8572_v62  ;;  %v8575_v17 = vld [vmem:[#allocation15 + $0x60] sm:$0xff] }
 0x5ba   :  { %10767 = vst [vmem:[#allocation171_spill] sm:$0xff] %v8560_v37  ;;  %3136 = vmatpush.msrb.mxu0 %v8575_v17  ;;  %v8578_v37 = vld [vmem:[#allocation15 + $0x68] sm:$0xff] }
 0x5bb   :  { %10768 = vst [vmem:[#allocation174_spill] sm:$0xff] %v8563_v26  ;;  %3156 = vmatpush.msrb.mxu1 %v8578_v37  ;;  %v8581_v26 = vld [vmem:[#allocation15 + $0x70] sm:$0xff] }
 0x5bc   :  { %10769 = vst [vmem:[#allocation175_spill] sm:$0xff] %v8566_v20  ;;  %3176 = vmatpush.msrb.mxu2 %v8581_v26  ;;  %v8584_v20 = vld [vmem:[#allocation15 + $0x78] sm:$0xff] }
 0x5bd   :  { %10770 = vst [vmem:[#allocation176_spill] sm:$0xff] %v8569_v4  ;;  %3196 = vmatpush.msrb.mxu3 %v8584_v20  ;;  %v8587_v4 = vld [vmem:[#allocation15 + $0x40] sm:$0xff] }
 0x5be   :  { %10771 = vst [vmem:[#allocation177_spill] sm:$0xff] %v8572_v62  ;;  %3137 = vmatpush.msrb.mxu0 %v8587_v4  ;;  %v8590_v62 = vld [vmem:[#allocation15 + $0x48] sm:$0xff] }
 0x5bf   :  { %10772 = vst [vmem:[#allocation178_spill] sm:$0xff] %v8575_v17  ;;  %3157 = vmatpush.msrb.mxu1 %v8590_v62  ;;  %v8593_v17 = vld [vmem:[#allocation15 + $0x50] sm:$0xff] }
 0x5c0   :  { %10773 = vst [vmem:[#allocation180_spill] sm:$0xff] %v8578_v37  ;;  %3177 = vmatpush.msrb.mxu2 %v8593_v17  ;;  %v8596_v37 = vld [vmem:[#allocation15 + $0x58] sm:$0xff] }
 0x5c1   :  { %10774 = vst [vmem:[#allocation181_spill] sm:$0xff] %v8581_v26  ;;  %3197 = vmatpush.msrb.mxu3 %v8596_v37  ;;  %v8599_v26 = vld [vmem:[#allocation15 + $0x20] sm:$0xff] }
 0x5c2   :  { %10775 = vst [vmem:[#allocation182_spill] sm:$0xff] %v8584_v20  ;;  %3138 = vmatpush.msrb.mxu0 %v8599_v26  ;;  %v8602_v20 = vld [vmem:[#allocation15 + $0x28] sm:$0xff] }
 0x5c3   :  { %10776 = vst [vmem:[#allocation183_spill] sm:$0xff] %v8587_v4  ;;  %3158 = vmatpush.msrb.mxu1 %v8602_v20  ;;  %v8605_v4 = vld [vmem:[#allocation15 + $0x30] sm:$0xff] }
 0x5c4   :  { %10777 = vst [vmem:[#allocation184_spill] sm:$0xff] %v8590_v62  ;;  %3178 = vmatpush.msrb.mxu2 %v8605_v4  ;;  %v8608_v62 = vld [vmem:[#allocation15 + $0x38] sm:$0xff] }
 0x5c5   :  { %10778 = vst [vmem:[#allocation76_spill] sm:$0xff] %v8593_v17  ;;  %3198 = vmatpush.msrb.mxu3 %v8608_v62  ;;  %v8611_v17 = vld [vmem:[#allocation15] sm:$0xff] }
 0x5c6   :  { %10779 = vst [vmem:[#allocation77_spill] sm:$0xff] %v8596_v37  ;;  %3139 = vmatpush.msrb.mxu0 %v8611_v17  ;;  %v8614_v37 = vld [vmem:[#allocation15 + $0x8] sm:$0xff] }
 0x5c7   :  { %10780 = vst [vmem:[#allocation91_spill] sm:$0xff] %v8599_v26  ;;  %3159 = vmatpush.msrb.mxu1 %v8614_v37  ;;  %v8617_v26 = vld [vmem:[#allocation15 + $0x10] sm:$0xff] }
 0x5c8   :  { %10781 = vst [vmem:[#allocation92_spill] sm:$0xff] %v8602_v20  ;;  %3179 = vmatpush.msrb.mxu2 %v8617_v26  ;;  %v8620_v20 = vld [vmem:[#allocation15 + $0x18] sm:$0xff] }
 0x5c9   :  { %10782 = vst [vmem:[#allocation194_spill] sm:$0xff] %v8605_v4  ;;  %3199 = vmatpush.msrb.mxu3 %v8620_v20  ;;  %v2683_v4 = vpop.f32.mrf.mxu0 }
 0x5ca   :  { %10783 = vst [vmem:[#allocation195_spill] sm:$0xff] %v8608_v62 }
 0x5cb   :  { %10784 = vst [vmem:[#allocation196_spill] sm:$0xff] %v8611_v17 }
 0x5cc   :  { %10785 = vst [vmem:[#allocation197_spill] sm:$0xff] %v8614_v37  ;;  %v2743_v37 = vpop.f32.mrf.mxu3 }
 0x5cd   :  { %10786 = vst [vmem:[#allocation198_spill] sm:$0xff] %v8617_v26  ;;  %v2803_v26 = vpop.f32.mrf.mxu2 }
 0x5ce   :  { %10787 = vst [vmem:[#allocation199_spill] sm:$0xff] %v8620_v20  ;;  %v2804_v60 = vadd.f32 %v2803_v26, %v2723_v15 }
 0x5d0   :  { %v2828_v20 = vadd.f32 %v2804_v60, %v10615_v35  ;;  %v10788_v60 = vld [vmem:[#allocation172_spill] sm:$0xff] }
 0x5d1   :  { %v2763_v62 = vpop.f32.mrf.mxu0 }
 0x5d2   :  { %v2764_v11 = vadd.f32 %v2763_v62, %v2683_v4  ;;  %v4041_v59 = vmul.f32 -1.442695, %v2828_v20 }
 0x5d4   :  { %v2826_v17 = vadd.f32 %v2764_v11, %v10613_v13  ;;  %v2823_v4 = vpop.f32.mrf.mxu3 }
 0x5d5   :  { %v2824_v11 = vadd.f32 %v2823_v4, %v2743_v37  ;;  %v2934_v37 = vpop.f32.mrf.mxu1 }
 0x5d6   :  { %v4039_v6 = vmul.f32 -1.442695, %v2826_v17  ;;  %v259_v17 = vadd.f32 %v10788_v60, %v10616_v21 }
 0x5d8   :  { %4245 = vpow2.f32 %v4039_v6  ;;  %v2829_v6 = vadd.f32 %v2824_v11, %v10622_v41 }
 0x5d9   :  { %4247 = vpow2.f32 %v4040_v22  ;;  %v2914_v43 = vpop.f32.mrf.mxu0 }
 0x5da   :  { %4249 = vpow2.f32 %v4041_v59  ;;  %v2977_v11 = vadd.f32 %v2914_v43, %v259_v17 }
 0x5dc   :  { %v4042_v60 = vmul.f32 -1.442695, %v2977_v11 }
 0x5de   :  { %v4246_v27 = vpop.eup %4245 }
 0x5df   :  { %v4248_v50 = vpop.eup %4247  ;;  %v2839_v55 = vadd.f32 1.0, %v4246_v27  ;;  %v10789_v27 = vld [vmem:[#allocation173_spill] sm:$0xff] }
 0x5e0   :  { %v2840_v12 = vadd.f32 1.0, %v4248_v50  ;;  %v4250_v2 = vpop.eup %4249  ;;  %v300_v59 = vadd.f32 %v10789_v27, %v10618_v36  ;;  %v10790_v27 = vld [vmem:[#allocation185_spill] sm:$0xff] }
 0x5e1   :  { %4251 = vrcp.f32 %v2839_v55  ;;  %v8626_v62 = vadd.f32 1.0, %v4250_v2  ;;  %v2851_v20 = vand.u32 2147483647, %v2839_v55  ;;  %v2853_v2 = vand.u32 2147483648, %v2839_v55 }
 0x5e2   :  { %4253 = vrcp.f32 %v2840_v12  ;;  %v2978_v41 = vadd.f32 %v2934_v37, %v300_v59  ;;  %v2868_v35 = vand.u32 2147483648, %v2840_v12  ;;  %v2866_v13 = vand.u32 2147483647, %v2840_v12 }
 0x5e3   :  { %4255 = vrcp.f32 %v8626_v62  ;;  %vm2862_vm7 = vweird.f32 %v2840_v12  ;;  %vm2847_vm8 = vweird.f32 %v2839_v55  ;;  %v2854_v17 = vor.u32 1.1754944e-38, %v2853_v2 }
 0x5e4   :  { %4257 = vtanh.f32 %v2829_v6  ;;  %v4043_v21 = vmul.f32 -1.442695, %v2978_v41  ;;  %v2869_v43 = vor.u32 1.1754944e-38, %v2868_v35  ;;  %vm2852_vm11 = vcmp.eq.f32.partialorder %v2851_v20, 8.507059e+37 }
 0x5e5   :  { %4259 = vpow2.f32 %v4042_v60  ;;  %vm2867_vm12 = vcmp.eq.f32.partialorder %v2866_v13, 8.507059e+37  ;;  %vm2877_vm14 = vweird.f32 %v8626_v62 }
 0x5e6   :  { %4261 = vpow2.f32 %v4043_v21 }
 0x5e7   :  { %v4252_v29 = vpop.eup %4251 }
 0x5e8   :  { %v4254_v22 = vpop.eup %4253  ;;  %v2843_v15 = vmul.f32 %v4252_v29, %v2839_v55  ;;  %vm2848_vm5 = vweird.f32 %v4252_v29 }
 0x5e9   :  { %v2858_v50 = vmul.f32 %v4254_v22, %v2840_v12  ;;  %vm2863_vm6 = vweird.f32 %v4254_v22  ;;  %v4256_v24 = vpop.eup %4255  ;;  %vm2849_vm9 = vmor %vm2847_vm8, %vm2848_vm5 }
 0x5ea   :  { %v2844_v26 = vsub.f32 1.0, %v2843_v15  ;;  %v341_v15 = vadd.f32 %v10790_v27, %v10620_v34  ;;  %vm2864_vm10 = vmor %vm2862_vm7, %vm2863_vm6  ;;  %v2954_v27 = vpop.f32.mrf.mxu2  ;;  %vm2878_vm13 = vweird.f32 %v4256_v24 }
 0x5eb   :  { %v2859_v4 = vsub.f32 1.0, %v2858_v50  ;;  %v2873_v50 = vmul.f32 %v4256_v24, %v8626_v62  ;;  %vm2879_vm15 = vmor %vm2877_vm14, %vm2878_vm13 }
 0x5ec   :  { %v2845_v38 = vmul.f32 %v4252_v29, %v2844_v26  ;;  %v4258_v26 = vpop.eup %4257  ;;  %v2979_v55 = vadd.f32 %v2954_v27, %v341_v15  ;;  %v10791_v15 = vld [vmem:[#allocation190_spill] sm:$0xff] }
 0x5ed   :  { %v2860_v16 = vmul.f32 %v4254_v22, %v2859_v4  ;;  %v2874_v41 = vsub.f32 1.0, %v2873_v50 }
 0x5ee   :  { %v2846_v6 = vadd.f32 %v4252_v29, %v2845_v38  ;;  %v4044_v2 = vmul.f32 -1.442695, %v2979_v55 }
 0x5ef   :  { %v2861_v59 = vadd.f32 %v4254_v22, %v2860_v16  ;;  %v2875_v34 = vmul.f32 %v4256_v24, %v2874_v41  ;;  %v4260_v16 = vpop.eup %4259 }
 0x5f0   :  { %v2850_v37 = vsel %vm2849_vm9, %v4252_v29, %v2846_v6  ;;  %v4262_v61 = vpop.eup %4261  ;;  %v8640_v35 = vadd.f32 1.0, %v4260_v16  ;;  %4263 = vpow2.f32 %v4044_v2  ;;  %v2883_v29 = vand.u32 2147483648, %v8626_v62 }
 0x5f1   :  { %v2855_v4 = vsel %vm2852_vm11, %v2854_v17, %v2850_v37  ;;  %v2865_v11 = vsel %vm2864_vm10, %v4254_v22, %v2861_v59  ;;  %v2876_v21 = vadd.f32 %v4256_v24, %v2875_v34  ;;  %v8644_v13 = vadd.f32 1.0, %v4262_v61  ;;  %v2974_v22 = vpop.f32.mrf.mxu3 }
 0x5f2   :  { %v2870_v12 = vsel %vm2867_vm12, %v2869_v43, %v2865_v11  ;;  %v2889_v38 = vmul.f32 %v4258_v26, %v2855_v4  ;;  %v2884_v20 = vor.u32 1.1754944e-38, %v2883_v29  ;;  %v382_v6 = vadd.f32 %v10791_v15, %v5947_v53  ;;  %v10811_v15 = vld [vmem:[#allocation32_spill] sm:$0xff] }
 0x5f3   :  { %v2888_v36 = vmul.f32 %v2870_v12, %v7993_v25  ;;  %v2881_v25 = vand.u32 2147483647, %v8626_v62  ;;  %v3004_v11 = vand.u32 2147483648, %v8640_v35  ;;  %v3019_v27 = vand.u32 2147483648, %v8644_v13 }
 0x5f4   :  { %v2980_v26 = vadd.f32 %v2974_v22, %v382_v6  ;;  %v3017_v2 = vand.u32 2147483647, %v8644_v13  ;;  %vm2998_vm3 = vweird.f32 %v8640_v35  ;;  %vm3013_vm4 = vweird.f32 %v8644_v13  ;;  %v10808_v22 = vld [vmem:[#allocation29_spill] sm:$0xff] }
 0x5f5   :  { %v8638_v60 = vadd.f32 %v2889_v38, %v2888_v36  ;;  %v2880_v36 = vsel %vm2879_vm15, %v4256_v24, %v2876_v21  ;;  %vm2882_vm0 = vcmp.eq.f32.partialorder %v2881_v25, 8.507059e+37  ;;  %v3002_v38 = vand.u32 2147483647, %v8640_v35  ;;  %v10806_v25 = vld [vmem:[#allocation114_spill] sm:$0xff]  ;;  %v10812_v6 = vld [vmem:[#allocation33_spill] sm:$0xff] }
 0x5f6   :  { %v4264_v34 = vpop.eup %4263  ;;  %v2885_v17 = vsel %vm2882_vm0, %v2884_v20, %v2880_v36  ;;  %vm3018_vm8 = vcmp.eq.f32.partialorder %v3017_v2, 8.507059e+37  ;;  %v10807_v36 = vld [vmem:[#allocation115_spill] sm:$0xff]  ;;  %v10809_v20 = vld [vmem:[#allocation30_spill] sm:$0xff] }
 0x5f7   :  { %4265 = vtanh.f32 %v8638_v60  ;;  %v8652_v61 = vadd.f32 1.0, %v4264_v34  ;;  %vm3003_vm7 = vcmp.eq.f32.partialorder %v3002_v38, 8.507059e+37  ;;  %v10810_v34 = vld [vmem:[#allocation31_spill] sm:$0xff]  ;;  %v10827_v38 = vld [vmem:[#allocation48_spill] sm:$0xff]  ;;  %v10829_v2 = vld [vmem:[#allocation50_spill] sm:$0xff] }
 0x5f8   :  { %4267 = vrcp.f32 %v8640_v35 }
 0x5f9   :  { %4269 = vrcp.f32 %v8644_v13  ;;  %vm3028_vm10 = vweird.f32 %v8652_v61 }
 0x5fa   :  { %4271 = vrcp.f32 %v8652_v61 }
 0x5fb   :  { %4273 = vtanh.f32 %v2980_v26  ;;  %v10817_v26 = vld [vmem:[#allocation38_spill] sm:$0xff] }
 0x5fd   :  { %v4266_v50 = vpop.eup %4265 }
 0x5fe   :  { %v4268_v59 = vpop.eup %4267  ;;  %v2892_v43 = vmul.f32 %v4266_v50, %v2885_v17  ;;  %v10813_v50 = vld [vmem:[#allocation34_spill] sm:$0xff]  ;;  %v10815_v17 = vld [vmem:[#allocation36_spill] sm:$0xff] }
 0x5ff   :  { %v4270_v37 = vpop.eup %4269  ;;  %v2994_v62 = vmul.f32 %v4268_v59, %v8640_v35  ;;  %vm2999_vm1 = vweird.f32 %v4268_v59 }
 0x600   :  { %v3009_v24 = vmul.f32 %v4270_v37, %v8644_v13  ;;  %3060 = vmatmul.f32.vlgmr.msra.gmra.mxu0 %v2892_v43  ;;  %3080 = vmatmul.f32.vlgmr.msra.gmra.mxu1 %v2892_v43  ;;  %vm3014_vm2 = vweird.f32 %v4270_v37  ;;  %vm3000_vm5 = vmor %vm2998_vm3, %vm2999_vm1  ;;  %v10805_v13 = vld [vmem:[#allocation97_spill] sm:$0xff] }
 0x601   :  { %v2995_v41 = vsub.f32 1.0, %v2994_v62  ;;  %3100 = vmatmul.f32.vlgmr.msra.gmra.mxu2 %v2892_v43  ;;  %3120 = vmatmul.f32.vlgmr.msra.gmra.mxu3 %v2892_v43  ;;  %vm3015_vm6 = vmor %vm3013_vm4, %vm3014_vm2  ;;  %v10818_v43 = vld [vmem:[#allocation39_spill] sm:$0xff]  ;;  %v10820_v62 = vld [vmem:[#allocation41_spill] sm:$0xff] }
 0x602   :  { %v3010_v4 = vsub.f32 1.0, %v3009_v24  ;;  %3275 = vmatpush.msra.mxu0 %v8026_v9  ;;  %3295 = vmatpush.msra.mxu1 %v8029_v28  ;;  %v8667_v9 = vpop.eup %4271  ;;  %v10821_v24 = vld [vmem:[#allocation42_spill] sm:$0xff] }
 0x603   :  { %v2996_v12 = vmul.f32 %v4268_v59, %v2995_v41  ;;  %3315 = vmatpush.msra.mxu2 %v8034_v19  ;;  %3335 = vmatpush.msra.mxu3 %v8037_v63  ;;  %v3024_v19 = vmul.f32 %v8667_v9, %v8652_v61  ;;  %v3005_v63 = vor.u32 1.1754944e-38, %v3004_v11  ;;  %vm3029_vm9 = vweird.f32 %v8667_v9  ;;  %v10822_v41 = vld [vmem:[#allocation43_spill] sm:$0xff]  ;;  %v10824_v11 = vld [vmem:[#allocation45_spill] sm:$0xff] }
 0x604   :  { %v3011_v55 = vmul.f32 %v4270_v37, %v3010_v4  ;;  %3276 = vmatpush.msra.mxu0 %v8046_v58  ;;  %3296 = vmatpush.msra.mxu1 %v8049_v32  ;;  %v3020_v32 = vor.u32 1.1754944e-38, %v3019_v27  ;;  %vm3030_vm11 = vmor %vm3028_vm10, %vm3029_vm9  ;;  %v10823_v4 = vld [vmem:[#allocation44_spill] sm:$0xff]  ;;  %v10825_v27 = vld [vmem:[#allocation46_spill] sm:$0xff] }
 0x605   :  { %v2997_v28 = vadd.f32 %v4268_v59, %v2996_v12  ;;  %3316 = vmatpush.msra.mxu2 %v8055_v46  ;;  %3336 = vmatpush.msra.mxu3 %v8058_v57  ;;  %v4274_v46 = vpop.eup %4273  ;;  %v3025_v57 = vsub.f32 1.0, %v3024_v19  ;;  %v10826_v12 = vld [vmem:[#allocation47_spill] sm:$0xff]  ;;  %v10832_v19 = vld [vmem:[#allocation53_spill] sm:$0xff] }
 0x606   :  { %v3012_v58 = vadd.f32 %v4270_v37, %v3011_v55  ;;  %3277 = vmatpush.msra.mxu0 %v8061_v51  ;;  %3297 = vmatpush.msra.mxu1 %v8064_v44  ;;  %v10828_v55 = vld [vmem:[#allocation49_spill] sm:$0xff] }
 0x607   :  { %v3001_v16 = vsel %vm3000_vm5, %v4268_v59, %v2997_v28  ;;  %3317 = vmatpush.msra.mxu2 %v8067_v52  ;;  %3337 = vmatpush.msra.mxu3 %v8070_v56  ;;  %v3026_v29 = vmul.f32 %v8667_v9, %v3025_v57  ;;  %v10816_v59 = vld [vmem:[#allocation37_spill] sm:$0xff]  ;;  %v10831_v28 = vld [vmem:[#allocation52_spill] sm:$0xff]  ;;  %v10838_v57 = vld [vmem:[#allocation59_spill] sm:$0xff] }
 0x608   :  { %v3006_v35 = vsel %vm3003_vm7, %v3005_v63, %v3001_v16  ;;  %v3016_v21 = vsel %vm3015_vm6, %v4270_v37, %v3012_v58  ;;  %3278 = vmatpush.msra.mxu0 %v8073_v18  ;;  %3298 = vmatpush.msra.mxu1 %v8076_v48  ;;  %v3032_v48 = vand.u32 2147483647, %v8652_v61  ;;  %v10819_v37 = vld [vmem:[#allocation40_spill] sm:$0xff]  ;;  %v10833_v63 = vld [vmem:[#allocation54_spill] sm:$0xff]  ;;  %v10834_v58 = vld [vmem:[#allocation55_spill] sm:$0xff] }
 0x609   :  { %v3021_v51 = vsel %vm3018_vm8, %v3020_v32, %v3016_v21  ;;  %v3040_v44 = vmul.f32 %v4274_v46, %v3006_v35  ;;  %3318 = vmatpush.msra.mxu2 %v8081_v40  ;;  %3338 = vmatpush.msra.mxu3 %v8084_v42  ;;  %v3027_v18 = vadd.f32 %v8667_v9, %v3026_v29  ;;  %v10835_v32 = vld [vmem:[#allocation56_spill] sm:$0xff]  ;;  %v10836_v16 = vld [vmem:[#allocation57_spill] sm:$0xff]  ;;  %v10837_v46 = vld [vmem:[#allocation58_spill] sm:$0xff] }
 0x60a   :  { %v3039_v52 = vmul.f32 %v3021_v51, %v8020_v45  ;;  %3279 = vmatpush.msra.mxu0 %v8087_v54  ;;  %3299 = vmatpush.msra.mxu1 %v8090_v31  ;;  %v3034_v45 = vand.u32 2147483648, %v8652_v61  ;;  %v10792_v54 = vld [vmem:[#allocation212_spill] sm:$0xff]  ;;  %v10793_v31 = vld [vmem:[#allocation213_spill] sm:$0xff]  ;;  %vm3033_vm12 = vcmp.eq.f32.partialorder %v3032_v48, 8.507059e+37  ;;  %v10814_v61 = vld [vmem:[#allocation35_spill] sm:$0xff] }
 0x60b   :  { %3319 = vmatpush.msra.mxu2 %v8097_v49  ;;  %3339 = vmatpush.msra.mxu3 %v8100_v23  ;;  %v3031_v40 = vsel %vm3030_vm11, %v8667_v9, %v3027_v18  ;;  %v10794_v49 = vld [vmem:[#allocation214_spill] sm:$0xff]  ;;  %v10795_v23 = vld [vmem:[#allocation215_spill] sm:$0xff]  ;;  %v10839_v35 = vld [vmem:[#allocation60_spill] sm:$0xff] }
 0x60c   :  { %v8691_v56 = vadd.f32 %v3040_v44, %v3039_v52  ;;  %3280 = vmatpush.msra.mxu0 %v8103_v8  ;;  %3300 = vmatpush.msra.mxu1 %v8106_v14  ;;  %v3035_v42 = vor.u32 1.1754944e-38, %v3034_v45  ;;  %v10830_v9 = vld [vmem:[#allocation51_spill] sm:$0xff]  ;;  %v10840_v21 = vld [vmem:[#allocation61_spill] sm:$0xff]  ;;  %v10841_v51 = vld [vmem:[#allocation62_spill] sm:$0xff] }
 0x60d   :  { %3320 = vmatpush.msra.mxu2 %v8109_v0  ;;  %3340 = vmatpush.msra.mxu3 %v8112_v1  ;;  %v10796_v0 = vld [vmem:[#allocation117_spill] sm:$0xff]  ;;  %v10797_v1 = vld [vmem:[#allocation118_spill] sm:$0xff]  ;;  %v10842_v44 = vld [vmem:[#allocation63_spill] sm:$0xff] }
 0x60e   :  { %4275 = vtanh.f32 %v8691_v56  ;;  %3281 = vmatpush.msra.mxu0 %v8115_v3  ;;  %3301 = vmatpush.msra.mxu1 %v8118_v47  ;;  %v3036_v14 = vsel %vm3033_vm12, %v3035_v42, %v3031_v40  ;;  %v10798_v47 = vld [vmem:[#allocation132_spill] sm:$0xff]  ;;  %v10844_v52 = vld [vmem:[#allocation65_spill] sm:$0xff]  ;;  %v10845_v18 = vld [vmem:[#allocation66_spill] sm:$0xff] }
 0x60f   :  { %3321 = vmatpush.msra.mxu2 %v8121_v5  ;;  %3341 = vmatpush.msra.mxu3 %v8124_v30  ;;  %v10799_v5 = vld [vmem:[#allocation133_spill] sm:$0xff]  ;;  %v10800_v30 = vld [vmem:[#allocation135_spill] sm:$0xff]  ;;  %v10843_v29 = vld [vmem:[#allocation64_spill] sm:$0xff] }
 0x610   :  { %3282 = vmatpush.msra.mxu0 %v8127_v7  ;;  %3302 = vmatpush.msra.mxu1 %v8130_v10  ;;  %v10801_v7 = vld [vmem:[#allocation136_spill] sm:$0xff]  ;;  %v10802_v10 = vld [vmem:[#allocation149_spill] sm:$0xff]  ;;  %v10846_v45 = vld [vmem:[#allocation67_spill] sm:$0xff] }
 0x611   :  { %3322 = vmatpush.msra.mxu2 %v8133_v33  ;;  %3342 = vmatpush.msra.mxu3 %v8136_v39  ;;  %v10803_v33 = vld [vmem:[#allocation156_spill] sm:$0xff]  ;;  %v10848_v40 = vld [vmem:[#allocation69_spill] sm:$0xff]  ;;  %v10849_v42 = vld [vmem:[#allocation70_spill] sm:$0xff] }
 0x612   :  { %3283 = vmatpush.msra.mxu0 %v10792_v54  ;;  %3303 = vmatpush.msra.mxu1 %v10793_v31  ;;  %v10804_v39 = vld [vmem:[#allocation96_spill] sm:$0xff]  ;;  %v10850_v54 = vld [vmem:[#allocation71_spill] sm:$0xff] }
 0x613   :  { %3323 = vmatpush.msra.mxu2 %v10794_v49  ;;  %3343 = vmatpush.msra.mxu3 %v10795_v23  ;;  %v10847_v48 = vld [vmem:[#allocation68_spill] sm:$0xff]  ;;  %v10852_v49 = vld [vmem:[#allocation73_spill] sm:$0xff]  ;;  %v10853_v23 = vld [vmem:[#allocation74_spill] sm:$0xff] }
 0x614   :  { %v4276_v8 = vpop.eup %4275  ;;  %3284 = vmatpush.msra.mxu0 %v10796_v0  ;;  %3304 = vmatpush.msra.mxu1 %v10797_v1  ;;  %v10851_v31 = vld [vmem:[#allocation72_spill] sm:$0xff]  ;;  %v10856_v0 = vld [vmem:[#allocation79_spill] sm:$0xff] }
 0x615   :  { %v3043_v3 = vmul.f32 %v4276_v8, %v3036_v14  ;;  %3324 = vmatpush.msra.mxu2 %v10798_v47  ;;  %3344 = vmatpush.msra.mxu3 %v10799_v5  ;;  %v10854_v8 = vld [vmem:[#allocation75_spill] sm:$0xff]  ;;  %v10855_v14 = vld [vmem:[#allocation78_spill] sm:$0xff]  ;;  %v10857_v1 = vld [vmem:[#allocation80_spill] sm:$0xff] }
 0x616   :  { %3285 = vmatpush.msra.mxu0 %v10800_v30  ;;  %3305 = vmatpush.msra.mxu1 %v10801_v7  ;;  %v10859_v47 = vld [vmem:[#allocation82_spill] sm:$0xff]  ;;  %v10860_v5 = vld [vmem:[#allocation83_spill] sm:$0xff]  ;;  %v10861_v30 = vld [vmem:[#allocation84_spill] sm:$0xff] }
 0x617   :  { %3325 = vmatpush.msra.mxu2 %v10802_v10  ;;  %3345 = vmatpush.msra.mxu3 %v10803_v33  ;;  %v10862_v7 = vld [vmem:[#allocation85_spill] sm:$0xff]  ;;  %v10863_v10 = vld [vmem:[#allocation86_spill] sm:$0xff]  ;;  %v10864_v33 = vld [vmem:[#allocation87_spill] sm:$0xff] }
 0x618   :  { %3140 = vmatmul.f32.vlgmr.msrb.gmra.mxu0 %v3043_v3  ;;  %3160 = vmatmul.f32.vlgmr.msrb.gmra.mxu1 %v3043_v3 }
 0x619   :  { %3180 = vmatmul.f32.vlgmr.msrb.gmra.mxu2 %v3043_v3  ;;  %3200 = vmatmul.f32.vlgmr.msrb.gmra.mxu3 %v3043_v3 }
 0x61a   :  { %3286 = vmatpush.msra.mxu0 %v10804_v39  ;;  %3306 = vmatpush.msra.mxu1 %v10805_v13  ;;  %v10865_v39 = vld [vmem:[#allocation88_spill] sm:$0xff]  ;;  %v10866_v13 = vld [vmem:[#allocation89_spill] sm:$0xff] }
 0x61b   :  { %3326 = vmatpush.msra.mxu2 %v10806_v25  ;;  %3346 = vmatpush.msra.mxu3 %v10807_v36  ;;  %v10867_v25 = vld [vmem:[#allocation90_spill] sm:$0xff]  ;;  %v10868_v36 = vld [vmem:[#allocation93_spill] sm:$0xff] }
 0x61c   :  { %3287 = vmatpush.msra.mxu0 %v10808_v22  ;;  %3307 = vmatpush.msra.mxu1 %v10809_v20  ;;  %v10869_v22 = vld [vmem:[#allocation94_spill] sm:$0xff]  ;;  %v10870_v20 = vld [vmem:[#allocation95_spill] sm:$0xff] }
 0x61d   :  { %3327 = vmatpush.msra.mxu2 %v10810_v34  ;;  %3347 = vmatpush.msra.mxu3 %v10811_v15  ;;  %v10871_v34 = vld [vmem:[#allocation98_spill] sm:$0xff]  ;;  %v10872_v15 = vld [vmem:[#allocation99_spill] sm:$0xff] }
 0x61e   :  { %3288 = vmatpush.msra.mxu0 %v10812_v6  ;;  %3308 = vmatpush.msra.mxu1 %v10813_v50  ;;  %v10873_v6 = vld [vmem:[#allocation100_spill] sm:$0xff]  ;;  %v10874_v50 = vld [vmem:[#allocation101_spill] sm:$0xff] }
 0x61f   :  { %3328 = vmatpush.msra.mxu2 %v10814_v61  ;;  %3348 = vmatpush.msra.mxu3 %v10815_v17  ;;  %v10875_v61 = vld [vmem:[#allocation102_spill] sm:$0xff]  ;;  %v10876_v17 = vld [vmem:[#allocation103_spill] sm:$0xff] }
 0x620   :  { %3289 = vmatpush.msra.mxu0 %v10816_v59  ;;  %3309 = vmatpush.msra.mxu1 %v10817_v26  ;;  %v10877_v59 = vld [vmem:[#allocation104_spill] sm:$0xff]  ;;  %v10878_v26 = vld [vmem:[#allocation105_spill] sm:$0xff] }
 0x621   :  { %3329 = vmatpush.msra.mxu2 %v10818_v43  ;;  %3349 = vmatpush.msra.mxu3 %v10819_v37  ;;  %v10879_v43 = vld [vmem:[#allocation106_spill] sm:$0xff]  ;;  %v10880_v37 = vld [vmem:[#allocation107_spill] sm:$0xff] }
 0x622   :  { %3290 = vmatpush.msra.mxu0 %v10820_v62  ;;  %3310 = vmatpush.msra.mxu1 %v10821_v24  ;;  %v10881_v62 = vld [vmem:[#allocation108_spill] sm:$0xff]  ;;  %v10882_v24 = vld [vmem:[#allocation109_spill] sm:$0xff] }
 0x623   :  { %3330 = vmatpush.msra.mxu2 %v10822_v41  ;;  %3350 = vmatpush.msra.mxu3 %v10823_v4  ;;  %v10883_v41 = vld [vmem:[#allocation110_spill] sm:$0xff]  ;;  %v10884_v4 = vld [vmem:[#allocation111_spill] sm:$0xff] }
 0x624   :  { %3291 = vmatmul.f32.vlgmr.msra.gmra.mxu0 %v3043_v3  ;;  %3311 = vmatmul.f32.vlgmr.msra.gmra.mxu1 %v3043_v3 }
 0x625   :  { %3331 = vmatmul.f32.vlgmr.msra.gmra.mxu2 %v3043_v3  ;;  %3351 = vmatmul.f32.vlgmr.msra.gmra.mxu3 %v3043_v3  ;;  %v10858_v3 = vld [vmem:[#allocation81_spill] sm:$0xff] }
 0x626   :  { %3422 = vmatpush.msrb.mxu0 %v10824_v11  ;;  %3442 = vmatpush.msrb.mxu1 %v10825_v27  ;;  %v10885_v11 = vld [vmem:[#allocation112_spill] sm:$0xff]  ;;  %v10886_v27 = vld [vmem:[#allocation119_spill] sm:$0xff] }
 0x627   :  { %3462 = vmatpush.msrb.mxu2 %v10826_v12  ;;  %3482 = vmatpush.msrb.mxu3 %v10827_v38  ;;  %v10887_v12 = vld [vmem:[#allocation120_spill] sm:$0xff]  ;;  %v10888_v38 = vld [vmem:[#allocation113_spill] sm:$0xff] }
 0x628   :  { %3423 = vmatpush.msrb.mxu0 %v10828_v55  ;;  %3443 = vmatpush.msrb.mxu1 %v10829_v2  ;;  %v10889_v55 = vld [vmem:[#allocation116_spill] sm:$0xff]  ;;  %v10890_v2 = vld [vmem:[#allocation123_spill] sm:$0xff] }
 0x629   :  { %3463 = vmatpush.msrb.mxu2 %v10830_v9  ;;  %3483 = vmatpush.msrb.mxu3 %v10831_v28  ;;  %v10891_v9 = vld [vmem:[#allocation124_spill] sm:$0xff]  ;;  %v10892_v28 = vld [vmem:[#allocation121_spill] sm:$0xff] }
 0x62a   :  { %3424 = vmatpush.msrb.mxu0 %v10832_v19  ;;  %3444 = vmatpush.msrb.mxu1 %v10833_v63  ;;  %v10893_v19 = vld [vmem:[#allocation122_spill] sm:$0xff]  ;;  %v10894_v63 = vld [vmem:[#allocation127_spill] sm:$0xff] }
 0x62b   :  { %3464 = vmatpush.msrb.mxu2 %v10834_v58  ;;  %3484 = vmatpush.msrb.mxu3 %v10835_v32  ;;  %v10895_v58 = vld [vmem:[#allocation128_spill] sm:$0xff]  ;;  %v10896_v32 = vld [vmem:[#allocation125_spill] sm:$0xff] }
 0x62c   :  { %3425 = vmatpush.msrb.mxu0 %v10836_v16  ;;  %3445 = vmatpush.msrb.mxu1 %v10837_v46  ;;  %v10897_v16 = vld [vmem:[#allocation126_spill] sm:$0xff]  ;;  %v10898_v46 = vld [vmem:[#allocation131_spill] sm:$0xff] }
 0x62d   :  { %3465 = vmatpush.msrb.mxu2 %v10838_v57  ;;  %3485 = vmatpush.msrb.mxu3 %v10839_v35  ;;  %v10899_v57 = vld [vmem:[#allocation134_spill] sm:$0xff]  ;;  %v10900_v35 = vld [vmem:[#allocation129_spill] sm:$0xff] }
 0x62e   :  { %3426 = vmatpush.msrb.mxu0 %v10840_v21  ;;  %3446 = vmatpush.msrb.mxu1 %v10841_v51  ;;  %v10901_v21 = vld [vmem:[#allocation130_spill] sm:$0xff]  ;;  %v10902_v51 = vld [vmem:[#allocation139_spill] sm:$0xff] }
 0x62f   :  { %3466 = vmatpush.msrb.mxu2 %v10842_v44  ;;  %3486 = vmatpush.msrb.mxu3 %v10843_v29  ;;  %v10903_v44 = vld [vmem:[#allocation140_spill] sm:$0xff]  ;;  %v10904_v29 = vld [vmem:[#allocation137_spill] sm:$0xff] }
 0x630   :  { %3427 = vmatpush.msrb.mxu0 %v10844_v52  ;;  %3447 = vmatpush.msrb.mxu1 %v10845_v18  ;;  %v10905_v52 = vld [vmem:[#allocation138_spill] sm:$0xff]  ;;  %v10906_v18 = vld [vmem:[#allocation143_spill] sm:$0xff] }
 0x631   :  { %3467 = vmatpush.msrb.mxu2 %v10846_v45  ;;  %3487 = vmatpush.msrb.mxu3 %v10847_v48  ;;  %v10907_v45 = vld [vmem:[#allocation144_spill] sm:$0xff]  ;;  %v10908_v48 = vld [vmem:[#allocation141_spill] sm:$0xff] }
 0x632   :  { %3428 = vmatpush.msrb.mxu0 %v10848_v40  ;;  %3448 = vmatpush.msrb.mxu1 %v10849_v42  ;;  %v10909_v40 = vld [vmem:[#allocation142_spill] sm:$0xff]  ;;  %v10910_v42 = vld [vmem:[#allocation147_spill] sm:$0xff] }
 0x633   :  { %3468 = vmatpush.msrb.mxu2 %v10850_v54  ;;  %3488 = vmatpush.msrb.mxu3 %v10851_v31  ;;  %v10911_v54 = vld [vmem:[#allocation148_spill] sm:$0xff]  ;;  %v10912_v31 = vld [vmem:[#allocation145_spill] sm:$0xff] }
 0x634   :  { %3429 = vmatpush.msrb.mxu0 %v10852_v49  ;;  %3449 = vmatpush.msrb.mxu1 %v10853_v23  ;;  %v10913_v49 = vld [vmem:[#allocation146_spill] sm:$0xff]  ;;  %v10914_v23 = vld [vmem:[#allocation152_spill] sm:$0xff] }
 0x635   :  { %3469 = vmatpush.msrb.mxu2 %v10854_v8  ;;  %3489 = vmatpush.msrb.mxu3 %v10855_v14  ;;  %v10915_v8 = vld [vmem:[#allocation155_spill] sm:$0xff]  ;;  %v10916_v14 = vld [vmem:[#allocation150_spill] sm:$0xff] }
 0x636   :  { %3430 = vmatpush.msrb.mxu0 %v10856_v0  ;;  %3450 = vmatpush.msrb.mxu1 %v10857_v1  ;;  %v10917_v0 = vld [vmem:[#allocation151_spill] sm:$0xff] }
 0x637   :  { %3470 = vmatpush.msrb.mxu2 %v10858_v3  ;;  %3490 = vmatpush.msrb.mxu3 %v10859_v47  ;;  %v10918_v1 = vld [vmem:[#allocation159_spill] sm:$0xff]  ;;  %v10919_v3 = vld [vmem:[#allocation160_spill] sm:$0xff]  ;;  %v10920_v47 = vld [vmem:[#allocation157_spill] sm:$0xff] }
 0x638   :  { %3431 = vmatpush.msrb.mxu0 %v10860_v5  ;;  %3451 = vmatpush.msrb.mxu1 %v10861_v30  ;;  %v10921_v5 = vld [vmem:[#allocation158_spill] sm:$0xff]  ;;  %v10922_v30 = vld [vmem:[#allocation163_spill] sm:$0xff] }
 0x639   :  { %3471 = vmatpush.msrb.mxu2 %v10862_v7  ;;  %3491 = vmatpush.msrb.mxu3 %v10863_v10  ;;  %v10923_v7 = vld [vmem:[#allocation164_spill] sm:$0xff]  ;;  %v10924_v10 = vld [vmem:[#allocation161_spill] sm:$0xff] }
 0x63a   :  { %3432 = vmatpush.msrb.mxu0 %v10864_v33  ;;  %3452 = vmatpush.msrb.mxu1 %v10865_v39  ;;  %v10925_v33 = vld [vmem:[#allocation162_spill] sm:$0xff]  ;;  %v10926_v39 = vld [vmem:[#allocation167_spill] sm:$0xff] }
 0x63b   :  { %3472 = vmatpush.msrb.mxu2 %v10866_v13  ;;  %3492 = vmatpush.msrb.mxu3 %v10867_v25  ;;  %v10927_v13 = vld [vmem:[#allocation169_spill] sm:$0xff] }
 0x63c   :  { %3433 = vmatpush.msrb.mxu0 %v10868_v36  ;;  %3453 = vmatpush.msrb.mxu1 %v10869_v22  ;;  %v10928_v25 = vld [vmem:[#allocation165_spill] sm:$0xff]  ;;  %v10929_v36 = vld [vmem:[#allocation166_spill] sm:$0xff] }
 0x63d   :  { %3473 = vmatpush.msrb.mxu2 %v10870_v20  ;;  %3493 = vmatpush.msrb.mxu3 %v10871_v34  ;;  %v10930_v22 = vld [vmem:[#allocation174_spill] sm:$0xff]  ;;  %v10931_v20 = vld [vmem:[#allocation175_spill] sm:$0xff] }
 0x63e   :  { %3434 = vmatpush.msrb.mxu0 %v10872_v15  ;;  %3454 = vmatpush.msrb.mxu1 %v10873_v6  ;;  %v10932_v34 = vld [vmem:[#allocation170_spill] sm:$0xff]  ;;  %v10933_v15 = vld [vmem:[#allocation171_spill] sm:$0xff] }
 0x63f   :  { %3474 = vmatpush.msrb.mxu2 %v10874_v50  ;;  %3494 = vmatpush.msrb.mxu3 %v10875_v61  ;;  %v10934_v6 = vld [vmem:[#allocation178_spill] sm:$0xff]  ;;  %v10935_v50 = vld [vmem:[#allocation180_spill] sm:$0xff] }
 0x640   :  { %3435 = vmatpush.msrb.mxu0 %v10876_v17  ;;  %3455 = vmatpush.msrb.mxu1 %v10877_v59  ;;  %v10936_v61 = vld [vmem:[#allocation176_spill] sm:$0xff]  ;;  %v10937_v17 = vld [vmem:[#allocation177_spill] sm:$0xff]  ;;  %v10938_v59 = vld [vmem:[#allocation183_spill] sm:$0xff] }
 0x641   :  { %3475 = vmatpush.msrb.mxu2 %v10878_v26  ;;  %3495 = vmatpush.msrb.mxu3 %v10879_v43  ;;  %v10939_v26 = vld [vmem:[#allocation184_spill] sm:$0xff]  ;;  %v10940_v43 = vld [vmem:[#allocation181_spill] sm:$0xff] }
 0x642   :  { %3436 = vmatpush.msrb.mxu0 %v10880_v37  ;;  %3456 = vmatpush.msrb.mxu1 %v10881_v62  ;;  %v10941_v37 = vld [vmem:[#allocation182_spill] sm:$0xff]  ;;  %v10942_v62 = vld [vmem:[#allocation91_spill] sm:$0xff] }
 0x643   :  { %3476 = vmatpush.msrb.mxu2 %v10882_v24  ;;  %3496 = vmatpush.msrb.mxu3 %v10883_v41  ;;  %v10943_v24 = vld [vmem:[#allocation92_spill] sm:$0xff] }
 0x644   :  { %3437 = vmatpush.msrb.mxu0 %v10884_v4  ;;  %3457 = vmatpush.msrb.mxu1 %v10885_v11  ;;  %v10944_v41 = vld [vmem:[#allocation76_spill] sm:$0xff]  ;;  %v10945_v4 = vld [vmem:[#allocation77_spill] sm:$0xff] }
 0x645   :  { %3477 = vmatpush.msrb.mxu2 %v10888_v38  ;;  %3497 = vmatpush.msrb.mxu3 %v10889_v55  ;;  %v10946_v11 = vld [vmem:[#allocation196_spill] sm:$0xff]  ;;  %v10949_v38 = vld [vmem:[#allocation195_spill] sm:$0xff]  ;;  %v10950_v55 = vld [vmem:[#allocation198_spill] sm:$0xff] }
 0x646   :  { %3502 = vmatpush.msra.mxu0 %v10886_v27  ;;  %3522 = vmatpush.msra.mxu1 %v10887_v12  ;;  %v10947_v27 = vld [vmem:[#allocation197_spill] sm:$0xff]  ;;  %v10948_v12 = vld [vmem:[#allocation194_spill] sm:$0xff] }
 0x647   :  { %3542 = vmatpush.msra.mxu2 %v10892_v28  ;;  %3562 = vmatpush.msra.mxu3 %v10893_v19 }
 0x648   :  { %3503 = vmatpush.msra.mxu0 %v10890_v2  ;;  %3523 = vmatpush.msra.mxu1 %v10891_v9  ;;  %v10951_v2 = vld [vmem:[#allocation199_spill] sm:$0xff] }
 0x649   :  { %3543 = vmatpush.msra.mxu2 %v10896_v32  ;;  %3563 = vmatpush.msra.mxu3 %v10897_v16 }
 0x64a   :  { %3504 = vmatpush.msra.mxu0 %v10894_v63  ;;  %3524 = vmatpush.msra.mxu1 %v10895_v58 }
 0x64b   :  { %3544 = vmatpush.msra.mxu2 %v10900_v35  ;;  %3564 = vmatpush.msra.mxu3 %v10901_v21  ;;  %v10953_v35 = vld [vmem:[#allocation26_spill] sm:$0xff] }
 0x64c   :  { %3505 = vmatpush.msra.mxu0 %v10898_v46  ;;  %3525 = vmatpush.msra.mxu1 %v10899_v57  ;;  %v10952_v46 = vld [vmem:[#allocation25_spill] sm:$0xff] }
 0x64d   :  { %3545 = vmatpush.msra.mxu2 %v10904_v29  ;;  %3565 = vmatpush.msra.mxu3 %v10905_v52 }
 0x64e   :  { %3506 = vmatpush.msra.mxu0 %v10902_v51  ;;  %3526 = vmatpush.msra.mxu1 %v10903_v44 }
 0x64f   :  { %3546 = vmatpush.msra.mxu2 %v10908_v48  ;;  %3566 = vmatpush.msra.mxu3 %v10909_v40  ;;  %v10955_v40 = vld [vmem:[#allocation188_spill] sm:$0xff] }
 0x650   :  { %3507 = vmatpush.msra.mxu0 %v10906_v18  ;;  %3527 = vmatpush.msra.mxu1 %v10907_v45  ;;  %v10954_v45 = vld [vmem:[#allocation27_spill] sm:$0xff] }
 0x651   :  { %3547 = vmatpush.msra.mxu2 %v10912_v31  ;;  %3567 = vmatpush.msra.mxu3 %v10913_v49  ;;  %v10957_v31 = vld [vmem:[#allocation189_spill] sm:$0xff]  ;;  %v10958_v49 = vld [vmem:[#allocation187_spill] sm:$0xff] }
 0x652   :  { %3508 = vmatpush.msra.mxu0 %v10910_v42  ;;  %3528 = vmatpush.msra.mxu1 %v10911_v54  ;;  %v10956_v42 = vld [vmem:[#allocation186_spill] sm:$0xff] }
 0x653   :  { %3548 = vmatpush.msra.mxu2 %v10916_v14  ;;  %3568 = vmatpush.msra.mxu3 %v10917_v0  ;;  %v262_v54 = vadd.f32 %v10956_v42, %v10955_v40 }
 0x654   :  { %3509 = vmatpush.msra.mxu0 %v10914_v23  ;;  %3529 = vmatpush.msra.mxu1 %v10915_v8  ;;  %v303_v23 = vadd.f32 %v10958_v49, %v10957_v31 }
 0x655   :  { %3549 = vmatpush.msra.mxu2 %v10920_v47  ;;  %3569 = vmatpush.msra.mxu3 %v10921_v5 }
 0x656   :  { %3510 = vmatpush.msra.mxu0 %v10918_v1  ;;  %3530 = vmatpush.msra.mxu1 %v10919_v3 }
 0x657   :  { %3550 = vmatpush.msra.mxu2 %v10924_v10  ;;  %3570 = vmatpush.msra.mxu3 %v10925_v33 }
 0x658   :  { %3511 = vmatpush.msra.mxu0 %v10922_v30  ;;  %3531 = vmatpush.msra.mxu1 %v10923_v7 }
 0x659   :  { %3551 = vmatpush.msra.mxu2 %v10928_v25  ;;  %3571 = vmatpush.msra.mxu3 %v10929_v36  ;;  %v10959_v25 = vld [vmem:[#allocation192_spill] sm:$0xff]  ;;  %v10960_v36 = vld [vmem:[#allocation191_spill] sm:$0xff] }
 0x65a   :  { %3512 = vmatpush.msra.mxu0 %v10926_v39  ;;  %3532 = vmatpush.msra.mxu1 %v10927_v13 }
 0x65b   :  { %3552 = vmatpush.msra.mxu2 %v10932_v34  ;;  %3572 = vmatpush.msra.mxu3 %v10933_v15 }
 0x65c   :  { %3513 = vmatpush.msra.mxu0 %v10930_v22  ;;  %3533 = vmatpush.msra.mxu1 %v10931_v20  ;;  %v344_v22 = vadd.f32 %v10960_v36, %v10959_v25 }
 0x65d   :  { %3553 = vmatpush.msra.mxu2 %v10936_v61  ;;  %3573 = vmatpush.msra.mxu3 %v10937_v17 }
 0x65e   :  { %3514 = vmatpush.msra.mxu0 %v10934_v6  ;;  %3534 = vmatpush.msra.mxu1 %v10935_v50  ;;  %v10961_v50 = vld [vmem:[#allocation28_spill] sm:$0xff] }
 0x65f   :  { %3554 = vmatpush.msra.mxu2 %v10940_v43  ;;  %3574 = vmatpush.msra.mxu3 %v10941_v37 }
 0x660   :  { %3515 = vmatpush.msra.mxu0 %v10938_v59  ;;  %3535 = vmatpush.msra.mxu1 %v10939_v26 }
 0x661   :  { %3555 = vmatpush.msra.mxu2 %v10944_v41  ;;  %3575 = vmatpush.msra.mxu3 %v10945_v4 }
 0x662   :  { %3516 = vmatpush.msra.mxu0 %v10942_v62  ;;  %3536 = vmatpush.msra.mxu1 %v10943_v24 }
 0x663   :  { %3556 = vmatpush.msra.mxu2 %v10948_v12  ;;  %3576 = vmatpush.msra.mxu3 %v10949_v38 }
 0x664   :  { %3517 = vmatpush.msra.mxu0 %v10946_v11  ;;  %3537 = vmatpush.msra.mxu1 %v10947_v27 }
 0x665   :  { %3557 = vmatpush.msra.mxu2 %v10950_v55  ;;  %3577 = vmatpush.msra.mxu3 %v10951_v2 }
 0x67d   :  { %v3061_v9 = vpop.f32.mrf.mxu0  ;;  %v3081_v28 = vpop.f32.mrf.mxu1 }
 0x684   :  { %v3101_v19 = vpop.f32.mrf.mxu2  ;;  %v3121_v29 = vpop.f32.mrf.mxu3 }
 0x695   :  { %v3141_v63 = vpop.f32.mrf.mxu0  ;;  %v3161_v58 = vpop.f32.mrf.mxu1 }
 0x696   :  { %v3142_v32 = vadd.f32 %v3141_v63, %v3061_v9  ;;  %v3162_v16 = vadd.f32 %v3161_v58, %v3081_v28  ;;  %v10962_v58 = vld [vmem:[#allocation193_spill] sm:$0xff] }
 0x698   :  { %v3204_v57 = vadd.f32 %v3142_v32, %v10952_v46  ;;  %v3205_v21 = vadd.f32 %v3162_v16, %v10953_v35  ;;  %v385_v32 = vadd.f32 %v10962_v58, %v5947_v53 }
 0x69a   :  { %v4045_v51 = vmul.f32 -1.442695, %v3204_v57  ;;  %v4046_v44 = vmul.f32 -1.442695, %v3205_v21 }
 0x69c   :  { %4277 = vpow2.f32 %v4045_v51  ;;  %v3181_v52 = vpop.f32.mrf.mxu2  ;;  %v3201_v7 = vpop.f32.mrf.mxu3 }
 0x69d   :  { %4279 = vpow2.f32 %v4046_v44  ;;  %v3182_v18 = vadd.f32 %v3181_v52, %v3101_v19  ;;  %v3202_v13 = vadd.f32 %v3201_v7, %v3121_v29 }
 0x69f   :  { %v3206_v48 = vadd.f32 %v3182_v18, %v10954_v45  ;;  %v3207_v61 = vadd.f32 %v3202_v13, %v10961_v50 }
 0x6a1   :  { %v4047_v8 = vmul.f32 -1.442695, %v3206_v48  ;;  %v3292_v14 = vpop.f32.mrf.mxu0  ;;  %v3312_v0 = vpop.f32.mrf.mxu1 }
 0x6a2   :  { %v4278_v1 = vpop.eup %4277  ;;  %v3355_v3 = vadd.f32 %v3292_v14, %v262_v54  ;;  %v3356_v47 = vadd.f32 %v3312_v0, %v303_v23 }
 0x6a3   :  { %v4280_v5 = vpop.eup %4279  ;;  %v3217_v30 = vadd.f32 1.0, %v4278_v1  ;;  %4281 = vpow2.f32 %v4047_v8 }
 0x6a4   :  { %v3218_v10 = vadd.f32 1.0, %v4280_v5  ;;  %v4048_v33 = vmul.f32 -1.442695, %v3355_v3  ;;  %v4049_v39 = vmul.f32 -1.442695, %v3356_v47 }
 0x6a5   :  { %4283 = vrcp.f32 %v3217_v30  ;;  %v3229_v27 = vand.u32 2147483647, %v3217_v30  ;;  %v3231_v12 = vand.u32 2147483648, %v3217_v30  ;;  %vm3225_vm0 = vweird.f32 %v3217_v30 }
 0x6a6   :  { %4285 = vrcp.f32 %v3218_v10  ;;  %v3246_v55 = vand.u32 2147483648, %v3218_v10  ;;  %v3244_v28 = vand.u32 2147483647, %v3218_v10  ;;  %vm3240_vm15 = vweird.f32 %v3218_v10 }
 0x6a7   :  { %4287 = vpow2.f32 %v4048_v33  ;;  %vm3230_vm2 = vcmp.eq.f32.partialorder %v3229_v27, 8.507059e+37  ;;  %v3232_v51 = vor.u32 1.1754944e-38, %v3231_v12 }
 0x6a8   :  { %4289 = vpow2.f32 %v4049_v39  ;;  %v3332_v20 = vpop.f32.mrf.mxu2  ;;  %v3352_v19 = vpop.f32.mrf.mxu3  ;;  %v3247_v52 = vor.u32 1.1754944e-38, %v3246_v55  ;;  %vm3245_vm4 = vcmp.eq.f32.partialorder %v3244_v28, 8.507059e+37  ;;  %v3686_v28 = vld [vmem:[#allocation18 + $0xf0] sm:$0xff] }
 0x6a9   :  { %v4282_v34 = vpop.eup %4281  ;;  %v3357_v15 = vadd.f32 %v3332_v20, %v344_v22  ;;  %v3358_v40 = vadd.f32 %v3352_v19, %v385_v32  ;;  %v3718_v19 = vld [vmem:[#allocation18 + $0x1f0] sm:$0xff]  ;;  %v3684_v32 = vld [vmem:[#allocation18 + $0xe0] sm:$0xff] }
 0x6aa   :  { %v8881_v6 = vadd.f32 1.0, %v4282_v34 }
 0x6ab   :  { %v4284_v17 = vpop.eup %4283  ;;  %v4050_v59 = vmul.f32 -1.442695, %v3357_v15 }
 0x6ac   :  { %v4286_v26 = vpop.eup %4285  ;;  %v3221_v43 = vmul.f32 %v4284_v17, %v3217_v30  ;;  %4291 = vrcp.f32 %v8881_v6  ;;  %vm3226_vm13 = vweird.f32 %v4284_v17  ;;  %vm3255_vm5 = vweird.f32 %v8881_v6 }
 0x6ad   :  { %v4288_v37 = vpop.eup %4287  ;;  %v3236_v62 = vmul.f32 %v4286_v26, %v3218_v10  ;;  %4293 = vpow2.f32 %v4050_v59  ;;  %vm3241_vm14 = vweird.f32 %v4286_v26  ;;  %vm3227_vm1 = vmor %vm3225_vm0, %vm3226_vm13  ;;  %v3261_v47 = vand.u32 2147483648, %v8881_v6 }
 0x6ae   :  { %v4290_v24 = vpop.eup %4289  ;;  %v3222_v41 = vsub.f32 1.0, %v3221_v43  ;;  %4295 = vtanh.f32 %v3207_v61  ;;  %v8885_v4 = vadd.f32 1.0, %v4288_v37  ;;  %vm3242_vm3 = vmor %vm3240_vm15, %vm3241_vm14  ;;  %v3259_v20 = vand.u32 2147483647, %v8881_v6  ;;  %v3688_v61 = vld [vmem:[#allocation18 + $0x100] sm:$0xff] }
 0x6af   :  { %v3237_v11 = vsub.f32 1.0, %v3236_v62  ;;  %v8887_v38 = vadd.f32 1.0, %v4290_v24 }
 0x6b0   :  { %v3223_v2 = vmul.f32 %v4284_v17, %v3222_v41  ;;  %4297 = vrcp.f32 %v8885_v4  ;;  %v3380_v7 = vand.u32 2147483647, %v8885_v4  ;;  %v3382_v33 = vand.u32 2147483648, %v8885_v4 }
 0x6b1   :  { %v3238_v9 = vmul.f32 %v4286_v26, %v3237_v11  ;;  %4299 = vrcp.f32 %v8887_v38  ;;  %v3395_v22 = vand.u32 2147483647, %v8887_v38  ;;  %vm3376_vm9 = vweird.f32 %v8885_v4 }
 0x6b2   :  { %v8891_v63 = vpop.eup %4291  ;;  %v3224_v16 = vadd.f32 %v4284_v17, %v3223_v2  ;;  %vm3391_vm11 = vweird.f32 %v8887_v38  ;;  %vm3381_vm14 = vcmp.eq.f32.partialorder %v3380_v7, 8.507059e+37  ;;  %vm3260_vm0 = vcmp.eq.f32.partialorder %v3259_v20, 8.507059e+37  ;;  %v3700_v7 = vld [vmem:[#allocation18 + $0x160] sm:$0xff]  ;;  %v3658_v20 = vld [vmem:[#allocation18 + $0x10] sm:$0xff] }
 0x6b3   :  { %v4294_v57 = vpop.eup %4293  ;;  %v3251_v21 = vmul.f32 %v8891_v63, %v8881_v6  ;;  %v3239_v44 = vadd.f32 %v4286_v26, %v3238_v9  ;;  %vm3256_vm6 = vweird.f32 %v8891_v63  ;;  %vm3396_vm15 = vcmp.eq.f32.partialorder %v3395_v22, 8.507059e+37  ;;  %v3692_v22 = vld [vmem:[#allocation18 + $0x120] sm:$0xff] }
 0x6b4   :  { %v4296_v29 = vpop.eup %4295  ;;  %v3228_v18 = vsel %vm3227_vm1, %v4284_v17, %v3224_v16  ;;  %v8898_v48 = vadd.f32 1.0, %v4294_v57  ;;  %vm8924_vm10 = vmor %vm3255_vm5, %vm3256_vm6  ;;  %v3262_v17 = vor.u32 1.1754944e-38, %v3261_v47  ;;  %v3716_v16 = vld [vmem:[#allocation18 + $0x1e0] sm:$0xff]  ;;  %v3702_v47 = vld [vmem:[#allocation18 + $0x170] sm:$0xff] }
 0x6b5   :  { %v3252_v53 = vsub.f32 1.0, %v3251_v21  ;;  %v3233_v42 = vsel %vm3230_vm2, %v3232_v51, %v3228_v18  ;;  %v3243_v54 = vsel %vm3242_vm3, %v4286_v26, %v3239_v44  ;;  %v3383_v26 = vor.u32 1.1754944e-38, %v3382_v33  ;;  %v3682_v21 = vld [vmem:[#allocation18 + $0xd0] sm:$0xff]  ;;  %v3712_v18 = vld [vmem:[#allocation18 + $0x1c0] sm:$0xff]  ;;  %v3699_v44 = vld [vmem:[#allocation18 + $0x158] sm:$0xff] }
 0x6b6   :  { %v4298_v31 = vpop.eup %4297  ;;  %v3248_v49 = vsel %vm3245_vm4, %v3247_v52, %v3243_v54  ;;  %v3267_v23 = vmul.f32 %v4296_v29, %v3233_v42  ;;  %4301 = vrcp.f32 %v8898_v48  ;;  %v3412_v57 = vand.u32 2147483648, %v8898_v48  ;;  %v3714_v51 = vld [vmem:[#allocation18 + $0x1d0] sm:$0xff]  ;;  %v3680_v52 = vld [vmem:[#allocation18 + $0xc0] sm:$0xff] }
 0x6b7   :  { %v4300_v8 = vpop.eup %4299  ;;  %v3253_v14 = vmul.f32 %v8891_v63, %v3252_v53  ;;  %v3266_v0 = vmul.f32 %v3248_v49, %v8638_v60  ;;  %v3372_v1 = vmul.f32 %v4298_v31, %v8885_v4  ;;  %4303 = vtanh.f32 %v3358_v40  ;;  %v3678_v53 = vld [vmem:[#allocation18 + $0xb0] sm:$0xff]  ;;  %v3676_v49 = vld [vmem:[#allocation18 + $0xa0] sm:$0xff] }
 0x6b8   :  { %v3387_v3 = vmul.f32 %v4300_v8, %v8887_v38  ;;  %v3397_v60 = vand.u32 2147483648, %v8887_v38  ;;  %vm3377_vm7 = vweird.f32 %v4298_v31  ;;  %vm3392_vm8 = vweird.f32 %v4300_v8  ;;  %v3698_v33 = vld [vmem:[#allocation18 + $0x150] sm:$0xff] }
 0x6b9   :  { %v8907_v5 = vadd.f32 %v3267_v23, %v3266_v0  ;;  %v3373_v30 = vsub.f32 1.0, %v3372_v1  ;;  %v3254_v39 = vadd.f32 %v8891_v63, %v3253_v14  ;;  %vm3378_vm12 = vmor %vm3376_vm9, %vm3377_vm7  ;;  %vm3406_vm2 = vweird.f32 %v8898_v48  ;;  %v3708_v23 = vld [vmem:[#allocation18 + $0x1a0] sm:$0xff]  ;;  %v3706_v14 = vld [vmem:[#allocation18 + $0x190] sm:$0xff] }
 0x6ba   :  { %v3388_v10 = vsub.f32 1.0, %v3387_v3  ;;  %vm3393_vm13 = vmor %vm3391_vm11, %vm3392_vm8  ;;  %v3398_v62 = vor.u32 1.1754944e-38, %v3397_v60  ;;  %v3413_v40 = vor.u32 1.1754944e-38, %v3412_v57  ;;  %v3672_v0 = vld [vmem:[#allocation18 + $0x80] sm:$0xff]  ;;  %v3670_v3 = vld [vmem:[#allocation18 + $0x70] sm:$0xff] }
 0x6bb   :  { %4305 = vtanh.f32 %v8907_v5  ;;  %v3374_v13 = vmul.f32 %v4298_v31, %v3373_v30  ;;  %v3258_v37 = vsel %vm8924_vm10, %v8891_v63, %v3254_v39  ;;  %v3704_v1 = vld [vmem:[#allocation18 + $0x180] sm:$0xff]  ;;  %v3703_v57 = vld [vmem:[#allocation18 + $0x178] sm:$0xff] }
 0x6bc   :  { %v8915_v25 = vpop.eup %4301  ;;  %v3389_v36 = vmul.f32 %v4300_v8, %v3388_v10  ;;  %v3263_v55 = vsel %vm3260_vm0, %v3262_v17, %v3258_v37  ;;  %v3668_v30 = vld [vmem:[#allocation18 + $0x60] sm:$0xff]  ;;  %v3666_v10 = vld [vmem:[#allocation18 + $0x50] sm:$0xff]  ;;  %v3687_v17 = vld [vmem:[#allocation18 + $0xf8] sm:$0xff] }
 0x6bd   :  { %v3402_v34 = vmul.f32 %v8915_v25, %v8898_v48  ;;  %v3375_v15 = vadd.f32 %v4298_v31, %v3374_v13  ;;  %v4304_v59 = vpop.eup %4303  ;;  %vm3407_vm1 = vweird.f32 %v8915_v25  ;;  %v3664_v39 = vld [vmem:[#allocation18 + $0x40] sm:$0xff]  ;;  %v3662_v13 = vld [vmem:[#allocation18 + $0x30] sm:$0xff] }
 0x6be   :  { %v3390_v43 = vadd.f32 %v4300_v8, %v3389_v36  ;;  %vm8942_vm3 = vmor %vm3406_vm2, %vm3407_vm1  ;;  %v3696_v60 = vld [vmem:[#allocation18 + $0x140] sm:$0xff]  ;;  %v3782_v37 = vld [vmem:[#allocation18 + $0x3f0] sm:$0xff] }
 0x6bf   :  { %v3403_v24 = vsub.f32 1.0, %v3402_v34  ;;  %v3379_v41 = vsel %vm3378_vm12, %v4298_v31, %v3375_v15  ;;  %v3660_v36 = vld [vmem:[#allocation18 + $0x20] sm:$0xff]  ;;  %v3690_v34 = vld [vmem:[#allocation18 + $0x110] sm:$0xff] }
 0x6c0   :  { %v3384_v6 = vsel %vm3381_vm14, %v3383_v26, %v3379_v41  ;;  %v3394_v4 = vsel %vm3393_vm13, %v4300_v8, %v3390_v43  ;;  %v3674_v8 = vld [vmem:[#allocation18 + $0x90] sm:$0xff]  ;;  %v3656_v15 = vld [vmem:[#allocation18] sm:$0xff]  ;;  %v3685_v26 = vld [vmem:[#allocation18 + $0xe8] sm:$0xff] }
 0x6c1   :  { %v4306_v11 = vpop.eup %4305  ;;  %v3404_v27 = vmul.f32 %v8915_v25, %v3403_v24  ;;  %v3399_v12 = vsel %vm3396_vm15, %v3398_v62, %v3394_v4  ;;  %v3418_v38 = vmul.f32 %v4304_v59, %v3384_v6  ;;  %v3719_v59 = vld [vmem:[#allocation18 + $0x1f8] sm:$0xff]  ;;  %v3717_v43 = vld [vmem:[#allocation18 + $0x1e8] sm:$0xff]  ;;  %v3780_v62 = vld [vmem:[#allocation18 + $0x3e0] sm:$0xff] }
 0x6c2   :  { %v3417_v2 = vmul.f32 %v3399_v12, %v8691_v56  ;;  %v3270_v9 = vmul.f32 %v4306_v11, %v3263_v55  ;;  %v3410_v56 = vand.u32 2147483647, %v8898_v48  ;;  %v3710_v48 = vld [vmem:[#allocation18 + $0x1b0] sm:$0xff]  ;;  %v3683_v24 = vld [vmem:[#allocation18 + $0xd8] sm:$0xff]  ;;  %v3681_v4 = vld [vmem:[#allocation18 + $0xc8] sm:$0xff] }
 0x6c3   :  { %v3405_v58 = vadd.f32 %v8915_v25, %v3404_v27  ;;  %v3715_v41 = vld [vmem:[#allocation18 + $0x1d8] sm:$0xff]  ;;  %v3778_v6 = vld [vmem:[#allocation18 + $0x3d0] sm:$0xff]  ;;  %v3713_v11 = vld [vmem:[#allocation18 + $0x1c8] sm:$0xff] }
 0x6c4   :  { %v8934_v63 = vadd.f32 %v3418_v38, %v3417_v2  ;;  %3438 = vmatmul.f32.vlgmr.msrb.gmra.mxu0 %v3270_v9  ;;  %3458 = vmatmul.f32.vlgmr.msrb.gmra.mxu1 %v3270_v9  ;;  %vm3411_vm4 = vcmp.eq.f32.partialorder %v3410_v56, 8.507059e+37  ;;  %v3776_v27 = vld [vmem:[#allocation18 + $0x3c0] sm:$0xff]  ;;  %v3679_v12 = vld [vmem:[#allocation18 + $0xb8] sm:$0xff]  ;;  %v3774_v55 = vld [vmem:[#allocation18 + $0x3b0] sm:$0xff] }
 0x6c5   :  { %3478 = vmatmul.f32.vlgmr.msrb.gmra.mxu2 %v3270_v9  ;;  %3498 = vmatmul.f32.vlgmr.msrb.gmra.mxu3 %v3270_v9  ;;  %v3409_v29 = vsel %vm8942_vm3, %v8915_v25, %v3405_v58  ;;  %v3694_v25 = vld [vmem:[#allocation18 + $0x130] sm:$0xff]  ;;  %v3711_v38 = vld [vmem:[#allocation18 + $0x1b8] sm:$0xff]  ;;  %v3677_v2 = vld [vmem:[#allocation18 + $0xa8] sm:$0xff] }
 0x6c6   :  { %4307 = vtanh.f32 %v8934_v63  ;;  %3790 = vmatpush.msrb.mxu0 %v3686_v28  ;;  %3810 = vmatpush.msrb.mxu1 %v3718_v19  ;;  %v3414_v54 = vsel %vm3411_vm4, %v3413_v40, %v3409_v29  ;;  %v3709_v9 = vld [vmem:[#allocation18 + $0x1a8] sm:$0xff]  ;;  %v3675_v28 = vld [vmem:[#allocation18 + $0x98] sm:$0xff] }
 0x6c7   :  { %3850 = vmatpush.msrb.mxu3 %v3782_v37  ;;  %v3707_v19 = vld [vmem:[#allocation18 + $0x198] sm:$0xff]  ;;  %v3673_v58 = vld [vmem:[#allocation18 + $0x88] sm:$0xff]  ;;  %v3724_v37 = vld [vmem:[#allocation18 + $0x220] sm:$0xff] }
 0x6c8   :  { %3791 = vmatpush.msrb.mxu0 %v3684_v32  ;;  %3811 = vmatpush.msrb.mxu1 %v3716_v16  ;;  %v3705_v32 = vld [vmem:[#allocation18 + $0x188] sm:$0xff]  ;;  %v3671_v16 = vld [vmem:[#allocation18 + $0x78] sm:$0xff] }
 0x6c9   :  { %3851 = vmatpush.msrb.mxu3 %v3780_v62  ;;  %v3669_v56 = vld [vmem:[#allocation18 + $0x68] sm:$0xff]  ;;  %v3695_v40 = vld [vmem:[#allocation18 + $0x138] sm:$0xff] }
 0x6ca   :  { %3792 = vmatpush.msrb.mxu0 %v3682_v21  ;;  %3812 = vmatpush.msrb.mxu1 %v3714_v51  ;;  %v3701_v21 = vld [vmem:[#allocation18 + $0x168] sm:$0xff]  ;;  %v3667_v51 = vld [vmem:[#allocation18 + $0x58] sm:$0xff] }
 0x6cb   :  { %3852 = vmatpush.msrb.mxu3 %v3778_v6  ;;  %v3665_v29 = vld [vmem:[#allocation18 + $0x48] sm:$0xff]  ;;  %v3779_v62 = vld [vmem:[#allocation18 + $0x3d8] sm:$0xff]  ;;  %v3722_v6 = vld [vmem:[#allocation18 + $0x210] sm:$0xff] }
 0x6cc   :  { %v4308_v42 = vpop.eup %4307  ;;  %3793 = vmatpush.msrb.mxu0 %v3680_v52  ;;  %3813 = vmatpush.msrb.mxu1 %v3712_v18  ;;  %v3697_v52 = vld [vmem:[#allocation18 + $0x148] sm:$0xff]  ;;  %v3663_v18 = vld [vmem:[#allocation18 + $0x38] sm:$0xff] }
 0x6cd   :  { %v8949_v31 = vmul.f32 %v4308_v42, %v3414_v54  ;;  %3853 = vmatpush.msrb.mxu3 %v3776_v27  ;;  %v3659_v42 = vld [vmem:[#allocation18 + $0x18] sm:$0xff] }
 0x6ce   :  { %3794 = vmatpush.msrb.mxu0 %v3678_v53  ;;  %3814 = vmatpush.msrb.mxu1 %v3710_v48  ;;  %v3661_v53 = vld [vmem:[#allocation18 + $0x28] sm:$0xff]  ;;  %v3691_v54 = vld [vmem:[#allocation18 + $0x118] sm:$0xff] }
 0x6cf   :  { %3518 = vmatmul.f32.vlgmr.msra.gmra.mxu0 %v8949_v31  ;;  %3538 = vmatmul.f32.vlgmr.msra.gmra.mxu1 %v8949_v31  ;;  %v3693_v48 = vld [vmem:[#allocation18 + $0x128] sm:$0xff]  ;;  %v3775_v27 = vld [vmem:[#allocation18 + $0x3b8] sm:$0xff] }
 0x6d0   :  { %3558 = vmatmul.f32.vlgmr.msra.gmra.mxu2 %v8949_v31  ;;  %3578 = vmatmul.f32.vlgmr.msra.gmra.mxu3 %v8949_v31 }
 0x6d1   :  { %3795 = vmatpush.msrb.mxu0 %v3676_v49  ;;  %3815 = vmatpush.msrb.mxu1 %v3708_v23  ;;  %v3657_v49 = vld [vmem:[#allocation18 + $0x8] sm:$0xff] }
 0x6d2   :  { %3854 = vmatpush.msrb.mxu3 %v3774_v55  ;;  %v3689_v23 = vld [vmem:[#allocation18 + $0x108] sm:$0xff] }
 0x6d3   :  { %3796 = vmatpush.msrb.mxu0 %v3674_v8  ;;  %3816 = vmatpush.msrb.mxu1 %v3706_v14  ;;  %v3750_v8 = vld [vmem:[#allocation18 + $0x2f0] sm:$0xff]  ;;  %v3772_v14 = vld [vmem:[#allocation18 + $0x3a0] sm:$0xff]  ;;  %v3749_v55 = vld [vmem:[#allocation18 + $0x2e8] sm:$0xff] }
 0x6d4   :  { %3830 = vmatpush.msrb.mxu2 %v3750_v8  ;;  %3855 = vmatpush.msrb.mxu3 %v3772_v14  ;;  %v3759_v14 = vld [vmem:[#allocation18 + $0x338] sm:$0xff] }
 0x6d5   :  { %3797 = vmatpush.msrb.mxu0 %v3672_v0  ;;  %3817 = vmatpush.msrb.mxu1 %v3704_v1  ;;  %v3748_v0 = vld [vmem:[#allocation18 + $0x2e0] sm:$0xff]  ;;  %v3770_v1 = vld [vmem:[#allocation18 + $0x390] sm:$0xff] }
 0x6d6   :  { %3831 = vmatpush.msrb.mxu2 %v3748_v0  ;;  %3856 = vmatpush.msrb.mxu3 %v3770_v1 }
 0x6d7   :  { %3798 = vmatpush.msrb.mxu0 %v3670_v3  ;;  %3818 = vmatpush.msrb.mxu1 %v3702_v47  ;;  %v3746_v3 = vld [vmem:[#allocation18 + $0x2d0] sm:$0xff]  ;;  %v3768_v47 = vld [vmem:[#allocation18 + $0x380] sm:$0xff] }
 0x6d8   :  { %3832 = vmatpush.msrb.mxu2 %v3746_v3  ;;  %3857 = vmatpush.msrb.mxu3 %v3768_v47  ;;  %v3733_v3 = vld [vmem:[#allocation18 + $0x268] sm:$0xff]  ;;  %v3755_v47 = vld [vmem:[#allocation18 + $0x318] sm:$0xff] }
 0x6d9   :  { %3799 = vmatpush.msrb.mxu0 %v3668_v30  ;;  %3819 = vmatpush.msrb.mxu1 %v3700_v7  ;;  %v3744_v30 = vld [vmem:[#allocation18 + $0x2c0] sm:$0xff]  ;;  %v3766_v7 = vld [vmem:[#allocation18 + $0x370] sm:$0xff] }
 0x6da   :  { %3833 = vmatpush.msrb.mxu2 %v3744_v30  ;;  %3858 = vmatpush.msrb.mxu3 %v3766_v7  ;;  %v3731_v7 = vld [vmem:[#allocation18 + $0x258] sm:$0xff] }
 0x6db   :  { %3800 = vmatpush.msrb.mxu0 %v3666_v10  ;;  %3820 = vmatpush.msrb.mxu1 %v3698_v33  ;;  %v3742_v10 = vld [vmem:[#allocation18 + $0x2b0] sm:$0xff] }
 0x6dc   :  { %3834 = vmatpush.msrb.mxu2 %v3742_v10  ;;  %v3762_v33 = vld [vmem:[#allocation18 + $0x350] sm:$0xff] }
 0x6dd   :  { %3801 = vmatpush.msrb.mxu0 %v3664_v39  ;;  %3821 = vmatpush.msrb.mxu1 %v3696_v60  ;;  %v3738_v39 = vld [vmem:[#allocation18 + $0x290] sm:$0xff]  ;;  %v3760_v60 = vld [vmem:[#allocation18 + $0x340] sm:$0xff] }
 0x6df   :  { %3802 = vmatpush.msrb.mxu0 %v3662_v13  ;;  %3822 = vmatpush.msrb.mxu1 %v3694_v25  ;;  %v3736_v13 = vld [vmem:[#allocation18 + $0x280] sm:$0xff]  ;;  %v3758_v25 = vld [vmem:[#allocation18 + $0x330] sm:$0xff] }
 0x6e1   :  { %3803 = vmatpush.msrb.mxu0 %v3660_v36  ;;  %3823 = vmatpush.msrb.mxu1 %v3692_v22  ;;  %v3734_v36 = vld [vmem:[#allocation18 + $0x270] sm:$0xff]  ;;  %v3756_v22 = vld [vmem:[#allocation18 + $0x320] sm:$0xff] }
 0x6e3   :  { %3804 = vmatpush.msrb.mxu0 %v3658_v20  ;;  %3824 = vmatpush.msrb.mxu1 %v3690_v34  ;;  %v3732_v20 = vld [vmem:[#allocation18 + $0x260] sm:$0xff]  ;;  %v3754_v34 = vld [vmem:[#allocation18 + $0x310] sm:$0xff] }
 0x6e5   :  { %3805 = vmatpush.msrb.mxu0 %v3656_v15  ;;  %3825 = vmatpush.msrb.mxu1 %v3688_v61  ;;  %v3730_v15 = vld [vmem:[#allocation18 + $0x250] sm:$0xff]  ;;  %v3752_v61 = vld [vmem:[#allocation18 + $0x300] sm:$0xff] }
 0x6e6   :  { %3806 = vmatmul.f32.vlgmr.msrb.gmra.mxu0 %v8949_v31  ;;  %3826 = vmatmul.f32.vlgmr.msrb.gmra.mxu1 %v8934_v63 }
 0x6e7   :  { %3870 = vmatpush.msra.mxu0 %v3687_v17  ;;  %3890 = vmatpush.msra.mxu1 %v3719_v59  ;;  %v3728_v17 = vld [vmem:[#allocation18 + $0x240] sm:$0xff]  ;;  %v3783_v59 = vld [vmem:[#allocation18 + $0x3f8] sm:$0xff] }
 0x6e9   :  { %3871 = vmatpush.msra.mxu0 %v3685_v26  ;;  %3891 = vmatpush.msra.mxu1 %v3717_v43  ;;  %v3726_v26 = vld [vmem:[#allocation18 + $0x230] sm:$0xff]  ;;  %v3781_v43 = vld [vmem:[#allocation18 + $0x3e8] sm:$0xff] }
 0x6eb   :  { %3872 = vmatpush.msra.mxu0 %v3683_v24  ;;  %3892 = vmatpush.msra.mxu1 %v3715_v41 }
 0x6ed   :  { %3873 = vmatpush.msra.mxu0 %v3681_v4  ;;  %3893 = vmatpush.msra.mxu1 %v3713_v11  ;;  %v3777_v4 = vld [vmem:[#allocation18 + $0x3c8] sm:$0xff]  ;;  %v3720_v11 = vld [vmem:[#allocation18 + $0x200] sm:$0xff] }
 0x6ef   :  { %3874 = vmatpush.msra.mxu0 %v3679_v12  ;;  %3894 = vmatpush.msra.mxu1 %v3711_v38  ;;  %v3751_v12 = vld [vmem:[#allocation18 + $0x2f8] sm:$0xff]  ;;  %v3773_v38 = vld [vmem:[#allocation18 + $0x3a8] sm:$0xff] }
 0x6f1   :  { %3875 = vmatpush.msra.mxu0 %v3677_v2  ;;  %3895 = vmatpush.msra.mxu1 %v3709_v9  ;;  %v3771_v9 = vld [vmem:[#allocation18 + $0x398] sm:$0xff] }
 0x6f3   :  { %3876 = vmatpush.msra.mxu0 %v3675_v28  ;;  %3896 = vmatpush.msra.mxu1 %v3707_v19  ;;  %v3747_v28 = vld [vmem:[#allocation18 + $0x2d8] sm:$0xff]  ;;  %v3769_v19 = vld [vmem:[#allocation18 + $0x388] sm:$0xff] }
 0x6f5   :  { %3877 = vmatpush.msra.mxu0 %v3673_v58  ;;  %3897 = vmatpush.msra.mxu1 %v3705_v32 }
 0x6f7   :  { %3878 = vmatpush.msra.mxu0 %v3671_v16  ;;  %3898 = vmatpush.msra.mxu1 %v3703_v57  ;;  %v3745_v16 = vld [vmem:[#allocation18 + $0x2c8] sm:$0xff] }
 0x6f9   :  { %3879 = vmatpush.msra.mxu0 %v3669_v56  ;;  %3899 = vmatpush.msra.mxu1 %v3701_v21  ;;  %v3767_v21 = vld [vmem:[#allocation18 + $0x378] sm:$0xff] }
 0x6fb   :  { %3880 = vmatpush.msra.mxu0 %v3667_v51  ;;  %3900 = vmatpush.msra.mxu1 %v3699_v44  ;;  %v3743_v51 = vld [vmem:[#allocation18 + $0x2b8] sm:$0xff]  ;;  %v3765_v44 = vld [vmem:[#allocation18 + $0x368] sm:$0xff] }
 0x6fd   :  { %3881 = vmatpush.msra.mxu0 %v3665_v29  ;;  %3901 = vmatpush.msra.mxu1 %v3697_v52  ;;  %v3741_v29 = vld [vmem:[#allocation18 + $0x2a8] sm:$0xff] }
 0x6ff   :  { %3882 = vmatpush.msra.mxu0 %v3663_v18  ;;  %3902 = vmatpush.msra.mxu1 %v3695_v40  ;;  %v3763_v40 = vld [vmem:[#allocation18 + $0x358] sm:$0xff] }
 0x701   :  { %3883 = vmatpush.msra.mxu0 %v3661_v53  ;;  %3903 = vmatpush.msra.mxu1 %v3693_v48  ;;  %v3739_v53 = vld [vmem:[#allocation18 + $0x298] sm:$0xff] }
 0x703   :  { %3884 = vmatpush.msra.mxu0 %v3659_v42  ;;  %3904 = vmatpush.msra.mxu1 %v3691_v54 }
 0x705   :  { %3885 = vmatpush.msra.mxu0 %v3657_v49  ;;  %3905 = vmatpush.msra.mxu1 %v3689_v23  ;;  %v3761_v49 = vld [vmem:[#allocation18 + $0x348] sm:$0xff] }
 0x706   :  { %3886 = vmatmul.f32.vlgmr.msra.gmra.mxu0 %v8949_v31  ;;  %3906 = vmatmul.f32.vlgmr.msra.gmra.mxu1 %v8934_v63  ;;  %v3764_v31 = vld [vmem:[#allocation18 + $0x360] sm:$0xff]  ;;  %v3737_v23 = vld [vmem:[#allocation18 + $0x288] sm:$0xff] }
 0x707   :  { %3859 = vmatpush.msrb.mxu3 %v3764_v31  ;;  %v3740_v63 = vld [vmem:[#allocation18 + $0x2a0] sm:$0xff]  ;;  %v3753_v31 = vld [vmem:[#allocation18 + $0x308] sm:$0xff] }
 0x708   :  { %3835 = vmatpush.msrb.mxu2 %v3740_v63 }
 0x709   :  { %3860 = vmatpush.msrb.mxu3 %v3762_v33 }
 0x70a   :  { %3836 = vmatpush.msrb.mxu2 %v3738_v39  ;;  %v3729_v39 = vld [vmem:[#allocation18 + $0x248] sm:$0xff] }
 0x70b   :  { %3861 = vmatpush.msrb.mxu3 %v3760_v60 }
 0x70c   :  { %3837 = vmatpush.msrb.mxu2 %v3736_v13 }
 0x70d   :  { %3862 = vmatpush.msrb.mxu3 %v3758_v25 }
 0x70e   :  { %3838 = vmatpush.msrb.mxu2 %v3734_v36  ;;  %v3725_v36 = vld [vmem:[#allocation18 + $0x228] sm:$0xff] }
 0x70f   :  { %3863 = vmatpush.msrb.mxu3 %v3756_v22 }
 0x710   :  { %3839 = vmatpush.msrb.mxu2 %v3732_v20  ;;  %v3723_v20 = vld [vmem:[#allocation18 + $0x218] sm:$0xff] }
 0x711   :  { %3864 = vmatpush.msrb.mxu3 %v3754_v34 }
 0x712   :  { %3840 = vmatpush.msrb.mxu2 %v3730_v15 }
 0x713   :  { %3865 = vmatpush.msrb.mxu3 %v3752_v61 }
 0x714   :  { %3841 = vmatpush.msrb.mxu2 %v3728_v17  ;;  %v3721_v17 = vld [vmem:[#allocation18 + $0x208] sm:$0xff] }
 0x715   :  { %3930 = vmatpush.msra.mxu3 %v3783_v59 }
 0x716   :  { %3842 = vmatpush.msrb.mxu2 %v3726_v26 }
 0x717   :  { %3931 = vmatpush.msra.mxu3 %v3781_v43 }
 0x718   :  { %3843 = vmatpush.msrb.mxu2 %v3724_v37 }
 0x719   :  { %3932 = vmatpush.msra.mxu3 %v3779_v62 }
 0x71a   :  { %3844 = vmatpush.msrb.mxu2 %v3722_v6 }
 0x71b   :  { %3933 = vmatpush.msra.mxu3 %v3777_v4 }
 0x71c   :  { %3845 = vmatpush.msrb.mxu2 %v3720_v11 }
 0x71d   :  { %3934 = vmatpush.msra.mxu3 %v3775_v27 }
 0x71e   :  { %3910 = vmatpush.msra.mxu2 %v3751_v12 }
 0x71f   :  { %3935 = vmatpush.msra.mxu3 %v3773_v38 }
 0x720   :  { %3911 = vmatpush.msra.mxu2 %v3749_v55 }
 0x721   :  { %3936 = vmatpush.msra.mxu3 %v3771_v9 }
 0x722   :  { %3912 = vmatpush.msra.mxu2 %v3747_v28 }
 0x723   :  { %3937 = vmatpush.msra.mxu3 %v3769_v19 }
 0x724   :  { %3913 = vmatpush.msra.mxu2 %v3745_v16 }
 0x725   :  { %3938 = vmatpush.msra.mxu3 %v3767_v21 }
 0x726   :  { %3914 = vmatpush.msra.mxu2 %v3743_v51 }
 0x727   :  { %3939 = vmatpush.msra.mxu3 %v3765_v44 }
 0x728   :  { %3915 = vmatpush.msra.mxu2 %v3741_v29 }
 0x729   :  { %3940 = vmatpush.msra.mxu3 %v3763_v40 }
 0x72a   :  { %3916 = vmatpush.msra.mxu2 %v3739_v53 }
 0x72b   :  { %3941 = vmatpush.msra.mxu3 %v3761_v49 }
 0x72c   :  { %3917 = vmatpush.msra.mxu2 %v3737_v23 }
 0x72d   :  { %3942 = vmatpush.msra.mxu3 %v3759_v14 }
 0x741   :  { %v3439_v24 = vpop.f32.mrf.mxu0  ;;  %v3459_v41 = vpop.f32.mrf.mxu1 }
 0x748   :  { %v3479_v2 = vpop.f32.mrf.mxu2  ;;  %v3499_v48 = vpop.f32.mrf.mxu3 }
 0x74c   :  { %v3519_v58 = vpop.f32.mrf.mxu0  ;;  %v3539_v32 = vpop.f32.mrf.mxu1 }
 0x74d   :  { %v3520_v57 = vadd.f32 %v3519_v58, %v3439_v24  ;;  %v3540_v56 = vadd.f32 %v3539_v32, %v3459_v41 }
 0x74f   :  { %v3582_v52 = vadd.f32 %v3520_v57, %v10952_v46  ;;  %v3583_v18 = vadd.f32 %v3540_v56, %v10953_v35  ;;  %v3735_v46 = vld [vmem:[#allocation18 + $0x278] sm:$0xff]  ;;  %v3757_v35 = vld [vmem:[#allocation18 + $0x328] sm:$0xff] }
 0x750   :  { %3918 = vmatpush.msra.mxu2 %v3735_v46  ;;  %3943 = vmatpush.msra.mxu3 %v3757_v35 }
 0x751   :  { %v4051_v42 = vmul.f32 -1.442695, %v3582_v52  ;;  %v4052_v54 = vmul.f32 -1.442695, %v3583_v18 }
 0x752   :  { %3919 = vmatpush.msra.mxu2 %v3733_v3  ;;  %3944 = vmatpush.msra.mxu3 %v3755_v47 }
 0x753   :  { %4309 = vpow2.f32 %v4051_v42  ;;  %v3559_v8 = vpop.f32.mrf.mxu2  ;;  %v3579_v13 = vpop.f32.mrf.mxu3 }
 0x754   :  { %4311 = vpow2.f32 %v4052_v54  ;;  %v3560_v0 = vadd.f32 %v3559_v8, %v3479_v2  ;;  %3920 = vmatpush.msra.mxu2 %v3731_v7  ;;  %3945 = vmatpush.msra.mxu3 %v3753_v31  ;;  %v3580_v25 = vadd.f32 %v3579_v13, %v3499_v48 }
 0x756   :  { %v3584_v1 = vadd.f32 %v3560_v0, %v10954_v45  ;;  %v3727_v45 = vld [vmem:[#allocation18 + $0x238] sm:$0xff]  ;;  %3921 = vmatpush.msra.mxu2 %v3729_v39  ;;  %v3585_v61 = vadd.f32 %v3580_v25, %v10961_v50 }
 0x758   :  { %v4053_v30 = vmul.f32 -1.442695, %v3584_v1  ;;  %3922 = vmatpush.msra.mxu2 %v3727_v45 }
 0x759   :  { %v4310_v10 = vpop.eup %4309 }
 0x75a   :  { %v4312_v63 = vpop.eup %4311  ;;  %v3595_v33 = vadd.f32 1.0, %v4310_v10  ;;  %4313 = vpow2.f32 %v4053_v30  ;;  %3923 = vmatpush.msra.mxu2 %v3725_v36 }
 0x75b   :  { %v3596_v60 = vadd.f32 1.0, %v4312_v63 }
 0x75c   :  { %4315 = vrcp.f32 %v3595_v33  ;;  %3924 = vmatpush.msra.mxu2 %v3723_v20  ;;  %v3609_v24 = vand.u32 2147483648, %v3595_v33  ;;  %v3607_v4 = vand.u32 2147483647, %v3595_v33  ;;  %vm3603_vm7 = vweird.f32 %v3595_v33 }
 0x75d   :  { %4317 = vrcp.f32 %v3596_v60  ;;  %v3624_v41 = vand.u32 2147483648, %v3596_v60  ;;  %v3622_v27 = vand.u32 2147483647, %v3596_v60  ;;  %vm3618_vm8 = vweird.f32 %v3596_v60 }
 0x75e   :  { %3925 = vmatpush.msra.mxu2 %v3721_v17  ;;  %v3610_v55 = vor.u32 1.1754944e-38, %v3609_v24  ;;  %vm3608_vm11 = vcmp.eq.f32.partialorder %v3607_v4, 8.507059e+37 }
 0x75f   :  { %v3625_v9 = vor.u32 1.1754944e-38, %v3624_v41  ;;  %vm3623_vm12 = vcmp.eq.f32.partialorder %v3622_v27, 8.507059e+37 }
 0x760   :  { %v4314_v22 = vpop.eup %4313 }
 0x761   :  { %v3597_v34 = vadd.f32 1.0, %v4314_v22 }
 0x762   :  { %v4316_v15 = vpop.eup %4315 }
 0x763   :  { %v4318_v59 = vpop.eup %4317  ;;  %v3599_v26 = vmul.f32 %v4316_v15, %v3595_v33  ;;  %4319 = vrcp.f32 %v3597_v34  ;;  %vm3604_vm5 = vweird.f32 %v4316_v15  ;;  %v3639_v52 = vand.u32 2147483648, %v3597_v34  ;;  %v3807_v23 = vpop.f32.mrf.mxu0 }
 0x764   :  { %v3614_v43 = vmul.f32 %v4318_v59, %v3596_v60  ;;  %4321 = vtanh.f32 %v3585_v61  ;;  %vm3619_vm6 = vweird.f32 %v4318_v59  ;;  %vm3605_vm9 = vmor %vm3603_vm7, %vm3604_vm5  ;;  %vm3633_vm14 = vweird.f32 %v3597_v34  ;;  %v3827_v14 = vpop.f32.mrf.mxu1 }
 0x765   :  { %v3600_v37 = vsub.f32 1.0, %v3599_v26  ;;  %vm3620_vm10 = vmor %vm3618_vm8, %vm3619_vm6  ;;  %v3637_v18 = vand.u32 2147483647, %v3597_v34  ;;  %v3640_v53 = vor.u32 1.1754944e-38, %v3639_v52 }
 0x766   :  { %v3615_v62 = vsub.f32 1.0, %v3614_v43 }
 0x767   :  { %v3601_v6 = vmul.f32 %v4316_v15, %v3600_v37  ;;  %vm3638_vm0 = vcmp.eq.f32.partialorder %v3637_v18, 8.507059e+37 }
 0x768   :  { %v3616_v11 = vmul.f32 %v4318_v59, %v3615_v62 }
 0x769   :  { %v4320_v12 = vpop.eup %4319  ;;  %v3602_v50 = vadd.f32 %v4316_v15, %v3601_v6 }
 0x76a   :  { %v3629_v38 = vmul.f32 %v4320_v12, %v3597_v34  ;;  %v3617_v2 = vadd.f32 %v4318_v59, %v3616_v11  ;;  %v4322_v19 = vpop.eup %4321  ;;  %vm3634_vm13 = vweird.f32 %v4320_v12 }
 0x76b   :  { %v3606_v28 = vsel %vm3605_vm9, %v4316_v15, %v3602_v50  ;;  %vm3635_vm15 = vmor %vm3633_vm14, %vm3634_vm13 }
 0x76c   :  { %v3630_v58 = vsub.f32 1.0, %v3629_v38  ;;  %v3611_v32 = vsel %vm3608_vm11, %v3610_v55, %v3606_v28  ;;  %v3621_v16 = vsel %vm3620_vm10, %v4318_v59, %v3617_v2 }
 0x76d   :  { %v3645_v57 = vmul.f32 %v4322_v19, %v3611_v32  ;;  %v3626_v56 = vsel %vm3623_vm12, %v3625_v9, %v3621_v16 }
 0x76e   :  { %v3631_v21 = vmul.f32 %v4320_v12, %v3630_v58  ;;  %v3644_v51 = vmul.f32 %v3626_v56, %v8907_v5  ;;  %v3784_v5 = vld [vmem:[%s8978_s8] sm:$0x3]  ;;  %s5121_s8 = smov [#allocation19]  }
 0x76f   :  { %v3786_v49 = vperm.slane %v3784_v5, 0  ;;  %v3787_v46 = vperm.slane %v3784_v5, 1  ;;  %s3959_s18 = sshll.u32 %s5121_s8, 4  ;;  %s3960_s18 = int_to_ptr.vmem [resolvable:$true] %s3959_s18 }
 0x770   :  { %v3646_v44 = vadd.f32 %v3645_v57, %v3644_v51  ;;  %v3632_v29 = vadd.f32 %v4320_v12, %v3631_v21 }
 0x771   :  { %v3808_v8 = vadd.f32 %v3807_v23, %v3786_v49 }
 0x772   :  { %4323 = vtanh.f32 %v3646_v44  ;;  %3866 = vmatmul.f32.vlgmr.msrb.gmra.mxu3 %v3646_v44  ;;  %v3636_v40 = vsel %vm3635_vm15, %v4320_v12, %v3632_v29 }
 0x773   :  { %v3641_v42 = vsel %vm3638_vm0, %v3640_v53, %v3636_v40  ;;  %v3828_v0 = vadd.f32 %v3827_v14, %v3808_v8 }
 0x778   :  { %v4324_v48 = vpop.eup %4323 }
 0x779   :  { %v3648_v54 = vmul.f32 %v4324_v48, %v3641_v42 }
 0x77a   :  { %3946 = vmatmul.f32.vlgmr.msra.gmra.mxu3 %v3646_v44 }
 0x77b   :  { %3846 = vmatmul.f32.vlgmr.msrb.gmra.mxu2 %v3648_v54 }
 0x783   :  { %3926 = vmatmul.f32.vlgmr.msra.gmra.mxu2 %v3648_v54  ;;  %v3887_v35 = vpop.f32.mrf.mxu0  ;;  %v3907_v10 = vpop.f32.mrf.mxu1 }
 0x784   :  { %v3888_v30 = vadd.f32 %v3887_v35, %v3787_v46 }
 0x786   :  { %v3908_v31 = vadd.f32 %v3907_v10, %v3888_v30 }
 0x7f5   :  { %v3867_v1 = vpop.f32.mrf.mxu3 }
 0x7fd   :  { %v3947_v39 = vpop.f32.mrf.mxu3 }
 0x7fe   :  { %v3847_v3 = vpop.f32.mrf.mxu2 }
 0x7ff   :  { %v3848_v47 = vadd.f32 %v3847_v3, %v3828_v0 }
 0x801   :  { %v3868_v7 = vadd.f32 %v3867_v1, %v3848_v47 }
 0x803   :  { %4325 = vtanh.f32 %v3868_v7 }
 0x806   :  { %v3927_v63 = vpop.f32.mrf.mxu2 }
 0x807   :  { %v3928_v33 = vadd.f32 %v3927_v63, %v3908_v31 }
 0x809   :  { %v4326_v60 = vpop.eup %4325  ;;  %v3948_v13 = vadd.f32 %v3947_v39, %v3928_v33 }
 0x80a   :  { %3952 = vst [vmem:[#allocation19] sm:$0xff] %v4326_v60 }
 0x80b   :  { %4327 = vtanh.f32 %v3948_v13 }
 0x811   :  { %v4328_v45 = vpop.eup %4327 }
 0x812   :  { %3953 = vst [vmem:[#allocation19 + $0x8] sm:$0xff] %v4328_v45 }
 0x813   :  { %3964 = dma.vmem_to_hbm [thread:$0]  %s3960_s18, 256, %s3962_s26, [#allocation9]  }
 0x814   :  { %5105 = dma.done.wait [#allocation9], 256  }
 0x815   :  { %5106 = vsyncadd [#allocation9], 4294967040 }
 0x816   :  { %3969 = vsyncpa [#allocation8], 1 }
 0x817   :  { %3970 = vsyncpa [#allocation11], 1 }
 0x818   :  { %3971 = vsyncpa [#allocation14], 1 }
 0x819   :  { %3972 = vsyncpa [#allocation17], 1 }
 0x81a   :  { %3973 = vsyncpa [#allocation9], 1 }

</bundles_post_ra>
